<compile_context>
chip_gen: v7x
topology: tpu7x:2x2x1
jax: 0.10.0
libtpu: 0.0.40
codegen_flags: <defaults>
</compile_context>

<pallas_src>
import functools

import jax
import jax.numpy as jnp
from jax.experimental import pallas as pl
from jax.experimental.pallas import tpu as pltpu

# --- hyperparameters hardcoded in the reference module -----------------------
N_EMBD = 384
N_HEADS = 6
HEAD_SIZE = N_EMBD // N_HEADS
N_LAYERS = 6
BLOCK_SIZE = 128
VOCAB_SIZE = 65          # len(chars) for the usual tiny-shakespeare charset
V_PAD = 128              # lane-dense padded lm_head output width
FF_HIDDEN = 4 * N_EMBD
LN_EPS = 1e-5
ATT_SCALE = N_EMBD ** (-0.5)   # reference scales by C**-0.5 with C = n_embd (not head_size)

VMEM_LIMIT = 48 * 1024 * 1024  # per-step residency here is ~8 MB; fits v7x's 64 MiB physical VMEM


def _layernorm(x, g, b):
    mu = jnp.mean(x, axis=-1, keepdims=True)
    var = jnp.mean((x - mu) ** 2, axis=-1, keepdims=True)
    return (x - mu) * jax.lax.rsqrt(var + LN_EPS) * g + b


# --- fused transformer kernel: all layers + final LN + lm_head -----------------
def _fused_kernel(x_ref,
                  ln1_g_ref, ln1_b_ref, wqkv_ref, wo_ref, bo_ref,
                  ln2_g_ref, ln2_b_ref, w1_ref, b1_ref, w2_ref, b2_ref,
                  lnf_g_ref, lnf_b_ref, wlm_ref, blm_ref,
                  logits_ref, res_ref,
                  *, bsub, seq):
    l = pl.program_id(1)
    n_layers = pl.num_programs(1)
    m_rows = bsub * seq

    # Initialize the VMEM-resident residual stream once per batch block.
    @pl.when(l == 0)
    def _():
        res_ref[...] = x_ref[...].reshape(m_rows, N_EMBD)

    x = res_ref[...]                                          # (M, C) f32 residual

    # ---- self-attention branch ----
    h = _layernorm(x, ln1_g_ref[0], ln1_b_ref[0]).astype(jnp.bfloat16)
    qkv = jnp.dot(h, wqkv_ref[0], preferred_element_type=jnp.float32)     # (M, 3C)
    qkv = qkv.astype(jnp.bfloat16)                            # single bulk cast

    row = jax.lax.broadcasted_iota(jnp.int32, (seq, seq), 0)
    col = jax.lax.broadcasted_iota(jnp.int32, (seq, seq), 1)
    causal = col <= row

    per_row = []
    for b in range(bsub):                                      # static unroll over batch rows
        r0 = b * seq
        heads = []
        for hd in range(N_HEADS):                              # static unroll over heads
            lo = hd * HEAD_SIZE
            q = qkv[r0:r0 + seq, lo:lo + HEAD_SIZE]            # C**-0.5 baked into weights
            k = qkv[r0:r0 + seq, N_EMBD + lo:N_EMBD + lo + HEAD_SIZE]
            v = qkv[r0:r0 + seq, 2 * N_EMBD + lo:2 * N_EMBD + lo + HEAD_SIZE]

            att = jax.lax.dot_general(q, k, (((1,), (1,)), ((), ())),
                                      preferred_element_type=jnp.float32)  # (T,T) f32
            att = jnp.where(causal, att, -1e30)
            att = att - jnp.max(att, axis=-1, keepdims=True)
            p = jnp.exp(att)
            inv = pl.reciprocal(jnp.sum(p, axis=-1, keepdims=True), approx=True)
            p = (p * inv).astype(jnp.bfloat16)                 # softmax (dropout = identity)

            heads.append(jnp.dot(p, v, preferred_element_type=jnp.float32)
                         .astype(jnp.bfloat16))                # (T, hs)
        per_row.append(jnp.concatenate(heads, axis=-1))        # (T, C) bf16
    sa_in = per_row[0] if bsub == 1 else jnp.concatenate(per_row, axis=0)   # (M, C)

    # Single full-depth Wo projection (K = 384) instead of 6 K=64 matmuls.
    sa = jnp.dot(sa_in, wo_ref[0], preferred_element_type=jnp.float32) + bo_ref[0]
    x = x + sa

    # ---- feed-forward branch ----
    h2 = _layernorm(x, ln2_g_ref[0], ln2_b_ref[0]).astype(jnp.bfloat16)
    ff = jnp.dot(h2, w1_ref[0], preferred_element_type=jnp.float32) + b1_ref[0]
    ff = jnp.maximum(ff, 0.0).astype(jnp.bfloat16)
    ff = jnp.dot(ff, w2_ref[0], preferred_element_type=jnp.float32) + b2_ref[0]
    x = x + ff
    res_ref[...] = x

    # ---- final LayerNorm + lm_head fused into the last layer iteration ----
    @pl.when(l == n_layers - 1)
    def _():
        hf = _layernorm(x, lnf_g_ref[...], lnf_b_ref[...]).astype(jnp.bfloat16)
        logits = (jnp.dot(hf, wlm_ref[...], preferred_element_type=jnp.float32)
                  + blm_ref[...])
        logits_ref[...] = logits.reshape(bsub, seq, V_PAD)


def _pick_bsub(B, T, target_rows=256):
    """Largest divisor of B with bsub*T <= target_rows (fills MXU rows, bounds VMEM)."""
    bsub = 1
    for cand in range(1, B + 1):
        if B % cand == 0 and cand * T <= target_rows:
            bsub = cand
    return bsub


def bigram_lm_forward(idx, params):
    tok_emb, pos_emb, stacked, head = params
    B, T = idx.shape
    # Embedding gather stays in plain JAX (data-dependent gather; tiny).
    x = jnp.take(tok_emb, idx, axis=0) + pos_emb[:T][None, :, :]   # (B, T, C) f32

    bsub = _pick_bsub(B, T)
    nb = B // bsub

    layer_keys = ('ln1_g', 'ln1_b', 'wqkv', 'wo', 'bo',
                  'ln2_g', 'ln2_b', 'w1', 'b1', 'w2', 'b2')
    layer_args = [stacked[k] for k in layer_keys]
    head_args = list(head)                                      # lnf_g, lnf_b, wlm_pad, blm_pad

    def layer_spec(a):
        blk = (1,) + a.shape[1:]
        nd = len(blk)
        return pl.BlockSpec(blk, lambda bb, l, _nd=nd: (l,) + (0,) * (_nd - 1))

    def const_spec(a):
        nd = a.ndim
        return pl.BlockSpec(a.shape, lambda bb, l, _nd=nd: (0,) * _nd)

    in_specs = ([pl.BlockSpec((bsub, T, N_EMBD), lambda bb, l: (bb, 0, 0))]
                + [layer_spec(a) for a in layer_args]
                + [const_spec(a) for a in head_args])

    kernel = functools.partial(_fused_kernel, bsub=bsub, seq=T)
    logits_pad = pl.pallas_call(
        kernel,
        out_shape=jax.ShapeDtypeStruct((B, T, V_PAD), jnp.float32),
        grid=(nb, N_LAYERS),
        in_specs=in_specs,
        out_specs=pl.BlockSpec((bsub, T, V_PAD), lambda bb, l: (bb, 0, 0)),
        scratch_shapes=[pltpu.VMEM((bsub * T, N_EMBD), jnp.float32)],   # residual stream
        compiler_params=pltpu.CompilerParams(
            dimension_semantics=("parallel", "arbitrary"),
            vmem_limit_bytes=VMEM_LIMIT),
    )(x, *layer_args, *head_args)

    logits = logits_pad[:, :, :VOCAB_SIZE]
    return logits, None   # targets=None -> loss=None
    # TODO(synk): training-path cross_entropy / dropout masks not implemented (eval-mode forward)


# --- parameter init (deterministic, synthetic) ---------------------------------
def init_model_params(key):
    keys = iter(jax.random.split(key, 8 * N_LAYERS + 8))

    def rnd(shape, scale=0.02):
        return (scale * jax.random.normal(next(keys), shape)).astype(jnp.float32)

    tok_emb = rnd((VOCAB_SIZE, N_EMBD))
    pos_emb = rnd((BLOCK_SIZE, N_EMBD))

    acc = {k: [] for k in ('ln1_g', 'ln1_b', 'wqkv', 'wo', 'bo',
                           'ln2_g', 'ln2_b', 'w1', 'b1', 'w2', 'b2')}
    for _ in range(N_LAYERS):
        wq = rnd((N_EMBD, N_EMBD)) * ATT_SCALE      # fold attention scale into Q columns
        wk = rnd((N_EMBD, N_EMBD))
        wv = rnd((N_EMBD, N_EMBD))
        acc['ln1_g'].append(jnp.ones((1, N_EMBD), jnp.float32))
        acc['ln1_b'].append(jnp.zeros((1, N_EMBD), jnp.float32))
        acc['wqkv'].append(jnp.concatenate([wq, wk, wv], axis=1).astype(jnp.bfloat16))
        acc['wo'].append(rnd((N_EMBD, N_EMBD)).astype(jnp.bfloat16))
        acc['bo'].append(jnp.zeros((1, N_EMBD), jnp.float32))
        acc['ln2_g'].append(jnp.ones((1, N_EMBD), jnp.float32))
        acc['ln2_b'].append(jnp.zeros((1, N_EMBD), jnp.float32))
        acc['w1'].append(rnd((N_EMBD, FF_HIDDEN)).astype(jnp.bfloat16))
        acc['b1'].append(jnp.zeros((1, FF_HIDDEN), jnp.float32))
        acc['w2'].append(rnd((FF_HIDDEN, N_EMBD)).astype(jnp.bfloat16))
        acc['b2'].append(jnp.zeros((1, N_EMBD), jnp.float32))
    stacked = {k: jnp.stack(v) for k, v in acc.items()}        # leading L axis

    lnf_g = jnp.ones((1, N_EMBD), jnp.float32)
    lnf_b = jnp.zeros((1, N_EMBD), jnp.float32)
    w_lm = rnd((N_EMBD, VOCAB_SIZE))
    w_lm_pad = (jnp.zeros((N_EMBD, V_PAD), jnp.float32)
                .at[:, :VOCAB_SIZE].set(w_lm)).astype(jnp.bfloat16)
    b_lm_pad = jnp.zeros((1, V_PAD), jnp.float32)
    return tok_emb, pos_emb, stacked, (lnf_g, lnf_b, w_lm_pad, b_lm_pad)


# --- pure-JAX reference for verification ----------------------------------------
def reference_forward(idx, params):
    tok_emb, pos_emb, stacked, head = params
    hp = jax.lax.Precision.HIGHEST
    B, T = idx.shape
    x = jnp.take(tok_emb, idx, axis=0) + pos_emb[:T][None, :, :]
    causal = jnp.tril(jnp.ones((T, T), dtype=bool))
    for l in range(N_LAYERS):
        h = _layernorm(x, stacked['ln1_g'][l, 0], stacked['ln1_b'][l, 0])
        wqkv = stacked['wqkv'][l].astype(jnp.float32)
        wq = wqkv[:, :N_EMBD]                       # already contains the C**-0.5 scale
        wk = wqkv[:, N_EMBD:2 * N_EMBD]
        wv = wqkv[:, 2 * N_EMBD:]
        outs = []
        for hd in range(N_HEADS):
            sl = slice(hd * HEAD_SIZE, (hd + 1) * HEAD_SIZE)
            q = jnp.einsum('btc,cd->btd', h, wq[:, sl], precision=hp)
            k = jnp.einsum('btc,cd->btd', h, wk[:, sl], precision=hp)
            v = jnp.einsum('btc,cd->btd', h, wv[:, sl], precision=hp)
            att = jnp.einsum('bqd,bkd->bqk', q, k, precision=hp)
            att = jnp.where(causal, att, -jnp.inf)
            p = jax.nn.softmax(att, axis=-1)
            outs.append(jnp.einsum('bqk,bkd->bqd', p, v, precision=hp))
        sa = jnp.concatenate(outs, axis=-1)
        sa = jnp.einsum('btc,cd->btd', sa, stacked['wo'][l].astype(jnp.float32),
                        precision=hp) + stacked['bo'][l, 0]
        x = x + sa
        h2 = _layernorm(x, stacked['ln2_g'][l, 0], stacked['ln2_b'][l, 0])
        ff = jnp.maximum(jnp.einsum('btc,cd->btd', h2,
                                    stacked['w1'][l].astype(jnp.float32),
                                    precision=hp) + stacked['b1'][l, 0], 0.0)
        ff = jnp.einsum('btc,cd->btd', ff, stacked['w2'][l].astype(jnp.float32),
                        precision=hp) + stacked['b2'][l, 0]
        x = x + ff
    lnf_g, lnf_b, w_lm_pad, b_lm_pad = head
    h = _layernorm(x, lnf_g[0], lnf_b[0])
    logits = jnp.einsum('btc,cv->btv', h, w_lm_pad.astype(jnp.float32),
                        precision=hp) + b_lm_pad[0]
    return logits[:, :, :VOCAB_SIZE]


if __name__ == "__main__":
    key = jax.random.PRNGKey(0)
    pkey, ikey = jax.random.split(key)
    params = init_model_params(pkey)

    B, T = 2, 8                                    # small shapes (T <= block_size)
    idx = jax.random.randint(ikey, (B, T), 0, VOCAB_SIZE, dtype=jnp.int32)

    logits, loss = jax.jit(bigram_lm_forward)(idx, params)
    logits = jax.block_until_ready(logits)

    assert logits.shape == (B, T, VOCAB_SIZE)
    assert loss is None

    ref = reference_forward(idx, params)
    assert bool(jnp.all(jnp.isfinite(logits)))
    assert bool(jnp.allclose(logits, ref, atol=2e-2, rtol=2e-2)), \
        f"max abs diff {float(jnp.max(jnp.abs(logits - ref)))}"

    print("KERNEL_OK")
</pallas_src>

<mosaic_0001>
module attributes {stable_mosaic.version = 11 : i64} {
  func.func @_fused_kernel(%arg0: i32, %arg1: i32, %arg2: memref<2x8x384xf32, #tpu.memory_space<vmem>>, %arg3: memref<1x1x384xf32, #tpu.memory_space<vmem>>, %arg4: memref<1x1x384xf32, #tpu.memory_space<vmem>>, %arg5: memref<1x384x1152xbf16, #tpu.memory_space<vmem>>, %arg6: memref<1x384x384xbf16, #tpu.memory_space<vmem>>, %arg7: memref<1x1x384xf32, #tpu.memory_space<vmem>>, %arg8: memref<1x1x384xf32, #tpu.memory_space<vmem>>, %arg9: memref<1x1x384xf32, #tpu.memory_space<vmem>>, %arg10: memref<1x384x1536xbf16, #tpu.memory_space<vmem>>, %arg11: memref<1x1x1536xf32, #tpu.memory_space<vmem>>, %arg12: memref<1x1536x384xbf16, #tpu.memory_space<vmem>>, %arg13: memref<1x1x384xf32, #tpu.memory_space<vmem>>, %arg14: memref<1x384xf32, #tpu.memory_space<vmem>>, %arg15: memref<1x384xf32, #tpu.memory_space<vmem>>, %arg16: memref<384x128xbf16, #tpu.memory_space<vmem>>, %arg17: memref<1x128xf32, #tpu.memory_space<vmem>>, %arg18: memref<2x8x128xf32, #tpu.memory_space<vmem>>, %arg19: memref<16x384xf32, #tpu.memory_space<vmem>>) attributes {dimension_semantics = [#tpu.dimension_semantics<parallel>, #tpu.dimension_semantics<arbitrary>], iteration_bounds = array<i64: 1, 6>, scalar_prefetch = 0 : i64, scratch_operands = 1 : i64, tpu.core_type = #tpu.core_type<tc>, window_params = [{transform_indices = @transform_0, window_bounds = array<i64: 2, 8, 384>}, {transform_indices = @transform_1, window_bounds = array<i64: 1, 1, 384>}, {transform_indices = @transform_2, window_bounds = array<i64: 1, 1, 384>}, {transform_indices = @transform_3, window_bounds = array<i64: 1, 384, 1152>}, {transform_indices = @transform_4, window_bounds = array<i64: 1, 384, 384>}, {transform_indices = @transform_5, window_bounds = array<i64: 1, 1, 384>}, {transform_indices = @transform_6, window_bounds = array<i64: 1, 1, 384>}, {transform_indices = @transform_7, window_bounds = array<i64: 1, 1, 384>}, {transform_indices = @transform_8, window_bounds = array<i64: 1, 384, 1536>}, {transform_indices = @transform_9, window_bounds = array<i64: 1, 1, 1536>}, {transform_indices = @transform_10, window_bounds = array<i64: 1, 1536, 384>}, {transform_indices = @transform_11, window_bounds = array<i64: 1, 1, 384>}, {pipeline_mode = #tpu.pipeline_mode<synchronous>, transform_indices = @transform_12, window_bounds = array<i64: 1, 384>}, {pipeline_mode = #tpu.pipeline_mode<synchronous>, transform_indices = @transform_13, window_bounds = array<i64: 1, 384>}, {pipeline_mode = #tpu.pipeline_mode<synchronous>, transform_indices = @transform_14, window_bounds = array<i64: 384, 128>}, {pipeline_mode = #tpu.pipeline_mode<synchronous>, transform_indices = @transform_15, window_bounds = array<i64: 1, 128>}, {transform_indices = @transform_16, window_bounds = array<i64: 2, 8, 128>}]} {
    %c0_i32 = arith.constant 0 : i32
    %0 = arith.cmpi eq, %arg1, %c0_i32 : i32
    %1 = arith.extui %0 : i1 to i32
    %c0_i32_0 = arith.constant 0 : i32
    %2 = arith.cmpi ne, %1, %c0_i32_0 : i32
    scf.if %2 {
      %c0_112 = arith.constant 0 : index
      %c0_113 = arith.constant 0 : index
      %c0_114 = arith.constant 0 : index
      %326 = vector.load %arg2[%c0_112, %c0_113, %c0_114] : memref<2x8x384xf32, #tpu.memory_space<vmem>>, vector<2x8x384xf32>
      %327 = vector.shape_cast %326 : vector<2x8x384xf32> to vector<16x384xf32>
      %c0_115 = arith.constant 0 : index
      %c0_116 = arith.constant 0 : index
      %328 = vector.load %arg19[%c0_115, %c0_116] : memref<16x384xf32, #tpu.memory_space<vmem>>, vector<16x384xf32>
      tpu.vector_store %arg19[%c0_115, %c0_116], %327 {strides = array<i32>} : memref<16x384xf32, #tpu.memory_space<vmem>>, vector<16x384xf32>,
    } else {
    }
    %c0 = arith.constant 0 : index
    %c0_1 = arith.constant 0 : index
    %3 = vector.load %arg19[%c0, %c0_1] : memref<16x384xf32, #tpu.memory_space<vmem>>, vector<16x384xf32>
    %c0_2 = arith.constant 0 : index
    %c0_3 = arith.constant 0 : index
    %c0_4 = arith.constant 0 : index
    %4 = vector.load %arg3[%c0_2, %c0_3, %c0_4] : memref<1x1x384xf32, #tpu.memory_space<vmem>>, vector<1x1x384xf32>
    %5 = vector.shape_cast %4 : vector<1x1x384xf32> to vector<1x384xf32>
    %c0_5 = arith.constant 0 : index
    %c0_6 = arith.constant 0 : index
    %c0_7 = arith.constant 0 : index
    %6 = vector.load %arg4[%c0_5, %c0_6, %c0_7] : memref<1x1x384xf32, #tpu.memory_space<vmem>>, vector<1x1x384xf32>
    %7 = vector.shape_cast %6 : vector<1x1x384xf32> to vector<1x384xf32>
    %cst = arith.constant dense<0.000000e+00> : vector<16xf32>
    %8 = vector.multi_reduction <add>, %3, %cst [1] : vector<16x384xf32> to vector<16xf32>
    %9 = vector.shape_cast %8 : vector<16xf32> to vector<16x1xf32>
    %cst_8 = arith.constant 3.840000e+02 : f32
    %10 = vector.broadcast %cst_8 : f32 to vector<16x1xf32>
    %11 = arith.divf %9, %10 : vector<16x1xf32>
    %12 = vector.broadcast %11 : vector<16x1xf32> to vector<16x384xf32>
    %13 = arith.subf %3, %12 : vector<16x384xf32>
    %14 = arith.mulf %13, %13 : vector<16x384xf32>
    %cst_9 = arith.constant dense<0.000000e+00> : vector<16xf32>
    %15 = vector.multi_reduction <add>, %14, %cst_9 [1] : vector<16x384xf32> to vector<16xf32>
    %16 = vector.shape_cast %15 : vector<16xf32> to vector<16x1xf32>
    %cst_10 = arith.constant 3.840000e+02 : f32
    %17 = vector.broadcast %cst_10 : f32 to vector<16x1xf32>
    %18 = arith.divf %16, %17 : vector<16x1xf32>
    %19 = vector.broadcast %11 : vector<16x1xf32> to vector<16x384xf32>
    %20 = arith.subf %3, %19 : vector<16x384xf32>
    %cst_11 = arith.constant 9.99999974E-6 : f32
    %21 = vector.broadcast %cst_11 : f32 to vector<16x1xf32>
    %22 = arith.addf %18, %21 : vector<16x1xf32>
    %23 = math.rsqrt %22 : vector<16x1xf32>
    %24 = vector.broadcast %23 : vector<16x1xf32> to vector<16x384xf32>
    %25 = arith.mulf %20, %24 : vector<16x384xf32>
    %26 = vector.broadcast %5 : vector<1x384xf32> to vector<16x384xf32>
    %27 = arith.mulf %25, %26 : vector<16x384xf32>
    %28 = vector.broadcast %7 : vector<1x384xf32> to vector<16x384xf32>
    %29 = arith.addf %27, %28 : vector<16x384xf32>
    %30 = arith.truncf %29 : vector<16x384xf32> to vector<16x384xbf16>
    %c0_12 = arith.constant 0 : index
    %c0_13 = arith.constant 0 : index
    %c0_14 = arith.constant 0 : index
    %31 = vector.load %arg5[%c0_12, %c0_13, %c0_14] : memref<1x384x1152xbf16, #tpu.memory_space<vmem>>, vector<1x384x1152xbf16>
    %32 = vector.shape_cast %31 : vector<1x384x1152xbf16> to vector<384x1152xbf16>
    %cst_15 = arith.constant dense<0.000000e+00> : vector<16x1152xf32>
    %33 = tpu.matmul %30, %32, %cst_15 {dimension_numbers = #tpu.dot_dimension_numbers<[1], [0], [0], [1], [0, 0, 1, 1], [], []>} : vector<16x384xbf16>, vector<384x1152xbf16>, vector<16x1152xf32> -> vector<16x1152xf32>
    %34 = arith.truncf %33 : vector<16x1152xf32> to vector<16x1152xbf16>
    %35 = tpu.iota {dimensions = array<i32: 0>} : vector<8x8xi32>
    %36 = tpu.iota {dimensions = array<i32: 1>} : vector<8x8xi32>
    %37 = arith.cmpi sle, %36, %35 : vector<8x8xi32>
    %38 = vector.extract_strided_slice %34 {offsets = [0, 0], sizes = [8, 64], strides = [1, 1]} : vector<16x1152xbf16> to vector<8x64xbf16>
    %39 = vector.extract_strided_slice %34 {offsets = [0, 384], sizes = [8, 64], strides = [1, 1]} : vector<16x1152xbf16> to vector<8x64xbf16>
    %40 = vector.extract_strided_slice %34 {offsets = [0, 768], sizes = [8, 64], strides = [1, 1]} : vector<16x1152xbf16> to vector<8x64xbf16>
    %cst_16 = arith.constant dense<0.000000e+00> : vector<8x8xf32>
    %41 = tpu.matmul %38, %39, %cst_16 {dimension_numbers = #tpu.dot_dimension_numbers<[1], [1], [0], [0], [0, 0, 1, 0], [], []>} : vector<8x64xbf16>, vector<8x64xbf16>, vector<8x8xf32> -> vector<8x8xf32>
    %cst_17 = arith.constant -1.000000e+30 : f32
    %42 = vector.broadcast %cst_17 : f32 to vector<8x8xf32>
    %43 = arith.select %37, %41, %42 : vector<8x8xi1>, vector<8x8xf32>
    %cst_18 = arith.constant dense<0xFF800000> : vector<8xf32>
    %44 = vector.multi_reduction <maximumf>, %43, %cst_18 [1] : vector<8x8xf32> to vector<8xf32>
    %45 = vector.shape_cast %44 : vector<8xf32> to vector<8x1xf32>
    %46 = vector.broadcast %45 : vector<8x1xf32> to vector<8x8xf32>
    %47 = arith.subf %43, %46 : vector<8x8xf32>
    %48 = math.exp %47 : vector<8x8xf32>
    %cst_19 = arith.constant dense<0.000000e+00> : vector<8xf32>
    %49 = vector.multi_reduction <add>, %48, %cst_19 [1] : vector<8x8xf32> to vector<8xf32>
    %50 = vector.shape_cast %49 : vector<8xf32> to vector<8x1xf32>
    %51 = tpu.reciprocal %50 {approx = true} : vector<8x1xf32> -> vector<8x1xf32>
    %52 = vector.broadcast %51 : vector<8x1xf32> to vector<8x8xf32>
    %53 = arith.mulf %48, %52 : vector<8x8xf32>
    %54 = arith.truncf %53 : vector<8x8xf32> to vector<8x8xbf16>
    %cst_20 = arith.constant dense<0.000000e+00> : vector<8x64xf32>
    %55 = tpu.matmul %54, %40, %cst_20 {dimension_numbers = #tpu.dot_dimension_numbers<[1], [0], [0], [1], [0, 0, 1, 1], [], []>} : vector<8x8xbf16>, vector<8x64xbf16>, vector<8x64xf32> -> vector<8x64xf32>
    %56 = arith.truncf %55 : vector<8x64xf32> to vector<8x64xbf16>
    %57 = vector.extract_strided_slice %34 {offsets = [0, 64], sizes = [8, 64], strides = [1, 1]} : vector<16x1152xbf16> to vector<8x64xbf16>
    %58 = vector.extract_strided_slice %34 {offsets = [0, 448], sizes = [8, 64], strides = [1, 1]} : vector<16x1152xbf16> to vector<8x64xbf16>
    %59 = vector.extract_strided_slice %34 {offsets = [0, 832], sizes = [8, 64], strides = [1, 1]} : vector<16x1152xbf16> to vector<8x64xbf16>
    %cst_21 = arith.constant dense<0.000000e+00> : vector<8x8xf32>
    %60 = tpu.matmul %57, %58, %cst_21 {dimension_numbers = #tpu.dot_dimension_numbers<[1], [1], [0], [0], [0, 0, 1, 0], [], []>} : vector<8x64xbf16>, vector<8x64xbf16>, vector<8x8xf32> -> vector<8x8xf32>
    %cst_22 = arith.constant -1.000000e+30 : f32
    %61 = vector.broadcast %cst_22 : f32 to vector<8x8xf32>
    %62 = arith.select %37, %60, %61 : vector<8x8xi1>, vector<8x8xf32>
    %cst_23 = arith.constant dense<0xFF800000> : vector<8xf32>
    %63 = vector.multi_reduction <maximumf>, %62, %cst_23 [1] : vector<8x8xf32> to vector<8xf32>
    %64 = vector.shape_cast %63 : vector<8xf32> to vector<8x1xf32>
    %65 = vector.broadcast %64 : vector<8x1xf32> to vector<8x8xf32>
    %66 = arith.subf %62, %65 : vector<8x8xf32>
    %67 = math.exp %66 : vector<8x8xf32>
    %cst_24 = arith.constant dense<0.000000e+00> : vector<8xf32>
    %68 = vector.multi_reduction <add>, %67, %cst_24 [1] : vector<8x8xf32> to vector<8xf32>
    %69 = vector.shape_cast %68 : vector<8xf32> to vector<8x1xf32>
    %70 = tpu.reciprocal %69 {approx = true} : vector<8x1xf32> -> vector<8x1xf32>
    %71 = vector.broadcast %70 : vector<8x1xf32> to vector<8x8xf32>
    %72 = arith.mulf %67, %71 : vector<8x8xf32>
    %73 = arith.truncf %72 : vector<8x8xf32> to vector<8x8xbf16>
    %cst_25 = arith.constant dense<0.000000e+00> : vector<8x64xf32>
    %74 = tpu.matmul %73, %59, %cst_25 {dimension_numbers = #tpu.dot_dimension_numbers<[1], [0], [0], [1], [0, 0, 1, 1], [], []>} : vector<8x8xbf16>, vector<8x64xbf16>, vector<8x64xf32> -> vector<8x64xf32>
    %75 = arith.truncf %74 : vector<8x64xf32> to vector<8x64xbf16>
    %76 = vector.extract_strided_slice %34 {offsets = [0, 128], sizes = [8, 64], strides = [1, 1]} : vector<16x1152xbf16> to vector<8x64xbf16>
    %77 = vector.extract_strided_slice %34 {offsets = [0, 512], sizes = [8, 64], strides = [1, 1]} : vector<16x1152xbf16> to vector<8x64xbf16>
    %78 = vector.extract_strided_slice %34 {offsets = [0, 896], sizes = [8, 64], strides = [1, 1]} : vector<16x1152xbf16> to vector<8x64xbf16>
    %cst_26 = arith.constant dense<0.000000e+00> : vector<8x8xf32>
    %79 = tpu.matmul %76, %77, %cst_26 {dimension_numbers = #tpu.dot_dimension_numbers<[1], [1], [0], [0], [0, 0, 1, 0], [], []>} : vector<8x64xbf16>, vector<8x64xbf16>, vector<8x8xf32> -> vector<8x8xf32>
    %cst_27 = arith.constant -1.000000e+30 : f32
    %80 = vector.broadcast %cst_27 : f32 to vector<8x8xf32>
    %81 = arith.select %37, %79, %80 : vector<8x8xi1>, vector<8x8xf32>
    %cst_28 = arith.constant dense<0xFF800000> : vector<8xf32>
    %82 = vector.multi_reduction <maximumf>, %81, %cst_28 [1] : vector<8x8xf32> to vector<8xf32>
    %83 = vector.shape_cast %82 : vector<8xf32> to vector<8x1xf32>
    %84 = vector.broadcast %83 : vector<8x1xf32> to vector<8x8xf32>
    %85 = arith.subf %81, %84 : vector<8x8xf32>
    %86 = math.exp %85 : vector<8x8xf32>
    %cst_29 = arith.constant dense<0.000000e+00> : vector<8xf32>
    %87 = vector.multi_reduction <add>, %86, %cst_29 [1] : vector<8x8xf32> to vector<8xf32>
    %88 = vector.shape_cast %87 : vector<8xf32> to vector<8x1xf32>
    %89 = tpu.reciprocal %88 {approx = true} : vector<8x1xf32> -> vector<8x1xf32>
    %90 = vector.broadcast %89 : vector<8x1xf32> to vector<8x8xf32>
    %91 = arith.mulf %86, %90 : vector<8x8xf32>
    %92 = arith.truncf %91 : vector<8x8xf32> to vector<8x8xbf16>
    %cst_30 = arith.constant dense<0.000000e+00> : vector<8x64xf32>
    %93 = tpu.matmul %92, %78, %cst_30 {dimension_numbers = #tpu.dot_dimension_numbers<[1], [0], [0], [1], [0, 0, 1, 1], [], []>} : vector<8x8xbf16>, vector<8x64xbf16>, vector<8x64xf32> -> vector<8x64xf32>
    %94 = arith.truncf %93 : vector<8x64xf32> to vector<8x64xbf16>
    %95 = vector.extract_strided_slice %34 {offsets = [0, 192], sizes = [8, 64], strides = [1, 1]} : vector<16x1152xbf16> to vector<8x64xbf16>
    %96 = vector.extract_strided_slice %34 {offsets = [0, 576], sizes = [8, 64], strides = [1, 1]} : vector<16x1152xbf16> to vector<8x64xbf16>
    %97 = vector.extract_strided_slice %34 {offsets = [0, 960], sizes = [8, 64], strides = [1, 1]} : vector<16x1152xbf16> to vector<8x64xbf16>
    %cst_31 = arith.constant dense<0.000000e+00> : vector<8x8xf32>
    %98 = tpu.matmul %95, %96, %cst_31 {dimension_numbers = #tpu.dot_dimension_numbers<[1], [1], [0], [0], [0, 0, 1, 0], [], []>} : vector<8x64xbf16>, vector<8x64xbf16>, vector<8x8xf32> -> vector<8x8xf32>
    %cst_32 = arith.constant -1.000000e+30 : f32
    %99 = vector.broadcast %cst_32 : f32 to vector<8x8xf32>
    %100 = arith.select %37, %98, %99 : vector<8x8xi1>, vector<8x8xf32>
    %cst_33 = arith.constant dense<0xFF800000> : vector<8xf32>
    %101 = vector.multi_reduction <maximumf>, %100, %cst_33 [1] : vector<8x8xf32> to vector<8xf32>
    %102 = vector.shape_cast %101 : vector<8xf32> to vector<8x1xf32>
    %103 = vector.broadcast %102 : vector<8x1xf32> to vector<8x8xf32>
    %104 = arith.subf %100, %103 : vector<8x8xf32>
    %105 = math.exp %104 : vector<8x8xf32>
    %cst_34 = arith.constant dense<0.000000e+00> : vector<8xf32>
    %106 = vector.multi_reduction <add>, %105, %cst_34 [1] : vector<8x8xf32> to vector<8xf32>
    %107 = vector.shape_cast %106 : vector<8xf32> to vector<8x1xf32>
    %108 = tpu.reciprocal %107 {approx = true} : vector<8x1xf32> -> vector<8x1xf32>
    %109 = vector.broadcast %108 : vector<8x1xf32> to vector<8x8xf32>
    %110 = arith.mulf %105, %109 : vector<8x8xf32>
    %111 = arith.truncf %110 : vector<8x8xf32> to vector<8x8xbf16>
    %cst_35 = arith.constant dense<0.000000e+00> : vector<8x64xf32>
    %112 = tpu.matmul %111, %97, %cst_35 {dimension_numbers = #tpu.dot_dimension_numbers<[1], [0], [0], [1], [0, 0, 1, 1], [], []>} : vector<8x8xbf16>, vector<8x64xbf16>, vector<8x64xf32> -> vector<8x64xf32>
    %113 = arith.truncf %112 : vector<8x64xf32> to vector<8x64xbf16>
    %114 = vector.extract_strided_slice %34 {offsets = [0, 256], sizes = [8, 64], strides = [1, 1]} : vector<16x1152xbf16> to vector<8x64xbf16>
    %115 = vector.extract_strided_slice %34 {offsets = [0, 640], sizes = [8, 64], strides = [1, 1]} : vector<16x1152xbf16> to vector<8x64xbf16>
    %116 = vector.extract_strided_slice %34 {offsets = [0, 1024], sizes = [8, 64], strides = [1, 1]} : vector<16x1152xbf16> to vector<8x64xbf16>
    %cst_36 = arith.constant dense<0.000000e+00> : vector<8x8xf32>
    %117 = tpu.matmul %114, %115, %cst_36 {dimension_numbers = #tpu.dot_dimension_numbers<[1], [1], [0], [0], [0, 0, 1, 0], [], []>} : vector<8x64xbf16>, vector<8x64xbf16>, vector<8x8xf32> -> vector<8x8xf32>
    %cst_37 = arith.constant -1.000000e+30 : f32
    %118 = vector.broadcast %cst_37 : f32 to vector<8x8xf32>
    %119 = arith.select %37, %117, %118 : vector<8x8xi1>, vector<8x8xf32>
    %cst_38 = arith.constant dense<0xFF800000> : vector<8xf32>
    %120 = vector.multi_reduction <maximumf>, %119, %cst_38 [1] : vector<8x8xf32> to vector<8xf32>
    %121 = vector.shape_cast %120 : vector<8xf32> to vector<8x1xf32>
    %122 = vector.broadcast %121 : vector<8x1xf32> to vector<8x8xf32>
    %123 = arith.subf %119, %122 : vector<8x8xf32>
    %124 = math.exp %123 : vector<8x8xf32>
    %cst_39 = arith.constant dense<0.000000e+00> : vector<8xf32>
    %125 = vector.multi_reduction <add>, %124, %cst_39 [1] : vector<8x8xf32> to vector<8xf32>
    %126 = vector.shape_cast %125 : vector<8xf32> to vector<8x1xf32>
    %127 = tpu.reciprocal %126 {approx = true} : vector<8x1xf32> -> vector<8x1xf32>
    %128 = vector.broadcast %127 : vector<8x1xf32> to vector<8x8xf32>
    %129 = arith.mulf %124, %128 : vector<8x8xf32>
    %130 = arith.truncf %129 : vector<8x8xf32> to vector<8x8xbf16>
    %cst_40 = arith.constant dense<0.000000e+00> : vector<8x64xf32>
    %131 = tpu.matmul %130, %116, %cst_40 {dimension_numbers = #tpu.dot_dimension_numbers<[1], [0], [0], [1], [0, 0, 1, 1], [], []>} : vector<8x8xbf16>, vector<8x64xbf16>, vector<8x64xf32> -> vector<8x64xf32>
    %132 = arith.truncf %131 : vector<8x64xf32> to vector<8x64xbf16>
    %133 = vector.extract_strided_slice %34 {offsets = [0, 320], sizes = [8, 64], strides = [1, 1]} : vector<16x1152xbf16> to vector<8x64xbf16>
    %134 = vector.extract_strided_slice %34 {offsets = [0, 704], sizes = [8, 64], strides = [1, 1]} : vector<16x1152xbf16> to vector<8x64xbf16>
    %135 = vector.extract_strided_slice %34 {offsets = [0, 1088], sizes = [8, 64], strides = [1, 1]} : vector<16x1152xbf16> to vector<8x64xbf16>
    %cst_41 = arith.constant dense<0.000000e+00> : vector<8x8xf32>
    %136 = tpu.matmul %133, %134, %cst_41 {dimension_numbers = #tpu.dot_dimension_numbers<[1], [1], [0], [0], [0, 0, 1, 0], [], []>} : vector<8x64xbf16>, vector<8x64xbf16>, vector<8x8xf32> -> vector<8x8xf32>
    %cst_42 = arith.constant -1.000000e+30 : f32
    %137 = vector.broadcast %cst_42 : f32 to vector<8x8xf32>
    %138 = arith.select %37, %136, %137 : vector<8x8xi1>, vector<8x8xf32>
    %cst_43 = arith.constant dense<0xFF800000> : vector<8xf32>
    %139 = vector.multi_reduction <maximumf>, %138, %cst_43 [1] : vector<8x8xf32> to vector<8xf32>
    %140 = vector.shape_cast %139 : vector<8xf32> to vector<8x1xf32>
    %141 = vector.broadcast %140 : vector<8x1xf32> to vector<8x8xf32>
    %142 = arith.subf %138, %141 : vector<8x8xf32>
    %143 = math.exp %142 : vector<8x8xf32>
    %cst_44 = arith.constant dense<0.000000e+00> : vector<8xf32>
    %144 = vector.multi_reduction <add>, %143, %cst_44 [1] : vector<8x8xf32> to vector<8xf32>
    %145 = vector.shape_cast %144 : vector<8xf32> to vector<8x1xf32>
    %146 = tpu.reciprocal %145 {approx = true} : vector<8x1xf32> -> vector<8x1xf32>
    %147 = vector.broadcast %146 : vector<8x1xf32> to vector<8x8xf32>
    %148 = arith.mulf %143, %147 : vector<8x8xf32>
    %149 = arith.truncf %148 : vector<8x8xf32> to vector<8x8xbf16>
    %cst_45 = arith.constant dense<0.000000e+00> : vector<8x64xf32>
    %150 = tpu.matmul %149, %135, %cst_45 {dimension_numbers = #tpu.dot_dimension_numbers<[1], [0], [0], [1], [0, 0, 1, 1], [], []>} : vector<8x8xbf16>, vector<8x64xbf16>, vector<8x64xf32> -> vector<8x64xf32>
    %151 = arith.truncf %150 : vector<8x64xf32> to vector<8x64xbf16>
    %152 = tpu.concatenate %56, %75, %94, %113, %132, %151 in 1 : vector<8x64xbf16>, vector<8x64xbf16>, vector<8x64xbf16>, vector<8x64xbf16>, vector<8x64xbf16>, vector<8x64xbf16> -> vector<8x384xbf16>
    %153 = vector.extract_strided_slice %34 {offsets = [8, 0], sizes = [8, 64], strides = [1, 1]} : vector<16x1152xbf16> to vector<8x64xbf16>
    %154 = vector.extract_strided_slice %34 {offsets = [8, 384], sizes = [8, 64], strides = [1, 1]} : vector<16x1152xbf16> to vector<8x64xbf16>
    %155 = vector.extract_strided_slice %34 {offsets = [8, 768], sizes = [8, 64], strides = [1, 1]} : vector<16x1152xbf16> to vector<8x64xbf16>
    %cst_46 = arith.constant dense<0.000000e+00> : vector<8x8xf32>
    %156 = tpu.matmul %153, %154, %cst_46 {dimension_numbers = #tpu.dot_dimension_numbers<[1], [1], [0], [0], [0, 0, 1, 0], [], []>} : vector<8x64xbf16>, vector<8x64xbf16>, vector<8x8xf32> -> vector<8x8xf32>
    %cst_47 = arith.constant -1.000000e+30 : f32
    %157 = vector.broadcast %cst_47 : f32 to vector<8x8xf32>
    %158 = arith.select %37, %156, %157 : vector<8x8xi1>, vector<8x8xf32>
    %cst_48 = arith.constant dense<0xFF800000> : vector<8xf32>
    %159 = vector.multi_reduction <maximumf>, %158, %cst_48 [1] : vector<8x8xf32> to vector<8xf32>
    %160 = vector.shape_cast %159 : vector<8xf32> to vector<8x1xf32>
    %161 = vector.broadcast %160 : vector<8x1xf32> to vector<8x8xf32>
    %162 = arith.subf %158, %161 : vector<8x8xf32>
    %163 = math.exp %162 : vector<8x8xf32>
    %cst_49 = arith.constant dense<0.000000e+00> : vector<8xf32>
    %164 = vector.multi_reduction <add>, %163, %cst_49 [1] : vector<8x8xf32> to vector<8xf32>
    %165 = vector.shape_cast %164 : vector<8xf32> to vector<8x1xf32>
    %166 = tpu.reciprocal %165 {approx = true} : vector<8x1xf32> -> vector<8x1xf32>
    %167 = vector.broadcast %166 : vector<8x1xf32> to vector<8x8xf32>
    %168 = arith.mulf %163, %167 : vector<8x8xf32>
    %169 = arith.truncf %168 : vector<8x8xf32> to vector<8x8xbf16>
    %cst_50 = arith.constant dense<0.000000e+00> : vector<8x64xf32>
    %170 = tpu.matmul %169, %155, %cst_50 {dimension_numbers = #tpu.dot_dimension_numbers<[1], [0], [0], [1], [0, 0, 1, 1], [], []>} : vector<8x8xbf16>, vector<8x64xbf16>, vector<8x64xf32> -> vector<8x64xf32>
    %171 = arith.truncf %170 : vector<8x64xf32> to vector<8x64xbf16>
    %172 = vector.extract_strided_slice %34 {offsets = [8, 64], sizes = [8, 64], strides = [1, 1]} : vector<16x1152xbf16> to vector<8x64xbf16>
    %173 = vector.extract_strided_slice %34 {offsets = [8, 448], sizes = [8, 64], strides = [1, 1]} : vector<16x1152xbf16> to vector<8x64xbf16>
    %174 = vector.extract_strided_slice %34 {offsets = [8, 832], sizes = [8, 64], strides = [1, 1]} : vector<16x1152xbf16> to vector<8x64xbf16>
    %cst_51 = arith.constant dense<0.000000e+00> : vector<8x8xf32>
    %175 = tpu.matmul %172, %173, %cst_51 {dimension_numbers = #tpu.dot_dimension_numbers<[1], [1], [0], [0], [0, 0, 1, 0], [], []>} : vector<8x64xbf16>, vector<8x64xbf16>, vector<8x8xf32> -> vector<8x8xf32>
    %cst_52 = arith.constant -1.000000e+30 : f32
    %176 = vector.broadcast %cst_52 : f32 to vector<8x8xf32>
    %177 = arith.select %37, %175, %176 : vector<8x8xi1>, vector<8x8xf32>
    %cst_53 = arith.constant dense<0xFF800000> : vector<8xf32>
    %178 = vector.multi_reduction <maximumf>, %177, %cst_53 [1] : vector<8x8xf32> to vector<8xf32>
    %179 = vector.shape_cast %178 : vector<8xf32> to vector<8x1xf32>
    %180 = vector.broadcast %179 : vector<8x1xf32> to vector<8x8xf32>
    %181 = arith.subf %177, %180 : vector<8x8xf32>
    %182 = math.exp %181 : vector<8x8xf32>
    %cst_54 = arith.constant dense<0.000000e+00> : vector<8xf32>
    %183 = vector.multi_reduction <add>, %182, %cst_54 [1] : vector<8x8xf32> to vector<8xf32>
    %184 = vector.shape_cast %183 : vector<8xf32> to vector<8x1xf32>
    %185 = tpu.reciprocal %184 {approx = true} : vector<8x1xf32> -> vector<8x1xf32>
    %186 = vector.broadcast %185 : vector<8x1xf32> to vector<8x8xf32>
    %187 = arith.mulf %182, %186 : vector<8x8xf32>
    %188 = arith.truncf %187 : vector<8x8xf32> to vector<8x8xbf16>
    %cst_55 = arith.constant dense<0.000000e+00> : vector<8x64xf32>
    %189 = tpu.matmul %188, %174, %cst_55 {dimension_numbers = #tpu.dot_dimension_numbers<[1], [0], [0], [1], [0, 0, 1, 1], [], []>} : vector<8x8xbf16>, vector<8x64xbf16>, vector<8x64xf32> -> vector<8x64xf32>
    %190 = arith.truncf %189 : vector<8x64xf32> to vector<8x64xbf16>
    %191 = vector.extract_strided_slice %34 {offsets = [8, 128], sizes = [8, 64], strides = [1, 1]} : vector<16x1152xbf16> to vector<8x64xbf16>
    %192 = vector.extract_strided_slice %34 {offsets = [8, 512], sizes = [8, 64], strides = [1, 1]} : vector<16x1152xbf16> to vector<8x64xbf16>
    %193 = vector.extract_strided_slice %34 {offsets = [8, 896], sizes = [8, 64], strides = [1, 1]} : vector<16x1152xbf16> to vector<8x64xbf16>
    %cst_56 = arith.constant dense<0.000000e+00> : vector<8x8xf32>
    %194 = tpu.matmul %191, %192, %cst_56 {dimension_numbers = #tpu.dot_dimension_numbers<[1], [1], [0], [0], [0, 0, 1, 0], [], []>} : vector<8x64xbf16>, vector<8x64xbf16>, vector<8x8xf32> -> vector<8x8xf32>
    %cst_57 = arith.constant -1.000000e+30 : f32
    %195 = vector.broadcast %cst_57 : f32 to vector<8x8xf32>
    %196 = arith.select %37, %194, %195 : vector<8x8xi1>, vector<8x8xf32>
    %cst_58 = arith.constant dense<0xFF800000> : vector<8xf32>
    %197 = vector.multi_reduction <maximumf>, %196, %cst_58 [1] : vector<8x8xf32> to vector<8xf32>
    %198 = vector.shape_cast %197 : vector<8xf32> to vector<8x1xf32>
    %199 = vector.broadcast %198 : vector<8x1xf32> to vector<8x8xf32>
    %200 = arith.subf %196, %199 : vector<8x8xf32>
    %201 = math.exp %200 : vector<8x8xf32>
    %cst_59 = arith.constant dense<0.000000e+00> : vector<8xf32>
    %202 = vector.multi_reduction <add>, %201, %cst_59 [1] : vector<8x8xf32> to vector<8xf32>
    %203 = vector.shape_cast %202 : vector<8xf32> to vector<8x1xf32>
    %204 = tpu.reciprocal %203 {approx = true} : vector<8x1xf32> -> vector<8x1xf32>
    %205 = vector.broadcast %204 : vector<8x1xf32> to vector<8x8xf32>
    %206 = arith.mulf %201, %205 : vector<8x8xf32>
    %207 = arith.truncf %206 : vector<8x8xf32> to vector<8x8xbf16>
    %cst_60 = arith.constant dense<0.000000e+00> : vector<8x64xf32>
    %208 = tpu.matmul %207, %193, %cst_60 {dimension_numbers = #tpu.dot_dimension_numbers<[1], [0], [0], [1], [0, 0, 1, 1], [], []>} : vector<8x8xbf16>, vector<8x64xbf16>, vector<8x64xf32> -> vector<8x64xf32>
    %209 = arith.truncf %208 : vector<8x64xf32> to vector<8x64xbf16>
    %210 = vector.extract_strided_slice %34 {offsets = [8, 192], sizes = [8, 64], strides = [1, 1]} : vector<16x1152xbf16> to vector<8x64xbf16>
    %211 = vector.extract_strided_slice %34 {offsets = [8, 576], sizes = [8, 64], strides = [1, 1]} : vector<16x1152xbf16> to vector<8x64xbf16>
    %212 = vector.extract_strided_slice %34 {offsets = [8, 960], sizes = [8, 64], strides = [1, 1]} : vector<16x1152xbf16> to vector<8x64xbf16>
    %cst_61 = arith.constant dense<0.000000e+00> : vector<8x8xf32>
    %213 = tpu.matmul %210, %211, %cst_61 {dimension_numbers = #tpu.dot_dimension_numbers<[1], [1], [0], [0], [0, 0, 1, 0], [], []>} : vector<8x64xbf16>, vector<8x64xbf16>, vector<8x8xf32> -> vector<8x8xf32>
    %cst_62 = arith.constant -1.000000e+30 : f32
    %214 = vector.broadcast %cst_62 : f32 to vector<8x8xf32>
    %215 = arith.select %37, %213, %214 : vector<8x8xi1>, vector<8x8xf32>
    %cst_63 = arith.constant dense<0xFF800000> : vector<8xf32>
    %216 = vector.multi_reduction <maximumf>, %215, %cst_63 [1] : vector<8x8xf32> to vector<8xf32>
    %217 = vector.shape_cast %216 : vector<8xf32> to vector<8x1xf32>
    %218 = vector.broadcast %217 : vector<8x1xf32> to vector<8x8xf32>
    %219 = arith.subf %215, %218 : vector<8x8xf32>
    %220 = math.exp %219 : vector<8x8xf32>
    %cst_64 = arith.constant dense<0.000000e+00> : vector<8xf32>
    %221 = vector.multi_reduction <add>, %220, %cst_64 [1] : vector<8x8xf32> to vector<8xf32>
    %222 = vector.shape_cast %221 : vector<8xf32> to vector<8x1xf32>
    %223 = tpu.reciprocal %222 {approx = true} : vector<8x1xf32> -> vector<8x1xf32>
    %224 = vector.broadcast %223 : vector<8x1xf32> to vector<8x8xf32>
    %225 = arith.mulf %220, %224 : vector<8x8xf32>
    %226 = arith.truncf %225 : vector<8x8xf32> to vector<8x8xbf16>
    %cst_65 = arith.constant dense<0.000000e+00> : vector<8x64xf32>
    %227 = tpu.matmul %226, %212, %cst_65 {dimension_numbers = #tpu.dot_dimension_numbers<[1], [0], [0], [1], [0, 0, 1, 1], [], []>} : vector<8x8xbf16>, vector<8x64xbf16>, vector<8x64xf32> -> vector<8x64xf32>
    %228 = arith.truncf %227 : vector<8x64xf32> to vector<8x64xbf16>
    %229 = vector.extract_strided_slice %34 {offsets = [8, 256], sizes = [8, 64], strides = [1, 1]} : vector<16x1152xbf16> to vector<8x64xbf16>
    %230 = vector.extract_strided_slice %34 {offsets = [8, 640], sizes = [8, 64], strides = [1, 1]} : vector<16x1152xbf16> to vector<8x64xbf16>
    %231 = vector.extract_strided_slice %34 {offsets = [8, 1024], sizes = [8, 64], strides = [1, 1]} : vector<16x1152xbf16> to vector<8x64xbf16>
    %cst_66 = arith.constant dense<0.000000e+00> : vector<8x8xf32>
    %232 = tpu.matmul %229, %230, %cst_66 {dimension_numbers = #tpu.dot_dimension_numbers<[1], [1], [0], [0], [0, 0, 1, 0], [], []>} : vector<8x64xbf16>, vector<8x64xbf16>, vector<8x8xf32> -> vector<8x8xf32>
    %cst_67 = arith.constant -1.000000e+30 : f32
    %233 = vector.broadcast %cst_67 : f32 to vector<8x8xf32>
    %234 = arith.select %37, %232, %233 : vector<8x8xi1>, vector<8x8xf32>
    %cst_68 = arith.constant dense<0xFF800000> : vector<8xf32>
    %235 = vector.multi_reduction <maximumf>, %234, %cst_68 [1] : vector<8x8xf32> to vector<8xf32>
    %236 = vector.shape_cast %235 : vector<8xf32> to vector<8x1xf32>
    %237 = vector.broadcast %236 : vector<8x1xf32> to vector<8x8xf32>
    %238 = arith.subf %234, %237 : vector<8x8xf32>
    %239 = math.exp %238 : vector<8x8xf32>
    %cst_69 = arith.constant dense<0.000000e+00> : vector<8xf32>
    %240 = vector.multi_reduction <add>, %239, %cst_69 [1] : vector<8x8xf32> to vector<8xf32>
    %241 = vector.shape_cast %240 : vector<8xf32> to vector<8x1xf32>
    %242 = tpu.reciprocal %241 {approx = true} : vector<8x1xf32> -> vector<8x1xf32>
    %243 = vector.broadcast %242 : vector<8x1xf32> to vector<8x8xf32>
    %244 = arith.mulf %239, %243 : vector<8x8xf32>
    %245 = arith.truncf %244 : vector<8x8xf32> to vector<8x8xbf16>
    %cst_70 = arith.constant dense<0.000000e+00> : vector<8x64xf32>
    %246 = tpu.matmul %245, %231, %cst_70 {dimension_numbers = #tpu.dot_dimension_numbers<[1], [0], [0], [1], [0, 0, 1, 1], [], []>} : vector<8x8xbf16>, vector<8x64xbf16>, vector<8x64xf32> -> vector<8x64xf32>
    %247 = arith.truncf %246 : vector<8x64xf32> to vector<8x64xbf16>
    %248 = vector.extract_strided_slice %34 {offsets = [8, 320], sizes = [8, 64], strides = [1, 1]} : vector<16x1152xbf16> to vector<8x64xbf16>
    %249 = vector.extract_strided_slice %34 {offsets = [8, 704], sizes = [8, 64], strides = [1, 1]} : vector<16x1152xbf16> to vector<8x64xbf16>
    %250 = vector.extract_strided_slice %34 {offsets = [8, 1088], sizes = [8, 64], strides = [1, 1]} : vector<16x1152xbf16> to vector<8x64xbf16>
    %cst_71 = arith.constant dense<0.000000e+00> : vector<8x8xf32>
    %251 = tpu.matmul %248, %249, %cst_71 {dimension_numbers = #tpu.dot_dimension_numbers<[1], [1], [0], [0], [0, 0, 1, 0], [], []>} : vector<8x64xbf16>, vector<8x64xbf16>, vector<8x8xf32> -> vector<8x8xf32>
    %cst_72 = arith.constant -1.000000e+30 : f32
    %252 = vector.broadcast %cst_72 : f32 to vector<8x8xf32>
    %253 = arith.select %37, %251, %252 : vector<8x8xi1>, vector<8x8xf32>
    %cst_73 = arith.constant dense<0xFF800000> : vector<8xf32>
    %254 = vector.multi_reduction <maximumf>, %253, %cst_73 [1] : vector<8x8xf32> to vector<8xf32>
    %255 = vector.shape_cast %254 : vector<8xf32> to vector<8x1xf32>
    %256 = vector.broadcast %255 : vector<8x1xf32> to vector<8x8xf32>
    %257 = arith.subf %253, %256 : vector<8x8xf32>
    %258 = math.exp %257 : vector<8x8xf32>
    %cst_74 = arith.constant dense<0.000000e+00> : vector<8xf32>
    %259 = vector.multi_reduction <add>, %258, %cst_74 [1] : vector<8x8xf32> to vector<8xf32>
    %260 = vector.shape_cast %259 : vector<8xf32> to vector<8x1xf32>
    %261 = tpu.reciprocal %260 {approx = true} : vector<8x1xf32> -> vector<8x1xf32>
    %262 = vector.broadcast %261 : vector<8x1xf32> to vector<8x8xf32>
    %263 = arith.mulf %258, %262 : vector<8x8xf32>
    %264 = arith.truncf %263 : vector<8x8xf32> to vector<8x8xbf16>
    %cst_75 = arith.constant dense<0.000000e+00> : vector<8x64xf32>
    %265 = tpu.matmul %264, %250, %cst_75 {dimension_numbers = #tpu.dot_dimension_numbers<[1], [0], [0], [1], [0, 0, 1, 1], [], []>} : vector<8x8xbf16>, vector<8x64xbf16>, vector<8x64xf32> -> vector<8x64xf32>
    %266 = arith.truncf %265 : vector<8x64xf32> to vector<8x64xbf16>
    %267 = tpu.concatenate %171, %190, %209, %228, %247, %266 in 1 : vector<8x64xbf16>, vector<8x64xbf16>, vector<8x64xbf16>, vector<8x64xbf16>, vector<8x64xbf16>, vector<8x64xbf16> -> vector<8x384xbf16>
    %268 = tpu.concatenate %152, %267 in 0 : vector<8x384xbf16>, vector<8x384xbf16> -> vector<16x384xbf16>
    %c0_76 = arith.constant 0 : index
    %c0_77 = arith.constant 0 : index
    %c0_78 = arith.constant 0 : index
    %269 = vector.load %arg6[%c0_76, %c0_77, %c0_78] : memref<1x384x384xbf16, #tpu.memory_space<vmem>>, vector<1x384x384xbf16>
    %270 = vector.shape_cast %269 : vector<1x384x384xbf16> to vector<384x384xbf16>
    %cst_79 = arith.constant dense<0.000000e+00> : vector<16x384xf32>
    %271 = tpu.matmul %268, %270, %cst_79 {dimension_numbers = #tpu.dot_dimension_numbers<[1], [0], [0], [1], [0, 0, 1, 1], [], []>} : vector<16x384xbf16>, vector<384x384xbf16>, vector<16x384xf32> -> vector<16x384xf32>
    %c0_80 = arith.constant 0 : index
    %c0_81 = arith.constant 0 : index
    %c0_82 = arith.constant 0 : index
    %272 = vector.load %arg7[%c0_80, %c0_81, %c0_82] : memref<1x1x384xf32, #tpu.memory_space<vmem>>, vector<1x1x384xf32>
    %273 = vector.shape_cast %272 : vector<1x1x384xf32> to vector<1x384xf32>
    %274 = vector.broadcast %273 : vector<1x384xf32> to vector<16x384xf32>
    %275 = arith.addf %271, %274 : vector<16x384xf32>
    %276 = arith.addf %3, %275 : vector<16x384xf32>
    %c0_83 = arith.constant 0 : index
    %c0_84 = arith.constant 0 : index
    %c0_85 = arith.constant 0 : index
    %277 = vector.load %arg8[%c0_83, %c0_84, %c0_85] : memref<1x1x384xf32, #tpu.memory_space<vmem>>, vector<1x1x384xf32>
    %278 = vector.shape_cast %277 : vector<1x1x384xf32> to vector<1x384xf32>
    %c0_86 = arith.constant 0 : index
    %c0_87 = arith.constant 0 : index
    %c0_88 = arith.constant 0 : index
    %279 = vector.load %arg9[%c0_86, %c0_87, %c0_88] : memref<1x1x384xf32, #tpu.memory_space<vmem>>, vector<1x1x384xf32>
    %280 = vector.shape_cast %279 : vector<1x1x384xf32> to vector<1x384xf32>
    %cst_89 = arith.constant dense<0.000000e+00> : vector<16xf32>
    %281 = vector.multi_reduction <add>, %276, %cst_89 [1] : vector<16x384xf32> to vector<16xf32>
    %282 = vector.shape_cast %281 : vector<16xf32> to vector<16x1xf32>
    %cst_90 = arith.constant 3.840000e+02 : f32
    %283 = vector.broadcast %cst_90 : f32 to vector<16x1xf32>
    %284 = arith.divf %282, %283 : vector<16x1xf32>
    %285 = vector.broadcast %284 : vector<16x1xf32> to vector<16x384xf32>
    %286 = arith.subf %276, %285 : vector<16x384xf32>
    %287 = arith.mulf %286, %286 : vector<16x384xf32>
    %cst_91 = arith.constant dense<0.000000e+00> : vector<16xf32>
    %288 = vector.multi_reduction <add>, %287, %cst_91 [1] : vector<16x384xf32> to vector<16xf32>
    %289 = vector.shape_cast %288 : vector<16xf32> to vector<16x1xf32>
    %cst_92 = arith.constant 3.840000e+02 : f32
    %290 = vector.broadcast %cst_92 : f32 to vector<16x1xf32>
    %291 = arith.divf %289, %290 : vector<16x1xf32>
    %292 = vector.broadcast %284 : vector<16x1xf32> to vector<16x384xf32>
    %293 = arith.subf %276, %292 : vector<16x384xf32>
    %cst_93 = arith.constant 9.99999974E-6 : f32
    %294 = vector.broadcast %cst_93 : f32 to vector<16x1xf32>
    %295 = arith.addf %291, %294 : vector<16x1xf32>
    %296 = math.rsqrt %295 : vector<16x1xf32>
    %297 = vector.broadcast %296 : vector<16x1xf32> to vector<16x384xf32>
    %298 = arith.mulf %293, %297 : vector<16x384xf32>
    %299 = vector.broadcast %278 : vector<1x384xf32> to vector<16x384xf32>
    %300 = arith.mulf %298, %299 : vector<16x384xf32>
    %301 = vector.broadcast %280 : vector<1x384xf32> to vector<16x384xf32>
    %302 = arith.addf %300, %301 : vector<16x384xf32>
    %303 = arith.truncf %302 : vector<16x384xf32> to vector<16x384xbf16>
    %c0_94 = arith.constant 0 : index
    %c0_95 = arith.constant 0 : index
    %c0_96 = arith.constant 0 : index
    %304 = vector.load %arg10[%c0_94, %c0_95, %c0_96] : memref<1x384x1536xbf16, #tpu.memory_space<vmem>>, vector<1x384x1536xbf16>
    %305 = vector.shape_cast %304 : vector<1x384x1536xbf16> to vector<384x1536xbf16>
    %cst_97 = arith.constant dense<0.000000e+00> : vector<16x1536xf32>
    %306 = tpu.matmul %303, %305, %cst_97 {dimension_numbers = #tpu.dot_dimension_numbers<[1], [0], [0], [1], [0, 0, 1, 1], [], []>} : vector<16x384xbf16>, vector<384x1536xbf16>, vector<16x1536xf32> -> vector<16x1536xf32>
    %c0_98 = arith.constant 0 : index
    %c0_99 = arith.constant 0 : index
    %c0_100 = arith.constant 0 : index
    %307 = vector.load %arg11[%c0_98, %c0_99, %c0_100] : memref<1x1x1536xf32, #tpu.memory_space<vmem>>, vector<1x1x1536xf32>
    %308 = vector.shape_cast %307 : vector<1x1x1536xf32> to vector<1x1536xf32>
    %309 = vector.broadcast %308 : vector<1x1536xf32> to vector<16x1536xf32>
    %310 = arith.addf %306, %309 : vector<16x1536xf32>
    %cst_101 = arith.constant 0.000000e+00 : f32
    %311 = vector.broadcast %cst_101 : f32 to vector<16x1536xf32>
    %312 = arith.maximumf %310, %311 : vector<16x1536xf32>
    %313 = arith.truncf %312 : vector<16x1536xf32> to vector<16x1536xbf16>
    %c0_102 = arith.constant 0 : index
    %c0_103 = arith.constant 0 : index
    %c0_104 = arith.constant 0 : index
    %314 = vector.load %arg12[%c0_102, %c0_103, %c0_104] : memref<1x1536x384xbf16, #tpu.memory_space<vmem>>, vector<1x1536x384xbf16>
    %315 = vector.shape_cast %314 : vector<1x1536x384xbf16> to vector<1536x384xbf16>
    %cst_105 = arith.constant dense<0.000000e+00> : vector<16x384xf32>
    %316 = tpu.matmul %313, %315, %cst_105 {dimension_numbers = #tpu.dot_dimension_numbers<[1], [0], [0], [1], [0, 0, 1, 1], [], []>} : vector<16x1536xbf16>, vector<1536x384xbf16>, vector<16x384xf32> -> vector<16x384xf32>
    %c0_106 = arith.constant 0 : index
    %c0_107 = arith.constant 0 : index
    %c0_108 = arith.constant 0 : index
    %317 = vector.load %arg13[%c0_106, %c0_107, %c0_108] : memref<1x1x384xf32, #tpu.memory_space<vmem>>, vector<1x1x384xf32>
    %318 = vector.shape_cast %317 : vector<1x1x384xf32> to vector<1x384xf32>
    %319 = vector.broadcast %318 : vector<1x384xf32> to vector<16x384xf32>
    %320 = arith.addf %316, %319 : vector<16x384xf32>
    %321 = arith.addf %276, %320 : vector<16x384xf32>
    %c0_109 = arith.constant 0 : index
    %c0_110 = arith.constant 0 : index
    %322 = vector.load %arg19[%c0_109, %c0_110] : memref<16x384xf32, #tpu.memory_space<vmem>>, vector<16x384xf32>
    tpu.vector_store %arg19[%c0_109, %c0_110], %321 {strides = array<i32>} : memref<16x384xf32, #tpu.memory_space<vmem>>, vector<16x384xf32>,
    %c5_i32 = arith.constant 5 : i32
    %323 = arith.cmpi eq, %arg1, %c5_i32 : i32
    %324 = arith.extui %323 : i1 to i32
    %c0_i32_111 = arith.constant 0 : i32
    %325 = arith.cmpi ne, %324, %c0_i32_111 : i32
    scf.if %325 {
      %c0_112 = arith.constant 0 : index
      %c0_113 = arith.constant 0 : index
      %326 = vector.load %arg14[%c0_112, %c0_113] : memref<1x384xf32, #tpu.memory_space<vmem>>, vector<1x384xf32>
      %c0_114 = arith.constant 0 : index
      %c0_115 = arith.constant 0 : index
      %327 = vector.load %arg15[%c0_114, %c0_115] : memref<1x384xf32, #tpu.memory_space<vmem>>, vector<1x384xf32>
      %cst_116 = arith.constant dense<0.000000e+00> : vector<16xf32>
      %328 = vector.multi_reduction <add>, %321, %cst_116 [1] : vector<16x384xf32> to vector<16xf32>
      %329 = vector.shape_cast %328 : vector<16xf32> to vector<16x1xf32>
      %cst_117 = arith.constant 3.840000e+02 : f32
      %330 = vector.broadcast %cst_117 : f32 to vector<16x1xf32>
      %331 = arith.divf %329, %330 : vector<16x1xf32>
      %332 = vector.broadcast %331 : vector<16x1xf32> to vector<16x384xf32>
      %333 = arith.subf %321, %332 : vector<16x384xf32>
      %334 = arith.mulf %333, %333 : vector<16x384xf32>
      %cst_118 = arith.constant dense<0.000000e+00> : vector<16xf32>
      %335 = vector.multi_reduction <add>, %334, %cst_118 [1] : vector<16x384xf32> to vector<16xf32>
      %336 = vector.shape_cast %335 : vector<16xf32> to vector<16x1xf32>
      %cst_119 = arith.constant 3.840000e+02 : f32
      %337 = vector.broadcast %cst_119 : f32 to vector<16x1xf32>
      %338 = arith.divf %336, %337 : vector<16x1xf32>
      %339 = vector.broadcast %331 : vector<16x1xf32> to vector<16x384xf32>
      %340 = arith.subf %321, %339 : vector<16x384xf32>
      %cst_120 = arith.constant 9.99999974E-6 : f32
      %341 = vector.broadcast %cst_120 : f32 to vector<16x1xf32>
      %342 = arith.addf %338, %341 : vector<16x1xf32>
      %343 = math.rsqrt %342 : vector<16x1xf32>
      %344 = vector.broadcast %343 : vector<16x1xf32> to vector<16x384xf32>
      %345 = arith.mulf %340, %344 : vector<16x384xf32>
      %346 = vector.broadcast %326 : vector<1x384xf32> to vector<16x384xf32>
      %347 = arith.mulf %345, %346 : vector<16x384xf32>
      %348 = vector.broadcast %327 : vector<1x384xf32> to vector<16x384xf32>
      %349 = arith.addf %347, %348 : vector<16x384xf32>
      %350 = arith.truncf %349 : vector<16x384xf32> to vector<16x384xbf16>
      %c0_121 = arith.constant 0 : index
      %c0_122 = arith.constant 0 : index
      %351 = vector.load %arg16[%c0_121, %c0_122] : memref<384x128xbf16, #tpu.memory_space<vmem>>, vector<384x128xbf16>
      %cst_123 = arith.constant dense<0.000000e+00> : vector<16x128xf32>
      %352 = tpu.matmul %350, %351, %cst_123 {dimension_numbers = #tpu.dot_dimension_numbers<[1], [0], [0], [1], [0, 0, 1, 1], [], []>} : vector<16x384xbf16>, vector<384x128xbf16>, vector<16x128xf32> -> vector<16x128xf32>
      %c0_124 = arith.constant 0 : index
      %c0_125 = arith.constant 0 : index
      %353 = vector.load %arg17[%c0_124, %c0_125] : memref<1x128xf32, #tpu.memory_space<vmem>>, vector<1x128xf32>
      %354 = vector.broadcast %353 : vector<1x128xf32> to vector<16x128xf32>
      %355 = arith.addf %352, %354 : vector<16x128xf32>
      %356 = vector.shape_cast %355 : vector<16x128xf32> to vector<2x8x128xf32>
      %c0_126 = arith.constant 0 : index
      %c0_127 = arith.constant 0 : index
      %c0_128 = arith.constant 0 : index
      %357 = vector.load %arg18[%c0_126, %c0_127, %c0_128] : memref<2x8x128xf32, #tpu.memory_space<vmem>>, vector<2x8x128xf32>
      tpu.vector_store %arg18[%c0_126, %c0_127, %c0_128], %356 {strides = array<i32>} : memref<2x8x128xf32, #tpu.memory_space<vmem>>, vector<2x8x128xf32>,
    } else {
    }
    return
  }
  func.func @transform_0(%arg0: i32, %arg1: i32) -> (i32, i32, i32) {
    %c0_i32 = arith.constant 0 : i32
    %c0_i32_0 = arith.constant 0 : i32
    %c0_i32_1 = arith.constant 0 : i32
    return %arg0, %c0_i32, %c0_i32_0 : i32, i32, i32
  }
  func.func @transform_1(%arg0: i32, %arg1: i32) -> (i32, i32, i32) {
    %c0_i32 = arith.constant 0 : i32
    %c0_i32_0 = arith.constant 0 : i32
    %c0_i32_1 = arith.constant 0 : i32
    return %arg1, %c0_i32, %c0_i32_0 : i32, i32, i32
  }
  func.func @transform_2(%arg0: i32, %arg1: i32) -> (i32, i32, i32) {
    %c0_i32 = arith.constant 0 : i32
    %c0_i32_0 = arith.constant 0 : i32
    %c0_i32_1 = arith.constant 0 : i32
    return %arg1, %c0_i32, %c0_i32_0 : i32, i32, i32
  }
  func.func @transform_3(%arg0: i32, %arg1: i32) -> (i32, i32, i32) {
    %c0_i32 = arith.constant 0 : i32
    %c0_i32_0 = arith.constant 0 : i32
    %c0_i32_1 = arith.constant 0 : i32
    return %arg1, %c0_i32, %c0_i32_0 : i32, i32, i32
  }
  func.func @transform_4(%arg0: i32, %arg1: i32) -> (i32, i32, i32) {
    %c0_i32 = arith.constant 0 : i32
    %c0_i32_0 = arith.constant 0 : i32
    %c0_i32_1 = arith.constant 0 : i32
    return %arg1, %c0_i32, %c0_i32_0 : i32, i32, i32
  }
  func.func @transform_5(%arg0: i32, %arg1: i32) -> (i32, i32, i32) {
    %c0_i32 = arith.constant 0 : i32
    %c0_i32_0 = arith.constant 0 : i32
    %c0_i32_1 = arith.constant 0 : i32
    return %arg1, %c0_i32, %c0_i32_0 : i32, i32, i32
  }
  func.func @transform_6(%arg0: i32, %arg1: i32) -> (i32, i32, i32) {
    %c0_i32 = arith.constant 0 : i32
    %c0_i32_0 = arith.constant 0 : i32
    %c0_i32_1 = arith.constant 0 : i32
    return %arg1, %c0_i32, %c0_i32_0 : i32, i32, i32
  }
  func.func @transform_7(%arg0: i32, %arg1: i32) -> (i32, i32, i32) {
    %c0_i32 = arith.constant 0 : i32
    %c0_i32_0 = arith.constant 0 : i32
    %c0_i32_1 = arith.constant 0 : i32
    return %arg1, %c0_i32, %c0_i32_0 : i32, i32, i32
  }
  func.func @transform_8(%arg0: i32, %arg1: i32) -> (i32, i32, i32) {
    %c0_i32 = arith.constant 0 : i32
    %c0_i32_0 = arith.constant 0 : i32
    %c0_i32_1 = arith.constant 0 : i32
    return %arg1, %c0_i32, %c0_i32_0 : i32, i32, i32
  }
  func.func @transform_9(%arg0: i32, %arg1: i32) -> (i32, i32, i32) {
    %c0_i32 = arith.constant 0 : i32
    %c0_i32_0 = arith.constant 0 : i32
    %c0_i32_1 = arith.constant 0 : i32
    return %arg1, %c0_i32, %c0_i32_0 : i32, i32, i32
  }
  func.func @transform_10(%arg0: i32, %arg1: i32) -> (i32, i32, i32) {
    %c0_i32 = arith.constant 0 : i32
    %c0_i32_0 = arith.constant 0 : i32
    %c0_i32_1 = arith.constant 0 : i32
    return %arg1, %c0_i32, %c0_i32_0 : i32, i32, i32
  }
  func.func @transform_11(%arg0: i32, %arg1: i32) -> (i32, i32, i32) {
    %c0_i32 = arith.constant 0 : i32
    %c0_i32_0 = arith.constant 0 : i32
    %c0_i32_1 = arith.constant 0 : i32
    return %arg1, %c0_i32, %c0_i32_0 : i32, i32, i32
  }
  func.func @transform_12(%arg0: i32, %arg1: i32) -> (i32, i32) {
    %c0_i32 = arith.constant 0 : i32
    %c0_i32_0 = arith.constant 0 : i32
    %c0_i32_1 = arith.constant 0 : i32
    return %c0_i32, %c0_i32_0 : i32, i32
  }
  func.func @transform_13(%arg0: i32, %arg1: i32) -> (i32, i32) {
    %c0_i32 = arith.constant 0 : i32
    %c0_i32_0 = arith.constant 0 : i32
    %c0_i32_1 = arith.constant 0 : i32
    return %c0_i32, %c0_i32_0 : i32, i32
  }
  func.func @transform_14(%arg0: i32, %arg1: i32) -> (i32, i32) {
    %c0_i32 = arith.constant 0 : i32
    %c0_i32_0 = arith.constant 0 : i32
    %c0_i32_1 = arith.constant 0 : i32
    return %c0_i32, %c0_i32_0 : i32, i32
  }
  func.func @transform_15(%arg0: i32, %arg1: i32) -> (i32, i32) {
    %c0_i32 = arith.constant 0 : i32
    %c0_i32_0 = arith.constant 0 : i32
    %c0_i32_1 = arith.constant 0 : i32
    return %c0_i32, %c0_i32_0 : i32, i32
  }
  func.func @transform_16(%arg0: i32, %arg1: i32) -> (i32, i32, i32) {
    %c0_i32 = arith.constant 0 : i32
    %c0_i32_0 = arith.constant 0 : i32
    %c0_i32_1 = arith.constant 0 : i32
    return %arg0, %c0_i32, %c0_i32_0 : i32, i32, i32
  }
}

</mosaic_0001>

<bundles_post_ra>
// kernel: bigram_lm_forward.1
= control target key start
LH: loop header
LB: loop body
LE: loop exit
PB: predicated region body
PF: predicated region fallthrough
CT: control target
= control target key end

     0   :  { %s16492_s0 = inlined_call_operand.vmem [shape: f32[2,8,384], index: 0, kind: input, shape index: {}]   ;;  %s16493_s1 = inlined_call_operand.hbm [shape: f32[6,1,384], index: 1, kind: input, shape index: {}]   ;;  %s16494_s2 = inlined_call_operand.hbm [shape: f32[6,1,384], index: 2, kind: input, shape index: {}]   ;;  %s16495_s3 = inlined_call_operand.hbm [shape: bf16[6,384,1152], index: 3, kind: input, shape index: {}]   ;;  %s16496_s4 = inlined_call_operand.hbm [shape: bf16[6,384,384], index: 4, kind: input, shape index: {}]   ;;  %s16497_s5 = inlined_call_operand.hbm [shape: f32[6,1,384], index: 5, kind: input, shape index: {}]   ;;  %s16498_s6 = inlined_call_operand.hbm [shape: f32[6,1,384], index: 6, kind: input, shape index: {}]   ;;  %s16499_s7 = inlined_call_operand.hbm [shape: f32[6,1,384], index: 7, kind: input, shape index: {}]   ;;  %s16500_s8 = inlined_call_operand.hbm [shape: bf16[6,384,1536], index: 8, kind: input, shape index: {}]   ;;  %s16501_s9 = inlined_call_operand.hbm [shape: f32[6,1,1536], index: 9, kind: input, shape index: {}]   ;;  %s16502_s10 = inlined_call_operand.hbm [shape: bf16[6,1536,384], index: 10, kind: input, shape index: {}]   ;;  %s16503_s11 = inlined_call_operand.hbm [shape: f32[6,1,384], index: 11, kind: input, shape index: {}]   ;;  %s16504_s12 = inlined_call_operand.hbm [shape: f32[1,384], index: 12, kind: input, shape index: {}]   ;;  %s16505_s13 = inlined_call_operand.hbm [shape: f32[1,384], index: 13, kind: input, shape index: {}]   ;;  %s16506_s14 = inlined_call_operand.hbm [shape: bf16[384,128], index: 14, kind: input, shape index: {}]   ;;  %s16507_s15 = inlined_call_operand.hbm [shape: f32[1,128], index: 15, kind: input, shape index: {}]   ;;  %s16508_s16 = inlined_call_operand.hbm [shape: f32[2,8,128], index: 16, kind: output, shape index: {}]  }
   0x1   :  { %16542 = sst [smem:[#allocation46_spill]] %s16492_s0 }
   0x2   :  { %16543 = sst [smem:[#allocation47_spill]] %s16494_s2 }
   0x3   :  { %16544 = sst [smem:[#allocation48_spill]] %s16496_s4 }
   0x4   :  { %16545 = sst [smem:[#allocation49_spill]] %s16498_s6 }
   0x5   :  { %16546 = sst [smem:[#allocation50_spill]] %s16500_s8 }
   0x6   :  { %16547 = sst [smem:[#allocation51_spill]] %s16501_s9 }
   0x7   :  { %16548 = sst [smem:[#allocation52_spill]] %s16503_s11 }
   0x8   :  { %16549 = sst [smem:[#allocation53_spill]] %s16504_s12 }
   0x9   :  { %16550 = sst [smem:[#allocation54_spill]] %s16506_s14 }
   0xa   :  { %16551 = sst [smem:[#allocation55_spill]] %s16508_s16 }
   0xb   :  { %21 = vsyncpa [#allocation4], 0 }
   0xc   :  { %23 = vsyncpa [#allocation4 + $0x1], 0 }
   0xd   :  { %24 = vsyncpa [#allocation7], 0 }
   0xe   :  { %26 = vsyncpa [#allocation7 + $0x1], 0 }
   0xf   :  { %27 = vsyncpa [#allocation10], 0 }
  0x10   :  { %29 = vsyncpa [#allocation10 + $0x1], 0 }
  0x11   :  { %30 = vsyncpa [#allocation13], 0 }
  0x12   :  { %32 = vsyncpa [#allocation13 + $0x1], 0 }
  0x13   :  { %33 = vsyncpa [#allocation16], 0 }
  0x14   :  { %35 = vsyncpa [#allocation16 + $0x1], 0 }
  0x15   :  { %36 = vsyncpa [#allocation19], 0 }
  0x16   :  { %38 = vsyncpa [#allocation19 + $0x1], 0 }
  0x17   :  { %39 = vsyncpa [#allocation22], 0 }
  0x18   :  { %40 = vsyncpa [#allocation25], 0 }
  0x19   :  { %41 = vsyncpa [#allocation5], 0  ;;  %s14246_s21 = smov 0   ;;  %s14248_s22 = smov 0  }
  0x1a   :  { %s14250_s23 = smov 0   ;;  %s14252_s24 = smov 0  }
  0x1b   :  { %s14254_s25 = smov 0   ;;  %s14256_s26 = smov 0  }
  0x1c LB: > { %16552 = sst [smem:[#allocation37_spill]] %s14111_s22  ;;  %s14275_s27 = sadd.s32 4294967295, %s14127_s26   ;;  %s14127_s26 = sphi %s14256_s26, %s47_s26   ;;  %s14123_s25 = sphi %s14254_s25, %s16621_s25   ;;  %s14119_s24 = sphi %s14252_s24, %s16620_s24   ;;  %s14115_s23 = sphi %s14250_s23, %s16618_s23   ;;  %s14111_s22 = sphi %s14248_s22, %s16617_s22   ;;  %s14107_s21 = sphi %s14246_s21, %s16616_s21  }
  0x1d   : > { %16553 = sst [smem:[#allocation38_spill]] %s14115_s23  ;;  %s56_s28 = sadd.s32 1, %s14123_s25 }
  0x1e   : > { %16554 = sst [smem:[#allocation39_spill]] %s14119_s24  ;;  %p57_p0 = scmp.ge.s32.totalorder %s56_s28, 6 }
  0x1f   : > { %16555 = sst [smem:[#allocation40_spill]] %s14127_s26  ;;  %s92_s29 = sadd.s32 1, %s14115_s23 }
  0x20   : > { %16556 = sst [smem:[#allocation41_spill]] %s14275_s27  ;;  %p99_p1 = scmp.ne.s32.totalorder %s14115_s23, %s14111_s22 }
  0x21   : > { %p100_p2 = scmp.eq.s32.totalorder %s14127_s26, 0  ;;  %s16623_s28 = smov (%p57_p0, %s56_s28), 0 }
  0x22   : > { %16557 = sst [smem:[#allocation42_spill]] %s16623_s28  ;;  %p105_p4 = scmp.ne.s32.totalorder %s14111_s22, %s14107_s21 }
  0x23   : > { %p14284_p3 = por %p100_p2, %p99_p1  ;;  %s89_s0 = ssub.s32 %s14123_s25, %s16623_s28 }
  0x24   : > { %p16520_p5 = scmp.eq.s32.totalorder %s14275_s27, 0  ;;  %p90_p6 = scmp.eq.s32.totalorder %s89_s0, 0 }
  0x25   : > { %p10552_p7 = scmp.ge.s32.totalorder %s14127_s26, 1  ;;  %p486_p9 = scmp.lt.s32.totalorder %s14127_s26, 7 }
  0x26   : > { %p14295_p8 = por %p16520_p5, %p105_p4  ;;  %s14129_s20 = smov [#allocation21]  }
  0x27   : > { %s14301_s18 = scalar_select %p90_p6, %s14115_s23, %s92_s29  }
  0x28   : > { %s16559_s17 = scalar_select %p14295_p8, 1, 0 }
  0x29   : > { %16561 = sst [smem:[#allocation44_spill]] %s14301_s18  ;;  %p14303_p10 = pnand %p10552_p7, %p486_p9 }
  0x2a   : > { %16560 = sst [smem:[#allocation43_spill]] %s16559_s17  ;;  %s509_s21 = sshll.u32 %s14129_s20, 4  ;;  %s510_s21 = int_to_ptr.vmem [resolvable:$true] %s509_s21 }
  0x2b   : > { %s16562_s19 = scalar_select %p14303_p10, 1, 0 }
  0x2c   : > { %p12136_p11 = pneg %p14303_p10  ;;  %p12187_p12 = scmp.lt.s32.totalorder %s14127_s26, 6 }
  0x2d   : > { %16563 = sst [smem:[#allocation45_spill]] %s16562_s19  ;;  %s14317_s28 = sand.u32 1, %s14115_s23  }
  0x2e   : > { %p14312_p13 = pnand %p12136_p11, %p16520_p5  ;;  %p14321_p0 = pnand %p12187_p12, %p14284_p3 }
  0x2f   : > { %s14130_s18 = smov [#allocation24]   ;;  %s16566_s12 = sld [smem:[#allocation53_spill]] }
  0x30   : > { %s16564_s0 = scalar_select %p14312_p13, 1, 0 }
  0x31   : > { %s16565_s29 = scalar_select %p14321_p0, 1, 0 }
  0x32   : > { %s530_s16 = sshll.u32 %s14130_s18, 4  ;;  %p14333_p2 = pneg %p14312_p13  ;;  %s531_s16 = int_to_ptr.vmem [resolvable:$true] %s530_s16 }
  0x34   : > { %s16567_s19 = scalar_select %p14333_p2, 1, 0 }
  0x35   : > { %s13577_s20 = scalar_lea.hbm %s16566_s12, 48 }
  0x36   : > { %p13578_p1 = scmp.ne.s32.totalorder %s16566_s12, %s13577_s20  ;;  %p13584_p6 = scmp.lt.u32.totalorder %s13577_s20, %s16566_s12 }
  0x38   : > { %p13580_p3 = pnand %p14333_p2, %p13578_p1 }
  0x3a   : > { %p13581_p4 = pneg %p13580_p3 }
  0x3c   : > { %p13586_p7 = pnand %p13584_p6, %p13581_p4 }
  0x3e   : > { %13589 = shalt.err (!%p13586_p7)
}
  0x3f   : > { %s13590_s24 = scalar_lea.vmem %s510_s21, 48  ;;  %s13597_s22 = scalar_lea.vmem %s510_s21, 64 }
  0x40   : > { %p13591_p9 = scmp.ne.s32.totalorder %s510_s21, %s13590_s24  ;;  %p13598_p5 = scmp.lt.s32.totalorder %s510_s21, %s510_s21 }
  0x41   : > { %p13599_p8 = scmp.lt.s32.totalorder %s13597_s22, %s13590_s24 }
  0x42   : > { %p13593_p11 = pnand %p13591_p9, %p14333_p2 }
  0x43   : > { %p13600_p10 = por %p13599_p8, %p13598_p5 }
  0x44   : > { %p13594_p12 = pneg %p13593_p11 }
  0x46   : > { %p13601_p0 = pnand %p13600_p10, %p13594_p12 }
  0x48   : > { %13604 = shalt.err (!%p13601_p0)
}
  0x49   : > { %12139 = dma.hbm_to_vmem [thread:$0]  (!%p14312_p13), %s16566_s12, 48, %s510_s21, [#allocation22]  }
  0x4a   : > { %s16568_s14 = sld [smem:[#allocation54_spill]] }
  0x50   : > { %s13605_s20 = scalar_lea.hbm %s16568_s14, 3072 }
  0x51   : > { %p13606_p1 = scmp.ne.s32.totalorder %s16568_s14, %s13605_s20  ;;  %p13612_p10 = scmp.lt.u32.totalorder %s13605_s20, %s16568_s14 }
  0x53   : > { %p13608_p5 = pnand %p13606_p1, %p14333_p2 }
  0x55   : > { %p13609_p8 = pneg %p13608_p5 }
  0x57   : > { %p13614_p0 = pnand %p13612_p10, %p13609_p8 }
  0x59   : > { %13617 = shalt.err (!%p13614_p0)
}
  0x5a   : > { %s13618_s27 = scalar_lea.vmem %s531_s16, 3072  ;;  %p13626_p7 = scmp.lt.s32.totalorder %s531_s16, %s531_s16 }
  0x5b   : > { %p13619_p3 = scmp.ne.s32.totalorder %s531_s16, %s13618_s27  ;;  %p13627_p9 = scmp.lt.s32.totalorder %s13618_s27, %s13618_s27 }
  0x5d   : > { %p13621_p4 = pnand %p13619_p3, %p14333_p2  ;;  %p13628_p11 = por %p13627_p9, %p13626_p7 }
  0x5f   : > { %p13622_p6 = pneg %p13621_p4 }
  0x61   : > { %p13629_p12 = pnand %p13628_p11, %p13622_p6 }
  0x63   : > { %13632 = shalt.err (!%p13629_p12)
}
  0x64   : > { %s14131_s11 = smov 64   ;;  %s14132_s21 = smov 4  }
  0x65   : > { %12145 = dma.hbm_to_vmem [thread:$0]  (!%p14312_p13), %s16568_s14, 3072, %s531_s16, [#allocation25], %s14131_s11, %s14131_s11, %s14132_s21  }
  0x66   : > { %s14368_s18 = smul.u32 3, %s14317_s28  ;;  %s14371_s20 = sand.u32 1, %s14127_s26  }
  0x67   : > { %s14374_s30 = smul.u32 48, %s14123_s25  ;;  %s16569_s2 = sld [smem:[#allocation47_spill]] }
  0x68   : > { %s578_s17 = scalar_lea.vmem [#allocation6], %s14368_s18  ;;  %s16531_s21 = scalar_lea.sflag [#allocation7], %s14371_s20 }
  0x69   : > { %s586_s16 = sshll.u32 %s578_s17, 4  ;;  %p16570_p5 = scmp.ne.s32.totalorder %s16565_s29, 0  ;;  %s14383_s16 = int_to_ptr.vmem [resolvable:$true] %s586_s16 }
  0x6b   : > { %p14391_p8 = pneg %p16570_p5 }
  0x6d   : > { %s14380_s27 = scalar_lea.hbm %s16569_s2, %s14374_s30  ;;  %s13638_s14 = scalar_lea.hbm %s16569_s2, 288 }
  0x6e   : > { %s13633_s23 = scalar_lea.hbm %s14380_s27, 48  ;;  %p13639_p3 = scmp.lt.u32.totalorder %s14380_s27, %s16569_s2 }
  0x6f   : > { %p13634_p1 = scmp.ne.s32.totalorder %s14380_s27, %s13633_s23  ;;  %p13640_p4 = scmp.lt.u32.totalorder %s13638_s14, %s13633_s23 }
  0x70   : > { %s16571_s12 = scalar_select %p14391_p8, 1, 0 }
  0x71   : > { %p13636_p10 = pnand %p14391_p8, %p13634_p1  ;;  %p13641_p6 = por %p13640_p4, %p13639_p3 }
  0x72   : > { %p13642_p7 = scmp.lt.u32.totalorder %s13633_s23, %s14380_s27 }
  0x73   : > { %p13637_p0 = pneg %p13636_p10 }
  0x74   : > { %p13643_p9 = por %p13642_p7, %p13641_p6 }
  0x76   : > { %p13644_p11 = pnand %p13643_p9, %p13637_p0 }
  0x78   : > { %13647 = shalt.err (!%p13644_p11)
}
  0x79   : > { %s13648_s11 = scalar_lea.vmem %s14383_s16, 48  ;;  %s14133_s24 = smov [#allocation6]  }
  0x7a   : > { %p13649_p12 = scmp.ne.s32.totalorder %s14383_s16, %s13648_s11  ;;  %s13653_s22 = sshll.u32 %s14133_s24, 4  ;;  %s13654_s22 = int_to_ptr.vmem [resolvable:$false] %s13653_s22 }
  0x7b   : > { %s13655_s26 = scalar_lea.vmem %s13654_s22, 96  ;;  %p13656_p13 = scmp.lt.s32.totalorder %s14383_s16, %s13654_s22 }
  0x7c   : > { %p13651_p1 = pnand %p13649_p12, %p14391_p8  ;;  %p13657_p2 = scmp.lt.s32.totalorder %s13655_s26, %s13648_s11 }
  0x7e   : > { %p13652_p10 = pneg %p13651_p1  ;;  %p13658_p3 = por %p13657_p2, %p13656_p13 }
  0x80   : > { %p13659_p4 = pnand %p13658_p3, %p13652_p10 }
  0x82   : > { %13662 = shalt.err (!%p13659_p4)
}
  0x83   : > { %12155 = dma.hbm_to_vmem [thread:$0]  (!%p16570_p5), %s14380_s27, 48, %s14383_s16, %s16531_s21  }
  0x84   : > { %s12074_s14 = smul.u32 9216, %s14123_s25  ;;  %s16573_s4 = sld [smem:[#allocation48_spill]] }
  0x85   : > { %s16572_s23 = smul.u32 576, %s14317_s28  ;;  %s16532_s2 = scalar_lea.sflag [#allocation10], %s14371_s20 }
  0x87   : > { %s618_s17 = scalar_lea.vmem [#allocation9], %s16572_s23 }
  0x88   : > { %s625_s24 = sshll.u32 %s618_s17, 4  ;;  %s14424_s24 = int_to_ptr.vmem [resolvable:$true] %s625_s24 }
  0x8a   : > { %s14422_s26 = scalar_lea.hbm %s16573_s4, %s12074_s14  ;;  %s13668_s23 = scalar_lea.hbm %s16573_s4, 55296 }
  0x8b   : > { %s13663_s9 = scalar_lea.hbm %s14422_s26, 9216  ;;  %p13669_p6 = scmp.lt.u32.totalorder %s14422_s26, %s16573_s4 }
  0x8c   : > { %p13664_p13 = scmp.ne.s32.totalorder %s14422_s26, %s13663_s9  ;;  %p13670_p7 = scmp.lt.u32.totalorder %s13668_s23, %s13663_s9 }
  0x8d   : > { %p13672_p11 = scmp.lt.u32.totalorder %s13663_s9, %s14422_s26 }
  0x8e   : > { %p13666_p2 = pnand %p13664_p13, %p14391_p8  ;;  %p13671_p9 = por %p13670_p7, %p13669_p6 }
  0x90   : > { %p13667_p0 = pneg %p13666_p2  ;;  %p13673_p12 = por %p13672_p11, %p13671_p9 }
  0x92   : > { %p13674_p1 = pnand %p13673_p12, %p13667_p0 }
  0x94   : > { %13677 = shalt.err (!%p13674_p1)
}
  0x95   : > { %s13678_s14 = scalar_lea.vmem %s14424_s24, 9216  ;;  %s14134_s11 = smov [#allocation9]  }
  0x96   : > { %p13679_p10 = scmp.ne.s32.totalorder %s14424_s24, %s13678_s14  ;;  %s13683_s27 = sshll.u32 %s14134_s11, 4  ;;  %s13684_s27 = int_to_ptr.vmem [resolvable:$false] %s13683_s27 }
  0x97   : > { %s13685_s16 = scalar_lea.vmem %s13684_s27, 18432  ;;  %p13686_p13 = scmp.lt.s32.totalorder %s14424_s24, %s13684_s27 }
  0x98   : > { %p13681_p3 = pnand %p13679_p10, %p14391_p8  ;;  %p13687_p2 = scmp.lt.s32.totalorder %s13685_s16, %s13678_s14 }
  0x9a   : > { %p13682_p4 = pneg %p13681_p3  ;;  %p13688_p6 = por %p13687_p2, %p13686_p13 }
  0x9c   : > { %p13689_p7 = pnand %p13688_p6, %p13682_p4 }
  0x9e   : > { %13692 = shalt.err (!%p13689_p7)
}
  0x9f   : > { %s16533_s9 = smov 192   ;;  %s16535_s23 = smov 12  }
  0xa0   : > { %12161 = dma.hbm_to_vmem [thread:$0]  (!%p16570_p5), %s14422_s26, 9216, %s14424_s24, %s16532_s2, %s16533_s9, %s16533_s9, %s16535_s23  }
  0xa1   : > { %s16574_s6 = sld [smem:[#allocation49_spill]]  ;;  %s658_s11 = scalar_lea.vmem [#allocation12], %s14368_s18 }
  0xa2   : > { %s666_s27 = sshll.u32 %s658_s11, 4  ;;  %s12081_s16 = smul.u32 2304, %s14317_s28  ;;  %s14460_s27 = int_to_ptr.vmem [resolvable:$true] %s666_s27 }
  0xa3   : > { %s16534_s21 = scalar_lea.sflag [#allocation13], %s14371_s20 }
  0xa7   : > { %s14457_s14 = scalar_lea.hbm %s16574_s6, %s14374_s30  ;;  %s13698_s17 = scalar_lea.hbm %s16574_s6, 288 }
  0xa8   : > { %s13693_s4 = scalar_lea.hbm %s14457_s14, 48  ;;  %p13699_p12 = scmp.lt.u32.totalorder %s14457_s14, %s16574_s6 }
  0xa9   : > { %p13694_p0 = scmp.ne.s32.totalorder %s14457_s14, %s13693_s4  ;;  %p13700_p1 = scmp.lt.u32.totalorder %s13698_s17, %s13693_s4 }
  0xaa   : > { %p13702_p3 = scmp.lt.u32.totalorder %s13693_s4, %s14457_s14 }
  0xab   : > { %p13696_p9 = pnand %p13694_p0, %p14391_p8  ;;  %p13701_p10 = por %p13700_p1, %p13699_p12 }
  0xad   : > { %p13697_p11 = pneg %p13696_p9  ;;  %p13703_p4 = por %p13702_p3, %p13701_p10 }
  0xaf   : > { %p13704_p13 = pnand %p13703_p4, %p13697_p11 }
  0xb1   : > { %13707 = shalt.err (!%p13704_p13)
}
  0xb2   : > { %s13708_s11 = scalar_lea.vmem %s14460_s27, 48  ;;  %s14137_s24 = smov [#allocation12]  }
  0xb3   : > { %p13709_p2 = scmp.ne.s32.totalorder %s14460_s27, %s13708_s11  ;;  %s13713_s26 = sshll.u32 %s14137_s24, 4  ;;  %s13714_s26 = int_to_ptr.vmem [resolvable:$false] %s13713_s26 }
  0xb4   : > { %s13715_s2 = scalar_lea.vmem %s13714_s26, 96  ;;  %p13716_p0 = scmp.lt.s32.totalorder %s14460_s27, %s13714_s26 }
  0xb5   : > { %p13711_p6 = pnand %p13709_p2, %p14391_p8  ;;  %p13717_p9 = scmp.lt.s32.totalorder %s13715_s2, %s13708_s11 }
  0xb7   : > { %p13712_p7 = pneg %p13711_p6  ;;  %p13718_p12 = por %p13717_p9, %p13716_p0 }
  0xb9   : > { %p13719_p1 = pnand %p13718_p12, %p13712_p7 }
  0xbb   : > { %13722 = shalt.err (!%p13719_p1)
}
  0xbc   : > { %12167 = dma.hbm_to_vmem [thread:$0]  (!%p16570_p5), %s14457_s14, 48, %s14460_s27, %s16534_s21  }
  0xbd   : > { %s12082_s4 = smul.u32 36864, %s14123_s25  ;;  %s696_s17 = scalar_lea.vmem [#allocation15], %s12081_s16 }
  0xbe   : > { %s703_s22 = sshll.u32 %s696_s17, 4  ;;  %s16575_s8 = sld [smem:[#allocation50_spill]]  ;;  %s14497_s22 = int_to_ptr.vmem [resolvable:$true] %s703_s22 }
  0xbf   : > { %s16541_s2 = scalar_lea.sflag [#allocation16], %s14371_s20 }
  0xc4   : > { %s14495_s26 = scalar_lea.hbm %s16575_s8, %s12082_s4  ;;  %s13728_s17 = scalar_lea.hbm %s16575_s8, 221184 }
  0xc5   : > { %s13723_s9 = scalar_lea.hbm %s14495_s26, 36864  ;;  %p13729_p4 = scmp.lt.u32.totalorder %s14495_s26, %s16575_s8 }
  0xc6   : > { %p13724_p11 = scmp.ne.s32.totalorder %s14495_s26, %s13723_s9  ;;  %p13730_p13 = scmp.lt.u32.totalorder %s13728_s17, %s13723_s9 }
  0xc7   : > { %p13732_p6 = scmp.lt.u32.totalorder %s13723_s9, %s14495_s26 }
  0xc8   : > { %p13726_p10 = pnand %p13724_p11, %p14391_p8  ;;  %p13731_p2 = por %p13730_p13, %p13729_p4 }
  0xca   : > { %p13727_p3 = pneg %p13726_p10  ;;  %p13733_p7 = por %p13732_p6, %p13731_p2 }
  0xcc   : > { %p13734_p0 = pnand %p13733_p7, %p13727_p3 }
  0xce   : > { %13737 = shalt.err (!%p13734_p0)
}
  0xcf   : > { %s13738_s24 = scalar_lea.vmem %s14497_s22, 36864  ;;  %s14138_s14 = smov [#allocation15]  }
  0xd0   : > { %p13739_p9 = scmp.ne.s32.totalorder %s14497_s22, %s13738_s24  ;;  %s13743_s27 = sshll.u32 %s14138_s14, 4  ;;  %s13744_s27 = int_to_ptr.vmem [resolvable:$false] %s13743_s27 }
  0xd1   : > { %s13745_s21 = scalar_lea.vmem %s13744_s27, 73728  ;;  %p13746_p11 = scmp.lt.s32.totalorder %s14497_s22, %s13744_s27 }
  0xd2   : > { %p13741_p12 = pnand %p13739_p9, %p14391_p8  ;;  %p13747_p10 = scmp.lt.s32.totalorder %s13745_s21, %s13738_s24 }
  0xd4   : > { %p13742_p1 = pneg %p13741_p12  ;;  %p13748_p4 = por %p13747_p10, %p13746_p11 }
  0xd6   : > { %p13749_p13 = pnand %p13748_p4, %p13742_p1 }
  0xd8   : > { %13752 = shalt.err (!%p13749_p13)
}
  0xd9   : > { %s14139_s9 = smov 768   ;;  %s14140_s17 = smov 48  }
  0xda   : > { %12173 = dma.hbm_to_vmem [thread:$0]  (!%p16570_p5), %s14495_s26, 36864, %s14497_s22, %s16541_s2, %s14139_s9, %s14139_s9, %s14140_s17  }
  0xdb   : > { %s14528_s24 = scalar_lea.hbm %s16502_s10, %s12082_s4  ;;  %s736_s27 = scalar_lea.vmem [#allocation18], %s12081_s16 }
  0xdc   : > { %s743_s21 = sshll.u32 %s736_s27, 4  ;;  %s14141_s23 = smov [#allocation23]   ;;  %s14532_s21 = int_to_ptr.vmem [resolvable:$true] %s743_s21 }
  0xdd   : > { %s14534_s6 = sshll.u32 %s14141_s23, 4  ;;  %s16540_s8 = scalar_lea.sflag [#allocation19], %s14371_s20  ;;  %s521_s6 = int_to_ptr.vmem [resolvable:$true] %s14534_s6 }
  0xde   : > { %s13753_s22 = scalar_lea.hbm %s14528_s24, 36864  ;;  %s13758_s9 = scalar_lea.hbm %s16502_s10, 221184 }
  0xdf   : > { %p13754_p3 = scmp.ne.s32.totalorder %s14528_s24, %s13753_s22  ;;  %p13759_p7 = scmp.lt.u32.totalorder %s14528_s24, %s16502_s10 }
  0xe0   : > { %p13760_p0 = scmp.lt.u32.totalorder %s13758_s9, %s13753_s22  ;;  %p13762_p12 = scmp.lt.u32.totalorder %s13753_s22, %s14528_s24 }
  0xe1   : > { %p13756_p2 = pnand %p13754_p3, %p14391_p8 }
  0xe2   : > { %p13761_p9 = por %p13760_p0, %p13759_p7 }
  0xe3   : > { %p13757_p6 = pneg %p13756_p2 }
  0xe4   : > { %p13763_p1 = por %p13762_p12, %p13761_p9 }
  0xe6   : > { %p13764_p11 = pnand %p13763_p1, %p13757_p6 }
  0xe8   : > { %13767 = shalt.err (!%p13764_p11)
}
  0xe9   : > { %s13768_s23 = scalar_lea.vmem %s14532_s21, 36864  ;;  %s14142_s16 = smov [#allocation18]  }
  0xea   : > { %p13769_p10 = scmp.ne.s32.totalorder %s14532_s21, %s13768_s23  ;;  %s13773_s14 = sshll.u32 %s14142_s16, 4  ;;  %s13774_s14 = int_to_ptr.vmem [resolvable:$false] %s13773_s14 }
  0xeb   : > { %s13775_s27 = scalar_lea.vmem %s13774_s14, 73728  ;;  %p13776_p3 = scmp.lt.s32.totalorder %s14532_s21, %s13774_s14 }
  0xec   : > { %p13771_p4 = pnand %p13769_p10, %p14391_p8  ;;  %p13777_p2 = scmp.lt.s32.totalorder %s13775_s27, %s13768_s23 }
  0xee   : > { %p13772_p13 = pneg %p13771_p4  ;;  %p13778_p7 = por %p13777_p2, %p13776_p3 }
  0xf0   : > { %p13779_p0 = pnand %p13778_p7, %p13772_p13 }
  0xf2   : > { %13782 = shalt.err (!%p13779_p0)
}
  0xf3   : > { %s16576_s22 = smov 12   ;;  %s16577_s4 = smov 192  }
  0xf4   : > { %12179 = dma.hbm_to_vmem [thread:$0]  (!%p16570_p5), %s14528_s24, 36864, %s14532_s21, %s16540_s8, %s16577_s4, %s16577_s4, %s16576_s22  }
  0xf5   : > { %s13783_s17 = scalar_lea.hbm %s16505_s13, 48  ;;  %p16578_p9 = scmp.ne.s32.totalorder %s16567_s19, 0 }
  0xf6   : > { %p13784_p6 = scmp.ne.s32.totalorder %s16505_s13, %s13783_s17  ;;  %p13790_p11 = scmp.lt.u32.totalorder %s13783_s17, %s16505_s13 }
  0xf8   : > { %p13786_p12 = pnand %p13784_p6, %p16578_p9 }
  0xfa   : > { %p13787_p1 = pneg %p13786_p12 }
  0xfc   : > { %p13792_p10 = pnand %p13790_p11, %p13787_p1 }
  0xfe   : > { %13795 = shalt.err (!%p13792_p10)
}
  0xff   : > { %s13796_s27 = scalar_lea.vmem %s521_s6, 48  ;;  %s13803_s24 = scalar_lea.vmem %s521_s6, 64 }
 0x100   : > { %p13797_p4 = scmp.ne.s32.totalorder %s521_s6, %s13796_s27  ;;  %p13804_p2 = scmp.lt.s32.totalorder %s521_s6, %s521_s6 }
 0x101   : > { %p13805_p7 = scmp.lt.s32.totalorder %s13803_s24, %s13796_s27 }
 0x102   : > { %p13799_p13 = pnand %p13797_p4, %p16578_p9 }
 0x103   : > { %p13806_p0 = por %p13805_p7, %p13804_p2 }
 0x104   : > { %p13800_p3 = pneg %p13799_p13 }
 0x106   : > { %p13807_p5 = pnand %p13806_p0, %p13800_p3 }
 0x108   : > { %13810 = shalt.err (!%p13807_p5)
}
 0x109   : > { %p16579_p6 = scmp.ne.s32.totalorder %s16564_s0, 0  ;;  %s14143_s4 = smov [#allocation26]  }
 0x10a   : > { %s544_s26 = sshll.u32 %s14143_s4, 4  ;;  %s13811_s11 = scalar_lea.hbm %s16507_s15, 16  ;;  %s545_s26 = int_to_ptr.vmem [resolvable:$true] %s544_s26 }
 0x10b   : > { %12142 = dma.hbm_to_vmem [thread:$0]  (!%p16579_p6), %s16505_s13, 48, %s521_s6, [#allocation22]  }
 0x10c   : > { %p13812_p12 = scmp.ne.s32.totalorder %s16507_s15, %s13811_s11  ;;  %p13818_p11 = scmp.lt.u32.totalorder %s13811_s11, %s16507_s15 }
 0x10e   : > { %p13814_p5 = pnand %p13812_p12, %p16578_p9 }
 0x110   : > { %p13815_p1 = pneg %p13814_p5 }
 0x112   : > { %p13820_p10 = pnand %p13818_p11, %p13815_p1 }
 0x114   : > { %13823 = shalt.err (!%p13820_p10)
}
 0x115   : > { %s13824_s6 = scalar_lea.vmem %s545_s26, 16  ;;  %s13831_s24 = scalar_lea.vmem %s545_s26, 32 }
 0x116   : > { %p13825_p4 = scmp.ne.s32.totalorder %s545_s26, %s13824_s6  ;;  %p13832_p2 = scmp.lt.s32.totalorder %s545_s26, %s545_s26 }
 0x117   : > { %p13833_p7 = scmp.lt.s32.totalorder %s13831_s24, %s13824_s6 }
 0x118   : > { %p13827_p13 = pnand %p13825_p4, %p16578_p9 }
 0x119   : > { %p13834_p0 = por %p13833_p7, %p13832_p2 }
 0x11a   : > { %p13828_p3 = pneg %p13827_p13 }
 0x11c   : > { %p13835_p8 = pnand %p13834_p0, %p13828_p3 }
 0x11e   : > { %13838 = shalt.err (!%p13835_p8)
}
 0x11f   : > { %12148 = dma.hbm_to_vmem [thread:$0]  (!%p16579_p6), %s16507_s15, 16, %s545_s26, [#allocation25]  }
 0x120   : > { %s14604_s9 = scalar_lea.hbm %s16493_s1, %s14374_s30  ;;  %s559_s17 = scalar_lea.vmem [#allocation3], %s14368_s18 }
 0x121   : > { %s567_s0 = sshll.u32 %s559_s17, 4  ;;  %s12071_s11 = smul.u32 1728, %s14317_s28  ;;  %s14607_s0 = int_to_ptr.vmem [resolvable:$true] %s567_s0 }
 0x122   : > { %s556_s23 = scalar_lea.sflag [#allocation4], %s14317_s28  ;;  %s13839_s16 = scalar_lea.hbm %s14604_s9, 48 }
 0x123   : > { %p13840_p8 = scmp.ne.s32.totalorder %s14604_s9, %s13839_s16  ;;  %p16580_p9 = scmp.ne.s32.totalorder %s16571_s12, 0 }
 0x124   : > { %s13844_s27 = scalar_lea.hbm %s16493_s1, 288  ;;  %p13845_p5 = scmp.lt.u32.totalorder %s14604_s9, %s16493_s1 }
 0x125   : > { %p13842_p12 = pnand %p13840_p8, %p16580_p9  ;;  %p13846_p1 = scmp.lt.u32.totalorder %s13844_s27, %s13839_s16 }
 0x126   : > { %p13848_p10 = scmp.lt.u32.totalorder %s13839_s16, %s14604_s9 }
 0x127   : > { %p13843_p6 = pneg %p13842_p12  ;;  %p13847_p11 = por %p13846_p1, %p13845_p5 }
 0x129   : > { %p13849_p4 = por %p13848_p10, %p13847_p11 }
 0x12b   : > { %p13850_p13 = pnand %p13849_p4, %p13843_p6 }
 0x12d   : > { %13853 = shalt.err (!%p13850_p13)
}
 0x12e   : > { %s13854_s21 = scalar_lea.vmem %s14607_s0, 48  ;;  %s14144_s22 = smov [#allocation3]  }
 0x12f   : > { %p13855_p3 = scmp.ne.s32.totalorder %s14607_s0, %s13854_s21  ;;  %s13859_s19 = sshll.u32 %s14144_s22, 4  ;;  %s13860_s19 = int_to_ptr.vmem [resolvable:$false] %s13859_s19 }
 0x130   : > { %s13861_s4 = scalar_lea.vmem %s13860_s19, 96  ;;  %p13862_p0 = scmp.lt.s32.totalorder %s14607_s0, %s13860_s19 }
 0x131   : > { %p13857_p2 = pnand %p13855_p3, %p16580_p9  ;;  %p13863_p8 = scmp.lt.s32.totalorder %s13861_s4, %s13854_s21 }
 0x133   : > { %p13858_p7 = pneg %p13857_p2  ;;  %p13864_p12 = por %p13863_p8, %p13862_p0 }
 0x135   : > { %p13865_p5 = pnand %p13864_p12, %p13858_p7 }
 0x137   : > { %13868 = shalt.err (!%p13865_p5)
}
 0x138   : > { %p16581_p6 = scmp.ne.s32.totalorder %s16565_s29, 0  ;;  %s12072_s17 = smul.u32 27648, %s14123_s25 }
 0x139   : > { %s597_s16 = scalar_lea.vmem [#allocation8], %s12071_s11  ;;  %s13874_s11 = scalar_lea.hbm %s16495_s3, 165888 }
 0x13a   : > { %12152 = dma.hbm_to_vmem [thread:$0]  (!%p16581_p6), %s14604_s9, 48, %s14607_s0, %s556_s23  }
 0x13b   : > { %s604_s26 = sshll.u32 %s597_s16, 4  ;;  %s14638_s6 = scalar_lea.hbm %s16495_s3, %s12072_s17  ;;  %s14640_s26 = int_to_ptr.vmem [resolvable:$true] %s604_s26 }
 0x13c   : > { %s13869_s24 = scalar_lea.hbm %s14638_s6, 27648  ;;  %p13875_p4 = scmp.lt.u32.totalorder %s14638_s6, %s16495_s3 }
 0x13d   : > { %p13870_p1 = scmp.ne.s32.totalorder %s14638_s6, %s13869_s24  ;;  %p13876_p13 = scmp.lt.u32.totalorder %s13874_s11, %s13869_s24 }
 0x13e   : > { %p13878_p2 = scmp.lt.u32.totalorder %s13869_s24, %s14638_s6 }
 0x13f   : > { %p13872_p11 = pnand %p13870_p1, %p16580_p9  ;;  %p13877_p3 = por %p13876_p13, %p13875_p4 }
 0x141   : > { %p13873_p10 = pneg %p13872_p11  ;;  %p13879_p7 = por %p13878_p2, %p13877_p3 }
 0x143   : > { %p13880_p0 = pnand %p13879_p7, %p13873_p10 }
 0x145   : > { %13883 = shalt.err (!%p13880_p0)
}
 0x146   : > { %s13884_s22 = scalar_lea.vmem %s14640_s26, 27648  ;;  %s14145_s19 = smov [#allocation8]  }
 0x147   : > { %p13885_p8 = scmp.ne.s32.totalorder %s14640_s26, %s13884_s22  ;;  %s13889_s4 = sshll.u32 %s14145_s19, 4  ;;  %s13890_s4 = int_to_ptr.vmem [resolvable:$false] %s13889_s4 }
 0x148   : > { %s13891_s17 = scalar_lea.vmem %s13890_s4, 55296  ;;  %p13892_p1 = scmp.lt.s32.totalorder %s14640_s26, %s13890_s4 }
 0x149   : > { %p13887_p12 = pnand %p13885_p8, %p16580_p9  ;;  %p13893_p11 = scmp.lt.s32.totalorder %s13891_s17, %s13884_s22 }
 0x14b   : > { %p13888_p5 = pneg %p13887_p12  ;;  %p13894_p4 = por %p13893_p11, %p13892_p1 }
 0x14d   : > { %p13895_p13 = pnand %p13894_p4, %p13888_p5 }
 0x14f   : > { %13898 = shalt.err (!%p13895_p13)
}
 0x150   : > { %s14146_s16 = smov 576   ;;  %s14147_s14 = smov 36  }
 0x151   : > { %s16582_s27 = scalar_lea.sflag [#allocation7], %s14371_s20  ;;  %s14669_s0 = scalar_lea.hbm %s16497_s5, %s14374_s30 }
 0x152   : > { %12158 = dma.hbm_to_vmem [thread:$0]  (!%p16581_p6), %s14638_s6, 27648, %s14640_s26, %s16582_s27, %s14146_s16, %s14146_s16, %s14147_s14  }
 0x153   : > { %s639_s11 = scalar_lea.vmem [#allocation11], %s14368_s18  ;;  %s13899_s21 = scalar_lea.hbm %s14669_s0, 48 }
 0x154   : > { %s647_s23 = sshll.u32 %s639_s11, 4  ;;  %p13900_p10 = scmp.ne.s32.totalorder %s14669_s0, %s13899_s21  ;;  %s648_s23 = int_to_ptr.vmem [resolvable:$true] %s647_s23 }
 0x155   : > { %s13904_s26 = scalar_lea.hbm %s16497_s5, 288  ;;  %p13905_p7 = scmp.lt.u32.totalorder %s14669_s0, %s16497_s5 }
 0x156   : > { %p13902_p3 = pnand %p13900_p10, %p16580_p9  ;;  %p13906_p0 = scmp.lt.u32.totalorder %s13904_s26, %s13899_s21 }
 0x157   : > { %p13908_p12 = scmp.lt.u32.totalorder %s13899_s21, %s14669_s0 }
 0x158   : > { %p13903_p2 = pneg %p13902_p3  ;;  %p13907_p8 = por %p13906_p0, %p13905_p7 }
 0x15a   : > { %p13909_p5 = por %p13908_p12, %p13907_p8 }
 0x15c   : > { %p13910_p1 = pnand %p13909_p5, %p13903_p2 }
 0x15e   : > { %13913 = shalt.err (!%p13910_p1)
}
 0x15f   : > { %s13914_s17 = scalar_lea.vmem %s648_s23, 48  ;;  %s14148_s16 = smov [#allocation11]  }
 0x160   : > { %p13915_p11 = scmp.ne.s32.totalorder %s648_s23, %s13914_s17  ;;  %s13919_s14 = sshll.u32 %s14148_s16, 4  ;;  %s13920_s14 = int_to_ptr.vmem [resolvable:$false] %s13919_s14 }
 0x161   : > { %s13921_s27 = scalar_lea.vmem %s13920_s14, 96  ;;  %p13922_p10 = scmp.lt.s32.totalorder %s648_s23, %s13920_s14 }
 0x162   : > { %p13917_p4 = pnand %p13915_p11, %p16580_p9  ;;  %p13923_p3 = scmp.lt.s32.totalorder %s13921_s27, %s13914_s17 }
 0x164   : > { %p13918_p13 = pneg %p13917_p4  ;;  %p13924_p6 = por %p13923_p3, %p13922_p10 }
 0x166   : > { %p13925_p0 = pnand %p13924_p6, %p13918_p13 }
 0x168   : > { %13928 = shalt.err (!%p13925_p0)
}
 0x169   : > { %p16583_p7 = scmp.ne.s32.totalorder %s16565_s29, 0  ;;  %s16584_s24 = scalar_lea.sflag [#allocation10], %s14371_s20 }
 0x16a   : > { %s14695_s21 = scalar_lea.hbm %s16499_s7, %s14374_s30  ;;  %s677_s22 = scalar_lea.vmem [#allocation14], %s14368_s18 }
 0x16b   : > { %12164 = dma.hbm_to_vmem [thread:$0]  (!%p16583_p7), %s14669_s0, 48, %s648_s23, %s16584_s24  }
 0x16c   : > { %s685_s19 = sshll.u32 %s677_s22, 4  ;;  %s12083_s26 = smul.u32 12, %s14317_s28  ;;  %s686_s19 = int_to_ptr.vmem [resolvable:$true] %s685_s19 }
 0x16d   : > { %s13929_s6 = scalar_lea.hbm %s14695_s21, 48  ;;  %s13934_s23 = scalar_lea.hbm %s16499_s7, 288 }
 0x16e   : > { %p13930_p6 = scmp.ne.s32.totalorder %s14695_s21, %s13929_s6  ;;  %p13935_p12 = scmp.lt.u32.totalorder %s14695_s21, %s16499_s7 }
 0x16f   : > { %p13936_p5 = scmp.lt.u32.totalorder %s13934_s23, %s13929_s6  ;;  %p13938_p11 = scmp.lt.u32.totalorder %s13929_s6, %s14695_s21 }
 0x170   : > { %p13932_p2 = pnand %p13930_p6, %p16580_p9 }
 0x171   : > { %p13937_p1 = por %p13936_p5, %p13935_p12 }
 0x172   : > { %p13933_p8 = pneg %p13932_p2 }
 0x173   : > { %p13939_p4 = por %p13938_p11, %p13937_p1 }
 0x175   : > { %p13940_p13 = pnand %p13939_p4, %p13933_p8 }
 0x177   : > { %13943 = shalt.err (!%p13940_p13)
}
 0x178   : > { %s13944_s28 = scalar_lea.vmem %s686_s19, 48  ;;  %s14149_s14 = smov [#allocation14]  }
 0x179   : > { %p13945_p10 = scmp.ne.s32.totalorder %s686_s19, %s13944_s28  ;;  %s13949_s27 = sshll.u32 %s14149_s14, 4  ;;  %s13950_s27 = int_to_ptr.vmem [resolvable:$false] %s13949_s27 }
 0x17a   : > { %s13951_s24 = scalar_lea.vmem %s13950_s27, 96  ;;  %p13952_p6 = scmp.lt.s32.totalorder %s686_s19, %s13950_s27 }
 0x17b   : > { %p13947_p3 = pnand %p13945_p10, %p16580_p9  ;;  %p13953_p2 = scmp.lt.s32.totalorder %s13951_s24, %s13944_s28 }
 0x17d   : > { %p13948_p0 = pneg %p13947_p3  ;;  %p13954_p7 = por %p13953_p2, %p13952_p6 }
 0x17f   : > { %p13955_p5 = pnand %p13954_p7, %p13948_p0 }
 0x181   : > { %13958 = shalt.err (!%p13955_p5)
}
 0x182   : > { %p16585_p12 = scmp.ne.s32.totalorder %s16565_s29, 0  ;;  %s16586_s9 = scalar_lea.sflag [#allocation13], %s14371_s20 }
 0x183   : > { %s12084_s11 = smul.u32 192, %s14123_s25  ;;  %s717_s22 = scalar_lea.vmem [#allocation17], %s12083_s26 }
 0x184   : > { %12170 = dma.hbm_to_vmem [thread:$0]  (!%p16585_p12), %s14695_s21, 48, %s686_s19, %s16586_s9  }
 0x185   : > { %s725_s6 = sshll.u32 %s717_s22, 4  ;;  %s16587_s23 = sld [smem:[#allocation51_spill]]  ;;  %s726_s6 = int_to_ptr.vmem [resolvable:$true] %s725_s6 }
 0x18b   : > { %s16588_s17 = smov %s16587_s23  ;;  %s723_s16 = scalar_lea.hbm %s16587_s23, %s12084_s11 }
 0x18c   : > { %s13959_s28 = scalar_lea.hbm %s723_s16, 192  ;;  %s13964_s24 = scalar_lea.hbm %s16588_s17, 1152 }
 0x18d   : > { %p13960_p8 = scmp.ne.s32.totalorder %s723_s16, %s13959_s28  ;;  %p13965_p11 = scmp.lt.u32.totalorder %s723_s16, %s16588_s17 }
 0x18e   : > { %p13966_p4 = scmp.lt.u32.totalorder %s13964_s24, %s13959_s28  ;;  %p13968_p10 = scmp.lt.u32.totalorder %s13959_s28, %s723_s16 }
 0x18f   : > { %p13962_p7 = pnand %p13960_p8, %p16580_p9 }
 0x190   : > { %p13967_p13 = por %p13966_p4, %p13965_p11 }
 0x191   : > { %p13963_p1 = pneg %p13962_p7 }
 0x192   : > { %p13969_p3 = por %p13968_p10, %p13967_p13 }
 0x194   : > { %p13970_p0 = pnand %p13969_p3, %p13963_p1 }
 0x196   : > { %13973 = shalt.err (!%p13970_p0)
}
 0x197   : > { %s13974_s21 = scalar_lea.vmem %s726_s6, 192  ;;  %s14150_s19 = smov [#allocation17]  }
 0x198   : > { %p13975_p6 = scmp.ne.s32.totalorder %s726_s6, %s13974_s21  ;;  %s13979_s26 = sshll.u32 %s14150_s19, 4  ;;  %s13980_s26 = int_to_ptr.vmem [resolvable:$false] %s13979_s26 }
 0x199   : > { %s13981_s9 = scalar_lea.vmem %s13980_s26, 384  ;;  %p13982_p8 = scmp.lt.s32.totalorder %s726_s6, %s13980_s26 }
 0x19a   : > { %p13977_p2 = pnand %p13975_p6, %p16580_p9  ;;  %p13983_p7 = scmp.lt.s32.totalorder %s13981_s9, %s13974_s21 }
 0x19c   : > { %p13978_p5 = pneg %p13977_p2  ;;  %p13984_p12 = por %p13983_p7, %p13982_p8 }
 0x19e   : > { %p13985_p4 = pnand %p13984_p12, %p13978_p5 }
 0x1a0   : > { %13988 = shalt.err (!%p13985_p4)
}
 0x1a1   : > { %p16589_p11 = scmp.ne.s32.totalorder %s16565_s29, 0  ;;  %s16590_s8 = scalar_lea.sflag [#allocation16], %s14371_s20 }
 0x1a2   : > { %s16591_s22 = sld [smem:[#allocation52_spill]]  ;;  %s757_s23 = scalar_lea.vmem [#allocation20], %s14368_s18 }
 0x1a3   : > { %12176 = dma.hbm_to_vmem [thread:$0]  (!%p16589_p11), %s723_s16, 192, %s726_s6, %s16590_s8  }
 0x1a4   : > { %s765_s28 = sshll.u32 %s757_s23, 4  ;;  %s766_s28 = int_to_ptr.vmem [resolvable:$true] %s765_s28 }
 0x1a8   : > { %s16592_s4 = smov %s16591_s22  ;;  %s14740_s0 = scalar_lea.hbm %s16591_s22, %s14374_s30 }
 0x1a9   : > { %s13989_s14 = scalar_lea.hbm %s14740_s0, 48  ;;  %s13994_s6 = scalar_lea.hbm %s16592_s4, 288 }
 0x1aa   : > { %p13990_p12 = scmp.ne.s32.totalorder %s14740_s0, %s13989_s14  ;;  %p13995_p10 = scmp.lt.u32.totalorder %s14740_s0, %s16592_s4 }
 0x1ab   : > { %p13996_p3 = scmp.lt.u32.totalorder %s13994_s6, %s13989_s14  ;;  %p13998_p6 = scmp.lt.u32.totalorder %s13989_s14, %s14740_s0 }
 0x1ac   : > { %p13992_p1 = pnand %p13990_p12, %p16580_p9 }
 0x1ad   : > { %p13997_p0 = por %p13996_p3, %p13995_p10 }
 0x1ae   : > { %p13993_p13 = pneg %p13992_p1 }
 0x1af   : > { %p13999_p2 = por %p13998_p6, %p13997_p0 }
 0x1b1   : > { %p14000_p5 = pnand %p13999_p2, %p13993_p13 }
 0x1b3   : > { %14003 = shalt.err (!%p14000_p5)
}
 0x1b4   : > { %s14004_s18 = scalar_lea.vmem %s766_s28, 48  ;;  %s14151_s30 = smov [#allocation20]  }
 0x1b5   : > { %p14005_p8 = scmp.ne.s32.totalorder %s766_s28, %s14004_s18  ;;  %s14009_s19 = sshll.u32 %s14151_s30, 4  ;;  %s14010_s19 = int_to_ptr.vmem [resolvable:$false] %s14009_s19 }
 0x1b6   : > { %s14011_s26 = scalar_lea.vmem %s14010_s19, 96  ;;  %p14012_p12 = scmp.lt.s32.totalorder %s766_s28, %s14010_s19 }
 0x1b7   : > { %p14007_p7 = pnand %p14005_p8, %p16580_p9  ;;  %p14013_p1 = scmp.lt.s32.totalorder %s14011_s26, %s14004_s18 }
 0x1b9   : > { %p14008_p4 = pneg %p14007_p7  ;;  %p14014_p11 = por %p14013_p1, %p14012_p12 }
 0x1bb   : > { %p14015_p3 = pnand %p14014_p11, %p14008_p4 }
 0x1bd   : > { %14018 = shalt.err (!%p14015_p3)
}
 0x1be   : > { %p16593_p10 = scmp.ne.s32.totalorder %s16565_s29, 0  ;;  %s16594_s9 = scalar_lea.sflag [#allocation19], %s14371_s20 }
 0x1bf   : > { %s16595_s8 = sld [smem:[#allocation45_spill]] }
 0x1c0   : > { %12182 = dma.hbm_to_vmem [thread:$0]  (!%p16593_p10), %s14740_s0, 48, %s766_s28, %s16594_s9  }
 0x1c5   : > { %p16596_p13 = scmp.ne.s32.totalorder %s16595_s8, 0 }
 0x1c6   : > { %s16597_s12 = sld [smem:[#allocation37_spill]] (!%p16596_p13)  ;;  %s16598_s2 = sld [smem:[#allocation43_spill]] (!%p16596_p13) }
 0x1c7   : > { %774 = sbr.rel (%p16596_p13) target bundleno = 5195 (0x144b), region = 84 }
 0x1cc   : > { %s14765_s11 = sand.u32 (!%p16596_p13), 1, %s16597_s12   ;;  %p16599_p9 = scmp.ne.s32.totalorder (!%p16596_p13), %s16598_s2, 0 }
 0x1cd   : > { %s14768_s22 = smul.u32 (!%p16596_p13), 3, %s14765_s11  ;;  %s777_s23 = scalar_lea.sflag (!%p16596_p13), [#allocation4], %s14765_s11 }
 0x1cf   : > { %s780_s14 = scalar_lea.vmem [#allocation3], %s14768_s22 }
 0x1d0   : > { %14070 = dma.done.wait (%p16599_p9), %s777_s23, 48  }
 0x1d1   : > { %14072 = vsyncadd (%p16599_p9), %s777_s23, 4294967248  ;;  %s16600_s29 = sld [smem:[#allocation41_spill]]  ;;  %s789_s28 = scalar_lea.vmem [#allocation6], %s14768_s22 }
 0x1d7   : > { %s785_s20 = sand.u32 1, %s16600_s29  }
 0x1d8   : > { %s786_s0 = scalar_lea.sflag [#allocation7], %s785_s20 }
 0x1d9   : > { %14074 = dma.done.wait (%p16599_p9), %s786_s0, 27696  }
 0x1da   : > { %14076 = vsyncadd (%p16599_p9), %s786_s0, 4294939600  ;;  %s12090_s27 = smul.u32 1728, %s14765_s11  ;;  %s804_s16 = scalar_lea.sflag [#allocation10], %s785_s20 }
 0x1db   : > { %s12091_s24 = smul.u32 576, %s14765_s11 }
 0x1dc   : > { %s14784_s6 = scalar_lea.vmem [#allocation8], %s12090_s27 }
 0x1dd   : > { %s14786_s21 = scalar_lea.vmem [#allocation9], %s12091_s24 }
 0x1de   : > { %14078 = dma.done.wait (%p16599_p9), %s804_s16, 9264  }
 0x1df   : > { %14080 = vsyncadd (%p16599_p9), %s804_s16, 4294958032  ;;  %s816_s18 = scalar_lea.vmem [#allocation11], %s14768_s22  ;;  %s822_s30 = scalar_lea.sflag [#allocation13], %s785_s20 }
 0x1e0   : > { %s825_s19 = scalar_lea.vmem [#allocation12], %s14768_s22 }
 0x1e1   : > { %14082 = dma.done.wait (%p16599_p9), %s822_s30, 96  }
 0x1e2   : > { %14084 = vsyncadd (%p16599_p9), %s822_s30, 4294967200  ;;  %s12092_s26 = smul.u32 2304, %s14765_s11  ;;  %s840_s8 = scalar_lea.sflag [#allocation16], %s785_s20 }
 0x1e4   : > { %s14800_s12 = scalar_lea.vmem [#allocation15], %s12092_s26 }
 0x1e5   : > { %14086 = dma.done.wait (%p16599_p9), %s840_s8, 37056  }
 0x1e6   : > { %14088 = vsyncadd (%p16599_p9), %s840_s8, 4294930240  ;;  %s12093_s23 = smul.u32 12, %s14765_s11  ;;  %s858_s27 = scalar_lea.sflag [#allocation19], %s785_s20 }
 0x1e7   : > { %s14809_s24 = scalar_lea.vmem [#allocation18], %s12092_s26 }
 0x1e8   : > { %s14807_s0 = scalar_lea.vmem [#allocation17], %s12093_s23 }
 0x1e9   : > { %14090 = dma.done.wait (%p16599_p9), %s858_s27, 36912  }
 0x1ea   : > { %14092 = vsyncadd (%p16599_p9), %s858_s27, 4294930384  ;;  %p16601_p11 = scmp.eq.s32.totalorder %s16600_s29, 0 }
 0x1ec   : > { %14094 = dma.done.wait (%p16601_p11), [#allocation22], 96   ;;  %p16602_p0 = pmov %p16601_p11 }
 0x1ee   : > { %14096 = vsyncadd (%p16602_p0), [#allocation22], 4294967200  ;;  %p16603_p6 = pmov %p16602_p0 }
 0x1ef   : > { %p16604_p2 = pmov %p16602_p0 }
 0x1f0   : > { %14098 = dma.done.wait (%p16603_p6), [#allocation25], 3088  }
 0x1f1   : > { %14100 = vsyncadd (%p16604_p2), [#allocation25], 4294964208  ;;  %s16605_s11 = sld [smem:[#allocation39_spill]] }
 0x1f7   : > { %p10575_p5 = scmp.ne.s32.totalorder %s16605_s11, 0 }
 0x1f8   : > { %s16606_s30 = sld [smem:[#allocation46_spill]] (!%p10575_p5) }
 0x1f9   : > { %998 = sbr.rel (%p10575_p5) target bundleno = 514 (0x202), region = 148 }
 0x1fe   : > { %v999_v0 = vld [vmem:[%s16606_s30] sm:$0xff] (!%p10575_p5)  ;;  %v1000_v1 = vld [vmem:[%s16606_s30 + $0x8] sm:$0xff] (!%p10575_p5)  ;;  %v1001_v2 = vld [vmem:[%s16606_s30 + $0x10] sm:$0xff] (!%p10575_p5) }
 0x1ff   : > { %1005 = vst [vmem:[#allocation2] sm:$0xff] (!%p10575_p5), %v999_v0  ;;  %1006 = vst [vmem:[#allocation2 + $0x8] sm:$0xff] (!%p10575_p5), %v1000_v1  ;;  %v1002_v3 = vld [vmem:[%s16606_s30 + $0x18] sm:$0xff] (!%p10575_p5)  ;;  %v1003_v4 = vld [vmem:[%s16606_s30 + $0x20] sm:$0xff] (!%p10575_p5) }
 0x200   : > { %1007 = vst [vmem:[#allocation2 + $0x10] sm:$0xff] %v1001_v2  ;;  %v1004_v5 = vld [vmem:[%s16606_s30 + $0x28] sm:$0xff]  ;;  %1008 = vst [vmem:[#allocation2 + $0x18] sm:$0xff] %v1002_v3 }
 0x201   : > { %1009 = vst [vmem:[#allocation2 + $0x20] sm:$0xff] %v1003_v4  ;;  %1010 = vst [vmem:[#allocation2 + $0x28] sm:$0xff] %v1004_v5 }
 0x202 PF: > { %v12263_v16 = vld [vmem:[%s14784_s6 + $0x4] ss:$36 sps:$4 sm:$0xff]   ;;  %v12266_v18 = vld [vmem:[%s14784_s6 + $0x4c] ss:$36 sps:$4 sm:$0xff]   ;;  %v12269_v20 = vld [vmem:[%s14784_s6 + $0x94] ss:$36 sps:$4 sm:$0xff]  }
 0x203   : > { %v12265_v17 = vld [vmem:[%s14784_s6] ss:$36 sps:$4 sm:$0xff]   ;;  %2453 = vmatprep.subr.bf16.mxu0 %v12263_v16  ;;  %v12268_v19 = vld [vmem:[%s14784_s6 + $0x48] ss:$36 sps:$4 sm:$0xff]   ;;  %v12271_v22 = vld [vmem:[%s14784_s6 + $0x90] ss:$36 sps:$4 sm:$0xff]  }
 0x204   : > { %2454 = vmatpush1.bf16.msra.mxu0 %v12265_v17  ;;  %v12287_v21 = vld [vmem:[%s14784_s6 + $0x48c] ss:$36 sps:$4 sm:$0xff]   ;;  %v12293_v24 = vld [vmem:[%s14784_s6 + $0x4d4] ss:$36 sps:$4 sm:$0xff]   ;;  %v12272_v25 = vld [vmem:[%s14784_s6 + $0xdc] ss:$36 sps:$4 sm:$0xff]  }
 0x205   : > { %2455 = vmatprep.subr.bf16.mxu0 %v12266_v18  ;;  %v12291_v23 = vld [vmem:[%s14784_s6 + $0x488] ss:$36 sps:$4 sm:$0xff]   ;;  %2582 = vmatprep.subr.bf16.mxu1 %v12287_v21  ;;  %v12297_v26 = vld [vmem:[%s14784_s6 + $0x4d0] ss:$36 sps:$4 sm:$0xff]   ;;  %v12274_v27 = vld [vmem:[%s14784_s6 + $0xd8] ss:$36 sps:$4 sm:$0xff]  }
 0x206   : > { %2583 = vmatpush1.bf16.msra.mxu1 %v12291_v23  ;;  %v12275_v28 = vld [vmem:[%s14784_s6 + $0x124] ss:$36 sps:$4 sm:$0xff]   ;;  %v12278_v30 = vld [vmem:[%s14784_s6 + $0x16c] ss:$36 sps:$4 sm:$0xff]   ;;  %v12281_v32 = vld [vmem:[%s14784_s6 + $0x1b4] ss:$36 sps:$4 sm:$0xff]  }
 0x207   : > { %2584 = vmatprep.subr.bf16.mxu1 %v12293_v24  ;;  %v12277_v29 = vld [vmem:[%s14784_s6 + $0x120] ss:$36 sps:$4 sm:$0xff]   ;;  %v12280_v31 = vld [vmem:[%s14784_s6 + $0x168] ss:$36 sps:$4 sm:$0xff]   ;;  %v12283_v33 = vld [vmem:[%s14784_s6 + $0x1b0] ss:$36 sps:$4 sm:$0xff]  }
 0x208   : > { %v1011_v6 = vld [vmem:[#allocation2] sm:$0xff]  ;;  %v1012_v7 = vld [vmem:[#allocation2 + $0x8] sm:$0xff]  ;;  %2456 = vmatpush1.bf16.msra.mxu0 %v12268_v19  ;;  %v12284_v34 = vld [vmem:[%s14784_s6 + $0x1fc] ss:$36 sps:$4 sm:$0xff]   ;;  %v14152_v17 = vmov 0   ;;  %vm14154_vm0 = vmmov 0  }
 0x209   : > { %v1013_v8 = vld [vmem:[#allocation2 + $0x10] sm:$0xff]  ;;  %v1019_v9 = vadd.f32 %v1012_v7, %v1011_v6  ;;  %v14843_v10 = vld [vmem:[#allocation2 + $0x18] sm:$0xff]  ;;  %v14845_v11 = vld [vmem:[#allocation2 + $0x20] sm:$0xff]  ;;  %2457 = vmatprep.subr.bf16.mxu0 %v12269_v20  ;;  %2614 = vmatprep.mubr.bf16.mxu1 %v14152_v17  ;;  %vm2957_vm1 = vcmask 1043456   ;;  %vm2893_vm2 = vcmask 523264   ;;  %vm2941_vm4 = vcmask 64512  }
 0x20a   : > { %v14847_v12 = vld [vmem:[#allocation2 + $0x28] sm:$0xff]  ;;  %v1023_v13 = vadd.f32 %v14845_v11, %v14843_v10  ;;  %2585 = vmatpush1.bf16.msra.mxu1 %v12297_v26  ;;  %v12286_v35 = vld [vmem:[%s14784_s6 + $0x1f8] ss:$36 sps:$4 sm:$0xff]   ;;  %v12289_v36 = vld [vmem:[%s14784_s6 + $0x244] ss:$36 sps:$4 sm:$0xff]   ;;  %v1063_v26 = vlaneseq }
 0x20b   : > { %v1020_v14 = vadd.f32 %v1019_v9, %v1013_v8  ;;  %v12292_v37 = vld [vmem:[%s14784_s6 + $0x240] ss:$36 sps:$4 sm:$0xff]   ;;  %v12295_v38 = vld [vmem:[%s14784_s6 + $0x28c] ss:$36 sps:$4 sm:$0xff]   ;;  %v12301_v61 = vld [vmem:[%s14784_s6 + $0x2d4] ss:$36 sps:$4 sm:$0xff]  }
 0x20c   : > { %v1024_v15 = vadd.f32 %v1023_v13, %v14847_v12  ;;  %2458 = vmatpush1.bf16.msra.mxu0 %v12271_v22  ;;  %v12298_v59 = vld [vmem:[%s14784_s6 + $0x288] ss:$36 sps:$4 sm:$0xff]   ;;  %v12299_v60 = vld [vmem:[%s14784_s6 + $0x51c] ss:$36 sps:$4 sm:$0xff]   ;;  %v12304_v63 = vld [vmem:[%s14784_s6 + $0x2d0] ss:$36 sps:$4 sm:$0xff]  }
 0x20d   : > { %1021 = vadd.xlane.f32.xlu0 %v1020_v14  ;;  %2459 = vmatprep.subr.bf16.mxu0 %v12272_v25  ;;  %v12303_v62 = vld [vmem:[%s14784_s6 + $0x518] ss:$36 sps:$4 sm:$0xff]   ;;  %v12305_v0 = vld [vmem:[%s14784_s6 + $0x564] ss:$36 sps:$4 sm:$0xff]   ;;  %v12311_v4 = vld [vmem:[%s14784_s6 + $0x5ac] ss:$36 sps:$4 sm:$0xff]  }
 0x20e   : > { %2586 = vmatprep.subr.bf16.mxu1 %v12299_v60  ;;  %v12307_v1 = vld [vmem:[%s14784_s6 + $0x31c] ss:$36 sps:$4 sm:$0xff]   ;;  %v12313_v5 = vld [vmem:[%s14784_s6 + $0x364] ss:$36 sps:$4 sm:$0xff]   ;;  %v12319_v9 = vld [vmem:[%s14784_s6 + $0x3ac] ss:$36 sps:$4 sm:$0xff]  }
 0x20f   : > { %2587 = vmatpush1.bf16.msra.mxu1 %v12303_v62  ;;  %v12309_v2 = vld [vmem:[%s14784_s6 + $0x560] ss:$36 sps:$4 sm:$0xff]   ;;  %v12310_v3 = vld [vmem:[%s14784_s6 + $0x318] ss:$36 sps:$4 sm:$0xff]  }
 0x210   : > { %2460 = vmatpush1.bf16.msra.mxu0 %v12274_v27  ;;  %2588 = vmatprep.subr.bf16.mxu1 %v12305_v0  ;;  %v12325_v13 = vld [vmem:[%s14784_s6 + $0x3f4] ss:$36 sps:$4 sm:$0xff]   ;;  %v12329_v16 = vld [vmem:[%s14784_s6 + $0x684] ss:$36 sps:$4 sm:$0xff]   ;;  %v12331_v18 = vld [vmem:[%s14784_s6 + $0x43c] ss:$36 sps:$4 sm:$0xff]  }
 0x211   : > { %1025 = vadd.xlane.f32.xlu0 %v1024_v15  ;;  %2461 = vmatprep.subr.bf16.mxu0 %v12275_v28  ;;  %v12327_v14 = vld [vmem:[%s14784_s6 + $0x638] ss:$36 sps:$4 sm:$0xff]   ;;  %v12328_v15 = vld [vmem:[%s14784_s6 + $0x3f0] ss:$36 sps:$4 sm:$0xff]   ;;  %v12333_v19 = vld [vmem:[%s14784_s6 + $0x680] ss:$36 sps:$4 sm:$0xff]  }
 0x212   : > { %v12334_v20 = vld [vmem:[%s14784_s6 + $0x438] ss:$36 sps:$4 sm:$0xff]   ;;  %v12340_v22 = vld [vmem:[%s14784_s6 + $0x484] ss:$36 sps:$4 sm:$0xff]  }
 0x213   : > { %2589 = vmatpush1.bf16.msra.mxu1 %v12309_v2  ;;  %v12337_v21 = vld [vmem:[%s14784_s6 + $0x1c] ss:$36 sps:$4 sm:$0xff]  }
 0x214   : > { %2462 = vmatpush1.bf16.msra.mxu0 %v12277_v29  ;;  %2590 = vmatprep.subr.bf16.mxu1 %v12311_v4  ;;  %v12341_v4 = vld [vmem:[%s14784_s6 + $0x60] ss:$36 sps:$4 sm:$0xff]  }
 0x215   : > { %2463 = vmatprep.subr.bf16.mxu0 %v12278_v30  ;;  %v14931_v30 = vshrl.u32 %v1063_v26, 7 }
 0x218   : > { %2464 = vmatpush1.bf16.msra.mxu0 %v12280_v31  ;;  %v1017_v31 = vld [vmem:[%s780_s14] sm:$0x7]  ;;  %s14155_s14 = smov 64  }
 0x219   : > { %2465 = vmatprep.subr.bf16.mxu0 %v12281_v32  ;;  %v14936_v32 = vsub.s32 1, %v14931_v30 }
 0x21c   : > { %2466 = vmatpush1.bf16.msra.mxu0 %v12283_v33  ;;  %v14939_v33 = vsub.s32 2, %v14931_v30 }
 0x21d   : > { %2467 = vmatprep.subr.bf16.mxu0 %v12284_v34  ;;  %v14942_v34 = vsub.s32 0, %v14931_v30 }
 0x220   : > { %2468 = vmatpush1.bf16.msra.mxu0 %v12286_v35 }
 0x221   : > { %2469 = vmatprep.subr.bf16.mxu0 %v12289_v36  ;;  %v1018_v36 = vld [vmem:[%s789_s28] sm:$0x7]  ;;  %s16609_s28 = scalar_lea.vmem [#allocation14], %s14768_s22 }
 0x224   : > { %2470 = vmatpush1.bf16.msra.mxu0 %v12292_v37 }
 0x225   : > { %2471 = vmatprep.subr.bf16.mxu0 %v12295_v38  ;;  %v1070_v38 = vrot.slane %v1017_v31, %v14936_v32 }
 0x228   : > { %2472 = vmatpush1.bf16.msra.mxu0 %v12298_v59 }
 0x229   : > { %2473 = vmatprep.subr.bf16.mxu0 %v12301_v61 }
 0x22c   : > { %2474 = vmatpush1.bf16.msra.mxu0 %v12304_v63 }
 0x22d   : > { %2475 = vmatprep.subr.bf16.mxu0 %v12307_v1 }
 0x230   : > { %2476 = vmatpush1.bf16.msra.mxu0 %v12310_v3 }
 0x231   : > { %2477 = vmatprep.subr.bf16.mxu0 %v12313_v5  ;;  %v12346_v5 = vld [vmem:[%s14784_s6 + $0x4cc] ss:$36 sps:$4 sm:$0xff]  }
 0x29a   : > { %v1022_v39 = vpop.xlane.xlu0 %1021 }
 0x29b   : > { %v1028_v40 = vmul.f32 0.0026041667, %v1022_v39 }
 0x29d   : > { %v14875_v41 = vsub.f32 %v1011_v6, %v1028_v40  ;;  %v14877_v42 = vsub.f32 %v1012_v7, %v1028_v40  ;;  %v14879_v43 = vsub.f32 %v1013_v8, %v1028_v40  ;;  %v12315_v6 = vld [vmem:[%s14784_s6 + $0x5a8] ss:$36 sps:$4 sm:$0xff]   ;;  %v12316_v7 = vld [vmem:[%s14784_s6 + $0x360] ss:$36 sps:$4 sm:$0xff]   ;;  %v12317_v8 = vld [vmem:[%s14784_s6 + $0x5f4] ss:$36 sps:$4 sm:$0xff]   ;;  %v1074_v40 = vrot.slane %v1017_v31, %v14939_v33 }
 0x29e   : > { %v1026_v44 = vpop.xlane.xlu0 %1025  ;;  %2591 = vmatpush1.bf16.msra.mxu1 %v12315_v6  ;;  %2478 = vmatpush1.bf16.msra.mxu0 %v12316_v7  ;;  %v12344_v6 = vld [vmem:[%s14784_s6 + $0x4c8] ss:$36 sps:$4 sm:$0xff]  }
 0x29f   : > { %v1029_v45 = vmul.f32 0.0026041667, %v1026_v44  ;;  %v1036_v46 = vmul.f32 %v14875_v41, %v14875_v41  ;;  %v1037_v47 = vmul.f32 %v14877_v42, %v14877_v42  ;;  %v1038_v48 = vmul.f32 %v14879_v43, %v14879_v43  ;;  %2592 = vmatprep.subr.bf16.mxu1 %v12317_v8  ;;  %2479 = vmatprep.subr.bf16.mxu0 %v12319_v9  ;;  %v12349_v7 = vld [vmem:[%s14784_s6 + $0xac] ss:$36 sps:$4 sm:$0xff]   ;;  %v12352_v8 = vld [vmem:[%s14784_s6 + $0x514] ss:$36 sps:$4 sm:$0xff]  }
 0x2a0   : > { %v12347_v9 = vld [vmem:[%s14784_s6 + $0xa8] ss:$36 sps:$4 sm:$0xff]  }
 0x2a1   : > { %v14888_v49 = vsub.f32 %v14843_v10, %v1029_v45  ;;  %v14891_v50 = vsub.f32 %v14845_v11, %v1029_v45  ;;  %v14894_v51 = vsub.f32 %v14847_v12, %v1029_v45  ;;  %v1042_v52 = vadd.f32 %v1037_v47, %v1036_v46  ;;  %v12321_v10 = vld [vmem:[%s14784_s6 + $0x5f0] ss:$36 sps:$4 sm:$0xff]   ;;  %v12322_v11 = vld [vmem:[%s14784_s6 + $0x3a8] ss:$36 sps:$4 sm:$0xff]   ;;  %v12323_v12 = vld [vmem:[%s14784_s6 + $0x63c] ss:$36 sps:$4 sm:$0xff]  }
 0x2a2   : > { %2593 = vmatpush1.bf16.msra.mxu1 %v12321_v10  ;;  %2480 = vmatpush1.bf16.msra.mxu0 %v12322_v11  ;;  %v1066_v45 = vrot.slane %v1017_v31, %v14942_v34  ;;  %v1092_v47 = vrot.slane %v1018_v36, %v14936_v32  ;;  %v12350_v10 = vld [vmem:[%s14784_s6 + $0x510] ss:$36 sps:$4 sm:$0xff]   ;;  %v12382_v31 = vld [vmem:[%s14784_s6 + $0x67c] ss:$36 sps:$4 sm:$0xff]  }
 0x2a3   : > { %v1043_v53 = vadd.f32 %v1042_v52, %v1038_v48  ;;  %v1039_v54 = vmul.f32 %v14888_v49, %v14888_v49  ;;  %v1040_v55 = vmul.f32 %v14891_v50, %v14891_v50  ;;  %v1041_v56 = vmul.f32 %v14894_v51, %v14894_v51  ;;  %2594 = vmatprep.subr.bf16.mxu1 %v12323_v12  ;;  %v12355_v11 = vld [vmem:[%s14784_s6 + $0xf4] ss:$36 sps:$4 sm:$0xff]   ;;  %v12358_v12 = vld [vmem:[%s14784_s6 + $0x55c] ss:$36 sps:$4 sm:$0xff]  }
 0x2a4   : > { %2481 = vmatprep.subr.bf16.mxu0 %v12325_v13  ;;  %v1096_v48 = vrot.slane %v1018_v36, %v14939_v33  ;;  %v12353_v13 = vld [vmem:[%s14784_s6 + $0xf0] ss:$36 sps:$4 sm:$0xff]  }
 0x2a5   : > { %1044 = vadd.xlane.f32.xlu1 %v1043_v53  ;;  %v1046_v57 = vadd.f32 %v1040_v55, %v1039_v54 }
 0x2a6   : > { %2595 = vmatpush1.bf16.msra.mxu1 %v12327_v14  ;;  %2482 = vmatpush1.bf16.msra.mxu0 %v12328_v15  ;;  %v12356_v14 = vld [vmem:[%s14784_s6 + $0x558] ss:$36 sps:$4 sm:$0xff]  }
 0x2a7   : > { %v1047_v58 = vadd.f32 %v1046_v57, %v1041_v56  ;;  %2596 = vmatprep.subr.bf16.mxu1 %v12329_v16  ;;  %2483 = vmatprep.subr.bf16.mxu0 %v12331_v18  ;;  %v12361_v15 = vld [vmem:[%s14784_s6 + $0x13c] ss:$36 sps:$4 sm:$0xff]   ;;  %v12364_v16 = vld [vmem:[%s14784_s6 + $0x5a4] ss:$36 sps:$4 sm:$0xff]  }
 0x2a8   : > { %v12359_v18 = vld [vmem:[%s14784_s6 + $0x138] ss:$36 sps:$4 sm:$0xff]  }
 0x2a9   : > { %1048 = vadd.xlane.f32.xlu1 %v1047_v58  ;;  %v12335_v58 = vld [vmem:[%s14784_s6 + $0x18] ss:$36 sps:$4 sm:$0xff]  }
 0x2aa   : > { %2597 = vmatpush1.bf16.msra.mxu1 %v12333_v19  ;;  %2484 = vmatpush1.bf16.msra.mxu0 %v12334_v20  ;;  %v12362_v19 = vld [vmem:[%s14784_s6 + $0x5a0] ss:$36 sps:$4 sm:$0xff]  }
 0x2ab   : > { %2711 = vmatprep.subr.bf16.mxu1 %v12337_v21  ;;  %2496 = vmatprep.subr.bf16.mxu0 %v12340_v22  ;;  %v12367_v20 = vld [vmem:[%s14784_s6 + $0x184] ss:$36 sps:$4 sm:$0xff]   ;;  %v12370_v21 = vld [vmem:[%s14784_s6 + $0x5ec] ss:$36 sps:$4 sm:$0xff]  }
 0x2ac   : > { %v12365_v22 = vld [vmem:[%s14784_s6 + $0x180] ss:$36 sps:$4 sm:$0xff]  }
 0x332   : > { %v1045_v23 = vpop.xlane.xlu1 %1044 }
 0x333   : > { %v1050_v24 = vmul.f32 0.0026041667, %v1045_v23  ;;  %v12368_v23 = vld [vmem:[%s14784_s6 + $0x5e8] ss:$36 sps:$4 sm:$0xff]  }
 0x335   : > { %v1052_v25 = vadd.f32 1e-05, %v1050_v24  ;;  %v12373_v24 = vld [vmem:[%s14784_s6 + $0x1cc] ss:$36 sps:$4 sm:$0xff]  }
 0x336   : > { %v1049_v27 = vpop.xlane.xlu1 %1048 }
 0x337   : > { %13487 = vrsqrt.f32 %v1052_v25  ;;  %v1051_v28 = vmul.f32 0.0026041667, %v1049_v27  ;;  %v12376_v25 = vld [vmem:[%s14784_s6 + $0x634] ss:$36 sps:$4 sm:$0xff]   ;;  %v12371_v27 = vld [vmem:[%s14784_s6 + $0x1c8] ss:$36 sps:$4 sm:$0xff]  }
 0x339   : > { %v1053_v29 = vadd.f32 1e-05, %v1051_v28  ;;  %v12374_v28 = vld [vmem:[%s14784_s6 + $0x630] ss:$36 sps:$4 sm:$0xff]  }
 0x33b   : > { %13489 = vrsqrt.f32 %v1053_v29  ;;  %v12379_v29 = vld [vmem:[%s14784_s6 + $0x214] ss:$36 sps:$4 sm:$0xff]  }
 0x341   : > { %v13488_v35 = vpop.eup %13487 }
 0x342   : > { %v1057_v37 = vmul.f32 %v13488_v35, %v14877_v42  ;;  %v1058_v39 = vmul.f32 %v13488_v35, %v14879_v43  ;;  %v1056_v44 = vmul.f32 %v13488_v35, %v14875_v41  ;;  %v1088_v41 = vrot.slane %v1018_v36, %v14942_v34  ;;  %v12377_v35 = vld [vmem:[%s14784_s6 + $0x210] ss:$36 sps:$4 sm:$0xff]   ;;  %v12380_v36 = vld [vmem:[%s14784_s6 + $0x678] ss:$36 sps:$4 sm:$0xff]  }
 0x344   : > { %v1079_v42 = vmul.f32 %v1070_v38, %v1057_v37  ;;  %v1080_v43 = vmul.f32 %v1074_v40, %v1058_v39  ;;  %v1078_v55 = vmul.f32 %v1066_v45, %v1056_v44  ;;  %v12385_v37 = vld [vmem:[%s14784_s6 + $0x25c] ss:$36 sps:$4 sm:$0xff]   ;;  %v12391_v44 = vld [vmem:[%s14784_s6 + $0x2a4] ss:$36 sps:$4 sm:$0xff]  }
 0x345   : > { %v13490_v46 = vpop.eup %13489  ;;  %v12383_v39 = vld [vmem:[%s14784_s6 + $0x258] ss:$36 sps:$4 sm:$0xff]  }
 0x346   : > { %v1060_v52 = vmul.f32 %v13490_v46, %v14891_v50  ;;  %v1061_v53 = vmul.f32 %v13490_v46, %v14894_v51  ;;  %v1059_v54 = vmul.f32 %v13490_v46, %v14888_v49  ;;  %v1101_v60 = vadd.f32 %v1092_v47, %v1079_v42  ;;  %v12338_v50 = vld [vmem:[%s14784_s6 + $0x480] ss:$36 sps:$4 sm:$0xff]   ;;  %v12394_v46 = vld [vmem:[%s14784_s6 + $0x54] ss:$36 sps:$4 sm:$0xff]   ;;  %v12395_v42 = vld [vmem:[%s14784_s6 + $0x2e8] ss:$36 sps:$4 sm:$0xff]  }
 0x347   : > { %v1102_v62 = vadd.f32 %v1096_v48, %v1080_v43  ;;  %v1100_v51 = vadd.f32 %v1088_v41, %v1078_v55  ;;  %v12343_v49 = vld [vmem:[%s14784_s6 + $0x64] ss:$36 sps:$4 sm:$0xff]   ;;  %v12403_v43 = vld [vmem:[%s14784_s6 + $0x334] ss:$36 sps:$4 sm:$0xff]  }
 0x348   : > { %v1082_v56 = vmul.f32 %v1070_v38, %v1060_v52  ;;  %v1083_v57 = vmul.f32 %v1074_v40, %v1061_v53  ;;  %v1081_v59 = vmul.f32 %v1066_v45, %v1059_v54  ;;  %v12388_v38 = vld [vmem:[%s14784_s6 + $0xc] ss:$36 sps:$4 sm:$0xff]   ;;  %v12389_v45 = vld [vmem:[%s14784_s6 + $0x2a0] ss:$36 sps:$4 sm:$0xff]   ;;  %v12398_v53 = vld [vmem:[%s14784_s6 + $0x98] ss:$36 sps:$4 sm:$0xff]  }
 0x349   : > { %v12386_v40 = vld [vmem:[%s14784_s6 + $0x8] ss:$36 sps:$4 sm:$0xff]   ;;  %v12400_v52 = vld [vmem:[%s14784_s6 + $0x9c] ss:$36 sps:$4 sm:$0xff]   ;;  %v12401_v55 = vld [vmem:[%s14784_s6 + $0x330] ss:$36 sps:$4 sm:$0xff]  }
 0x34a   : > { %v1104_v61 = vadd.f32 %v1092_v47, %v1082_v56  ;;  %v1105_v63 = vadd.f32 %v1096_v48, %v1083_v57  ;;  %v1103_v0 = vadd.f32 %v1088_v41, %v1081_v59  ;;  %v12392_v47 = vld [vmem:[%s14784_s6 + $0x50] ss:$36 sps:$4 sm:$0xff]   ;;  %v12406_v54 = vld [vmem:[%s14784_s6 + $0xe4] ss:$36 sps:$4 sm:$0xff]   ;;  %v12409_v56 = vld [vmem:[%s14784_s6 + $0x37c] ss:$36 sps:$4 sm:$0xff]  }
 0x34b   : > { %v12397_v48 = vld [vmem:[%s14784_s6 + $0x2ec] ss:$36 sps:$4 sm:$0xff]   ;;  %v12404_v41 = vld [vmem:[%s14784_s6 + $0xe0] ss:$36 sps:$4 sm:$0xff]  }
 0x34c   : > { %v14961_v1 = vpack.c.bf16 %v1104_v61, %v1101_v60  ;;  %v14963_v2 = vpack.c.bf16 %v1105_v63, %v1102_v62  ;;  %v14965_v3 = vpack.c.bf16 %v1103_v0, %v1100_v51  ;;  %v12412_v57 = vld [vmem:[%s14784_s6 + $0x12c] ss:$36 sps:$4 sm:$0xff]   ;;  %v12415_v60 = vld [vmem:[%s14784_s6 + $0x3c4] ss:$36 sps:$4 sm:$0xff]   ;;  %v12418_v61 = vld [vmem:[%s14784_s6 + $0x174] ss:$36 sps:$4 sm:$0xff]  }
 0x34d   : > { %v12410_v59 = vld [vmem:[%s14784_s6 + $0x128] ss:$36 sps:$4 sm:$0xff]   ;;  %v12416_v62 = vld [vmem:[%s14784_s6 + $0x170] ss:$36 sps:$4 sm:$0xff]   ;;  %v12424_v51 = vld [vmem:[%s14784_s6 + $0x1bc] ss:$36 sps:$4 sm:$0xff]  }
 0x34e   : > { %2485 = vmatprep.mubr.bf16.mxu0 %v14961_v1  ;;  %2615 = vmatmul.mubr.bf16.vlgmr.msra.gmra.mrb[0].mxu1 %v14963_v2  ;;  %v12421_v63 = vld [vmem:[%s14784_s6 + $0x40c] ss:$36 sps:$4 sm:$0xff]  }
 0x34f   : > { %2712 = vmatpush1.bf16.msra.mxu1 %v12335_v58  ;;  %2486 = vmatmul.mubr.bf16.vlgmr.msra.gmra.mrb[0].mxu0 %v14965_v3  ;;  %v12407_v58 = vld [vmem:[%s14784_s6 + $0x378] ss:$36 sps:$4 sm:$0xff]   ;;  %v12419_v0 = vld [vmem:[%s14784_s6 + $0x408] ss:$36 sps:$4 sm:$0xff]  }
 0x350   : > { %2497 = vmatpush1.bf16.msra.mxu0 %v12338_v50  ;;  %2743 = vmatprep.mubr.bf16.mxu1 %v14961_v1  ;;  %v12413_v50 = vld [vmem:[%s14784_s6 + $0x3c0] ss:$36 sps:$4 sm:$0xff]  }
 0x351   : > { %2713 = vmatprep.subr.bf16.mxu1 %v12343_v49  ;;  %2498 = vmatprep.subr.bf16.mxu0 %v12346_v5  ;;  %v12422_v49 = vld [vmem:[%s14784_s6 + $0x1b8] ss:$36 sps:$4 sm:$0xff]   ;;  %v12430_v5 = vld [vmem:[%s14784_s6 + $0x204] ss:$36 sps:$4 sm:$0xff]  }
 0x352   : > { %2528 = vmatprep.mubr.bf16.mxu0 %v14152_v17 }
 0x353   : > { %2714 = vmatpush1.bf16.msra.mxu1 %v12341_v4  ;;  %v12427_v4 = vld [vmem:[%s14784_s6 + $0x454] ss:$36 sps:$4 sm:$0xff]  }
 0x354   : > { %2499 = vmatpush1.bf16.msra.mxu0 %v12344_v6  ;;  %2715 = vmatprep.subr.bf16.mxu1 %v12349_v7  ;;  %v12425_v6 = vld [vmem:[%s14784_s6 + $0x450] ss:$36 sps:$4 sm:$0xff]   ;;  %v12428_v7 = vld [vmem:[%s14784_s6 + $0x200] ss:$36 sps:$4 sm:$0xff]  }
 0x355   : > { %2500 = vmatprep.subr.bf16.mxu0 %v12352_v8  ;;  %v12433_v8 = vld [vmem:[%s14784_s6 + $0x49c] ss:$36 sps:$4 sm:$0xff]  }
 0x357   : > { %2716 = vmatpush1.bf16.msra.mxu1 %v12347_v9  ;;  %v12436_v9 = vld [vmem:[%s14784_s6 + $0x24c] ss:$36 sps:$4 sm:$0xff]  }
 0x358   : > { %2501 = vmatpush1.bf16.msra.mxu0 %v12350_v10  ;;  %2717 = vmatprep.subr.bf16.mxu1 %v12355_v11  ;;  %v12431_v10 = vld [vmem:[%s14784_s6 + $0x498] ss:$36 sps:$4 sm:$0xff]   ;;  %v12434_v11 = vld [vmem:[%s14784_s6 + $0x248] ss:$36 sps:$4 sm:$0xff]  }
 0x359   : > { %2502 = vmatprep.subr.bf16.mxu0 %v12358_v12  ;;  %v12439_v12 = vld [vmem:[%s14784_s6 + $0x4e4] ss:$36 sps:$4 sm:$0xff]  }
 0x35b   : > { %2718 = vmatpush1.bf16.msra.mxu1 %v12353_v13  ;;  %v12437_v13 = vld [vmem:[%s14784_s6 + $0x4e0] ss:$36 sps:$4 sm:$0xff]  }
 0x35c   : > { %2503 = vmatpush1.bf16.msra.mxu0 %v12356_v14  ;;  %2719 = vmatprep.subr.bf16.mxu1 %v12361_v15  ;;  %v12442_v14 = vld [vmem:[%s14784_s6 + $0x294] ss:$36 sps:$4 sm:$0xff]  }
 0x35d   : > { %2504 = vmatprep.subr.bf16.mxu0 %v12364_v16  ;;  %v12440_v15 = vld [vmem:[%s14784_s6 + $0x290] ss:$36 sps:$4 sm:$0xff]  }
 0x35e   : > { %v12445_v16 = vld [vmem:[%s14784_s6 + $0x52c] ss:$36 sps:$4 sm:$0xff]  }
 0x35f   : > { %2720 = vmatpush1.bf16.msra.mxu1 %v12359_v18  ;;  %v12443_v18 = vld [vmem:[%s14784_s6 + $0x528] ss:$36 sps:$4 sm:$0xff]  }
 0x360   : > { %2505 = vmatpush1.bf16.msra.mxu0 %v12362_v19  ;;  %2721 = vmatprep.subr.bf16.mxu1 %v12367_v20  ;;  %v12448_v19 = vld [vmem:[%s14784_s6 + $0x2dc] ss:$36 sps:$4 sm:$0xff]  }
 0x361   : > { %2506 = vmatprep.subr.bf16.mxu0 %v12370_v21  ;;  %v12446_v20 = vld [vmem:[%s14784_s6 + $0x2d8] ss:$36 sps:$4 sm:$0xff]  }
 0x362   : > { %v12451_v21 = vld [vmem:[%s14784_s6 + $0x574] ss:$36 sps:$4 sm:$0xff]  }
 0x363   : > { %2722 = vmatpush1.bf16.msra.mxu1 %v12365_v22  ;;  %v12449_v22 = vld [vmem:[%s14784_s6 + $0x570] ss:$36 sps:$4 sm:$0xff]  }
 0x364   : > { %2507 = vmatpush1.bf16.msra.mxu0 %v12368_v23  ;;  %2723 = vmatprep.subr.bf16.mxu1 %v12373_v24  ;;  %v12454_v23 = vld [vmem:[%s14784_s6 + $0x324] ss:$36 sps:$4 sm:$0xff]  }
 0x365   : > { %2508 = vmatprep.subr.bf16.mxu0 %v12376_v25  ;;  %v12452_v24 = vld [vmem:[%s14784_s6 + $0x320] ss:$36 sps:$4 sm:$0xff]  }
 0x366   : > { %v12457_v25 = vld [vmem:[%s14784_s6 + $0x5bc] ss:$36 sps:$4 sm:$0xff]  }
 0x367   : > { %2724 = vmatpush1.bf16.msra.mxu1 %v12371_v27  ;;  %v12455_v27 = vld [vmem:[%s14784_s6 + $0x5b8] ss:$36 sps:$4 sm:$0xff]  }
 0x368   : > { %2509 = vmatpush1.bf16.msra.mxu0 %v12374_v28  ;;  %2725 = vmatprep.subr.bf16.mxu1 %v12379_v29  ;;  %v12460_v28 = vld [vmem:[%s14784_s6 + $0x36c] ss:$36 sps:$4 sm:$0xff]  }
 0x369   : > { %2510 = vmatprep.subr.bf16.mxu0 %v12382_v31  ;;  %v12458_v29 = vld [vmem:[%s14784_s6 + $0x368] ss:$36 sps:$4 sm:$0xff]  }
 0x36a   : > { %v12463_v31 = vld [vmem:[%s14784_s6 + $0x604] ss:$36 sps:$4 sm:$0xff]  }
 0x36b   : > { %2726 = vmatpush1.bf16.msra.mxu1 %v12377_v35  ;;  %v12461_v35 = vld [vmem:[%s14784_s6 + $0x600] ss:$36 sps:$4 sm:$0xff]  }
 0x36c   : > { %2511 = vmatpush1.bf16.msra.mxu0 %v12380_v36  ;;  %2727 = vmatprep.subr.bf16.mxu1 %v12385_v37  ;;  %v12466_v36 = vld [vmem:[%s14784_s6 + $0x3b4] ss:$36 sps:$4 sm:$0xff]  }
 0x36d   : > { %2539 = vmatprep.subr.bf16.mxu0 %v12388_v38  ;;  %v12464_v37 = vld [vmem:[%s14784_s6 + $0x3b0] ss:$36 sps:$4 sm:$0xff]  }
 0x36e   : > { %v12469_v38 = vld [vmem:[%s14784_s6 + $0x64c] ss:$36 sps:$4 sm:$0xff]  }
 0x36f   : > { %2529 = vmatmul.mubr.bf16.vlgmr.msra.gmra.mrb[0].mxu0 %v14963_v2  ;;  %2728 = vmatpush1.bf16.msra.mxu1 %v12383_v39  ;;  %v12472_v39 = vld [vmem:[%s14784_s6 + $0x3fc] ss:$36 sps:$4 sm:$0xff]  }
 0x370   : > { %2540 = vmatpush1.bf16.msra.mxu0 %v12386_v40  ;;  %2571 = vmatprep.mubr.bf16.mxu0 %v14961_v1  ;;  %v12467_v40 = vld [vmem:[%s14784_s6 + $0x648] ss:$36 sps:$4 sm:$0xff]  }
 0x371   : > { %2729 = vmatprep.subr.bf16.mxu1 %v12391_v44  ;;  %2541 = vmatprep.subr.bf16.mxu0 %v12394_v46  ;;  %v12470_v44 = vld [vmem:[%s14784_s6 + $0x3f8] ss:$36 sps:$4 sm:$0xff]   ;;  %v12478_v46 = vld [vmem:[%s14784_s6 + $0x444] ss:$36 sps:$4 sm:$0xff]  }
 0x373   : > { %2730 = vmatpush1.bf16.msra.mxu1 %v12389_v45  ;;  %v12475_v45 = vld [vmem:[%s14784_s6 + $0x694] ss:$36 sps:$4 sm:$0xff]  }
 0x374   : > { %2542 = vmatpush1.bf16.msra.mxu0 %v12392_v47  ;;  %2731 = vmatprep.subr.bf16.mxu1 %v12397_v48  ;;  %v12473_v47 = vld [vmem:[%s14784_s6 + $0x690] ss:$36 sps:$4 sm:$0xff]   ;;  %v12476_v48 = vld [vmem:[%s14784_s6 + $0x440] ss:$36 sps:$4 sm:$0xff]  }
 0x375   : > { %2543 = vmatprep.subr.bf16.mxu0 %v12400_v52  ;;  %v12481_v52 = vld [vmem:[%s14784_s6 + $0x14] ss:$36 sps:$4 sm:$0xff]  }
 0x377   : > { %2732 = vmatpush1.bf16.msra.mxu1 %v12395_v42  ;;  %v12482_v42 = vld [vmem:[%s14784_s6 + $0x4a0] ss:$36 sps:$4 sm:$0xff]  }
 0x378   : > { %2544 = vmatpush1.bf16.msra.mxu0 %v12398_v53  ;;  %2733 = vmatprep.subr.bf16.mxu1 %v12403_v43  ;;  %v14153_v53 = vmov 0.0   ;;  %v12479_v43 = vld [vmem:[%s14784_s6 + $0x10] ss:$36 sps:$4 sm:$0xff]  }
 0x379   : > { %2545 = vmatprep.subr.bf16.mxu0 %v12406_v54  ;;  %v12485_v54 = vld [vmem:[%s14784_s6 + $0x5c] ss:$36 sps:$4 sm:$0xff]  }
 0x37b   : > { %2734 = vmatpush1.bf16.msra.mxu1 %v12401_v55  ;;  %v12486_v55 = vld [vmem:[%s14784_s6 + $0x4e8] ss:$36 sps:$4 sm:$0xff]  }
 0x37c   : > { %2546 = vmatpush1.bf16.msra.mxu0 %v12404_v41  ;;  %2735 = vmatprep.subr.bf16.mxu1 %v12409_v56  ;;  %v12483_v41 = vld [vmem:[%s14784_s6 + $0x58] ss:$36 sps:$4 sm:$0xff]   ;;  %v12489_v56 = vld [vmem:[%s14784_s6 + $0xa4] ss:$36 sps:$4 sm:$0xff]  }
 0x37d   : > { %2547 = vmatprep.subr.bf16.mxu0 %v12412_v57  ;;  %v12490_v57 = vld [vmem:[%s14784_s6 + $0x530] ss:$36 sps:$4 sm:$0xff]  }
 0x37f   : > { %2736 = vmatpush1.bf16.msra.mxu1 %v12407_v58  ;;  %v12487_v58 = vld [vmem:[%s14784_s6 + $0xa0] ss:$36 sps:$4 sm:$0xff]  }
 0x380   : > { %2548 = vmatpush1.bf16.msra.mxu0 %v12410_v59  ;;  %2737 = vmatprep.subr.bf16.mxu1 %v12415_v60  ;;  %v12493_v59 = vld [vmem:[%s14784_s6 + $0xec] ss:$36 sps:$4 sm:$0xff]   ;;  %v12494_v60 = vld [vmem:[%s14784_s6 + $0x578] ss:$36 sps:$4 sm:$0xff]  }
 0x381   : > { %2549 = vmatprep.subr.bf16.mxu0 %v12418_v61  ;;  %v12491_v61 = vld [vmem:[%s14784_s6 + $0xe8] ss:$36 sps:$4 sm:$0xff]  }
 0x383   : > { %2738 = vmatpush1.bf16.msra.mxu1 %v12413_v50  ;;  %v12497_v50 = vld [vmem:[%s14784_s6 + $0x134] ss:$36 sps:$4 sm:$0xff]  }
 0x384   : > { %2550 = vmatpush1.bf16.msra.mxu0 %v12416_v62  ;;  %2739 = vmatprep.subr.bf16.mxu1 %v12421_v63  ;;  %v12498_v62 = vld [vmem:[%s14784_s6 + $0x5c0] ss:$36 sps:$4 sm:$0xff]   ;;  %v12495_v63 = vld [vmem:[%s14784_s6 + $0x130] ss:$36 sps:$4 sm:$0xff]  }
 0x385   : > { %2551 = vmatprep.subr.bf16.mxu0 %v12424_v51  ;;  %v12501_v51 = vld [vmem:[%s14784_s6 + $0x17c] ss:$36 sps:$4 sm:$0xff]  }
 0x387   : > { %2740 = vmatpush1.bf16.msra.mxu1 %v12419_v0  ;;  %v12502_v0 = vld [vmem:[%s14784_s6 + $0x608] ss:$36 sps:$4 sm:$0xff]  }
 0x388   : > { %2552 = vmatpush1.bf16.msra.mxu0 %v12422_v49  ;;  %2741 = vmatprep.subr.bf16.mxu1 %v12427_v4  ;;  %v12499_v49 = vld [vmem:[%s14784_s6 + $0x178] ss:$36 sps:$4 sm:$0xff]   ;;  %v12505_v4 = vld [vmem:[%s14784_s6 + $0x1c4] ss:$36 sps:$4 sm:$0xff]  }
 0x389   : > { %2553 = vmatprep.subr.bf16.mxu0 %v12430_v5  ;;  %v12506_v5 = vld [vmem:[%s14784_s6 + $0x650] ss:$36 sps:$4 sm:$0xff]  }
 0x38b   : > { %2742 = vmatpush1.bf16.msra.mxu1 %v12425_v6  ;;  %v12503_v6 = vld [vmem:[%s14784_s6 + $0x1c0] ss:$36 sps:$4 sm:$0xff]  }
 0x38c   : > { %2554 = vmatpush1.bf16.msra.mxu0 %v12428_v7  ;;  %2754 = vmatprep.subr.bf16.mxu1 %v12433_v8  ;;  %v12509_v7 = vld [vmem:[%s14784_s6 + $0x20c] ss:$36 sps:$4 sm:$0xff]   ;;  %v12510_v8 = vld [vmem:[%s14784_s6 + $0x698] ss:$36 sps:$4 sm:$0xff]  }
 0x38d   : > { %2555 = vmatprep.subr.bf16.mxu0 %v12436_v9  ;;  %v12507_v9 = vld [vmem:[%s14784_s6 + $0x208] ss:$36 sps:$4 sm:$0xff]  }
 0x38e   : > { %2744 = vmatmul.mubr.bf16.vlgmr.msra.gmra.mrb[4].mxu1 %v14965_v3 }
 0x38f   : > { %2755 = vmatpush1.bf16.msra.mxu1 %v12431_v10  ;;  %2786 = vmatprep.mubr.bf16.mxu1 %v14152_v17  ;;  %v12513_v10 = vld [vmem:[%s14784_s6 + $0x254] ss:$36 sps:$4 sm:$0xff]  }
 0x390   : > { %2556 = vmatpush1.bf16.msra.mxu0 %v12434_v11  ;;  %2756 = vmatprep.subr.bf16.mxu1 %v12439_v12  ;;  %v12511_v11 = vld [vmem:[%s14784_s6 + $0x250] ss:$36 sps:$4 sm:$0xff]   ;;  %v12516_v12 = vld [vmem:[%s14784_s6 + $0x29c] ss:$36 sps:$4 sm:$0xff]  }
 0x391   : > { %2557 = vmatprep.subr.bf16.mxu0 %v12442_v14  ;;  %v12519_v14 = vld [vmem:[%s14784_s6 + $0x2e4] ss:$36 sps:$4 sm:$0xff]  }
 0x393   : > { %2757 = vmatpush1.bf16.msra.mxu1 %v12437_v13  ;;  %v12514_v13 = vld [vmem:[%s14784_s6 + $0x298] ss:$36 sps:$4 sm:$0xff]  }
 0x394   : > { %2558 = vmatpush1.bf16.msra.mxu0 %v12440_v15  ;;  %2758 = vmatprep.subr.bf16.mxu1 %v12445_v16  ;;  %v12517_v15 = vld [vmem:[%s14784_s6 + $0x2e0] ss:$36 sps:$4 sm:$0xff]   ;;  %v12522_v16 = vld [vmem:[%s14784_s6 + $0x32c] ss:$36 sps:$4 sm:$0xff]  }
 0x395   : > { %2559 = vmatprep.subr.bf16.mxu0 %v12448_v19  ;;  %v12525_v19 = vld [vmem:[%s14784_s6 + $0x374] ss:$36 sps:$4 sm:$0xff]  }
 0x397   : > { %2759 = vmatpush1.bf16.msra.mxu1 %v12443_v18  ;;  %v12520_v18 = vld [vmem:[%s14784_s6 + $0x328] ss:$36 sps:$4 sm:$0xff]  }
 0x398   : > { %2560 = vmatpush1.bf16.msra.mxu0 %v12446_v20  ;;  %2760 = vmatprep.subr.bf16.mxu1 %v12451_v21  ;;  %v12523_v20 = vld [vmem:[%s14784_s6 + $0x370] ss:$36 sps:$4 sm:$0xff]   ;;  %v12528_v21 = vld [vmem:[%s14784_s6 + $0x3bc] ss:$36 sps:$4 sm:$0xff]  }
 0x399   : > { %2561 = vmatprep.subr.bf16.mxu0 %v12454_v23  ;;  %v12531_v23 = vld [vmem:[%s14784_s6 + $0x404] ss:$36 sps:$4 sm:$0xff]  }
 0x39b   : > { %2761 = vmatpush1.bf16.msra.mxu1 %v12449_v22  ;;  %v12526_v22 = vld [vmem:[%s14784_s6 + $0x3b8] ss:$36 sps:$4 sm:$0xff]  }
 0x39c   : > { %2562 = vmatpush1.bf16.msra.mxu0 %v12452_v24  ;;  %2762 = vmatprep.subr.bf16.mxu1 %v12457_v25  ;;  %v12529_v24 = vld [vmem:[%s14784_s6 + $0x400] ss:$36 sps:$4 sm:$0xff]   ;;  %v12534_v25 = vld [vmem:[%s14784_s6 + $0x44c] ss:$36 sps:$4 sm:$0xff]  }
 0x39d   : > { %2563 = vmatprep.subr.bf16.mxu0 %v12460_v28  ;;  %v12537_v28 = vld [vmem:[%s14784_s6 + $0x494] ss:$36 sps:$4 sm:$0xff]  }
 0x39f   : > { %2763 = vmatpush1.bf16.msra.mxu1 %v12455_v27  ;;  %v12532_v27 = vld [vmem:[%s14784_s6 + $0x448] ss:$36 sps:$4 sm:$0xff]  }
 0x3a0   : > { %2564 = vmatpush1.bf16.msra.mxu0 %v12458_v29  ;;  %2764 = vmatprep.subr.bf16.mxu1 %v12463_v31  ;;  %v12535_v29 = vld [vmem:[%s14784_s6 + $0x490] ss:$36 sps:$4 sm:$0xff]   ;;  %v12540_v31 = vld [vmem:[%s14784_s6 + $0x4dc] ss:$36 sps:$4 sm:$0xff]  }
 0x3a1   : > { %2565 = vmatprep.subr.bf16.mxu0 %v12466_v36  ;;  %v12543_v36 = vld [vmem:[%s14784_s6 + $0x524] ss:$36 sps:$4 sm:$0xff]  }
 0x3a3   : > { %2765 = vmatpush1.bf16.msra.mxu1 %v12461_v35  ;;  %v12538_v35 = vld [vmem:[%s14784_s6 + $0x4d8] ss:$36 sps:$4 sm:$0xff]  }
 0x3a4   : > { %2566 = vmatpush1.bf16.msra.mxu0 %v12464_v37  ;;  %2766 = vmatprep.subr.bf16.mxu1 %v12469_v38  ;;  %v12541_v37 = vld [vmem:[%s14784_s6 + $0x520] ss:$36 sps:$4 sm:$0xff]   ;;  %v12546_v38 = vld [vmem:[%s14784_s6 + $0x56c] ss:$36 sps:$4 sm:$0xff]  }
 0x3a5   : > { %2567 = vmatprep.subr.bf16.mxu0 %v12472_v39  ;;  %v12544_v39 = vld [vmem:[%s14784_s6 + $0x568] ss:$36 sps:$4 sm:$0xff]  }
 0x3a7   : > { %2767 = vmatpush1.bf16.msra.mxu1 %v12467_v40  ;;  %v12549_v40 = vld [vmem:[%s14784_s6 + $0x5b4] ss:$36 sps:$4 sm:$0xff]  }
 0x3a8   : > { %2568 = vmatpush1.bf16.msra.mxu0 %v12470_v44  ;;  %2768 = vmatprep.subr.bf16.mxu1 %v12475_v45  ;;  %v12547_v44 = vld [vmem:[%s14784_s6 + $0x5b0] ss:$36 sps:$4 sm:$0xff]   ;;  %v12552_v45 = vld [vmem:[%s14784_s6 + $0x5fc] ss:$36 sps:$4 sm:$0xff]  }
 0x3a9   : > { %2569 = vmatprep.subr.bf16.mxu0 %v12478_v46  ;;  %v12550_v46 = vld [vmem:[%s14784_s6 + $0x5f8] ss:$36 sps:$4 sm:$0xff]  }
 0x3ab   : > { %2769 = vmatpush1.bf16.msra.mxu1 %v12473_v47  ;;  %v12555_v47 = vld [vmem:[%s14784_s6 + $0x644] ss:$36 sps:$4 sm:$0xff]  }
 0x3ac   : > { %2570 = vmatpush1.bf16.msra.mxu0 %v12476_v48  ;;  %11767 = vmatprep.subr.bf16.mxu1 %v14153_v53  ;;  %v12553_v48 = vld [vmem:[%s14784_s6 + $0x640] ss:$36 sps:$4 sm:$0xff]  }
 0x3ad   : > { %2625 = vmatprep.subr.bf16.mxu0 %v12481_v52  ;;  %v12558_v52 = vld [vmem:[%s14784_s6 + $0x68c] ss:$36 sps:$4 sm:$0xff]  }
 0x3ae   : > { %2787 = vmatmul.mubr.bf16.vlgmr.msra.gmra.mrb[4].mxu1 %v14963_v2 }
 0x3af   : > { %2572 = vmatmul.mubr.bf16.vlgmr.msra.gmra.mrb[4].mxu0 %v14965_v3  ;;  %11768 = vmatpush3.bf16.msra.mxu1 %v12482_v42  ;;  %v12556_v42 = vld [vmem:[%s14784_s6 + $0x688] ss:$36 sps:$4 sm:$0xff]  }
 0x3b0   : > { %2626 = vmatpush1.bf16.msra.mxu0 %v12479_v43  ;;  %2657 = vmatprep.mubr.bf16.mxu0 %v14961_v1  ;;  %v12559_v43 = vld [vmem:[%s14784_s6 + $0x260] ss:$36 sps:$4 sm:$0xff]  }
 0x3b1   : > { %11769 = vmatprep.subr.bf16.mxu1 %v14153_v53  ;;  %2627 = vmatprep.subr.bf16.mxu0 %v12485_v54  ;;  %v12560_v54 = vld [vmem:[%s14784_s6 + $0x20] ss:$36 sps:$4 sm:$0xff]  }
 0x3b2   : > { %11783 = vmatprep.mubr.msk.bf16.mxu1 %vm14154_vm0, %v14153_v53 }
 0x3b3   : > { %11770 = vmatpush3.bf16.msra.mxu1 %v12486_v55  ;;  %v12561_v55 = vld [vmem:[%s14784_s6 + $0x2a8] ss:$36 sps:$4 sm:$0xff]  }
 0x3b4   : > { %2628 = vmatpush1.bf16.msra.mxu0 %v12483_v41  ;;  %11771 = vmatprep.subr.bf16.mxu1 %v14153_v53  ;;  %v12562_v41 = vld [vmem:[%s14784_s6 + $0x68] ss:$36 sps:$4 sm:$0xff]  }
 0x3b5   : > { %2629 = vmatprep.subr.bf16.mxu0 %v12489_v56  ;;  %v12563_v56 = vld [vmem:[%s14784_s6 + $0x2f0] ss:$36 sps:$4 sm:$0xff]  }
 0x3b7   : > { %11772 = vmatpush3.bf16.msra.mxu1 %v12490_v57  ;;  %v12564_v57 = vld [vmem:[%s14784_s6 + $0xb0] ss:$36 sps:$4 sm:$0xff]  }
 0x3b8   : > { %2630 = vmatpush1.bf16.msra.mxu0 %v12487_v58  ;;  %11773 = vmatprep.subr.bf16.mxu1 %v14153_v53  ;;  %v12565_v58 = vld [vmem:[%s14784_s6 + $0x338] ss:$36 sps:$4 sm:$0xff]  }
 0x3b9   : > { %2631 = vmatprep.subr.bf16.mxu0 %v12493_v59  ;;  %v12566_v59 = vld [vmem:[%s14784_s6 + $0xf8] ss:$36 sps:$4 sm:$0xff]  }
 0x3bb   : > { %11774 = vmatpush3.bf16.msra.mxu1 %v12494_v60  ;;  %v12567_v60 = vld [vmem:[%s14784_s6 + $0x380] ss:$36 sps:$4 sm:$0xff]  }
 0x3bc   : > { %2632 = vmatpush1.bf16.msra.mxu0 %v12491_v61  ;;  %11775 = vmatprep.subr.bf16.mxu1 %v14153_v53  ;;  %v12570_v61 = vld [vmem:[%s14784_s6 + $0x188] ss:$36 sps:$4 sm:$0xff]  }
 0x3bd   : > { %2633 = vmatprep.subr.bf16.mxu0 %v12497_v50 }
 0x3bf   : > { %11776 = vmatpush3.bf16.msra.mxu1 %v12498_v62  ;;  %v12571_v62 = vld [vmem:[%s14784_s6 + $0x410] ss:$36 sps:$4 sm:$0xff]  }
 0x3c0   : > { %2634 = vmatpush1.bf16.msra.mxu0 %v12495_v63  ;;  %11777 = vmatprep.subr.bf16.mxu1 %v14153_v53 }
 0x3c1   : > { %2635 = vmatprep.subr.bf16.mxu0 %v12501_v51 }
 0x3c3   : > { %11778 = vmatpush3.bf16.msra.mxu1 %v12502_v0 }
 0x3c4   : > { %2636 = vmatpush1.bf16.msra.mxu0 %v12499_v49  ;;  %11779 = vmatprep.subr.bf16.mxu1 %v14153_v53  ;;  %v12572_v49 = vld [vmem:[%s14784_s6 + $0x1d0] ss:$36 sps:$4 sm:$0xff]  }
 0x3c5   : > { %2637 = vmatprep.subr.bf16.mxu0 %v12505_v4  ;;  %v12573_v4 = vld [vmem:[%s14784_s6 + $0x458] ss:$36 sps:$4 sm:$0xff]  }
 0x3c7   : > { %11780 = vmatpush3.bf16.msra.mxu1 %v12506_v5  ;;  %v12574_v5 = vld [vmem:[%s14784_s6 + $0x218] ss:$36 sps:$4 sm:$0xff]  }
 0x3c8   : > { %2638 = vmatpush1.bf16.msra.mxu0 %v12503_v6  ;;  %11781 = vmatprep.subr.bf16.mxu1 %v14153_v53 }
 0x3c9   : > { %2639 = vmatprep.subr.bf16.mxu0 %v12509_v7 }
 0x3cb   : > { %11782 = vmatpush3.bf16.msra.mxu1 %v12510_v8 }
 0x3cc   : > { %2640 = vmatpush1.bf16.msra.mxu0 %v12507_v9  ;;  %11817 = vmatprep.subr.bf16.mxu1 %v14153_v53 }
 0x3cd   : > { %2641 = vmatprep.subr.bf16.mxu0 %v12513_v10 }
 0x3ce   : > { %11784 = vmatmul.mubr.bf16.vlgmr.msra.gmra.mrb[8].mxu1 %v14963_v2 }
 0x3cf   : > { %11819 = vmatprep.mubr.msk.bf16.mxu1 %vm14154_vm0, %v14153_v53 }
 0x3d0   : > { %2642 = vmatpush1.bf16.msra.mxu0 %v12511_v11 }
 0x3d1   : > { %2643 = vmatprep.subr.bf16.mxu0 %v12516_v12 }
 0x3d4   : > { %2644 = vmatpush1.bf16.msra.mxu0 %v12514_v13 }
 0x3d5   : > { %2645 = vmatprep.subr.bf16.mxu0 %v12519_v14 }
 0x3d8   : > { %2646 = vmatpush1.bf16.msra.mxu0 %v12517_v15 }
 0x3d9   : > { %2647 = vmatprep.subr.bf16.mxu0 %v12522_v16 }
 0x3dc   : > { %2648 = vmatpush1.bf16.msra.mxu0 %v12520_v18 }
 0x3dd   : > { %2649 = vmatprep.subr.bf16.mxu0 %v12525_v19 }
 0x3e0   : > { %2650 = vmatpush1.bf16.msra.mxu0 %v12523_v20 }
 0x3e1   : > { %2651 = vmatprep.subr.bf16.mxu0 %v12528_v21 }
 0x3e4   : > { %2652 = vmatpush1.bf16.msra.mxu0 %v12526_v22 }
 0x3e5   : > { %2653 = vmatprep.subr.bf16.mxu0 %v12531_v23 }
 0x3e8   : > { %2654 = vmatpush1.bf16.msra.mxu0 %v12529_v24 }
 0x3e9   : > { %2655 = vmatprep.subr.bf16.mxu0 %v12534_v25 }
 0x3ec   : > { %2656 = vmatpush1.bf16.msra.mxu0 %v12532_v27 }
 0x3ed   : > { %2668 = vmatprep.subr.bf16.mxu0 %v12537_v28 }
 0x3ef   : > { %2658 = vmatmul.mubr.bf16.vlgmr.msra.gmra.mrb[8].mxu0 %v14965_v3 }
 0x3f0   : > { %2669 = vmatpush1.bf16.msra.mxu0 %v12535_v29  ;;  %2700 = vmatprep.mubr.bf16.mxu0 %v14152_v17 }
 0x3f1   : > { %2670 = vmatprep.subr.bf16.mxu0 %v12540_v31 }
 0x3f4   : > { %2671 = vmatpush1.bf16.msra.mxu0 %v12538_v35 }
 0x3f5   : > { %2672 = vmatprep.subr.bf16.mxu0 %v12543_v36 }
 0x3f8   : > { %2673 = vmatpush1.bf16.msra.mxu0 %v12541_v37 }
 0x3f9   : > { %2674 = vmatprep.subr.bf16.mxu0 %v12546_v38 }
 0x3fc   : > { %2675 = vmatpush1.bf16.msra.mxu0 %v12544_v39 }
 0x3fd   : > { %2676 = vmatprep.subr.bf16.mxu0 %v12549_v40 }
 0x400   : > { %2677 = vmatpush1.bf16.msra.mxu0 %v12547_v44 }
 0x401   : > { %2678 = vmatprep.subr.bf16.mxu0 %v12552_v45 }
 0x404   : > { %2679 = vmatpush1.bf16.msra.mxu0 %v12550_v46 }
 0x405   : > { %2680 = vmatprep.subr.bf16.mxu0 %v12555_v47 }
 0x408   : > { %2681 = vmatpush1.bf16.msra.mxu0 %v12553_v48 }
 0x409   : > { %2682 = vmatprep.subr.bf16.mxu0 %v12558_v52 }
 0x40c   : > { %2683 = vmatpush1.bf16.msra.mxu0 %v12556_v42 }
 0x40d   : > { %11494 = vmatprep.subr.bf16.mxu0 %v12559_v43 }
 0x40f   : > { %2701 = vmatmul.mubr.bf16.vlgmr.msra.gmra.mrb[8].mxu0 %v14963_v2  ;;  %v12568_v2 = vld [vmem:[%s14784_s6 + $0x140] ss:$36 sps:$4 sm:$0xff]  }
 0x410   : > { %11495 = vmatpush3.bf16.msra.mxu0 %v12560_v54  ;;  %2829 = vmatprep.mubr.bf16.mxu0 %v14961_v1  ;;  %v12569_v1 = vld [vmem:[%s14784_s6 + $0x3c8] ss:$36 sps:$4 sm:$0xff]   ;;  %s16610_s6 = scalar_lea.vmem [#allocation20], %s14768_s22  ;;  %s16611_s22 = sld [smem:[#allocation39_spill]] }
 0x411   : > { %11496 = vmatprep.subr.bf16.mxu0 %v12561_v55 }
 0x414   : > { %11497 = vmatpush3.bf16.msra.mxu0 %v12562_v41 }
 0x415   : > { %11498 = vmatprep.subr.bf16.mxu0 %v12563_v56 }
 0x416   : > { %p11464_p8 = scmp.ne.s32.totalorder %s16611_s22, 5 }
 0x417   : > { %vm14157_vm5 = vmmov (!%p11464_p8), 0  }
 0x418   : > { %11499 = vmatpush3.bf16.msra.mxu0 %v12564_v57 }
 0x419   : > { %11500 = vmatprep.subr.bf16.mxu0 %v12565_v58 }
 0x41c   : > { %11501 = vmatpush3.bf16.msra.mxu0 %v12566_v59  ;;  %v2891_v59 = vand.u32 127, %v1063_v26 }
 0x41d   : > { %11502 = vmatprep.subr.bf16.mxu0 %v12567_v60 }
 0x41e   : > { %vm15197_vm3 = vcmp.le.s32.totalorder %v2891_v59, %v14931_v30 }
 0x420   : > { %11503 = vmatpush3.bf16.msra.mxu0 %v12568_v2 }
 0x421   : > { %v2616_v50 = vpop.f32.mrb[0].mxu1  ;;  %11504 = vmatprep.subr.bf16.mxu0 %v12569_v1 }
 0x422   : > { %v2618_v63 = vpop.f32.mrb[1].mxu1 }
 0x423   : > { %v2620_v51 = vpop.f32.mrb[2].mxu1 }
 0x424   : > { %11505 = vmatpush3.bf16.msra.mxu0 %v12570_v61  ;;  %v2622_v0 = vpop.f32.mrb[3].mxu1 }
 0x425   : > { %11506 = vmatprep.subr.bf16.mxu0 %v12571_v62 }
 0x428   : > { %11507 = vmatpush3.bf16.msra.mxu0 %v12572_v49 }
 0x429   : > { %11508 = vmatprep.subr.bf16.mxu0 %v12573_v4 }
 0x42c   : > { %11509 = vmatpush3.bf16.msra.mxu0 %v12574_v5 }
 0x42d   : > { %11787 = vmatprep.subr.bf16.mxu0 %v14153_v53 }
 0x42f   : > { %2830 = vmatmul.mubr.bf16.vlgmr.msra.gmra.mrb[12].mxu0 %v14965_v3 }
 0x430   : > { %11789 = vmatprep.mubr.msk.bf16.mxu0 %vm14154_vm0, %v14153_v53 }
 0x442   : > { %v2530_v6 = vpop.f32.mrb[0].mxu0 }
 0x443   : > { %v2532_v7 = vpop.f32.mrb[1].mxu0 }
 0x444   : > { %v2534_v8 = vpop.f32.mrb[2].mxu0 }
 0x445   : > { %v15164_v9 = vpack.c.bf16 %v2534_v8, %v2530_v6  ;;  %v2536_v10 = vpop.f32.mrb[3].mxu0 }
 0x446   : > { %v15166_v11 = vpack.c.bf16 %v2536_v10, %v2532_v7 }
 0x481   : > { %v2788_v12 = vpop.f32.mrb[4].mxu1 }
 0x482   : > { %v2573_v13 = vpop.f32.mrb[4].mxu0  ;;  %v2790_v14 = vpop.f32.mrb[5].mxu1 }
 0x483   : > { %v2617_v15 = vadd.f32 %v2616_v50, %v2573_v13  ;;  %v2575_v16 = vpop.f32.mrb[5].mxu0  ;;  %v2792_v18 = vpop.f32.mrb[6].mxu1 }
 0x484   : > { %v2619_v19 = vadd.f32 %v2618_v63, %v2575_v16  ;;  %v15168_v20 = vpack.c.bf16 %v2792_v18, %v2788_v12  ;;  %v2577_v3 = vpop.f32.mrb[6].mxu0  ;;  %v2794_v21 = vpop.f32.mrb[7].mxu1 }
 0x485   : > { %v2621_v22 = vadd.f32 %v2620_v51, %v2577_v3  ;;  %v15170_v23 = vpack.c.bf16 %v2794_v21, %v2790_v14  ;;  %v2579_v24 = vpop.f32.mrb[7].mxu0 }
 0x486   : > { %v2623_v25 = vadd.f32 %v2622_v0, %v2579_v24  ;;  %v2959_v35 = vsel %vm2957_vm1, %v15168_v20, 0 }
 0x487   : > { %v15172_v27 = vpack.c.bf16 %v2621_v22, %v2617_v15  ;;  %v3180_v28 = vsel %vm2957_vm1, %v15170_v23, 0 }
 0x488   : > { %v15176_v29 = vpack.c.bf16 %v2623_v25, %v2619_v19  ;;  %11818 = vmatpush3.bf16.msra.mxu1 %v3180_v28 }
 0x489   : > { %11829 = vmatprep.subr.bf16.mxu1 %v14153_v53 }
 0x48a   : > { %v2898_v31 = vsel %vm2893_vm2, %v15176_v29, 0  ;;  %v3578_v28 = vrot.slane %v15176_v29, 4 }
 0x48b   : > { %11788 = vmatpush3.bf16.xpose.msra.mxu0 %v2898_v31 }
 0x48c   : > { %11793 = vmatprep.subr.bf16.mxu0 %v14153_v53 }
 0x492   : > { %11790 = vmatmul.mubr.msk.bf16.vlgmr.msra.gmra.mrb[16].mxu0 %vm2893_vm2, %v15164_v9 }
 0x493   : > { %11794 = vmatpush3.bf16.msra.mxu0 %v2959_v35  ;;  %11795 = vmatprep.mubr.msk.bf16.mxu0 %vm14154_vm0, %v14153_v53 }
 0x494   : > { %11799 = vmatprep.subr.bf16.mxu0 %v14153_v53 }
 0x4a1   : > { %v2872_v36 = vpop.f32.mrb[8].mxu1 }
 0x4a2   : > { %v11785_v37 = vpop.f32.mrb[9].mxu1 }
 0x4a3   : > { %v2875_v38 = vpop.f32.mrb[10].mxu1 }
 0x4a4   : > { %v11786_v39 = vpop.f32.mrb[11].mxu1 }
 0x4e2   : > { %v2702_v40 = vpop.f32.mrb[8].mxu0 }
 0x4e3   : > { %v2704_v44 = vpop.f32.mrb[9].mxu0 }
 0x4e4   : > { %v2706_v45 = vpop.f32.mrb[10].mxu0 }
 0x4e5   : > { %v15189_v46 = vpack.c.bf16 %v2706_v45, %v2702_v40  ;;  %v2708_v47 = vpop.f32.mrb[11].mxu0  ;;  %v3577_v40 = vrot.slane %v15164_v9, 4  ;;  %v4019_v45 = vrot.slane %v15172_v27, 4 }
 0x4e6   : > { %v15191_v48 = vpack.c.bf16 %v2708_v47, %v2704_v44  ;;  %v3798_v44 = vrot.slane %v15166_v11, 4 }
 0x4e7   : > { %v3799_v31 = vrot.slane %v15189_v46, 4 }
 0x4e8   : > { %v4020_v35 = vrot.slane %v15191_v48, 4  ;;  %v3342_v59 = vsel %vm2893_vm2, %v15191_v48, 0 }
 0x502   : > { %v11510_v52 = vpop.f32.mrb[12].mxu0 }
 0x503   : > { %v11511_v42 = vpop.f32.mrb[13].mxu0 }
 0x504   : > { %v11512_v43 = vadd.f32 %v11511_v42, %v11510_v52  ;;  %v11513_v54 = vpop.f32.mrb[14].mxu0 }
 0x505   : > { %v11514_v55 = vpop.f32.mrb[15].mxu0 }
 0x506   : > { %v2873_v41 = vadd.f32 %v11512_v43, %v2872_v36  ;;  %v11515_v56 = vadd.f32 %v11514_v55, %v11513_v54  ;;  %v3121_v55 = vsel %vm2893_vm2, %v15189_v46, 0 }
 0x508   : > { %v2876_v57 = vadd.f32 %v11515_v56, %v2875_v38 }
 0x50a   : > { %v15193_v58 = vpack.c.bf16 %v2876_v57, %v2873_v41 }
 0x565   : > { %v2934_v2 = vpop.f32.mrb[16].mxu0 }
 0x566   : > { %v2940_v1 = vsel %vm15197_vm3, %v2934_v2, -1e+30  ;;  %v11791_v61 = vpop.f32.mrb[17].mxu0 }
 0x567   : > { %v2937_v50 = vpop.f32.mrb[18].mxu0  ;;  %v2942_v62 = vsel %vm2941_vm4, %v2940_v1, -inf  ;;  %v3583_v61 = vsel %vm2893_vm2, %v3578_v28, 0 }
 0x568   : > { %2943 = vmax.xlane.f32.xlu0 %v2942_v62  ;;  %v11792_v63 = vpop.f32.mrb[19].mxu0 }
 0x57e   : > { %3006 = vrot.lane.b32.xlu0 %v15176_v29, %s14155_s14 }
 0x5f5   : > { %v2944_v26 = vpop.xlane.xlu0 %2943 }
 0x5f6   : > { %v2945_v51 = vsub.f32 %v2940_v1, %v2944_v26  ;;  %v3804_v26 = vsel %vm2893_vm2, %v3799_v31, 0 }
 0x5f8   : > { %v2946_v0 = vmul.f32 1.442695, %v2945_v51 }
 0x5f9   : > { %v3007_v8 = vpop.permute.xlu0 %3006 }
 0x5fa   : > { %13491 = vpow2.f32 %v2946_v0  ;;  %v3012_v12 = vsel %vm2893_vm2, %v3007_v8, 0 }
 0x604   : > { %v13492_v49 = vpop.eup %13491 }
 0x605   : > { %v2948_v4 = vsel %vm2941_vm4, %v13492_v49, 0.0 }
 0x606   : > { %2949 = vadd.xlane.f32.xlu1 %v2948_v4 }
 0x617   : > { %3003 = vrot.lane.b32.xlu1 %v15164_v9, %s14155_s14 }
 0x693   : > { %v2950_v5 = vpop.xlane.xlu1 %2949 }
 0x694   : > { %13493 = vrcp.f32 %v2950_v5 }
 0x697   : > { %v3004_v13 = vpop.permute.xlu1 %3003 }
 0x69e   : > { %v13494_v6 = vpop.eup %13493 }
 0x69f   : > { %v2952_v7 = vmul.f32 %v13494_v6, %v13492_v49  ;;  %v4025_v49 = vsel %vm2893_vm2, %v4020_v35, 0 }
 0x6a1   : > { %v2953_v10 = vpack.c.bf16 %v2952_v7, %v2952_v7 }
 0x6a3   : > { %11796 = vmatmul.mubr.msk.bf16.vlgmr.msra.gmra.mrb[20].mxu0 %vm2941_vm4, %v2953_v10 }
 0x6a4   : > { %11800 = vmatpush3.bf16.xpose.msra.mxu0 %v3012_v12  ;;  %11801 = vmatprep.mubr.msk.bf16.mxu0 %vm14154_vm0, %v14153_v53 }
 0x6a5   : > { %11805 = vmatprep.subr.bf16.mxu0 %v14153_v53 }
 0x6ab   : > { %11802 = vmatmul.mubr.msk.bf16.vlgmr.msra.gmra.mrb[24].mxu0 %vm2893_vm2, %v3004_v13 }
 0x6ac   : > { %11807 = vmatprep.mubr.msk.bf16.mxu0 %vm14154_vm0, %v14153_v53 }
 0x776   : > { %v15217_v14 = vpop.f32.mrb[20].mxu0 }
 0x777   : > { %v11797_v15 = vpop.f32.mrb[21].mxu0 }
 0x778   : > { %v2998_v16 = vpop.f32.mrb[22].mxu0 }
 0x779   : > { %v11798_v18 = vpop.f32.mrb[23].mxu0 }
 0x77e   : > { %v3048_v19 = vpop.f32.mrb[24].mxu0 }
 0x77f   : > { %v3054_v3 = vsel %vm15197_vm3, %v3048_v19, -1e+30  ;;  %v11803_v21 = vpop.f32.mrb[25].mxu0 }
 0x780   : > { %v3051_v22 = vpop.f32.mrb[26].mxu0  ;;  %v3055_v24 = vsel %vm2941_vm4, %v3054_v3, -inf }
 0x781   : > { %3056 = vmax.xlane.f32.xlu1 %v3055_v24  ;;  %v11804_v25 = vpop.f32.mrb[27].mxu0 }
 0x792   : > { %3227 = vrot.lane.b32.xlu1 %v15189_v46, %s14155_s14 }
 0x796   : > { %3224 = vrot.lane.b32.xlu1 %v15166_v11, %s14155_s14 }
 0x79a   : > { %3448 = vrot.lane.b32.xlu1 %v15191_v48, %s14155_s14 }
 0x79e   : > { %3688 = vrot.lane.b32.xlu1 %v3578_v28, %s14155_s14 }
 0x7a2   : > { %3909 = vrot.lane.b32.xlu1 %v3799_v31, %s14155_s14 }
 0x7a6   : > { %4130 = vrot.lane.b32.xlu1 %v4020_v35, %s14155_s14 }
 0x80e   : > { %v3057_v36 = vpop.xlane.xlu1 %3056 }
 0x80f   : > { %v3058_v37 = vsub.f32 %v3054_v3, %v3057_v36 }
 0x811   : > { %v3059_v38 = vmul.f32 1.442695, %v3058_v37 }
 0x812   : > { %v3228_v41 = vpop.permute.xlu1 %3227 }
 0x813   : > { %13495 = vpow2.f32 %v3059_v38  ;;  %v3233_v56 = vsel %vm2893_vm2, %v3228_v41, 0 }
 0x816   : > { %v3225_v57 = vpop.permute.xlu1 %3224 }
 0x81a   : > { %v3449_v2 = vpop.permute.xlu1 %3448 }
 0x81d   : > { %v13496_v39 = vpop.eup %13495 }
 0x81e   : > { %v3061_v29 = vsel %vm2941_vm4, %v13496_v39, 0.0  ;;  %v3689_v50 = vpop.permute.xlu1 %3688 }
 0x81f   : > { %3062 = vadd.xlane.f32.xlu0 %v3061_v29  ;;  %v3694_v62 = vsel %vm2893_vm2, %v3689_v50, 0 }
 0x822   : > { %v3910_v51 = vpop.permute.xlu1 %3909 }
 0x823   : > { %v3915_v0 = vsel %vm2893_vm2, %v3910_v51, 0 }
 0x826   : > { %v4131_v4 = vpop.permute.xlu1 %4130 }
 0x827   : > { %v4136_v5 = vsel %vm2893_vm2, %v4131_v4, 0 }
 0x835   : > { %3068 = vrot.lane.b32.xlu0 %v15168_v20, %s14155_s14 }
 0x839   : > { %3445 = vrot.lane.b32.xlu0 %v15172_v27, %s14155_s14 }
 0x83d   : > { %3686 = vrot.lane.b32.xlu0 %v3577_v40, %s14155_s14 }
 0x841   : > { %3907 = vrot.lane.b32.xlu0 %v3798_v44, %s14155_s14 }
 0x845   : > { %4128 = vrot.lane.b32.xlu0 %v4019_v45, %s14155_s14 }
 0x8ac   : > { %v3063_v47 = vpop.xlane.xlu0 %3062 }
 0x8ad   : > { %13497 = vrcp.f32 %v3063_v47 }
 0x8b0   : > { %v3069_v52 = vpop.permute.xlu0 %3068 }
 0x8b1   : > { %v3074_v42 = vsel %vm2957_vm1, %v3069_v52, 0 }
 0x8b2   : > { %11806 = vmatpush3.bf16.msra.mxu0 %v3074_v42 }
 0x8b3   : > { %11811 = vmatprep.subr.bf16.mxu0 %v14153_v53 }
 0x8b4   : > { %v3446_v1 = vpop.permute.xlu0 %3445 }
 0x8b7   : > { %v13498_v9 = vpop.eup %13497 }
 0x8b8   : > { %v3065_v43 = vmul.f32 %v13498_v9, %v13496_v39  ;;  %v3687_v63 = vpop.permute.xlu0 %3686 }
 0x8ba   : > { %v3066_v54 = vpack.c.bf16 %v3065_v43, %v3065_v43 }
 0x8bc   : > { %11808 = vmatmul.mubr.msk.bf16.vlgmr.msra.gmra.mrb[28].mxu0 %vm2941_vm4, %v3066_v54  ;;  %v3908_v46 = vpop.permute.xlu0 %3907 }
 0x8bd   : > { %11812 = vmatpush3.bf16.xpose.msra.mxu0 %v3121_v55  ;;  %11813 = vmatprep.mubr.msk.bf16.mxu0 %vm14154_vm0, %v14153_v53 }
 0x8be   : > { %11823 = vmatprep.subr.bf16.mxu0 %v14153_v53 }
 0x8c0   : > { %v4129_v48 = vpop.permute.xlu0 %4128 }
 0x8c4   : > { %11814 = vmatmul.mubr.msk.bf16.vlgmr.msra.gmra.mrb[32].mxu0 %vm2893_vm2, %v15166_v11  ;;  %v3454_v11 = vsel %vm2893_vm2, %v3449_v2, 0 }
 0x8c5   : > { %11824 = vmatpush3.bf16.xpose.msra.mxu0 %v3233_v56  ;;  %11825 = vmatprep.mubr.msk.bf16.mxu0 %vm14154_vm0, %v14153_v53 }
 0x8c6   : > { %11835 = vmatprep.subr.bf16.mxu0 %v14153_v53 }
 0x8cc   : > { %11826 = vmatmul.mubr.msk.bf16.vlgmr.msra.gmra.mrb[36].mxu0 %vm2893_vm2, %v3225_v57 }
 0x8cd   : > { %11836 = vmatpush3.bf16.xpose.msra.mxu0 %v3342_v59  ;;  %11837 = vmatprep.mubr.msk.bf16.mxu0 %vm14154_vm0, %v14153_v53 }
 0x8ce   : > { %11847 = vmatprep.subr.bf16.mxu0 %v14153_v53 }
 0x8d4   : > { %11838 = vmatmul.mubr.msk.bf16.vlgmr.msra.gmra.mrb[40].mxu0 %vm2893_vm2, %v15172_v27 }
 0x8d5   : > { %11848 = vmatpush3.bf16.xpose.msra.mxu0 %v3454_v11  ;;  %11849 = vmatprep.mubr.msk.bf16.mxu0 %vm14154_vm0, %v14153_v53 }
 0x8d6   : > { %11859 = vmatprep.subr.bf16.mxu0 %v14153_v53 }
 0x8dc   : > { %11850 = vmatmul.mubr.msk.bf16.vlgmr.msra.gmra.mrb[44].mxu0 %vm2893_vm2, %v3446_v1 }
 0x8dd   : > { %11860 = vmatpush3.bf16.xpose.msra.mxu0 %v3583_v61  ;;  %11861 = vmatprep.mubr.msk.bf16.mxu0 %vm14154_vm0, %v14153_v53 }
 0x8de   : > { %11871 = vmatprep.subr.bf16.mxu0 %v14153_v53 }
 0x8e4   : > { %11862 = vmatmul.mubr.msk.bf16.vlgmr.msra.gmra.mrb[48].mxu0 %vm2893_vm2, %v3577_v40 }
 0x8e5   : > { %11872 = vmatpush3.bf16.xpose.msra.mxu0 %v3694_v62  ;;  %11873 = vmatprep.mubr.msk.bf16.mxu0 %vm14154_vm0, %v14153_v53 }
 0x8e6   : > { %11883 = vmatprep.subr.bf16.mxu0 %v14153_v53 }
 0x8ec   : > { %11874 = vmatmul.mubr.msk.bf16.vlgmr.msra.gmra.mrb[52].mxu0 %vm2893_vm2, %v3687_v63 }
 0x8ed   : > { %11884 = vmatpush3.bf16.xpose.msra.mxu0 %v3804_v26  ;;  %11885 = vmatprep.mubr.msk.bf16.mxu0 %vm14154_vm0, %v14153_v53 }
 0x8ee   : > { %11895 = vmatprep.subr.bf16.mxu0 %v14153_v53 }
 0x8f4   : > { %11886 = vmatmul.mubr.msk.bf16.vlgmr.msra.gmra.mrb[56].mxu0 %vm2893_vm2, %v3798_v44 }
 0x8f5   : > { %11896 = vmatpush3.bf16.xpose.msra.mxu0 %v3915_v0  ;;  %11897 = vmatprep.mubr.msk.bf16.mxu0 %vm14154_vm0, %v14153_v53 }
 0x8f6   : > { %11907 = vmatprep.subr.bf16.mxu0 %v14153_v53 }
 0x8fc   : > { %11898 = vmatmul.mubr.msk.bf16.vlgmr.msra.gmra.mrb[60].mxu0 %vm2893_vm2, %v3908_v46 }
 0x8fd   : > { %11908 = vmatpush3.bf16.xpose.msra.mxu0 %v4025_v49  ;;  %11909 = vmatprep.mubr.msk.bf16.mxu0 %vm14154_vm0, %v14153_v53 }
 0x8fe   : > { %11919 = vmatprep.subr.bf16.mxu0 %v14153_v53 }
 0x904   : > { %11910 = vmatmul.mubr.msk.bf16.vlgmr.msra.gmra.mrb[64].mxu0 %vm2893_vm2, %v4019_v45 }
 0x905   : > { %11920 = vmatpush3.bf16.xpose.msra.mxu0 %v4136_v5  ;;  %11921 = vmatprep.mubr.msk.bf16.mxu0 %vm14154_vm0, %v14153_v53 }
 0x90c   : > { %11922 = vmatmul.mubr.msk.bf16.vlgmr.msra.gmra.mrb[68].mxu0 %vm2893_vm2, %v4129_v48 }
 0x98f   : > { %v15313_v6 = vpop.f32.mrb[28].mxu0 }
 0x990   : > { %v11809_v7 = vpop.f32.mrb[29].mxu0 }
 0x991   : > { %v3113_v8 = vpop.f32.mrb[30].mxu0 }
 0x992   : > { %v11810_v10 = vpop.f32.mrb[31].mxu0 }
 0x997   : > { %v3157_v12 = vpop.f32.mrb[32].mxu0 }
 0x998   : > { %v15317_v13 = vsel %vm15197_vm3, %v3157_v12, -1e+30  ;;  %v11815_v27 = vpop.f32.mrb[33].mxu0 }
 0x999   : > { %v3160_v15 = vpop.f32.mrb[34].mxu0  ;;  %v3164_v16 = vsel %vm2941_vm4, %v15317_v13, -inf }
 0x99a   : > { %3165 = vmax.xlane.f32.xlu1 %v3164_v16  ;;  %v11816_v18 = vpop.f32.mrb[35].mxu0 }
 0x99f   : > { %v3269_v19 = vpop.f32.mrb[36].mxu0 }
 0x9a0   : > { %v15323_v3 = vsel %vm15197_vm3, %v3269_v19, -1e+30  ;;  %v11827_v21 = vpop.f32.mrb[37].mxu0 }
 0x9a1   : > { %v3272_v22 = vpop.f32.mrb[38].mxu0  ;;  %v3276_v24 = vsel %vm2941_vm4, %v15323_v3, -inf }
 0x9a2   : > { %3277 = vmax.xlane.f32.xlu0 %v3276_v24  ;;  %v11828_v25 = vpop.f32.mrb[39].mxu0 }
 0x9a7   : > { %v3378_v28 = vpop.f32.mrb[40].mxu0 }
 0x9a8   : > { %v15329_v31 = vsel %vm15197_vm3, %v3378_v28, -1e+30  ;;  %v11839_v35 = vpop.f32.mrb[41].mxu0 }
 0x9a9   : > { %v3381_v36 = vpop.f32.mrb[42].mxu0  ;;  %v3385_v37 = vsel %vm2941_vm4, %v15329_v31, -inf }
 0x9aa   : > { %3386 = vmax.xlane.f32.xlu0 %v3385_v37  ;;  %v11840_v38 = vpop.f32.mrb[43].mxu0 }
 0x9af   : > { %v3490_v39 = vpop.f32.mrb[44].mxu0 }
 0x9b0   : > { %v15335_v29 = vsel %vm15197_vm3, %v3490_v39, -1e+30  ;;  %v11851_v40 = vpop.f32.mrb[45].mxu0 }
 0x9b1   : > { %v3493_v44 = vpop.f32.mrb[46].mxu0  ;;  %v3497_v45 = vsel %vm2941_vm4, %v15335_v29, -inf }
 0x9b2   : > { %3498 = vmax.xlane.f32.xlu0 %v3497_v45  ;;  %v11852_v47 = vpop.f32.mrb[47].mxu0 }
 0x9b7   : > { %v3619_v52 = vpop.f32.mrb[48].mxu0 }
 0x9b8   : > { %v15341_v42 = vsel %vm15197_vm3, %v3619_v52, -1e+30  ;;  %v11863_v9 = vpop.f32.mrb[49].mxu0 }
 0x9b9   : > { %v3622_v43 = vpop.f32.mrb[50].mxu0  ;;  %v3626_v54 = vsel %vm2941_vm4, %v15341_v42, -inf }
 0x9ba   : > { %3627 = vmax.xlane.f32.xlu1 %v3626_v54  ;;  %v11864_v55 = vpop.f32.mrb[51].mxu0 }
 0x9bf   : > { %v3730_v41 = vpop.f32.mrb[52].mxu0 }
 0x9c0   : > { %v15347_v56 = vsel %vm15197_vm3, %v3730_v41, -1e+30  ;;  %v11875_v57 = vpop.f32.mrb[53].mxu0 }
 0x9c1   : > { %v3733_v59 = vpop.f32.mrb[54].mxu0  ;;  %v3737_v2 = vsel %vm2941_vm4, %v15347_v56, -inf }
 0x9c2   : > { %3738 = vmax.xlane.f32.xlu0 %v3737_v2  ;;  %v11876_v11 = vpop.f32.mrb[55].mxu0 }
 0x9c7   : > { %v3840_v1 = vpop.f32.mrb[56].mxu0 }
 0x9c8   : > { %v15353_v61 = vsel %vm15197_vm3, %v3840_v1, -1e+30  ;;  %v11887_v50 = vpop.f32.mrb[57].mxu0 }
 0x9c9   : > { %v3843_v62 = vpop.f32.mrb[58].mxu0  ;;  %v3847_v63 = vsel %vm2941_vm4, %v15353_v61, -inf }
 0x9ca   : > { %3848 = vmax.xlane.f32.xlu1 %v3847_v63  ;;  %v11888_v26 = vpop.f32.mrb[59].mxu0 }
 0x9cf   : > { %v3951_v51 = vpop.f32.mrb[60].mxu0 }
 0x9d0   : > { %v15359_v0 = vsel %vm15197_vm3, %v3951_v51, -1e+30  ;;  %v11899_v46 = vpop.f32.mrb[61].mxu0 }
 0x9d1   : > { %v3954_v49 = vpop.f32.mrb[62].mxu0  ;;  %v3958_v4 = vsel %vm2941_vm4, %v15359_v0, -inf }
 0x9d2   : > { %3959 = vmax.xlane.f32.xlu0 %v3958_v4  ;;  %v11900_v5 = vpop.f32.mrb[63].mxu0 }
 0x9d3   : > { %v3638_v5 = vrot.slane %v15168_v20, 4 }
 0x9d7   : > { %v4061_v48 = vpop.f32.mrb[64].mxu0 }
 0x9d8   : > { %v15365_v7 = vsel %vm15197_vm3, %v4061_v48, -1e+30  ;;  %v11911_v8 = vpop.f32.mrb[65].mxu0  ;;  %v3859_v48 = vrot.slane %v15170_v23, 4 }
 0x9d9   : > { %v4064_v10 = vpop.f32.mrb[66].mxu0  ;;  %v4068_v12 = vsel %vm2941_vm4, %v15365_v7, -inf }
 0x9da   : > { %4069 = vmax.xlane.f32.xlu1 %v4068_v12  ;;  %v11912_v27 = vpop.f32.mrb[67].mxu0 }
 0x9df   : > { %v4172_v15 = vpop.f32.mrb[68].mxu0 }
 0x9e0   : > { %v15371_v16 = vsel %vm15197_vm3, %v4172_v15, -1e+30  ;;  %v11923_v18 = vpop.f32.mrb[69].mxu0 }
 0x9e1   : > { %v4175_v19 = vpop.f32.mrb[70].mxu0  ;;  %v4179_v21 = vsel %vm2941_vm4, %v15371_v16, -inf }
 0x9e2   : > { %4180 = vmax.xlane.f32.xlu1 %v4179_v21  ;;  %v11924_v22 = vpop.f32.mrb[71].mxu0 }
 0xa27   : > { %v3166_v24 = vpop.xlane.xlu1 %3165 }
 0xa28   : > { %v3167_v25 = vsub.f32 %v15317_v13, %v3166_v24  ;;  %v4080_v24 = vrot.slane %v15193_v58, 4 }
 0xa2a   : > { %v3168_v28 = vmul.f32 1.442695, %v3167_v25 }
 0xa2c   : > { %13499 = vpow2.f32 %v3168_v28  ;;  %v3116_v28 = vpack.c.bf16 %v15313_v6, %v15313_v6 }
 0xa2f   : > { %v3278_v35 = vpop.xlane.xlu0 %3277 }
 0xa30   : > { %v3279_v36 = vsub.f32 %v15323_v3, %v3278_v35 }
 0xa32   : > { %v3280_v37 = vmul.f32 1.442695, %v3279_v36 }
 0xa34   : > { %13501 = vpow2.f32 %v3280_v37 }
 0xa36   : > { %v15377_v60 = vpop.eup %13499 }
 0xa37   : > { %v3387_v38 = vpop.xlane.xlu0 %3386  ;;  %v3170_v39 = vsel %vm2941_vm4, %v15377_v60, 0.0 }
 0xa38   : > { %v3388_v40 = vsub.f32 %v15329_v31, %v3387_v38  ;;  %3171 = vadd.xlane.f32.xlu0 %v3170_v39 }
 0xa3a   : > { %v3389_v44 = vmul.f32 1.442695, %v3388_v40 }
 0xa3c   : > { %13503 = vpow2.f32 %v3389_v44 }
 0xa3e   : > { %v15382_v45 = vpop.eup %13501 }
 0xa3f   : > { %v3499_v13 = vpop.xlane.xlu0 %3498  ;;  %v3282_v47 = vsel %vm2941_vm4, %v15382_v45, 0.0 }
 0xa40   : > { %v3500_v3 = vsub.f32 %v15335_v29, %v3499_v13  ;;  %3283 = vadd.xlane.f32.xlu0 %v3282_v47  ;;  %v3401_v47 = vsel %vm2957_vm1, %v15193_v58, 0 }
 0xa42   : > { %v3501_v52 = vmul.f32 1.442695, %v3500_v3 }
 0xa44   : > { %13505 = vpow2.f32 %v3501_v52 }
 0xa46   : > { %v15387_v9 = vpop.eup %13503 }
 0xa47   : > { %v3391_v43 = vsel %vm2941_vm4, %v15387_v9, 0.0  ;;  %v3628_v55 = vpop.xlane.xlu1 %3627 }
 0xa48   : > { %3392 = vadd.xlane.f32.xlu1 %v3391_v43  ;;  %v3629_v29 = vsub.f32 %v15341_v42, %v3628_v55 }
 0xa4a   : > { %v3630_v57 = vmul.f32 1.442695, %v3629_v29 }
 0xa4c   : > { %13507 = vpow2.f32 %v3630_v57 }
 0xa4e   : > { %v15391_v31 = vpop.eup %13505 }
 0xa4f   : > { %v3503_v54 = vsel %vm2941_vm4, %v15391_v31, 0.0  ;;  %v3739_v41 = vpop.xlane.xlu0 %3738 }
 0xa50   : > { %3504 = vadd.xlane.f32.xlu0 %v3503_v54  ;;  %v3740_v59 = vsub.f32 %v15347_v56, %v3739_v41 }
 0xa52   : > { %v3741_v50 = vmul.f32 1.442695, %v3740_v59 }
 0xa54   : > { %13509 = vpow2.f32 %v3741_v50 }
 0xa56   : > { %v15403_v51 = vpop.eup %13507 }
 0xa57   : > { %v3849_v2 = vpop.xlane.xlu1 %3848  ;;  %v3632_v42 = vsel %vm2941_vm4, %v15403_v51, 0.0 }
 0xa58   : > { %v3850_v1 = vsub.f32 %v15353_v61, %v3849_v2 }
 0xa59   : > { %3510 = vrot.lane.b32.xlu1 %v15193_v58, %s14155_s14 }
 0xa5a   : > { %v3851_v63 = vmul.f32 1.442695, %v3850_v1 }
 0xa5c   : > { %13511 = vpow2.f32 %v3851_v63 }
 0xa5e   : > { %v15407_v46 = vpop.eup %13509 }
 0xa5f   : > { %v3960_v11 = vpop.xlane.xlu0 %3959  ;;  %v3743_v61 = vsel %vm2941_vm4, %v15407_v46, 0.0 }
 0xa60   : > { %v3961_v62 = vsub.f32 %v15359_v0, %v3960_v11 }
 0xa62   : > { %v3962_v26 = vmul.f32 1.442695, %v3961_v62 }
 0xa64   : > { %13513 = vpow2.f32 %v3962_v26 }
 0xa66   : > { %3289 = vrot.lane.b32.xlu0 %v15170_v23, %s14155_s14  ;;  %v15409_v56 = vpop.eup %13511 }
 0xa67   : > { %v3853_v4 = vsel %vm2941_vm4, %v15409_v56, 0.0  ;;  %v4070_v8 = vpop.xlane.xlu1 %4069 }
 0xa68   : > { %v4071_v10 = vsub.f32 %v15365_v7, %v4070_v8 }
 0xa6a   : > { %v4072_v27 = vmul.f32 1.442695, %v4071_v10 }
 0xa6c   : > { %13515 = vpow2.f32 %v4072_v27 }
 0xa6e   : > { %v15413_v49 = vpop.eup %13513 }
 0xa6f   : > { %v3964_v0 = vsel %vm2941_vm4, %v15413_v49, 0.0  ;;  %v4181_v12 = vpop.xlane.xlu1 %4180 }
 0xa70   : > { %v4182_v15 = vsub.f32 %v15371_v16, %v4181_v12 }
 0xa72   : > { %v4183_v18 = vmul.f32 1.442695, %v4182_v15 }
 0xa74   : > { %13517 = vpow2.f32 %v4183_v18 }
 0xa76   : > { %v15427_v19 = vpop.eup %13515 }
 0xa77   : > { %v4074_v20 = vsel %vm2941_vm4, %v15427_v19, 0.0 }
 0xa7d   : > { %3633 = vadd.xlane.f32.xlu1 %v3632_v42 }
 0xa7e   : > { %v15431_v21 = vpop.eup %13517 }
 0xa7f   : > { %v4185_v22 = vsel %vm2941_vm4, %v15431_v21, 0.0 }
 0xa81   : > { %3744 = vadd.xlane.f32.xlu1 %v3743_v61  ;;  %v3864_v61 = vsel %vm2957_vm1, %v3859_v48, 0 }
 0xa85   : > { %3965 = vadd.xlane.f32.xlu0 %v3964_v0  ;;  %3854 = vadd.xlane.f32.xlu1 %v3853_v4 }
 0xa96   : > { %3749 = vrot.lane.b32.xlu1 %v3638_v5, %s14155_s14 }
 0xa9b   : > { %3970 = vrot.lane.b32.xlu0 %v3859_v48, %s14155_s14 }
 0xaba   : > { %4075 = vadd.xlane.f32.xlu1 %v4074_v20 }
 0xabe   : > { %4186 = vadd.xlane.f32.xlu1 %v4185_v22 }
 0xac5   : > { %v3172_v7 = vpop.xlane.xlu0 %3171 }
 0xac6   : > { %13519 = vrcp.f32 %v3172_v7 }
 0xacd   : > { %v3284_v25 = vpop.xlane.xlu0 %3283 }
 0xace   : > { %13521 = vrcp.f32 %v3284_v25 }
 0xacf   : > { %4191 = vrot.lane.b32.xlu1 %v4080_v24, %s14155_s14 }
 0xad0   : > { %v13520_v16 = vpop.eup %13519 }
 0xad1   : > { %v3174_v35 = vmul.f32 %v13520_v16, %v15377_v60 }
 0xad3   : > { %3560 = vrot.lane.b32.xlu1 %v3116_v28, %s14155_s14  ;;  %v3175_v36 = vpack.c.bf16 %v3174_v35, %v3174_v35 }
 0xad5   : > { %11820 = vmatmul.mubr.msk.bf16.vlgmr.msra.gmra.mrb[12].mxu1 %vm2941_vm4, %v3175_v36  ;;  %v3393_v37 = vpop.xlane.xlu1 %3392 }
 0xad6   : > { %11831 = vmatprep.mubr.msk.bf16.mxu1 %vm14154_vm0, %v14153_v53  ;;  %13523 = vrcp.f32 %v3393_v37 }
 0xad8   : > { %v13522_v38 = vpop.eup %13521 }
 0xad9   : > { %v3286_v40 = vmul.f32 %v13522_v38, %v15382_v45  ;;  %v3511_v3 = vpop.permute.xlu1 %3510  ;;  %v12575_v38 = vld [vmem:[%s14786_s21] ss:$12 sps:$4 sm:$0xff]  }
 0xada   : > { %v3516_v54 = vsel %vm2957_vm1, %v3511_v3, 0  ;;  %v12602_v3 = vld [vmem:[%s14786_s21 + $0xc8] ss:$12 sps:$4 sm:$0xff]  }
 0xadb   : > { %v3287_v60 = vpack.c.bf16 %v3286_v40, %v3286_v40 }
 0xadd   : > { %v3505_v39 = vpop.xlane.xlu0 %3504 }
 0xade   : > { %13525 = vrcp.f32 %v3505_v39  ;;  %v12580_v39 = vld [vmem:[%s14786_s21 + $0x1c] ss:$12 sps:$4 sm:$0xff]  }
 0xae0   : > { %v13524_v13 = vpop.eup %13523 }
 0xae1   : > { %v3290_v44 = vpop.permute.xlu0 %3289  ;;  %v3395_v45 = vmul.f32 %v13524_v13, %v15387_v9  ;;  %v3643_v9 = vsel %vm2957_vm1, %v3638_v5, 0  ;;  %v12583_v13 = vld [vmem:[%s14786_s21 + $0x34] ss:$12 sps:$4 sm:$0xff]  }
 0xae2   : > { %v3295_v6 = vsel %vm2957_vm1, %v3290_v44, 0 }
 0xae3   : > { %11830 = vmatpush3.bf16.msra.mxu1 %v3295_v6  ;;  %v3396_v52 = vpack.c.bf16 %v3395_v45, %v3395_v45  ;;  %v12578_v6 = vld [vmem:[%s14786_s21 + $0x18] ss:$12 sps:$4 sm:$0xff]   ;;  %v12581_v45 = vld [vmem:[%s14786_s21 + $0x30] ss:$12 sps:$4 sm:$0xff]  }
 0xae4   : > { %11841 = vmatprep.subr.bf16.mxu1 %v14153_v53 }
 0xae6   : > { %11832 = vmatmul.mubr.msk.bf16.vlgmr.msra.gmra.mrb[16].mxu1 %vm2941_vm4, %v3287_v60 }
 0xae7   : > { %11842 = vmatpush3.bf16.msra.mxu1 %v3401_v47  ;;  %11843 = vmatprep.mubr.msk.bf16.mxu1 %vm14154_vm0, %v14153_v53 }
 0xae8   : > { %11853 = vmatprep.subr.bf16.mxu1 %v14153_v53  ;;  %v13526_v43 = vpop.eup %13525 }
 0xae9   : > { %v3507_v55 = vmul.f32 %v13526_v43, %v15391_v31  ;;  %v12586_v43 = vld [vmem:[%s14786_s21 + $0x4c] ss:$12 sps:$4 sm:$0xff]  }
 0xaeb   : > { %v3508_v29 = vpack.c.bf16 %v3507_v55, %v3507_v55 }
 0xaee   : > { %11844 = vmatmul.mubr.msk.bf16.vlgmr.msra.gmra.mrb[20].mxu1 %vm2941_vm4, %v3396_v52  ;;  %v12603_v52 = vld [vmem:[%s14786_s21 + $0x8] ss:$12 sps:$4 sm:$0xff]  }
 0xaef   : > { %11854 = vmatpush3.bf16.msra.mxu1 %v3516_v54  ;;  %11855 = vmatprep.mubr.msk.bf16.mxu1 %vm14154_vm0, %v14153_v53  ;;  %v12607_v54 = vld [vmem:[%s14786_s21 + $0xe0] ss:$12 sps:$4 sm:$0xff]  }
 0xaf0   : > { %11865 = vmatprep.subr.bf16.mxu1 %v14153_v53 }
 0xaf6   : > { %11856 = vmatmul.mubr.msk.bf16.vlgmr.msra.gmra.mrb[24].mxu1 %vm2941_vm4, %v3508_v29  ;;  %v12608_v29 = vld [vmem:[%s14786_s21 + $0x20] ss:$12 sps:$4 sm:$0xff]  }
 0xaf7   : > { %11866 = vmatpush3.bf16.msra.mxu1 %v3643_v9  ;;  %11867 = vmatprep.mubr.msk.bf16.mxu1 %vm14154_vm0, %v14153_v53 }
 0xaf8   : > { %11877 = vmatprep.subr.bf16.mxu1 %v14153_v53 }
 0xb0a   : > { %v3634_v41 = vpop.xlane.xlu1 %3633 }
 0xb0b   : > { %13527 = vrcp.f32 %v3634_v41 }
 0xb0e   : > { %v3745_v57 = vpop.xlane.xlu1 %3744 }
 0xb0f   : > { %13529 = vrcp.f32 %v3745_v57  ;;  %v12584_v57 = vld [vmem:[%s14786_s21 + $0x48] ss:$12 sps:$4 sm:$0xff]  }
 0xb12   : > { %v3855_v59 = vpop.xlane.xlu1 %3854  ;;  %v3966_v26 = vpop.xlane.xlu0 %3965 }
 0xb13   : > { %13531 = vrcp.f32 %v3855_v59 }
 0xb14   : > { %13533 = vrcp.f32 %v3966_v26  ;;  %v12598_v26 = vld [vmem:[%s14786_s21 + $0xac] ss:$12 sps:$4 sm:$0xff]  }
 0xb15   : > { %v13528_v2 = vpop.eup %13527 }
 0xb16   : > { %v3636_v31 = vmul.f32 %v13528_v2, %v15403_v51  ;;  %v3750_v11 = vpop.permute.xlu1 %3749  ;;  %v12589_v2 = vld [vmem:[%s14786_s21 + $0x64] ss:$12 sps:$4 sm:$0xff]  }
 0xb17   : > { %v3755_v62 = vsel %vm2957_vm1, %v3750_v11, 0  ;;  %v12587_v11 = vld [vmem:[%s14786_s21 + $0x60] ss:$12 sps:$4 sm:$0xff]  }
 0xb18   : > { %v3637_v1 = vpack.c.bf16 %v3636_v31, %v3636_v31 }
 0xb19   : > { %v13530_v50 = vpop.eup %13529 }
 0xb1a   : > { %11868 = vmatmul.mubr.msk.bf16.vlgmr.msra.gmra.mrb[28].mxu1 %vm2941_vm4, %v3637_v1  ;;  %v3747_v63 = vmul.f32 %v13530_v50, %v15407_v46  ;;  %v3971_v46 = vpop.permute.xlu0 %3970  ;;  %v12592_v1 = vld [vmem:[%s14786_s21 + $0x7c] ss:$12 sps:$4 sm:$0xff]   ;;  %v12590_v50 = vld [vmem:[%s14786_s21 + $0x78] ss:$12 sps:$4 sm:$0xff]  }
 0xb1b   : > { %11878 = vmatpush3.bf16.msra.mxu1 %v3755_v62  ;;  %11879 = vmatprep.mubr.msk.bf16.mxu1 %vm14154_vm0, %v14153_v53  ;;  %v3976_v8 = vsel %vm2957_vm1, %v3971_v46, 0  ;;  %v12595_v62 = vld [vmem:[%s14786_s21 + $0x94] ss:$12 sps:$4 sm:$0xff]   ;;  %v12604_v46 = vld [vmem:[%s14786_s21 + $0xd8] ss:$12 sps:$4 sm:$0xff]  }
 0xb1c   : > { %11889 = vmatprep.subr.bf16.mxu1 %v14153_v53  ;;  %v3748_v42 = vpack.c.bf16 %v3747_v63, %v3747_v63  ;;  %v12593_v63 = vld [vmem:[%s14786_s21 + $0x90] ss:$12 sps:$4 sm:$0xff]  }
 0xb1d   : > { %v13532_v51 = vpop.eup %13531 }
 0xb1e   : > { %v3857_v0 = vmul.f32 %v13532_v51, %v15409_v56  ;;  %v13534_v5 = vpop.eup %13533  ;;  %v4085_v56 = vsel %vm2957_vm1, %v4080_v24, 0  ;;  %v12601_v51 = vld [vmem:[%s14786_s21 + $0xc4] ss:$12 sps:$4 sm:$0xff]  }
 0xb1f   : > { %v3968_v23 = vmul.f32 %v13534_v5, %v15413_v49  ;;  %v12609_v5 = vld [vmem:[%s14786_s21 + $0xf0] ss:$12 sps:$4 sm:$0xff]  }
 0xb20   : > { %v3858_v4 = vpack.c.bf16 %v3857_v0, %v3857_v0  ;;  %v12606_v0 = vld [vmem:[%s14786_s21 + $0xdc] ss:$12 sps:$4 sm:$0xff]  }
 0xb21   : > { %v3969_v48 = vpack.c.bf16 %v3968_v23, %v3968_v23  ;;  %v12613_v23 = vld [vmem:[%s14786_s21 + $0x38] ss:$12 sps:$4 sm:$0xff]  }
 0xb22   : > { %11880 = vmatmul.mubr.msk.bf16.vlgmr.msra.gmra.mrb[32].mxu1 %vm2941_vm4, %v3748_v42  ;;  %v12596_v42 = vld [vmem:[%s14786_s21 + $0xa8] ss:$12 sps:$4 sm:$0xff]  }
 0xb23   : > { %11890 = vmatpush3.bf16.msra.mxu1 %v3864_v61  ;;  %11891 = vmatprep.mubr.msk.bf16.mxu1 %vm14154_vm0, %v14153_v53  ;;  %v12599_v61 = vld [vmem:[%s14786_s21 + $0xc0] ss:$12 sps:$4 sm:$0xff]  }
 0xb24   : > { %11901 = vmatprep.subr.bf16.mxu1 %v14153_v53 }
 0xb2a   : > { %11892 = vmatmul.mubr.msk.bf16.vlgmr.msra.gmra.mrb[36].mxu1 %vm2941_vm4, %v3858_v4  ;;  %v12611_v4 = vld [vmem:[%s14786_s21 + $0xf4] ss:$12 sps:$4 sm:$0xff]  }
 0xb2b   : > { %11902 = vmatpush3.bf16.msra.mxu1 %v3976_v8  ;;  %11903 = vmatprep.mubr.msk.bf16.mxu1 %vm14154_vm0, %v14153_v53  ;;  %v12612_v8 = vld [vmem:[%s14786_s21 + $0xf8] ss:$12 sps:$4 sm:$0xff]  }
 0xb2c   : > { %11913 = vmatprep.subr.bf16.mxu1 %v14153_v53 }
 0xb32   : > { %11904 = vmatmul.mubr.msk.bf16.vlgmr.msra.gmra.mrb[40].mxu1 %vm2941_vm4, %v3969_v48  ;;  %v12614_v48 = vld [vmem:[%s14786_s21 + $0x108] ss:$12 sps:$4 sm:$0xff]  }
 0xb33   : > { %11914 = vmatpush3.bf16.msra.mxu1 %v4085_v56  ;;  %11915 = vmatprep.mubr.msk.bf16.mxu1 %vm14154_vm0, %v14153_v53  ;;  %v12616_v56 = vld [vmem:[%s14786_s21 + $0x10c] ss:$12 sps:$4 sm:$0xff]  }
 0xb34   : > { %11925 = vmatprep.subr.bf16.mxu1 %v14153_v53 }
 0xb47   : > { %v4076_v10 = vpop.xlane.xlu1 %4075 }
 0xb48   : > { %13535 = vrcp.f32 %v4076_v10  ;;  %v12617_v10 = vld [vmem:[%s14786_s21 + $0x110] ss:$12 sps:$4 sm:$0xff]  }
 0xb4b   : > { %v4187_v12 = vpop.xlane.xlu1 %4186 }
 0xb4c   : > { %13537 = vrcp.f32 %v4187_v12 }
 0xb4f   : > { %v4192_v15 = vpop.permute.xlu1 %4191 }
 0xb50   : > { %v4197_v58 = vsel %vm2957_vm1, %v4192_v15, 0  ;;  %v12621_v15 = vld [vmem:[%s14786_s21 + $0x124] ss:$12 sps:$4 sm:$0xff]  }
 0xb52   : > { %v13536_v49 = vpop.eup %13535 }
 0xb53   : > { %v4078_v27 = vmul.f32 %v13536_v49, %v15427_v19  ;;  %v12618_v49 = vld [vmem:[%s14786_s21 + $0x50] ss:$12 sps:$4 sm:$0xff]  }
 0xb55   : > { %v4079_v18 = vpack.c.bf16 %v4078_v27, %v4078_v27 }
 0xb56   : > { %v13538_v20 = vpop.eup %13537 }
 0xb57   : > { %11916 = vmatmul.mubr.msk.bf16.vlgmr.msra.gmra.mrb[44].mxu1 %vm2941_vm4, %v4079_v18  ;;  %v4189_v22 = vmul.f32 %v13538_v20, %v15431_v21  ;;  %v12577_v21 = vld [vmem:[%s14786_s21 + $0x4] ss:$12 sps:$4 sm:$0xff]   ;;  %v12622_v18 = vld [vmem:[%s14786_s21 + $0x128] ss:$12 sps:$4 sm:$0xff]  }
 0xb58   : > { %11926 = vmatpush3.bf16.msra.mxu1 %v4197_v58  ;;  %11927 = vmatprep.mubr.msk.bf16.mxu1 %vm14154_vm0, %v14153_v53  ;;  %v12619_v58 = vld [vmem:[%s14786_s21 + $0x120] ss:$12 sps:$4 sm:$0xff]  }
 0xb59   : > { %v4190_v7 = vpack.c.bf16 %v4189_v22, %v4189_v22  ;;  %4770 = vmatprep.subr.bf16.mxu0 %v12577_v21  ;;  %11573 = vmatprep.subr.bf16.mxu1 %v12602_v3 }
 0xb5a   : > { %4771 = vmatpush1.bf16.msra.mxu0 %v12575_v38 }
 0xb5b   : > { %4772 = vmatprep.subr.bf16.mxu0 %v12580_v39 }
 0xb5e   : > { %4773 = vmatpush1.bf16.msra.mxu0 %v12578_v6 }
 0xb5f   : > { %11928 = vmatmul.mubr.msk.bf16.vlgmr.msra.gmra.mrb[48].mxu1 %vm2941_vm4, %v4190_v7  ;;  %4774 = vmatprep.subr.bf16.mxu0 %v12583_v13  ;;  %v12623_v7 = vld [vmem:[%s14786_s21 + $0x68] ss:$12 sps:$4 sm:$0xff]   ;;  %v12633_v13 = vld [vmem:[%s14786_s21 + $0x98] ss:$12 sps:$4 sm:$0xff]  }
 0xb60   : > { %11574 = vmatpush3.bf16.msra.mxu1 %v12603_v52  ;;  %v12637_v52 = vld [vmem:[%s14786_s21 + $0x170] ss:$12 sps:$4 sm:$0xff]  }
 0xb61   : > { %11575 = vmatprep.subr.bf16.mxu1 %v12607_v54  ;;  %v12638_v54 = vld [vmem:[%s14786_s21 + $0xb0] ss:$12 sps:$4 sm:$0xff]  }
 0xb62   : > { %4775 = vmatpush1.bf16.msra.mxu0 %v12581_v45  ;;  %v12636_v45 = vld [vmem:[%s14786_s21 + $0x16c] ss:$12 sps:$4 sm:$0xff]  }
 0xb63   : > { %4776 = vmatprep.subr.bf16.mxu0 %v12586_v43 }
 0xb64   : > { %11576 = vmatpush3.bf16.msra.mxu1 %v12608_v29 }
 0xb65   : > { %11577 = vmatprep.subr.bf16.mxu1 %v12612_v8 }
 0xb66   : > { %4777 = vmatpush1.bf16.msra.mxu0 %v12584_v57 }
 0xb67   : > { %4778 = vmatprep.subr.bf16.mxu0 %v12589_v2 }
 0xb68   : > { %11578 = vmatpush3.bf16.msra.mxu1 %v12613_v23 }
 0xb69   : > { %11579 = vmatprep.subr.bf16.mxu1 %v12617_v10 }
 0xb6a   : > { %4779 = vmatpush1.bf16.msra.mxu0 %v12587_v11 }
 0xb6b   : > { %4780 = vmatprep.subr.bf16.mxu0 %v12592_v1 }
 0xb6c   : > { %11580 = vmatpush3.bf16.msra.mxu1 %v12618_v49 }
 0xb6d   : > { %11581 = vmatprep.subr.bf16.mxu1 %v12622_v18 }
 0xb6e   : > { %4781 = vmatpush1.bf16.msra.mxu0 %v12590_v50 }
 0xb6f   : > { %4782 = vmatprep.subr.bf16.mxu0 %v12595_v62 }
 0xb70   : > { %11582 = vmatpush3.bf16.msra.mxu1 %v12623_v7  ;;  %v12645_v7 = vld [vmem:[%s14786_s21 + $0x19c] ss:$12 sps:$4 sm:$0xff]  }
 0xb72   : > { %4783 = vmatpush1.bf16.msra.mxu0 %v12593_v63 }
 0xb73   : > { %4784 = vmatprep.subr.bf16.mxu0 %v12598_v26 }
 0xb76   : > { %4785 = vmatpush1.bf16.msra.mxu0 %v12596_v42 }
 0xb77   : > { %4786 = vmatprep.subr.bf16.mxu0 %v12601_v51 }
 0xb7a   : > { %4787 = vmatpush1.bf16.msra.mxu0 %v12599_v61 }
 0xb7b   : > { %4788 = vmatprep.subr.bf16.mxu0 %v12606_v0 }
 0xb7e   : > { %4789 = vmatpush1.bf16.msra.mxu0 %v12604_v46 }
 0xb7f   : > { %4790 = vmatprep.subr.bf16.mxu0 %v12611_v4 }
 0xb82   : > { %4791 = vmatpush1.bf16.msra.mxu0 %v12609_v5  ;;  %v3001_v5 = vpack.c.bf16 %v15217_v14, %v15217_v14 }
 0xb83   : > { %4792 = vmatprep.subr.bf16.mxu0 %v12616_v56 }
 0xb86   : > { %4793 = vmatpush1.bf16.msra.mxu0 %v12614_v48 }
 0xb87   : > { %4794 = vmatprep.subr.bf16.mxu0 %v12621_v15 }
 0xb8a   : > { %4795 = vmatpush1.bf16.msra.mxu0 %v12619_v58  ;;  %v12642_v58 = vld [vmem:[%s14786_s21 + $0x188] ss:$12 sps:$4 sm:$0xff]  }
 0xba8   : > { %v15502_v19 = vpop.f32.mrb[12].mxu1 }
 0xba9   : > { %v11821_v24 = vpop.f32.mrb[13].mxu1 }
 0xbaa   : > { %v3219_v16 = vpop.f32.mrb[14].mxu1  ;;  %v12626_v24 = vld [vmem:[%s14786_s21 + $0x13c] ss:$12 sps:$4 sm:$0xff]  }
 0xbab   : > { %v11822_v25 = vpop.f32.mrb[15].mxu1  ;;  %v12627_v16 = vld [vmem:[%s14786_s21 + $0x140] ss:$12 sps:$4 sm:$0xff]   ;;  %4796 = vmatprep.subr.bf16.mxu0 %v12626_v24 }
 0xbac   : > { %v12624_v25 = vld [vmem:[%s14786_s21 + $0x138] ss:$12 sps:$4 sm:$0xff]   ;;  %11583 = vmatprep.subr.bf16.mxu1 %v12627_v16  ;;  %v12646_v24 = vld [vmem:[%s14786_s21 + $0x1a0] ss:$12 sps:$4 sm:$0xff]  }
 0xbad   : > { %4797 = vmatpush1.bf16.msra.mxu0 %v12624_v25  ;;  %v12649_v16 = vld [vmem:[%s14786_s21 + $0x1b4] ss:$12 sps:$4 sm:$0xff]   ;;  %v12647_v25 = vld [vmem:[%s14786_s21 + $0x1b0] ss:$12 sps:$4 sm:$0xff]  }
 0xbb9   : > { %v15504_v28 = vpop.f32.mrb[16].mxu1 }
 0xbba   : > { %v11833_v35 = vpop.f32.mrb[17].mxu1  ;;  %v3337_v11 = vpack.c.bf16 %v15504_v28, %v15504_v28  ;;  %v3561_v28 = vpop.permute.xlu1 %3560 }
 0xbbb   : > { %v3334_v36 = vpop.f32.mrb[18].mxu1  ;;  %v12628_v35 = vld [vmem:[%s14786_s21 + $0x80] ss:$12 sps:$4 sm:$0xff]   ;;  %v3570_v48 = vsel %vm2893_vm2, %v3001_v5, %v3561_v28 }
 0xbbc   : > { %v11834_v37 = vpop.f32.mrb[19].mxu1  ;;  %11584 = vmatpush3.bf16.msra.mxu1 %v12628_v35  ;;  %v12650_v35 = vld [vmem:[%s14786_s21 + $0x1b8] ss:$12 sps:$4 sm:$0xff]  }
 0xbbd   : > { %v12631_v37 = vld [vmem:[%s14786_s21 + $0x154] ss:$12 sps:$4 sm:$0xff]  }
 0xbbe   : > { %4798 = vmatprep.subr.bf16.mxu0 %v12631_v37  ;;  %v12651_v37 = vld [vmem:[%s14786_s21 + $0x1c8] ss:$12 sps:$4 sm:$0xff]  }
 0xbc1   : > { %v15509_v40 = vpop.f32.mrb[20].mxu1 }
 0xbc2   : > { %v11845_v44 = vpop.f32.mrb[21].mxu1 }
 0xbc3   : > { %v3440_v60 = vpop.f32.mrb[22].mxu1  ;;  %v12629_v44 = vld [vmem:[%s14786_s21 + $0x150] ss:$12 sps:$4 sm:$0xff]  }
 0xbc4   : > { %v11846_v47 = vpop.f32.mrb[23].mxu1  ;;  %v12632_v60 = vld [vmem:[%s14786_s21 + $0x158] ss:$12 sps:$4 sm:$0xff]   ;;  %4799 = vmatpush1.bf16.msra.mxu0 %v12629_v44  ;;  %v12658_v44 = vld [vmem:[%s14786_s21 + $0x1e8] ss:$12 sps:$4 sm:$0xff]  }
 0xbc5   : > { %11585 = vmatprep.subr.bf16.mxu1 %v12632_v60  ;;  %v12634_v47 = vld [vmem:[%s14786_s21 + $0x168] ss:$12 sps:$4 sm:$0xff]   ;;  %4800 = vmatprep.subr.bf16.mxu0 %v12636_v45  ;;  %v12659_v60 = vld [vmem:[%s14786_s21 + $0x1f8] ss:$12 sps:$4 sm:$0xff]   ;;  %v12663_v45 = vld [vmem:[%s14786_s21 + $0x210] ss:$12 sps:$4 sm:$0xff]  }
 0xbc6   : > { %11586 = vmatpush3.bf16.msra.mxu1 %v12633_v13  ;;  %v12662_v13 = vld [vmem:[%s14786_s21 + $0x200] ss:$12 sps:$4 sm:$0xff]  }
 0xbc7   : > { %11587 = vmatprep.subr.bf16.mxu1 %v12637_v52  ;;  %v12669_v52 = vld [vmem:[%s14786_s21 + $0x22c] ss:$12 sps:$4 sm:$0xff]  }
 0xbc8   : > { %4801 = vmatpush1.bf16.msra.mxu0 %v12634_v47  ;;  %v12665_v47 = vld [vmem:[%s14786_s21 + $0x214] ss:$12 sps:$4 sm:$0xff]  }
 0xbc9   : > { %v3552_v55 = vpop.f32.mrb[24].mxu1 }
 0xbca   : > { %v3558_v9 = vpack.c.bf16 %v3552_v55, %v3552_v55  ;;  %v11857_v41 = vpop.f32.mrb[25].mxu1  ;;  %11588 = vmatpush3.bf16.msra.mxu1 %v12638_v54  ;;  %v12670_v54 = vld [vmem:[%s14786_s21 + $0x230] ss:$12 sps:$4 sm:$0xff]  }
 0xbcb   : > { %v3555_v59 = vpop.f32.mrb[26].mxu1  ;;  %11931 = vmatprep.subr.bf16.mxu1 %v14153_v53 }
 0xbcc   : > { %3566 = vrot.lane.b32.xlu1 %v3558_v9, %s14155_s14  ;;  %v11858_v31 = vpop.f32.mrb[27].mxu1  ;;  %v12641_v9 = vld [vmem:[%s14786_s21 + $0x184] ss:$12 sps:$4 sm:$0xff]  }
 0xbcd   : > { %4813 = vmatprep.subr.bf16.mxu0 %v12641_v9 }
 0xbed   : > { %v15540_v12 = vpop.f32.mrb[28].mxu1 }
 0xbee   : > { %v11869_v27 = vpop.f32.mrb[29].mxu1  ;;  %v3685_v46 = vpack.c.bf16 %v15540_v12, %v15540_v12  ;;  %v3222_v12 = vpack.c.bf16 %v15502_v19, %v15502_v19  ;;  %v12643_v19 = vld [vmem:[%s14786_s21 + $0x198] ss:$12 sps:$4 sm:$0xff]  }
 0xbef   : > { %v3682_v20 = vpop.f32.mrb[30].mxu1 }
 0xbf0   : > { %v11870_v22 = vpop.f32.mrb[31].mxu1  ;;  %v12639_v20 = vld [vmem:[%s14786_s21 + $0x180] ss:$12 sps:$4 sm:$0xff]  }
 0xbf5   : > { %v3791_v36 = vpop.f32.mrb[32].mxu1 }
 0xbf6   : > { %v3797_v38 = vpack.c.bf16 %v3791_v36, %v3791_v36  ;;  %v11881_v21 = vpop.f32.mrb[33].mxu1  ;;  %v12653_v36 = vld [vmem:[%s14786_s21 + $0x1cc] ss:$12 sps:$4 sm:$0xff]  }
 0xbf7   : > { %v3794_v39 = vpop.f32.mrb[34].mxu1  ;;  %v12657_v21 = vld [vmem:[%s14786_s21 + $0x1e4] ss:$12 sps:$4 sm:$0xff]  }
 0xbf8   : > { %4241 = vrot.lane.b32.xlu0 %v3797_v38, %s14155_s14  ;;  %v11882_v6 = vpop.f32.mrb[35].mxu1  ;;  %v12654_v38 = vld [vmem:[%s14786_s21 + $0x1d0] ss:$12 sps:$4 sm:$0xff]   ;;  %v12655_v39 = vld [vmem:[%s14786_s21 + $0x1e0] ss:$12 sps:$4 sm:$0xff]  }
 0xbf9   : > { %v12661_v6 = vld [vmem:[%s14786_s21 + $0x1fc] ss:$12 sps:$4 sm:$0xff]  }
 0xbfd   : > { %v3900_v3 = vpop.f32.mrb[36].mxu1 }
 0xbfe   : > { %v11893_v43 = vpop.f32.mrb[37].mxu1  ;;  %v3906_v10 = vpack.c.bf16 %v3900_v3, %v3900_v3  ;;  %v12666_v3 = vld [vmem:[%s14786_s21 + $0x218] ss:$12 sps:$4 sm:$0xff]  }
 0xbff   : > { %v3903_v55 = vpop.f32.mrb[38].mxu1  ;;  %v12667_v43 = vld [vmem:[%s14786_s21 + $0x228] ss:$12 sps:$4 sm:$0xff]  }
 0xc00   : > { %v11894_v29 = vpop.f32.mrb[39].mxu1 }
 0xc05   : > { %v4012_v41 = vpop.f32.mrb[40].mxu1 }
 0xc06   : > { %v4018_v57 = vpack.c.bf16 %v4012_v41, %v4012_v41  ;;  %v11905_v59 = vpop.f32.mrb[41].mxu1  ;;  %v3443_v41 = vpack.c.bf16 %v15509_v40, %v15509_v40 }
 0xc07   : > { %v4015_v2 = vpop.f32.mrb[42].mxu1 }
 0xc08   : > { %4244 = vrot.lane.b32.xlu0 %v4018_v57, %s14155_s14  ;;  %v11906_v31 = vpop.f32.mrb[43].mxu1 }
 0xc0c   : > { %3563 = vrot.lane.b32.xlu0 %v3337_v11, %s14155_s14 }
 0xc2a   : > { %v15566_v1 = vpop.f32.mrb[44].mxu1 }
 0xc2b   : > { %v11917_v50 = vpop.f32.mrb[45].mxu1  ;;  %v4127_v55 = vpack.c.bf16 %v15566_v1, %v15566_v1 }
 0xc2c   : > { %v4124_v62 = vpop.f32.mrb[46].mxu1 }
 0xc2d   : > { %v11918_v63 = vpop.f32.mrb[47].mxu1 }
 0xc32   : > { %v4233_v26 = vpop.f32.mrb[48].mxu1 }
 0xc33   : > { %v4239_v42 = vpack.c.bf16 %v4233_v26, %v4233_v26  ;;  %v11929_v51 = vpop.f32.mrb[49].mxu1  ;;  %v4369_v26 = vld [vmem:[%s816_s18] sm:$0x7] }
 0xc34   : > { %v4236_v61 = vpop.f32.mrb[50].mxu1  ;;  %v4374_v40 = vrot.slane %v4369_v26, %v14942_v34  ;;  %v4378_v51 = vrot.slane %v4369_v26, %v14936_v32 }
 0xc35   : > { %4247 = vrot.lane.b32.xlu0 %v4239_v42, %s14155_s14  ;;  %v11930_v0 = vpop.f32.mrb[51].mxu1  ;;  %v4382_v42 = vrot.slane %v4369_v26, %v14939_v33  ;;  %v12704_v26 = vld [vmem:[%s14800_s12 + $0x1e8] ss:$48 sps:$4 sm:$0xff]  }
 0xc3e   : > { %v3567_v29 = vpop.permute.xlu1 %3566 }
 0xc3f   : > { %v3576_v2 = vsel %vm2893_vm2, %v3443_v41, %v3567_v29  ;;  %v12683_v29 = vld [vmem:[%s14800_s12 + $0xc0] ss:$48 sps:$4 sm:$0xff]   ;;  %v12691_v41 = vld [vmem:[%s14800_s12 + $0x124] ss:$48 sps:$4 sm:$0xff]  }
 0xc6a   : > { %v4242_v4 = vpop.permute.xlu0 %4241 }
 0xc6b   : > { %v4251_v8 = vsel %vm2893_vm2, %v3685_v46, %v4242_v4 }
 0xc6c   : > { %v4261_v23 = vrot.slane %v4251_v8, 4 }
 0xc6e   : > { %v4265_v56 = vsel %vm2957_vm1, %v3570_v48, %v4261_v23 }
 0xc7a   : > { %v4245_v49 = vpop.permute.xlu0 %4244 }
 0xc7b   : > { %v4254_v27 = vsel %vm2893_vm2, %v3906_v10, %v4245_v49  ;;  %v13543_v49 = vld [vmem:[#allocation2] sm:$0xff] }
 0xc7c   : > { %v4262_v15 = vrot.slane %v4254_v27, 4 }
 0xc7e   : > { %v3564_v18 = vpop.permute.xlu0 %3563 }
 0xc7f   : > { %v3573_v14 = vsel %vm2893_vm2, %v3222_v12, %v3564_v18 }
 0xc80   : > { %v4268_v22 = vsel %vm2957_vm1, %v3573_v14, %v4262_v15 }
 0xc81   : > { %4802 = vmatprep.mubr.bf16.mxu0 %v4268_v22  ;;  %4888 = vmatprep.mubr.bf16.mxu1 %v4268_v22 }
 0xc82   : > { %4803 = vmatmul.mubr.bf16.vlgmr.msra.gmra.mrb[72].mxu0 %v4265_v56  ;;  %4889 = vmatmul.mubr.bf16.vlgmr.msra.gmra.mrb[52].mxu1 %v4265_v56 }
 0xc83   : > { %4814 = vmatpush1.bf16.msra.mxu0 %v12639_v20  ;;  %11932 = vmatpush3.bf16.msra.mxu1 %v12642_v58  ;;  %v13544_v20 = vld [vmem:[#allocation2 + $0x8] sm:$0xff] }
 0xc84   : > { %4815 = vmatprep.subr.bf16.mxu0 %v12645_v7  ;;  %11933 = vmatprep.subr.bf16.mxu1 %v14153_v53  ;;  %v13545_v7 = vld [vmem:[#allocation2 + $0x18] sm:$0xff] }
 0xc85   : > { %4845 = vmatprep.mubr.bf16.mxu0 %v14152_v17  ;;  %11947 = vmatprep.mubr.msk.bf16.mxu1 %vm14154_vm0, %v14153_v53 }
 0xc87   : > { %4816 = vmatpush1.bf16.msra.mxu0 %v12643_v19  ;;  %11934 = vmatpush3.bf16.msra.mxu1 %v12646_v24  ;;  %v13546_v24 = vld [vmem:[#allocation2 + $0x10] sm:$0xff] }
 0xc88   : > { %4817 = vmatprep.subr.bf16.mxu0 %v12649_v16  ;;  %11935 = vmatprep.subr.bf16.mxu1 %v14153_v53 }
 0xc8b   : > { %4818 = vmatpush1.bf16.msra.mxu0 %v12647_v25  ;;  %11936 = vmatpush3.bf16.msra.mxu1 %v12650_v35  ;;  %v13547_v25 = vld [vmem:[#allocation2 + $0x20] sm:$0xff] }
 0xc8c   : > { %4819 = vmatprep.subr.bf16.mxu0 %v12653_v36  ;;  %11937 = vmatprep.subr.bf16.mxu1 %v14153_v53 }
 0xc8f   : > { %4820 = vmatpush1.bf16.msra.mxu0 %v12651_v37  ;;  %11938 = vmatpush3.bf16.msra.mxu1 %v12654_v38  ;;  %v13548_v37 = vld [vmem:[#allocation2 + $0x28] sm:$0xff] }
 0xc90   : > { %4821 = vmatprep.subr.bf16.mxu0 %v12657_v21  ;;  %11939 = vmatprep.subr.bf16.mxu1 %v14153_v53 }
 0xc93   : > { %4822 = vmatpush1.bf16.msra.mxu0 %v12655_v39  ;;  %11940 = vmatpush3.bf16.msra.mxu1 %v12658_v44 }
 0xc94   : > { %4823 = vmatprep.subr.bf16.mxu0 %v12661_v6  ;;  %11941 = vmatprep.subr.bf16.mxu1 %v14153_v53  ;;  %v12671_v6 = vld [vmem:[%s14800_s12] ss:$48 sps:$4 sm:$0xff]  }
 0xc97   : > { %4824 = vmatpush1.bf16.msra.mxu0 %v12659_v60  ;;  %11942 = vmatpush3.bf16.msra.mxu1 %v12662_v13  ;;  %v12673_v60 = vld [vmem:[%s14800_s12 + $0x4] ss:$48 sps:$4 sm:$0xff]   ;;  %v12674_v13 = vld [vmem:[%s14800_s12 + $0x8] ss:$48 sps:$4 sm:$0xff]  }
 0xc98   : > { %4825 = vmatprep.subr.bf16.mxu0 %v12665_v47  ;;  %11943 = vmatprep.subr.bf16.mxu1 %v14153_v53  ;;  %v12676_v47 = vld [vmem:[%s14800_s12 + $0xc] ss:$48 sps:$4 sm:$0xff]  }
 0xc9b   : > { %4826 = vmatpush1.bf16.msra.mxu0 %v12663_v45  ;;  %11944 = vmatpush3.bf16.msra.mxu1 %v12666_v3  ;;  %v12679_v45 = vld [vmem:[%s14800_s12 + $0x64] ss:$48 sps:$4 sm:$0xff]   ;;  %v12682_v3 = vld [vmem:[%s14800_s12 + $0x6c] ss:$48 sps:$4 sm:$0xff]  }
 0xc9c   : > { %4827 = vmatprep.subr.bf16.mxu0 %v12669_v52  ;;  %11945 = vmatprep.subr.bf16.mxu1 %v14153_v53  ;;  %v12677_v52 = vld [vmem:[%s14800_s12 + $0x60] ss:$48 sps:$4 sm:$0xff]  }
 0xc9f   : > { %4828 = vmatpush1.bf16.msra.mxu0 %v12667_v43  ;;  %11946 = vmatpush3.bf16.msra.mxu1 %v12670_v54  ;;  %v12680_v43 = vld [vmem:[%s14800_s12 + $0x68] ss:$48 sps:$4 sm:$0xff]   ;;  %v12685_v54 = vld [vmem:[%s14800_s12 + $0xc4] ss:$48 sps:$4 sm:$0xff]  }
 0xca0   : > { %6827 = vmatprep.subr.bf16.mxu1 %v12673_v60  ;;  %6913 = vmatprep.subr.bf16.mxu0 %v12676_v47 }
 0xca7   : > { %v4248_v9 = vpop.permute.xlu0 %4247 }
 0xca8   : > { %v4257_v57 = vsel %vm2893_vm2, %v4127_v55, %v4248_v9  ;;  %v12688_v55 = vld [vmem:[%s14800_s12 + $0xcc] ss:$48 sps:$4 sm:$0xff]   ;;  %v12686_v9 = vld [vmem:[%s14800_s12 + $0xc8] ss:$48 sps:$4 sm:$0xff]  }
 0xca9   : > { %v4263_v59 = vrot.slane %v4257_v57, 4  ;;  %v12694_v57 = vld [vmem:[%s14800_s12 + $0x12c] ss:$48 sps:$4 sm:$0xff]  }
 0xcab   : > { %v4271_v31 = vsel %vm2957_vm1, %v3576_v2, %v4263_v59  ;;  %v12689_v59 = vld [vmem:[%s14800_s12 + $0x120] ss:$48 sps:$4 sm:$0xff]   ;;  %v12692_v2 = vld [vmem:[%s14800_s12 + $0x128] ss:$48 sps:$4 sm:$0xff]  }
 0xcac   : > { %4846 = vmatmul.mubr.bf16.vlgmr.msra.gmra.mrb[72].mxu0 %v4271_v31  ;;  %11948 = vmatmul.mubr.bf16.vlgmr.msra.gmra.mrb[56].mxu1 %v4271_v31  ;;  %v12697_v31 = vld [vmem:[%s14800_s12 + $0x184] ss:$48 sps:$4 sm:$0xff]  }
 0xcad   : > { %6828 = vmatpush1.bf16.msra.mxu1 %v12671_v6  ;;  %6914 = vmatpush1.bf16.msra.mxu0 %v12674_v13 }
 0xcae   : > { %6829 = vmatprep.subr.bf16.mxu1 %v12679_v45  ;;  %6915 = vmatprep.subr.bf16.mxu0 %v12682_v3 }
 0xcb1   : > { %6830 = vmatpush1.bf16.msra.mxu1 %v12677_v52  ;;  %6916 = vmatpush1.bf16.msra.mxu0 %v12680_v43  ;;  %v12733_v43 = vld [vmem:[%s14800_s12 + $0x3c4] ss:$48 sps:$4 sm:$0xff]  }
 0xcb2   : > { %6831 = vmatprep.subr.bf16.mxu1 %v12685_v54  ;;  %6917 = vmatprep.subr.bf16.mxu0 %v12688_v55  ;;  %v12736_v54 = vld [vmem:[%s14800_s12 + $0x3cc] ss:$48 sps:$4 sm:$0xff]   ;;  %v12731_v55 = vld [vmem:[%s14800_s12 + $0x3c0] ss:$48 sps:$4 sm:$0xff]  }
 0xcb5   : > { %6832 = vmatpush1.bf16.msra.mxu1 %v12683_v29  ;;  %6918 = vmatpush1.bf16.msra.mxu0 %v12686_v9  ;;  %v12734_v29 = vld [vmem:[%s14800_s12 + $0x3c8] ss:$48 sps:$4 sm:$0xff]   ;;  %v12739_v9 = vld [vmem:[%s14800_s12 + $0x424] ss:$48 sps:$4 sm:$0xff]  }
 0xcb6   : > { %6833 = vmatprep.subr.bf16.mxu1 %v12691_v41  ;;  %6919 = vmatprep.subr.bf16.mxu0 %v12694_v57  ;;  %v12742_v41 = vld [vmem:[%s14800_s12 + $0x42c] ss:$48 sps:$4 sm:$0xff]   ;;  %v12737_v57 = vld [vmem:[%s14800_s12 + $0x420] ss:$48 sps:$4 sm:$0xff]  }
 0xcb9   : > { %6834 = vmatpush1.bf16.msra.mxu1 %v12689_v59  ;;  %6920 = vmatpush1.bf16.msra.mxu0 %v12692_v2  ;;  %v12740_v59 = vld [vmem:[%s14800_s12 + $0x428] ss:$48 sps:$4 sm:$0xff]   ;;  %v12743_v2 = vld [vmem:[%s14800_s12 + $0x480] ss:$48 sps:$4 sm:$0xff]  }
 0xcba   : > { %6835 = vmatprep.subr.bf16.mxu1 %v12697_v31  ;;  %v12745_v31 = vld [vmem:[%s14800_s12 + $0x484] ss:$48 sps:$4 sm:$0xff]  }
 0xd55   : > { %v11589_v53 = vpop.f32.mrb[52].mxu1 }
 0xd56   : > { %v11590_v11 = vpop.f32.mrb[53].mxu1 }
 0xd57   : > { %v11591_v50 = vadd.f32 %v11590_v11, %v11589_v53  ;;  %v11592_v62 = vpop.f32.mrb[54].mxu1  ;;  %v12700_v53 = vld [vmem:[%s14800_s12 + $0x18c] ss:$48 sps:$4 sm:$0xff]   ;;  %v12695_v11 = vld [vmem:[%s14800_s12 + $0x180] ss:$48 sps:$4 sm:$0xff]  }
 0xd58   : > { %v11593_v1 = vpop.f32.mrb[55].mxu1  ;;  %6921 = vmatprep.subr.bf16.mxu0 %v12700_v53  ;;  %6836 = vmatpush1.bf16.msra.mxu1 %v12695_v11  ;;  %v12746_v53 = vld [vmem:[%s14800_s12 + $0x488] ss:$48 sps:$4 sm:$0xff]   ;;  %v12748_v11 = vld [vmem:[%s14800_s12 + $0x48c] ss:$48 sps:$4 sm:$0xff]  }
 0xd59   : > { %v11594_v63 = vadd.f32 %v11593_v1, %v11592_v62  ;;  %v4891_v61 = vadd.f32 %v11591_v50, %v4382_v42  ;;  %v12698_v50 = vld [vmem:[%s14800_s12 + $0x188] ss:$48 sps:$4 sm:$0xff]   ;;  %v12703_v62 = vld [vmem:[%s14800_s12 + $0x1e4] ss:$48 sps:$4 sm:$0xff]   ;;  %v12706_v1 = vld [vmem:[%s14800_s12 + $0x1ec] ss:$48 sps:$4 sm:$0xff]  }
 0xd5a   : > { %6922 = vmatpush1.bf16.msra.mxu0 %v12698_v50  ;;  %6837 = vmatprep.subr.bf16.mxu1 %v12703_v62  ;;  %v12751_v50 = vld [vmem:[%s14800_s12 + $0x4e4] ss:$48 sps:$4 sm:$0xff]   ;;  %v12754_v62 = vld [vmem:[%s14800_s12 + $0x4ec] ss:$48 sps:$4 sm:$0xff]  }
 0xd5b   : > { %v4894_v23 = vadd.f32 %v11594_v63, %v4382_v42  ;;  %v12701_v63 = vld [vmem:[%s14800_s12 + $0x1e0] ss:$48 sps:$4 sm:$0xff]   ;;  %v12709_v42 = vld [vmem:[%s14800_s12 + $0x244] ss:$48 sps:$4 sm:$0xff]   ;;  %6923 = vmatprep.subr.bf16.mxu0 %v12706_v1 }
 0xd5c   : > { %6838 = vmatpush1.bf16.msra.mxu1 %v12701_v63  ;;  %v12749_v1 = vld [vmem:[%s14800_s12 + $0x4e0] ss:$48 sps:$4 sm:$0xff]   ;;  %v12752_v63 = vld [vmem:[%s14800_s12 + $0x4e8] ss:$48 sps:$4 sm:$0xff]  }
 0xd5d   : > { %6839 = vmatprep.subr.bf16.mxu1 %v12709_v42  ;;  %v12760_v42 = vld [vmem:[%s14800_s12 + $0x54c] ss:$48 sps:$4 sm:$0xff]  }
 0xd5e   : > { %6924 = vmatpush1.bf16.msra.mxu0 %v12704_v26  ;;  %v12757_v26 = vld [vmem:[%s14800_s12 + $0x544] ss:$48 sps:$4 sm:$0xff]  }
 0xd7f   : > { %v4847_v0 = vpop.f32.mrb[72].mxu0  ;;  %v4931_v46 = vpop.f32.mrb[56].mxu1 }
 0xd80   : > { %v11975_v28 = vadd.f32 %v4847_v0, %v4374_v40  ;;  %v4932_v4 = vadd.f32 %v4931_v46, %v4891_v61  ;;  %v4849_v5 = vpop.f32.mrb[73].mxu0  ;;  %v11949_v8 = vpop.f32.mrb[57].mxu1  ;;  %v12710_v61 = vld [vmem:[%s14800_s12 + $0x248] ss:$48 sps:$4 sm:$0xff]   ;;  %v12715_v0 = vld [vmem:[%s14800_s12 + $0x2a4] ss:$48 sps:$4 sm:$0xff]  }
 0xd81   : > { %v11976_v48 = vadd.f32 %v4849_v5, %v4378_v51  ;;  %v4851_v56 = vpop.f32.mrb[74].mxu0  ;;  %v4934_v10 = vpop.f32.mrb[58].mxu1  ;;  %v12718_v46 = vld [vmem:[%s14800_s12 + $0x2ac] ss:$48 sps:$4 sm:$0xff]   ;;  %v12721_v5 = vld [vmem:[%s14800_s12 + $0x304] ss:$48 sps:$4 sm:$0xff]  }
 0xd82   : > { %v15626_v27 = vadd.f32 %v13543_v49, %v11975_v28  ;;  %v11977_v12 = vadd.f32 %v4851_v56, %v4374_v40  ;;  %v4935_v15 = vadd.f32 %v4934_v10, %v4894_v23  ;;  %v4853_v18 = vpop.f32.mrb[75].mxu0  ;;  %v11950_v14 = vpop.f32.mrb[59].mxu1  ;;  %v15632_v16 = vadd.f32 %v13546_v24, %v4932_v4  ;;  %v12712_v40 = vld [vmem:[%s14800_s12 + $0x24c] ss:$48 sps:$4 sm:$0xff]   ;;  %v12713_v28 = vld [vmem:[%s14800_s12 + $0x2a0] ss:$48 sps:$4 sm:$0xff]  }
 0xd83   : > { %v15628_v58 = vadd.f32 %v13544_v20, %v11976_v48  ;;  %v11978_v22 = vadd.f32 %v4853_v18, %v4378_v51  ;;  %v12707_v51 = vld [vmem:[%s14800_s12 + $0x240] ss:$48 sps:$4 sm:$0xff]   ;;  %6925 = vmatprep.subr.bf16.mxu0 %v12712_v40  ;;  %v12716_v4 = vld [vmem:[%s14800_s12 + $0x2a8] ss:$48 sps:$4 sm:$0xff]   ;;  %v12724_v8 = vld [vmem:[%s14800_s12 + $0x30c] ss:$48 sps:$4 sm:$0xff]  }
 0xd84   : > { %v15630_v19 = vadd.f32 %v13545_v7, %v11977_v12  ;;  %v15638_v38 = vadd.f32 %v13548_v37, %v4935_v15  ;;  %6840 = vmatpush1.bf16.msra.mxu1 %v12707_v51  ;;  %6926 = vmatpush1.bf16.msra.mxu0 %v12710_v61  ;;  %v12719_v23 = vld [vmem:[%s14800_s12 + $0x300] ss:$48 sps:$4 sm:$0xff]   ;;  %v12722_v48 = vld [vmem:[%s14800_s12 + $0x308] ss:$48 sps:$4 sm:$0xff]   ;;  %v12727_v56 = vld [vmem:[%s14800_s12 + $0x364] ss:$48 sps:$4 sm:$0xff]  }
 0xd85   : > { %v15634_v35 = vadd.f32 %v13547_v25, %v11978_v22  ;;  %v4946_v36 = vadd.f32 %v15628_v58, %v15626_v27  ;;  %6841 = vmatprep.subr.bf16.mxu1 %v12715_v0  ;;  %6927 = vmatprep.subr.bf16.mxu0 %v12718_v46  ;;  %v12730_v10 = vld [vmem:[%s14800_s12 + $0x36c] ss:$48 sps:$4 sm:$0xff]   ;;  %v12725_v49 = vld [vmem:[%s14800_s12 + $0x360] ss:$48 sps:$4 sm:$0xff]   ;;  %v12728_v12 = vld [vmem:[%s14800_s12 + $0x368] ss:$48 sps:$4 sm:$0xff]  }
 0xd86   : > { %v12755_v40 = vld [vmem:[%s14800_s12 + $0x540] ss:$48 sps:$4 sm:$0xff]   ;;  %v12758_v51 = vld [vmem:[%s14800_s12 + $0x548] ss:$48 sps:$4 sm:$0xff]   ;;  %v12763_v61 = vld [vmem:[%s14800_s12 + $0x5a4] ss:$48 sps:$4 sm:$0xff]  }
 0xd87   : > { %v4947_v21 = vadd.f32 %v4946_v36, %v15632_v16  ;;  %v4950_v39 = vadd.f32 %v15634_v35, %v15630_v19  ;;  %v12766_v0 = vld [vmem:[%s14800_s12 + $0x5ac] ss:$48 sps:$4 sm:$0xff]   ;;  %v12761_v46 = vld [vmem:[%s14800_s12 + $0x5a0] ss:$48 sps:$4 sm:$0xff]  }
 0xd88   : > { %6842 = vmatpush1.bf16.msra.mxu1 %v12713_v28  ;;  %6928 = vmatpush1.bf16.msra.mxu0 %v12716_v4  ;;  %v12764_v28 = vld [vmem:[%s14800_s12 + $0x5a8] ss:$48 sps:$4 sm:$0xff]   ;;  %v12769_v4 = vld [vmem:[%s14800_s12 + $0x604] ss:$48 sps:$4 sm:$0xff]  }
 0xd89   : > { %4948 = vadd.xlane.f32.xlu0 %v4947_v21  ;;  %v4951_v44 = vadd.f32 %v4950_v39, %v15638_v38  ;;  %6843 = vmatprep.subr.bf16.mxu1 %v12721_v5  ;;  %v12772_v5 = vld [vmem:[%s14800_s12 + $0x60c] ss:$48 sps:$4 sm:$0xff]  }
 0xd8a   : > { %6929 = vmatprep.subr.bf16.mxu0 %v12724_v8 }
 0xd8b   : > { %4952 = vadd.xlane.f32.xlu1 %v4951_v44 }
 0xd8c   : > { %6844 = vmatpush1.bf16.msra.mxu1 %v12719_v23  ;;  %6930 = vmatpush1.bf16.msra.mxu0 %v12722_v48 }
 0xd8d   : > { %6845 = vmatprep.subr.bf16.mxu1 %v12727_v56  ;;  %6931 = vmatprep.subr.bf16.mxu0 %v12730_v10 }
 0xd90   : > { %6846 = vmatpush1.bf16.msra.mxu1 %v12725_v49  ;;  %6932 = vmatpush1.bf16.msra.mxu0 %v12728_v12  ;;  %v15742_v12 = vld [vmem:[%s825_s19] sm:$0x7] }
 0xd91   : > { %6847 = vmatprep.subr.bf16.mxu1 %v12733_v43  ;;  %6933 = vmatprep.subr.bf16.mxu0 %v12736_v54 }
 0xd94   : > { %6848 = vmatpush1.bf16.msra.mxu1 %v12731_v55  ;;  %6934 = vmatpush1.bf16.msra.mxu0 %v12734_v29 }
 0xd95   : > { %6849 = vmatprep.subr.bf16.mxu1 %v12739_v9  ;;  %6935 = vmatprep.subr.bf16.mxu0 %v12742_v41  ;;  %v12767_v9 = vld [vmem:[%s14800_s12 + $0x600] ss:$48 sps:$4 sm:$0xff]   ;;  %v12770_v41 = vld [vmem:[%s14800_s12 + $0x608] ss:$48 sps:$4 sm:$0xff]  }
 0xd98   : > { %6850 = vmatpush1.bf16.msra.mxu1 %v12737_v57  ;;  %6936 = vmatpush1.bf16.msra.mxu0 %v12740_v59  ;;  %v12775_v57 = vld [vmem:[%s14800_s12 + $0x664] ss:$48 sps:$4 sm:$0xff]   ;;  %v12778_v59 = vld [vmem:[%s14800_s12 + $0x66c] ss:$48 sps:$4 sm:$0xff]  }
 0xd99   : > { %6851 = vmatprep.subr.bf16.mxu1 %v12745_v31  ;;  %6937 = vmatprep.subr.bf16.mxu0 %v12748_v11  ;;  %v12781_v31 = vld [vmem:[%s14800_s12 + $0x6c4] ss:$48 sps:$4 sm:$0xff]   ;;  %v12779_v11 = vld [vmem:[%s14800_s12 + $0x6c0] ss:$48 sps:$4 sm:$0xff]  }
 0xd9c   : > { %6852 = vmatpush1.bf16.msra.mxu1 %v12743_v2  ;;  %6938 = vmatpush1.bf16.msra.mxu0 %v12746_v53  ;;  %v12776_v2 = vld [vmem:[%s14800_s12 + $0x668] ss:$48 sps:$4 sm:$0xff]   ;;  %v12784_v53 = vld [vmem:[%s14800_s12 + $0x6cc] ss:$48 sps:$4 sm:$0xff]  }
 0xd9d   : > { %6853 = vmatprep.subr.bf16.mxu1 %v12751_v50  ;;  %6939 = vmatprep.subr.bf16.mxu0 %v12754_v62  ;;  %v12782_v50 = vld [vmem:[%s14800_s12 + $0x6c8] ss:$48 sps:$4 sm:$0xff]   ;;  %v12787_v62 = vld [vmem:[%s14800_s12 + $0x724] ss:$48 sps:$4 sm:$0xff]  }
 0xda0   : > { %6854 = vmatpush1.bf16.msra.mxu1 %v12749_v1  ;;  %6940 = vmatpush1.bf16.msra.mxu0 %v12752_v63  ;;  %v12790_v1 = vld [vmem:[%s14800_s12 + $0x72c] ss:$48 sps:$4 sm:$0xff]   ;;  %v12785_v63 = vld [vmem:[%s14800_s12 + $0x720] ss:$48 sps:$4 sm:$0xff]  }
 0xda1   : > { %6855 = vmatprep.subr.bf16.mxu1 %v12757_v26  ;;  %6941 = vmatprep.subr.bf16.mxu0 %v12760_v42  ;;  %v12788_v26 = vld [vmem:[%s14800_s12 + $0x728] ss:$48 sps:$4 sm:$0xff]   ;;  %v12793_v42 = vld [vmem:[%s14800_s12 + $0x784] ss:$48 sps:$4 sm:$0xff]  }
 0xda4   : > { %6856 = vmatpush1.bf16.msra.mxu1 %v12755_v40  ;;  %6942 = vmatpush1.bf16.msra.mxu0 %v12758_v51  ;;  %v12796_v40 = vld [vmem:[%s14800_s12 + $0x78c] ss:$48 sps:$4 sm:$0xff]   ;;  %v12791_v51 = vld [vmem:[%s14800_s12 + $0x780] ss:$48 sps:$4 sm:$0xff]  }
 0xda5   : > { %6857 = vmatprep.subr.bf16.mxu1 %v12763_v61  ;;  %6943 = vmatprep.subr.bf16.mxu0 %v12766_v0  ;;  %v12794_v61 = vld [vmem:[%s14800_s12 + $0x788] ss:$48 sps:$4 sm:$0xff]   ;;  %v12799_v0 = vld [vmem:[%s14800_s12 + $0x7e4] ss:$48 sps:$4 sm:$0xff]  }
 0xda8   : > { %6858 = vmatpush1.bf16.msra.mxu1 %v12761_v46  ;;  %6944 = vmatpush1.bf16.msra.mxu0 %v12764_v28  ;;  %v12802_v46 = vld [vmem:[%s14800_s12 + $0x7ec] ss:$48 sps:$4 sm:$0xff]   ;;  %v12797_v28 = vld [vmem:[%s14800_s12 + $0x7e0] ss:$48 sps:$4 sm:$0xff]  }
 0xda9   : > { %6870 = vmatprep.subr.bf16.mxu1 %v12769_v4  ;;  %6956 = vmatprep.subr.bf16.mxu0 %v12772_v5  ;;  %v12800_v4 = vld [vmem:[%s14800_s12 + $0x7e8] ss:$48 sps:$4 sm:$0xff]   ;;  %v12805_v5 = vld [vmem:[%s14800_s12 + $0x844] ss:$48 sps:$4 sm:$0xff]  }
 0xe16   : > { %v4949_v15 = vpop.xlane.xlu0 %4948 }
 0xe17   : > { %v4954_v18 = vmul.f32 0.0026041667, %v4949_v15 }
 0xe18   : > { %v4953_v14 = vpop.xlane.xlu1 %4952 }
 0xe19   : > { %v15685_v20 = vsub.f32 %v15626_v27, %v4954_v18  ;;  %v15688_v22 = vsub.f32 %v15628_v58, %v4954_v18  ;;  %v4955_v7 = vmul.f32 0.0026041667, %v4953_v14  ;;  %v15691_v24 = vsub.f32 %v15632_v16, %v4954_v18  ;;  %v15748_v18 = vld [vmem:[%s16609_s28] sm:$0x7] }
 0xe1b   : > { %v15694_v25 = vsub.f32 %v15630_v19, %v4955_v7  ;;  %v15697_v36 = vsub.f32 %v15634_v35, %v4955_v7  ;;  %v4962_v37 = vmul.f32 %v15685_v20, %v15685_v20  ;;  %v4963_v21 = vmul.f32 %v15688_v22, %v15688_v22 }
 0xe1c   : > { %v15708_v6 = vsub.f32 %v15638_v38, %v4955_v7  ;;  %v4964_v60 = vmul.f32 %v15691_v24, %v15691_v24  ;;  %v4996_v7 = vrot.slane %v15742_v12, %v14936_v32 }
 0xe1d   : > { %v4965_v39 = vmul.f32 %v15694_v25, %v15694_v25  ;;  %v4966_v44 = vmul.f32 %v15697_v36, %v15697_v36  ;;  %v4968_v13 = vadd.f32 %v4963_v21, %v4962_v37  ;;  %v4992_v21 = vrot.slane %v15742_v12, %v14942_v34 }
 0xe1e   : > { %v4967_v3 = vmul.f32 %v15708_v6, %v15708_v6 }
 0xe1f   : > { %v4969_v47 = vadd.f32 %v4968_v13, %v4964_v60  ;;  %v4972_v45 = vadd.f32 %v4966_v44, %v4965_v39  ;;  %v5018_v44 = vrot.slane %v15748_v18, %v14936_v32 }
 0xe21   : > { %4970 = vadd.xlane.f32.xlu0 %v4969_v47  ;;  %v4973_v52 = vadd.f32 %v4972_v45, %v4967_v3 }
 0xe25   : > { %4974 = vadd.xlane.f32.xlu0 %v4973_v52 }
 0xeae   : > { %v4971_v8 = vpop.xlane.xlu0 %4970 }
 0xeaf   : > { %v4976_v23 = vmul.f32 0.0026041667, %v4971_v8  ;;  %v12808_v8 = vld [vmem:[%s14800_s12 + $0x84c] ss:$48 sps:$4 sm:$0xff]  }
 0xeb1   : > { %v4978_v48 = vadd.f32 1e-05, %v4976_v23 }
 0xeb2   : > { %v4975_v56 = vpop.xlane.xlu0 %4974 }
 0xeb3   : > { %13539 = vrsqrt.f32 %v4978_v48  ;;  %v4977_v10 = vmul.f32 0.0026041667, %v4975_v56  ;;  %v5000_v56 = vrot.slane %v15742_v12, %v14939_v33  ;;  %v12809_v12 = vld [vmem:[%s14800_s12 + $0x8a0] ss:$48 sps:$4 sm:$0xff]  }
 0xeb5   : > { %v4979_v49 = vadd.f32 1e-05, %v4977_v10  ;;  %v12803_v10 = vld [vmem:[%s14800_s12 + $0x840] ss:$48 sps:$4 sm:$0xff]  }
 0xeb7   : > { %13541 = vrsqrt.f32 %v4979_v49  ;;  %v12806_v49 = vld [vmem:[%s14800_s12 + $0x848] ss:$48 sps:$4 sm:$0xff]  }
 0xebd   : > { %v15744_v15 = vpop.eup %13539 }
 0xebe   : > { %v4983_v14 = vmul.f32 %v15744_v15, %v15688_v22  ;;  %v4982_v37 = vmul.f32 %v15744_v15, %v15685_v20  ;;  %v5014_v22 = vrot.slane %v15748_v18, %v14942_v34  ;;  %v4984_v48 = vmul.f32 %v15744_v15, %v15691_v24  ;;  %v12812_v15 = vld [vmem:[%s14800_s12 + $0x8a8] ss:$48 sps:$4 sm:$0xff]  }
 0xebf   : > { %v5022_v24 = vrot.slane %v15748_v18, %v14939_v33 }
 0xec0   : > { %v5005_v13 = vmul.f32 %v4996_v7, %v4983_v14  ;;  %v5004_v47 = vmul.f32 %v4992_v21, %v4982_v37  ;;  %v12811_v14 = vld [vmem:[%s14800_s12 + $0x8a4] ss:$48 sps:$4 sm:$0xff]   ;;  %v5006_v37 = vmul.f32 %v5000_v56, %v4984_v48  ;;  %v12874_v48 = vld [vmem:[%s14800_s12 + $0x37c] ss:$48 sps:$4 sm:$0xff]  }
 0xec1   : > { %v15758_v39 = vpop.eup %13541 }
 0xec2   : > { %v4986_v60 = vmul.f32 %v15758_v39, %v15697_v36  ;;  %v4985_v20 = vmul.f32 %v15758_v39, %v15694_v25  ;;  %v5027_v52 = vadd.f32 %v5018_v44, %v5005_v13  ;;  %v5026_v54 = vadd.f32 %v5014_v22, %v5004_v47  ;;  %v12773_v25 = vld [vmem:[%s14800_s12 + $0x660] ss:$48 sps:$4 sm:$0xff]   ;;  %v12818_v13 = vld [vmem:[%s14800_s12 + $0x18] ss:$48 sps:$4 sm:$0xff]   ;;  %v12826_v47 = vld [vmem:[%s14800_s12 + $0x7c] ss:$48 sps:$4 sm:$0xff]  }
 0xec3   : > { %v4987_v23 = vmul.f32 %v15758_v39, %v15708_v6  ;;  %v12817_v39 = vld [vmem:[%s14800_s12 + $0x14] ss:$48 sps:$4 sm:$0xff]  }
 0xec4   : > { %v5008_v45 = vmul.f32 %v4996_v7, %v4986_v60  ;;  %v5007_v3 = vmul.f32 %v4992_v21, %v4985_v20  ;;  %v12814_v7 = vld [vmem:[%s14800_s12 + $0x8ac] ss:$48 sps:$4 sm:$0xff]   ;;  %v12815_v60 = vld [vmem:[%s14800_s12 + $0x10] ss:$48 sps:$4 sm:$0xff]   ;;  %v12823_v20 = vld [vmem:[%s14800_s12 + $0x74] ss:$48 sps:$4 sm:$0xff]  }
 0xec5   : > { %v5009_v6 = vmul.f32 %v5000_v56, %v4987_v23  ;;  %v12871_v23 = vld [vmem:[%s14800_s12 + $0x374] ss:$48 sps:$4 sm:$0xff]   ;;  %v12869_v56 = vld [vmem:[%s14800_s12 + $0x370] ss:$48 sps:$4 sm:$0xff]  }
 0xec6   : > { %v5030_v43 = vadd.f32 %v5018_v44, %v5008_v45  ;;  %v5029_v55 = vadd.f32 %v5014_v22, %v5007_v3  ;;  %v12820_v44 = vld [vmem:[%s14800_s12 + $0x1c] ss:$48 sps:$4 sm:$0xff]   ;;  %v5028_v22 = vadd.f32 %v5022_v24, %v5006_v37  ;;  %v12821_v45 = vld [vmem:[%s14800_s12 + $0x70] ss:$48 sps:$4 sm:$0xff]   ;;  %v12824_v3 = vld [vmem:[%s14800_s12 + $0x78] ss:$48 sps:$4 sm:$0xff]  }
 0xec7   : > { %v5031_v21 = vadd.f32 %v5022_v24, %v5009_v6  ;;  %v12878_v6 = vld [vmem:[%s14800_s12 + $0x3d8] ss:$48 sps:$4 sm:$0xff]   ;;  %v12883_v37 = vld [vmem:[%s14800_s12 + $0x434] ss:$48 sps:$4 sm:$0xff]   ;;  %v12886_v24 = vld [vmem:[%s14800_s12 + $0x43c] ss:$48 sps:$4 sm:$0xff]  }
 0xec8   : > { %v15768_v29 = vpack.c.bf16 %v5030_v43, %v5027_v52  ;;  %v15772_v36 = vpack.c.bf16 %v5029_v55, %v5026_v54  ;;  %v12829_v52 = vld [vmem:[%s14800_s12 + $0xd4] ss:$48 sps:$4 sm:$0xff]   ;;  %v12832_v43 = vld [vmem:[%s14800_s12 + $0xdc] ss:$48 sps:$4 sm:$0xff]   ;;  %v12827_v54 = vld [vmem:[%s14800_s12 + $0xd0] ss:$48 sps:$4 sm:$0xff]  }
 0xec9   : > { %v15819_v18 = vpack.c.bf16 %v5031_v21, %v5028_v22  ;;  %v12830_v55 = vld [vmem:[%s14800_s12 + $0xd8] ss:$48 sps:$4 sm:$0xff]   ;;  %v12889_v21 = vld [vmem:[%s14800_s12 + $0x494] ss:$48 sps:$4 sm:$0xff]  }
 0xeca   : > { %6859 = vmatprep.mubr.bf16.mxu1 %v15768_v29  ;;  %6945 = vmatprep.mubr.bf16.mxu0 %v15768_v29  ;;  %v12890_v22 = vld [vmem:[%s14800_s12 + $0x498] ss:$48 sps:$4 sm:$0xff]  }
 0xecb   : > { %6860 = vmatmul.mubr.bf16.vlgmr.msra.gmra.mrb[60].mxu1 %v15772_v36  ;;  %6946 = vmatmul.mubr.bf16.vlgmr.msra.gmra.mrb[76].mxu0 %v15772_v36 }
 0xecc   : > { %6871 = vmatpush1.bf16.msra.mxu1 %v12767_v9  ;;  %6957 = vmatpush1.bf16.msra.mxu0 %v12770_v41  ;;  %v12835_v9 = vld [vmem:[%s14800_s12 + $0x134] ss:$48 sps:$4 sm:$0xff]   ;;  %v12838_v41 = vld [vmem:[%s14800_s12 + $0x13c] ss:$48 sps:$4 sm:$0xff]  }
 0xecd   : > { %6872 = vmatprep.subr.bf16.mxu1 %v12775_v57  ;;  %6958 = vmatprep.subr.bf16.mxu0 %v12778_v59  ;;  %v12833_v57 = vld [vmem:[%s14800_s12 + $0x130] ss:$48 sps:$4 sm:$0xff]   ;;  %v12836_v59 = vld [vmem:[%s14800_s12 + $0x138] ss:$48 sps:$4 sm:$0xff]  }
 0xece   : > { %6902 = vmatprep.mubr.bf16.mxu1 %v14152_v17  ;;  %6988 = vmatprep.mubr.bf16.mxu0 %v14152_v17 }
 0xed0   : > { %6873 = vmatpush1.bf16.msra.mxu1 %v12773_v25  ;;  %6959 = vmatpush1.bf16.msra.mxu0 %v12776_v2  ;;  %v12841_v25 = vld [vmem:[%s14800_s12 + $0x194] ss:$48 sps:$4 sm:$0xff]   ;;  %v12844_v2 = vld [vmem:[%s14800_s12 + $0x19c] ss:$48 sps:$4 sm:$0xff]  }
 0xed1   : > { %6874 = vmatprep.subr.bf16.mxu1 %v12781_v31  ;;  %6960 = vmatprep.subr.bf16.mxu0 %v12784_v53  ;;  %v12839_v31 = vld [vmem:[%s14800_s12 + $0x190] ss:$48 sps:$4 sm:$0xff]   ;;  %v12842_v53 = vld [vmem:[%s14800_s12 + $0x198] ss:$48 sps:$4 sm:$0xff]  }
 0xed4   : > { %6875 = vmatpush1.bf16.msra.mxu1 %v12779_v11  ;;  %6961 = vmatpush1.bf16.msra.mxu0 %v12782_v50  ;;  %v12847_v11 = vld [vmem:[%s14800_s12 + $0x1f4] ss:$48 sps:$4 sm:$0xff]   ;;  %v12850_v50 = vld [vmem:[%s14800_s12 + $0x1fc] ss:$48 sps:$4 sm:$0xff]  }
 0xed5   : > { %6876 = vmatprep.subr.bf16.mxu1 %v12787_v62  ;;  %6962 = vmatprep.subr.bf16.mxu0 %v12790_v1  ;;  %v12845_v62 = vld [vmem:[%s14800_s12 + $0x1f0] ss:$48 sps:$4 sm:$0xff]   ;;  %v12848_v1 = vld [vmem:[%s14800_s12 + $0x1f8] ss:$48 sps:$4 sm:$0xff]  }
 0xed8   : > { %6877 = vmatpush1.bf16.msra.mxu1 %v12785_v63  ;;  %6963 = vmatpush1.bf16.msra.mxu0 %v12788_v26  ;;  %v12853_v63 = vld [vmem:[%s14800_s12 + $0x254] ss:$48 sps:$4 sm:$0xff]   ;;  %v12856_v26 = vld [vmem:[%s14800_s12 + $0x25c] ss:$48 sps:$4 sm:$0xff]  }
 0xed9   : > { %6878 = vmatprep.subr.bf16.mxu1 %v12793_v42  ;;  %6964 = vmatprep.subr.bf16.mxu0 %v12796_v40  ;;  %v12851_v42 = vld [vmem:[%s14800_s12 + $0x250] ss:$48 sps:$4 sm:$0xff]   ;;  %v12854_v40 = vld [vmem:[%s14800_s12 + $0x258] ss:$48 sps:$4 sm:$0xff]  }
 0xedc   : > { %6879 = vmatpush1.bf16.msra.mxu1 %v12791_v51  ;;  %6965 = vmatpush1.bf16.msra.mxu0 %v12794_v61  ;;  %v12859_v51 = vld [vmem:[%s14800_s12 + $0x2b4] ss:$48 sps:$4 sm:$0xff]   ;;  %v12862_v61 = vld [vmem:[%s14800_s12 + $0x2bc] ss:$48 sps:$4 sm:$0xff]  }
 0xedd   : > { %6880 = vmatprep.subr.bf16.mxu1 %v12799_v0  ;;  %6966 = vmatprep.subr.bf16.mxu0 %v12802_v46  ;;  %v12857_v0 = vld [vmem:[%s14800_s12 + $0x2b0] ss:$48 sps:$4 sm:$0xff]   ;;  %v12860_v46 = vld [vmem:[%s14800_s12 + $0x2b8] ss:$48 sps:$4 sm:$0xff]  }
 0xee0   : > { %6881 = vmatpush1.bf16.msra.mxu1 %v12797_v28  ;;  %6967 = vmatpush1.bf16.msra.mxu0 %v12800_v4  ;;  %v12865_v28 = vld [vmem:[%s14800_s12 + $0x314] ss:$48 sps:$4 sm:$0xff]   ;;  %v12868_v4 = vld [vmem:[%s14800_s12 + $0x31c] ss:$48 sps:$4 sm:$0xff]  }
 0xee1   : > { %6882 = vmatprep.subr.bf16.mxu1 %v12805_v5  ;;  %6968 = vmatprep.subr.bf16.mxu0 %v12808_v8  ;;  %v12863_v5 = vld [vmem:[%s14800_s12 + $0x310] ss:$48 sps:$4 sm:$0xff]   ;;  %v12866_v8 = vld [vmem:[%s14800_s12 + $0x318] ss:$48 sps:$4 sm:$0xff]  }
 0xee4   : > { %6883 = vmatpush1.bf16.msra.mxu1 %v12803_v10  ;;  %6969 = vmatpush1.bf16.msra.mxu0 %v12806_v49  ;;  %v12872_v10 = vld [vmem:[%s14800_s12 + $0x378] ss:$48 sps:$4 sm:$0xff]   ;;  %v12877_v49 = vld [vmem:[%s14800_s12 + $0x3d4] ss:$48 sps:$4 sm:$0xff]  }
 0xee5   : > { %6884 = vmatprep.subr.bf16.mxu1 %v12811_v14  ;;  %6970 = vmatprep.subr.bf16.mxu0 %v12814_v7  ;;  %v12880_v14 = vld [vmem:[%s14800_s12 + $0x3dc] ss:$48 sps:$4 sm:$0xff]   ;;  %v12875_v7 = vld [vmem:[%s14800_s12 + $0x3d0] ss:$48 sps:$4 sm:$0xff]  }
 0xee8   : > { %6885 = vmatpush1.bf16.msra.mxu1 %v12809_v12  ;;  %6971 = vmatpush1.bf16.msra.mxu0 %v12812_v15  ;;  %v12881_v12 = vld [vmem:[%s14800_s12 + $0x430] ss:$48 sps:$4 sm:$0xff]   ;;  %v12884_v15 = vld [vmem:[%s14800_s12 + $0x438] ss:$48 sps:$4 sm:$0xff]  }
 0xee9   : > { %6999 = vmatprep.subr.bf16.mxu1 %v12817_v39  ;;  %7085 = vmatprep.subr.bf16.mxu0 %v12820_v44  ;;  %v12892_v39 = vld [vmem:[%s14800_s12 + $0x49c] ss:$48 sps:$4 sm:$0xff]   ;;  %v12887_v44 = vld [vmem:[%s14800_s12 + $0x490] ss:$48 sps:$4 sm:$0xff]  }
 0xeeb   : > { %6903 = vmatmul.mubr.bf16.vlgmr.msra.gmra.mrb[60].mxu1 %v15819_v18  ;;  %6989 = vmatmul.mubr.bf16.vlgmr.msra.gmra.mrb[76].mxu0 %v15819_v18 }
 0xeec   : > { %7000 = vmatpush1.bf16.msra.mxu1 %v12815_v60  ;;  %7031 = vmatprep.mubr.bf16.mxu1 %v15768_v29  ;;  %v12895_v60 = vld [vmem:[%s14800_s12 + $0x4f4] ss:$48 sps:$4 sm:$0xff]  }
 0xeed   : > { %7086 = vmatpush1.bf16.msra.mxu0 %v12818_v13  ;;  %7117 = vmatprep.mubr.bf16.mxu0 %v15768_v29  ;;  %v12898_v13 = vld [vmem:[%s14800_s12 + $0x4fc] ss:$48 sps:$4 sm:$0xff]  }
 0xeee   : > { %7001 = vmatprep.subr.bf16.mxu1 %v12823_v20  ;;  %7087 = vmatprep.subr.bf16.mxu0 %v12826_v47  ;;  %v12893_v20 = vld [vmem:[%s14800_s12 + $0x4f0] ss:$48 sps:$4 sm:$0xff]   ;;  %v12896_v47 = vld [vmem:[%s14800_s12 + $0x4f8] ss:$48 sps:$4 sm:$0xff]  }
 0xef0   : > { %7002 = vmatpush1.bf16.msra.mxu1 %v12821_v45  ;;  %v12901_v45 = vld [vmem:[%s14800_s12 + $0x554] ss:$48 sps:$4 sm:$0xff]  }
 0xef1   : > { %7088 = vmatpush1.bf16.msra.mxu0 %v12824_v3  ;;  %7003 = vmatprep.subr.bf16.mxu1 %v12829_v52  ;;  %v12904_v3 = vld [vmem:[%s14800_s12 + $0x55c] ss:$48 sps:$4 sm:$0xff]   ;;  %v12899_v52 = vld [vmem:[%s14800_s12 + $0x550] ss:$48 sps:$4 sm:$0xff]  }
 0xef2   : > { %7089 = vmatprep.subr.bf16.mxu0 %v12832_v43  ;;  %v12902_v43 = vld [vmem:[%s14800_s12 + $0x558] ss:$48 sps:$4 sm:$0xff]  }
 0xef4   : > { %7004 = vmatpush1.bf16.msra.mxu1 %v12827_v54  ;;  %v12907_v54 = vld [vmem:[%s14800_s12 + $0x5b4] ss:$48 sps:$4 sm:$0xff]  }
 0xef5   : > { %7090 = vmatpush1.bf16.msra.mxu0 %v12830_v55  ;;  %7005 = vmatprep.subr.bf16.mxu1 %v12835_v9  ;;  %v12910_v55 = vld [vmem:[%s14800_s12 + $0x5bc] ss:$48 sps:$4 sm:$0xff]   ;;  %v12905_v9 = vld [vmem:[%s14800_s12 + $0x5b0] ss:$48 sps:$4 sm:$0xff]  }
 0xef6   : > { %7091 = vmatprep.subr.bf16.mxu0 %v12838_v41  ;;  %v12908_v41 = vld [vmem:[%s14800_s12 + $0x5b8] ss:$48 sps:$4 sm:$0xff]  }
 0xef8   : > { %7006 = vmatpush1.bf16.msra.mxu1 %v12833_v57  ;;  %v12913_v57 = vld [vmem:[%s14800_s12 + $0x614] ss:$48 sps:$4 sm:$0xff]  }
 0xef9   : > { %7092 = vmatpush1.bf16.msra.mxu0 %v12836_v59  ;;  %7007 = vmatprep.subr.bf16.mxu1 %v12841_v25  ;;  %v12916_v59 = vld [vmem:[%s14800_s12 + $0x61c] ss:$48 sps:$4 sm:$0xff]   ;;  %v12911_v25 = vld [vmem:[%s14800_s12 + $0x610] ss:$48 sps:$4 sm:$0xff]  }
 0xefa   : > { %7093 = vmatprep.subr.bf16.mxu0 %v12844_v2  ;;  %v12914_v2 = vld [vmem:[%s14800_s12 + $0x618] ss:$48 sps:$4 sm:$0xff]  }
 0xefc   : > { %7008 = vmatpush1.bf16.msra.mxu1 %v12839_v31  ;;  %v12919_v31 = vld [vmem:[%s14800_s12 + $0x674] ss:$48 sps:$4 sm:$0xff]  }
 0xefd   : > { %7094 = vmatpush1.bf16.msra.mxu0 %v12842_v53  ;;  %7009 = vmatprep.subr.bf16.mxu1 %v12847_v11  ;;  %v12922_v53 = vld [vmem:[%s14800_s12 + $0x67c] ss:$48 sps:$4 sm:$0xff]   ;;  %v12917_v11 = vld [vmem:[%s14800_s12 + $0x670] ss:$48 sps:$4 sm:$0xff]  }
 0xefe   : > { %7095 = vmatprep.subr.bf16.mxu0 %v12850_v50  ;;  %v12920_v50 = vld [vmem:[%s14800_s12 + $0x678] ss:$48 sps:$4 sm:$0xff]  }
 0xf00   : > { %7010 = vmatpush1.bf16.msra.mxu1 %v12845_v62  ;;  %v12925_v62 = vld [vmem:[%s14800_s12 + $0x6d4] ss:$48 sps:$4 sm:$0xff]  }
 0xf01   : > { %7096 = vmatpush1.bf16.msra.mxu0 %v12848_v1  ;;  %7011 = vmatprep.subr.bf16.mxu1 %v12853_v63  ;;  %v12928_v1 = vld [vmem:[%s14800_s12 + $0x6dc] ss:$48 sps:$4 sm:$0xff]   ;;  %v12923_v63 = vld [vmem:[%s14800_s12 + $0x6d0] ss:$48 sps:$4 sm:$0xff]  }
 0xf02   : > { %7097 = vmatprep.subr.bf16.mxu0 %v12856_v26  ;;  %v12926_v26 = vld [vmem:[%s14800_s12 + $0x6d8] ss:$48 sps:$4 sm:$0xff]  }
 0xf04   : > { %7012 = vmatpush1.bf16.msra.mxu1 %v12851_v42  ;;  %v12931_v42 = vld [vmem:[%s14800_s12 + $0x734] ss:$48 sps:$4 sm:$0xff]  }
 0xf05   : > { %7098 = vmatpush1.bf16.msra.mxu0 %v12854_v40  ;;  %7013 = vmatprep.subr.bf16.mxu1 %v12859_v51  ;;  %v12934_v40 = vld [vmem:[%s14800_s12 + $0x73c] ss:$48 sps:$4 sm:$0xff]   ;;  %v12929_v51 = vld [vmem:[%s14800_s12 + $0x730] ss:$48 sps:$4 sm:$0xff]  }
 0xf06   : > { %7099 = vmatprep.subr.bf16.mxu0 %v12862_v61  ;;  %v12932_v61 = vld [vmem:[%s14800_s12 + $0x738] ss:$48 sps:$4 sm:$0xff]  }
 0xf08   : > { %7014 = vmatpush1.bf16.msra.mxu1 %v12857_v0  ;;  %v12937_v0 = vld [vmem:[%s14800_s12 + $0x794] ss:$48 sps:$4 sm:$0xff]  }
 0xf09   : > { %7100 = vmatpush1.bf16.msra.mxu0 %v12860_v46  ;;  %7015 = vmatprep.subr.bf16.mxu1 %v12865_v28  ;;  %v12940_v46 = vld [vmem:[%s14800_s12 + $0x79c] ss:$48 sps:$4 sm:$0xff]   ;;  %v12935_v28 = vld [vmem:[%s14800_s12 + $0x790] ss:$48 sps:$4 sm:$0xff]  }
 0xf0a   : > { %7101 = vmatprep.subr.bf16.mxu0 %v12868_v4  ;;  %v12938_v4 = vld [vmem:[%s14800_s12 + $0x798] ss:$48 sps:$4 sm:$0xff]  }
 0xf0c   : > { %7016 = vmatpush1.bf16.msra.mxu1 %v12863_v5  ;;  %v12943_v5 = vld [vmem:[%s14800_s12 + $0x7f4] ss:$48 sps:$4 sm:$0xff]  }
 0xf0d   : > { %7102 = vmatpush1.bf16.msra.mxu0 %v12866_v8  ;;  %7017 = vmatprep.subr.bf16.mxu1 %v12871_v23  ;;  %v12946_v8 = vld [vmem:[%s14800_s12 + $0x7fc] ss:$48 sps:$4 sm:$0xff]   ;;  %v12941_v23 = vld [vmem:[%s14800_s12 + $0x7f0] ss:$48 sps:$4 sm:$0xff]  }
 0xf0e   : > { %7103 = vmatprep.subr.bf16.mxu0 %v12874_v48  ;;  %v12944_v48 = vld [vmem:[%s14800_s12 + $0x7f8] ss:$48 sps:$4 sm:$0xff]  }
 0xf10   : > { %7018 = vmatpush1.bf16.msra.mxu1 %v12869_v56  ;;  %v12949_v56 = vld [vmem:[%s14800_s12 + $0x854] ss:$48 sps:$4 sm:$0xff]  }
 0xf11   : > { %7104 = vmatpush1.bf16.msra.mxu0 %v12872_v10  ;;  %7019 = vmatprep.subr.bf16.mxu1 %v12877_v49  ;;  %v12952_v10 = vld [vmem:[%s14800_s12 + $0x85c] ss:$48 sps:$4 sm:$0xff]   ;;  %v12947_v49 = vld [vmem:[%s14800_s12 + $0x850] ss:$48 sps:$4 sm:$0xff]  }
 0xf12   : > { %7105 = vmatprep.subr.bf16.mxu0 %v12880_v14  ;;  %v12950_v14 = vld [vmem:[%s14800_s12 + $0x858] ss:$48 sps:$4 sm:$0xff]  }
 0xf14   : > { %7020 = vmatpush1.bf16.msra.mxu1 %v12875_v7  ;;  %v12955_v7 = vld [vmem:[%s14800_s12 + $0x8b4] ss:$48 sps:$4 sm:$0xff]  }
 0xf15   : > { %7106 = vmatpush1.bf16.msra.mxu0 %v12878_v6  ;;  %7021 = vmatprep.subr.bf16.mxu1 %v12883_v37  ;;  %v12958_v6 = vld [vmem:[%s14800_s12 + $0x8bc] ss:$48 sps:$4 sm:$0xff]   ;;  %v12953_v37 = vld [vmem:[%s14800_s12 + $0x8b0] ss:$48 sps:$4 sm:$0xff]  }
 0xf16   : > { %7107 = vmatprep.subr.bf16.mxu0 %v12886_v24  ;;  %v12956_v24 = vld [vmem:[%s14800_s12 + $0x8b8] ss:$48 sps:$4 sm:$0xff]  }
 0xf18   : > { %7022 = vmatpush1.bf16.msra.mxu1 %v12881_v12  ;;  %v12961_v12 = vld [vmem:[%s14800_s12 + $0x24] ss:$48 sps:$4 sm:$0xff]  }
 0xf19   : > { %7108 = vmatpush1.bf16.msra.mxu0 %v12884_v15  ;;  %7023 = vmatprep.subr.bf16.mxu1 %v12889_v21  ;;  %v12964_v15 = vld [vmem:[%s14800_s12 + $0x2c] ss:$48 sps:$4 sm:$0xff]   ;;  %v12959_v21 = vld [vmem:[%s14800_s12 + $0x20] ss:$48 sps:$4 sm:$0xff]  }
 0xf1a   : > { %7109 = vmatprep.subr.bf16.mxu0 %v12892_v39  ;;  %v12962_v39 = vld [vmem:[%s14800_s12 + $0x28] ss:$48 sps:$4 sm:$0xff]  }
 0xf1c   : > { %7024 = vmatpush1.bf16.msra.mxu1 %v12887_v44  ;;  %v12967_v44 = vld [vmem:[%s14800_s12 + $0x84] ss:$48 sps:$4 sm:$0xff]  }
 0xf1d   : > { %7110 = vmatpush1.bf16.msra.mxu0 %v12890_v22  ;;  %7025 = vmatprep.subr.bf16.mxu1 %v12895_v60  ;;  %v12970_v22 = vld [vmem:[%s14800_s12 + $0x8c] ss:$48 sps:$4 sm:$0xff]   ;;  %v12965_v60 = vld [vmem:[%s14800_s12 + $0x80] ss:$48 sps:$4 sm:$0xff]  }
 0xf1e   : > { %7111 = vmatprep.subr.bf16.mxu0 %v12898_v13  ;;  %v12968_v13 = vld [vmem:[%s14800_s12 + $0x88] ss:$48 sps:$4 sm:$0xff]  }
 0xf20   : > { %7026 = vmatpush1.bf16.msra.mxu1 %v12893_v20  ;;  %v12973_v20 = vld [vmem:[%s14800_s12 + $0xe4] ss:$48 sps:$4 sm:$0xff]  }
 0xf21   : > { %7112 = vmatpush1.bf16.msra.mxu0 %v12896_v47  ;;  %7027 = vmatprep.subr.bf16.mxu1 %v12901_v45  ;;  %v12976_v47 = vld [vmem:[%s14800_s12 + $0xec] ss:$48 sps:$4 sm:$0xff]   ;;  %v12971_v45 = vld [vmem:[%s14800_s12 + $0xe0] ss:$48 sps:$4 sm:$0xff]  }
 0xf22   : > { %7113 = vmatprep.subr.bf16.mxu0 %v12904_v3  ;;  %v12974_v3 = vld [vmem:[%s14800_s12 + $0xe8] ss:$48 sps:$4 sm:$0xff]  }
 0xf24   : > { %7028 = vmatpush1.bf16.msra.mxu1 %v12899_v52  ;;  %v12979_v52 = vld [vmem:[%s14800_s12 + $0x144] ss:$48 sps:$4 sm:$0xff]  }
 0xf25   : > { %7114 = vmatpush1.bf16.msra.mxu0 %v12902_v43  ;;  %7029 = vmatprep.subr.bf16.mxu1 %v12907_v54  ;;  %v12982_v43 = vld [vmem:[%s14800_s12 + $0x14c] ss:$48 sps:$4 sm:$0xff]   ;;  %v12980_v54 = vld [vmem:[%s14800_s12 + $0x148] ss:$48 sps:$4 sm:$0xff]  }
 0xf26   : > { %7115 = vmatprep.subr.bf16.mxu0 %v12910_v55  ;;  %v12985_v55 = vld [vmem:[%s14800_s12 + $0x1a4] ss:$48 sps:$4 sm:$0xff]  }
 0xf28   : > { %7030 = vmatpush1.bf16.msra.mxu1 %v12905_v9  ;;  %v12988_v9 = vld [vmem:[%s14800_s12 + $0x1ac] ss:$48 sps:$4 sm:$0xff]  }
 0xf29   : > { %7116 = vmatpush1.bf16.msra.mxu0 %v12908_v41  ;;  %7042 = vmatprep.subr.bf16.mxu1 %v12913_v57  ;;  %v12983_v41 = vld [vmem:[%s14800_s12 + $0x1a0] ss:$48 sps:$4 sm:$0xff]   ;;  %v12986_v57 = vld [vmem:[%s14800_s12 + $0x1a8] ss:$48 sps:$4 sm:$0xff]  }
 0xf2a   : > { %7128 = vmatprep.subr.bf16.mxu0 %v12916_v59  ;;  %v12991_v59 = vld [vmem:[%s14800_s12 + $0x204] ss:$48 sps:$4 sm:$0xff]  }
 0xf2b   : > { %7032 = vmatmul.mubr.bf16.vlgmr.msra.gmra.mrb[64].mxu1 %v15772_v36 }
 0xf2c   : > { %7118 = vmatmul.mubr.bf16.vlgmr.msra.gmra.mrb[80].mxu0 %v15772_v36  ;;  %7043 = vmatpush1.bf16.msra.mxu1 %v12911_v25  ;;  %v12994_v25 = vld [vmem:[%s14800_s12 + $0x20c] ss:$48 sps:$4 sm:$0xff]  }
 0xf2d   : > { %7129 = vmatpush1.bf16.msra.mxu0 %v12914_v2  ;;  %7044 = vmatprep.subr.bf16.mxu1 %v12919_v31  ;;  %v12989_v2 = vld [vmem:[%s14800_s12 + $0x200] ss:$48 sps:$4 sm:$0xff]   ;;  %v12992_v31 = vld [vmem:[%s14800_s12 + $0x208] ss:$48 sps:$4 sm:$0xff]  }
 0xf2e   : > { %7130 = vmatprep.subr.bf16.mxu0 %v12922_v53  ;;  %7074 = vmatprep.mubr.bf16.mxu1 %v14152_v17  ;;  %v12997_v53 = vld [vmem:[%s14800_s12 + $0x264] ss:$48 sps:$4 sm:$0xff]  }
 0xf2f   : > { %7160 = vmatprep.mubr.bf16.mxu0 %v14152_v17 }
 0xf30   : > { %7045 = vmatpush1.bf16.msra.mxu1 %v12917_v11  ;;  %v13000_v11 = vld [vmem:[%s14800_s12 + $0x26c] ss:$48 sps:$4 sm:$0xff]  }
 0xf31   : > { %7131 = vmatpush1.bf16.msra.mxu0 %v12920_v50  ;;  %7046 = vmatprep.subr.bf16.mxu1 %v12925_v62  ;;  %v12995_v50 = vld [vmem:[%s14800_s12 + $0x260] ss:$48 sps:$4 sm:$0xff]   ;;  %v12998_v62 = vld [vmem:[%s14800_s12 + $0x268] ss:$48 sps:$4 sm:$0xff]  }
 0xf32   : > { %7132 = vmatprep.subr.bf16.mxu0 %v12928_v1  ;;  %v13003_v1 = vld [vmem:[%s14800_s12 + $0x2c4] ss:$48 sps:$4 sm:$0xff]  }
 0xf34   : > { %7047 = vmatpush1.bf16.msra.mxu1 %v12923_v63  ;;  %v13006_v63 = vld [vmem:[%s14800_s12 + $0x2cc] ss:$48 sps:$4 sm:$0xff]  }
 0xf35   : > { %7133 = vmatpush1.bf16.msra.mxu0 %v12926_v26  ;;  %7048 = vmatprep.subr.bf16.mxu1 %v12931_v42  ;;  %v13001_v26 = vld [vmem:[%s14800_s12 + $0x2c0] ss:$48 sps:$4 sm:$0xff]   ;;  %v13004_v42 = vld [vmem:[%s14800_s12 + $0x2c8] ss:$48 sps:$4 sm:$0xff]  }
 0xf36   : > { %7134 = vmatprep.subr.bf16.mxu0 %v12934_v40  ;;  %v13009_v40 = vld [vmem:[%s14800_s12 + $0x324] ss:$48 sps:$4 sm:$0xff]  }
 0xf38   : > { %7049 = vmatpush1.bf16.msra.mxu1 %v12929_v51  ;;  %v13012_v51 = vld [vmem:[%s14800_s12 + $0x32c] ss:$48 sps:$4 sm:$0xff]  }
 0xf39   : > { %7135 = vmatpush1.bf16.msra.mxu0 %v12932_v61  ;;  %7050 = vmatprep.subr.bf16.mxu1 %v12937_v0  ;;  %v13007_v61 = vld [vmem:[%s14800_s12 + $0x320] ss:$48 sps:$4 sm:$0xff]   ;;  %v13010_v0 = vld [vmem:[%s14800_s12 + $0x328] ss:$48 sps:$4 sm:$0xff]  }
 0xf3a   : > { %7136 = vmatprep.subr.bf16.mxu0 %v12940_v46  ;;  %v13015_v46 = vld [vmem:[%s14800_s12 + $0x384] ss:$48 sps:$4 sm:$0xff]  }
 0xf3c   : > { %7051 = vmatpush1.bf16.msra.mxu1 %v12935_v28  ;;  %v13018_v28 = vld [vmem:[%s14800_s12 + $0x38c] ss:$48 sps:$4 sm:$0xff]  }
 0xf3d   : > { %7137 = vmatpush1.bf16.msra.mxu0 %v12938_v4  ;;  %7052 = vmatprep.subr.bf16.mxu1 %v12943_v5  ;;  %v13013_v4 = vld [vmem:[%s14800_s12 + $0x380] ss:$48 sps:$4 sm:$0xff]   ;;  %v13016_v5 = vld [vmem:[%s14800_s12 + $0x388] ss:$48 sps:$4 sm:$0xff]  }
 0xf3e   : > { %7138 = vmatprep.subr.bf16.mxu0 %v12946_v8  ;;  %v13021_v8 = vld [vmem:[%s14800_s12 + $0x3e4] ss:$48 sps:$4 sm:$0xff]  }
 0xf40   : > { %7053 = vmatpush1.bf16.msra.mxu1 %v12941_v23  ;;  %v13024_v23 = vld [vmem:[%s14800_s12 + $0x3ec] ss:$48 sps:$4 sm:$0xff]  }
 0xf41   : > { %7139 = vmatpush1.bf16.msra.mxu0 %v12944_v48  ;;  %7054 = vmatprep.subr.bf16.mxu1 %v12949_v56  ;;  %v13019_v48 = vld [vmem:[%s14800_s12 + $0x3e0] ss:$48 sps:$4 sm:$0xff]   ;;  %v13022_v56 = vld [vmem:[%s14800_s12 + $0x3e8] ss:$48 sps:$4 sm:$0xff]  }
 0xf42   : > { %7140 = vmatprep.subr.bf16.mxu0 %v12952_v10  ;;  %v13027_v10 = vld [vmem:[%s14800_s12 + $0x444] ss:$48 sps:$4 sm:$0xff]  }
 0xf44   : > { %7055 = vmatpush1.bf16.msra.mxu1 %v12947_v49  ;;  %v13030_v49 = vld [vmem:[%s14800_s12 + $0x44c] ss:$48 sps:$4 sm:$0xff]  }
 0xf45   : > { %7141 = vmatpush1.bf16.msra.mxu0 %v12950_v14  ;;  %7056 = vmatprep.subr.bf16.mxu1 %v12955_v7  ;;  %v13025_v14 = vld [vmem:[%s14800_s12 + $0x440] ss:$48 sps:$4 sm:$0xff]   ;;  %v13028_v7 = vld [vmem:[%s14800_s12 + $0x448] ss:$48 sps:$4 sm:$0xff]  }
 0xf46   : > { %7142 = vmatprep.subr.bf16.mxu0 %v12958_v6  ;;  %v13033_v6 = vld [vmem:[%s14800_s12 + $0x4a4] ss:$48 sps:$4 sm:$0xff]  }
 0xf48   : > { %7057 = vmatpush1.bf16.msra.mxu1 %v12953_v37  ;;  %v13036_v37 = vld [vmem:[%s14800_s12 + $0x4ac] ss:$48 sps:$4 sm:$0xff]  }
 0xf49   : > { %7143 = vmatpush1.bf16.msra.mxu0 %v12956_v24  ;;  %7171 = vmatprep.subr.bf16.mxu1 %v12961_v12  ;;  %v13031_v24 = vld [vmem:[%s14800_s12 + $0x4a0] ss:$48 sps:$4 sm:$0xff]   ;;  %v13034_v12 = vld [vmem:[%s14800_s12 + $0x4a8] ss:$48 sps:$4 sm:$0xff]  }
 0xf4a   : > { %7257 = vmatprep.subr.bf16.mxu0 %v12964_v15  ;;  %v13039_v15 = vld [vmem:[%s14800_s12 + $0x504] ss:$48 sps:$4 sm:$0xff]  }
 0xf4b   : > { %7075 = vmatmul.mubr.bf16.vlgmr.msra.gmra.mrb[64].mxu1 %v15819_v18 }
 0xf4c   : > { %7161 = vmatmul.mubr.bf16.vlgmr.msra.gmra.mrb[80].mxu0 %v15819_v18  ;;  %7172 = vmatpush1.bf16.msra.mxu1 %v12959_v21  ;;  %v13042_v21 = vld [vmem:[%s14800_s12 + $0x50c] ss:$48 sps:$4 sm:$0xff]  }
 0xf4d   : > { %7203 = vmatprep.mubr.bf16.mxu1 %v15768_v29  ;;  %7258 = vmatpush1.bf16.msra.mxu0 %v12962_v39  ;;  %v13037_v39 = vld [vmem:[%s14800_s12 + $0x500] ss:$48 sps:$4 sm:$0xff]  }
 0xf4e   : > { %7289 = vmatprep.mubr.bf16.mxu0 %v15768_v29  ;;  %7173 = vmatprep.subr.bf16.mxu1 %v12967_v44  ;;  %v12977_v29 = vld [vmem:[%s14800_s12 + $0x140] ss:$48 sps:$4 sm:$0xff]   ;;  %v13040_v44 = vld [vmem:[%s14800_s12 + $0x508] ss:$48 sps:$4 sm:$0xff]  }
 0xf4f   : > { %7259 = vmatprep.subr.bf16.mxu0 %v12970_v22  ;;  %v13045_v22 = vld [vmem:[%s14800_s12 + $0x564] ss:$48 sps:$4 sm:$0xff]  }
 0xf50   : > { %7174 = vmatpush1.bf16.msra.mxu1 %v12965_v60  ;;  %v13048_v60 = vld [vmem:[%s14800_s12 + $0x56c] ss:$48 sps:$4 sm:$0xff]  }
 0xf51   : > { %7260 = vmatpush1.bf16.msra.mxu0 %v12968_v13  ;;  %7175 = vmatprep.subr.bf16.mxu1 %v12973_v20  ;;  %v13043_v13 = vld [vmem:[%s14800_s12 + $0x560] ss:$48 sps:$4 sm:$0xff]   ;;  %v13046_v20 = vld [vmem:[%s14800_s12 + $0x568] ss:$48 sps:$4 sm:$0xff]  }
 0xf52   : > { %7261 = vmatprep.subr.bf16.mxu0 %v12976_v47  ;;  %v13051_v47 = vld [vmem:[%s14800_s12 + $0x5c4] ss:$48 sps:$4 sm:$0xff]  }
 0xf54   : > { %7176 = vmatpush1.bf16.msra.mxu1 %v12971_v45  ;;  %v13054_v45 = vld [vmem:[%s14800_s12 + $0x5cc] ss:$48 sps:$4 sm:$0xff]  }
 0xf55   : > { %7262 = vmatpush1.bf16.msra.mxu0 %v12974_v3  ;;  %7177 = vmatprep.subr.bf16.mxu1 %v12979_v52  ;;  %v13049_v3 = vld [vmem:[%s14800_s12 + $0x5c0] ss:$48 sps:$4 sm:$0xff]   ;;  %v13052_v52 = vld [vmem:[%s14800_s12 + $0x5c8] ss:$48 sps:$4 sm:$0xff]  }
 0xf56   : > { %7263 = vmatprep.subr.bf16.mxu0 %v12982_v43  ;;  %v13057_v43 = vld [vmem:[%s14800_s12 + $0x624] ss:$48 sps:$4 sm:$0xff]  }
 0xf58   : > { %7178 = vmatpush1.bf16.msra.mxu1 %v12977_v29  ;;  %v13060_v29 = vld [vmem:[%s14800_s12 + $0x62c] ss:$48 sps:$4 sm:$0xff]  }
 0xf59   : > { %7264 = vmatpush1.bf16.msra.mxu0 %v12980_v54  ;;  %7179 = vmatprep.subr.bf16.mxu1 %v12985_v55  ;;  %v13055_v54 = vld [vmem:[%s14800_s12 + $0x620] ss:$48 sps:$4 sm:$0xff]   ;;  %v13058_v55 = vld [vmem:[%s14800_s12 + $0x628] ss:$48 sps:$4 sm:$0xff]  }
 0xf5a   : > { %7265 = vmatprep.subr.bf16.mxu0 %v12988_v9  ;;  %v13063_v9 = vld [vmem:[%s14800_s12 + $0x684] ss:$48 sps:$4 sm:$0xff]  }
 0xf5c   : > { %7180 = vmatpush1.bf16.msra.mxu1 %v12983_v41  ;;  %v13066_v41 = vld [vmem:[%s14800_s12 + $0x68c] ss:$48 sps:$4 sm:$0xff]  }
 0xf5d   : > { %7266 = vmatpush1.bf16.msra.mxu0 %v12986_v57  ;;  %7181 = vmatprep.subr.bf16.mxu1 %v12991_v59  ;;  %v13061_v57 = vld [vmem:[%s14800_s12 + $0x680] ss:$48 sps:$4 sm:$0xff]   ;;  %v13064_v59 = vld [vmem:[%s14800_s12 + $0x688] ss:$48 sps:$4 sm:$0xff]  }
 0xf5e   : > { %7267 = vmatprep.subr.bf16.mxu0 %v12994_v25  ;;  %v13069_v25 = vld [vmem:[%s14800_s12 + $0x6e4] ss:$48 sps:$4 sm:$0xff]  }
 0xf60   : > { %7182 = vmatpush1.bf16.msra.mxu1 %v12989_v2  ;;  %v13072_v2 = vld [vmem:[%s14800_s12 + $0x6ec] ss:$48 sps:$4 sm:$0xff]  }
 0xf61   : > { %7268 = vmatpush1.bf16.msra.mxu0 %v12992_v31  ;;  %7183 = vmatprep.subr.bf16.mxu1 %v12997_v53  ;;  %v13070_v31 = vld [vmem:[%s14800_s12 + $0x6e8] ss:$48 sps:$4 sm:$0xff]   ;;  %v13075_v53 = vld [vmem:[%s14800_s12 + $0x744] ss:$48 sps:$4 sm:$0xff]  }
 0xf62   : > { %7269 = vmatprep.subr.bf16.mxu0 %v13000_v11  ;;  %v13078_v11 = vld [vmem:[%s14800_s12 + $0x74c] ss:$48 sps:$4 sm:$0xff]  }
 0xf64   : > { %7184 = vmatpush1.bf16.msra.mxu1 %v12995_v50  ;;  %v13073_v50 = vld [vmem:[%s14800_s12 + $0x740] ss:$48 sps:$4 sm:$0xff]  }
 0xf65   : > { %7270 = vmatpush1.bf16.msra.mxu0 %v12998_v62  ;;  %7185 = vmatprep.subr.bf16.mxu1 %v13003_v1  ;;  %v13076_v62 = vld [vmem:[%s14800_s12 + $0x748] ss:$48 sps:$4 sm:$0xff]   ;;  %v13084_v1 = vld [vmem:[%s14800_s12 + $0x7ac] ss:$48 sps:$4 sm:$0xff]  }
 0xf66   : > { %7271 = vmatprep.subr.bf16.mxu0 %v13006_v63  ;;  %v13079_v63 = vld [vmem:[%s14800_s12 + $0x7a0] ss:$48 sps:$4 sm:$0xff]  }
 0xf68   : > { %7186 = vmatpush1.bf16.msra.mxu1 %v13001_v26  ;;  %v13082_v26 = vld [vmem:[%s14800_s12 + $0x7a8] ss:$48 sps:$4 sm:$0xff]  }
 0xf69   : > { %7272 = vmatpush1.bf16.msra.mxu0 %v13004_v42  ;;  %7187 = vmatprep.subr.bf16.mxu1 %v13009_v40  ;;  %v13087_v42 = vld [vmem:[%s14800_s12 + $0x804] ss:$48 sps:$4 sm:$0xff]   ;;  %v13090_v40 = vld [vmem:[%s14800_s12 + $0x80c] ss:$48 sps:$4 sm:$0xff]  }
 0xf6a   : > { %7273 = vmatprep.subr.bf16.mxu0 %v13012_v51  ;;  %v13085_v51 = vld [vmem:[%s14800_s12 + $0x800] ss:$48 sps:$4 sm:$0xff]  }
 0xf6c   : > { %7188 = vmatpush1.bf16.msra.mxu1 %v13007_v61  ;;  %v13088_v61 = vld [vmem:[%s14800_s12 + $0x808] ss:$48 sps:$4 sm:$0xff]  }
 0xf6d   : > { %7274 = vmatpush1.bf16.msra.mxu0 %v13010_v0  ;;  %7189 = vmatprep.subr.bf16.mxu1 %v13015_v46  ;;  %v13093_v0 = vld [vmem:[%s14800_s12 + $0x864] ss:$48 sps:$4 sm:$0xff]   ;;  %v13096_v46 = vld [vmem:[%s14800_s12 + $0x86c] ss:$48 sps:$4 sm:$0xff]  }
 0xf6e   : > { %7275 = vmatprep.subr.bf16.mxu0 %v13018_v28  ;;  %v13091_v28 = vld [vmem:[%s14800_s12 + $0x860] ss:$48 sps:$4 sm:$0xff]  }
 0xf70   : > { %7190 = vmatpush1.bf16.msra.mxu1 %v13013_v4  ;;  %v13094_v4 = vld [vmem:[%s14800_s12 + $0x868] ss:$48 sps:$4 sm:$0xff]  }
 0xf71   : > { %7276 = vmatpush1.bf16.msra.mxu0 %v13016_v5  ;;  %7191 = vmatprep.subr.bf16.mxu1 %v13021_v8  ;;  %v13099_v5 = vld [vmem:[%s14800_s12 + $0x8c4] ss:$48 sps:$4 sm:$0xff]   ;;  %v13102_v8 = vld [vmem:[%s14800_s12 + $0x8cc] ss:$48 sps:$4 sm:$0xff]  }
 0xf72   : > { %7277 = vmatprep.subr.bf16.mxu0 %v13024_v23  ;;  %v13097_v23 = vld [vmem:[%s14800_s12 + $0x8c0] ss:$48 sps:$4 sm:$0xff]  }
 0xf74   : > { %7192 = vmatpush1.bf16.msra.mxu1 %v13019_v48  ;;  %v13100_v48 = vld [vmem:[%s14800_s12 + $0x8c8] ss:$48 sps:$4 sm:$0xff]  }
 0xf75   : > { %7278 = vmatpush1.bf16.msra.mxu0 %v13022_v56  ;;  %7193 = vmatprep.subr.bf16.mxu1 %v13027_v10  ;;  %v13105_v56 = vld [vmem:[%s14809_s24 + $0x4] ss:$12 sps:$4 sm:$0xff]   ;;  %v13106_v10 = vld [vmem:[%s14809_s24 + $0xc8] ss:$12 sps:$4 sm:$0xff]  }
 0xf76   : > { %7279 = vmatprep.subr.bf16.mxu0 %v13030_v49  ;;  %v13103_v49 = vld [vmem:[%s14809_s24] ss:$12 sps:$4 sm:$0xff]  }
 0xf78   : > { %7194 = vmatpush1.bf16.msra.mxu1 %v13025_v14  ;;  %v13107_v14 = vld [vmem:[%s14809_s24 + $0x8] ss:$12 sps:$4 sm:$0xff]  }
 0xf79   : > { %7280 = vmatpush1.bf16.msra.mxu0 %v13028_v7  ;;  %7195 = vmatprep.subr.bf16.mxu1 %v13033_v6  ;;  %v13110_v7 = vld [vmem:[%s14809_s24 + $0x1c] ss:$12 sps:$4 sm:$0xff]   ;;  %v13111_v6 = vld [vmem:[%s14809_s24 + $0xe0] ss:$12 sps:$4 sm:$0xff]  }
 0xf7a   : > { %7281 = vmatprep.subr.bf16.mxu0 %v13036_v37  ;;  %v13108_v37 = vld [vmem:[%s14809_s24 + $0x18] ss:$12 sps:$4 sm:$0xff]  }
 0xf7c   : > { %7196 = vmatpush1.bf16.msra.mxu1 %v13031_v24  ;;  %v13112_v24 = vld [vmem:[%s14809_s24 + $0x20] ss:$12 sps:$4 sm:$0xff]  }
 0xf7d   : > { %7282 = vmatpush1.bf16.msra.mxu0 %v13034_v12  ;;  %7197 = vmatprep.subr.bf16.mxu1 %v13039_v15  ;;  %v13115_v12 = vld [vmem:[%s14809_s24 + $0x34] ss:$12 sps:$4 sm:$0xff]   ;;  %v13116_v15 = vld [vmem:[%s14809_s24 + $0xf8] ss:$12 sps:$4 sm:$0xff]  }
 0xf7e   : > { %7283 = vmatprep.subr.bf16.mxu0 %v13042_v21  ;;  %v13113_v21 = vld [vmem:[%s14809_s24 + $0x30] ss:$12 sps:$4 sm:$0xff]  }
 0xf80   : > { %7198 = vmatpush1.bf16.msra.mxu1 %v13037_v39  ;;  %v13120_v39 = vld [vmem:[%s14809_s24 + $0x4c] ss:$12 sps:$4 sm:$0xff]  }
 0xf81   : > { %7284 = vmatpush1.bf16.msra.mxu0 %v13040_v44  ;;  %7199 = vmatprep.subr.bf16.mxu1 %v13045_v22  ;;  %v13121_v44 = vld [vmem:[%s14809_s24 + $0x110] ss:$12 sps:$4 sm:$0xff]   ;;  %v13118_v22 = vld [vmem:[%s14809_s24 + $0x48] ss:$12 sps:$4 sm:$0xff]  }
 0xf82   : > { %7285 = vmatprep.subr.bf16.mxu0 %v13048_v60  ;;  %v13122_v60 = vld [vmem:[%s14809_s24 + $0x50] ss:$12 sps:$4 sm:$0xff]  }
 0xf84   : > { %7200 = vmatpush1.bf16.msra.mxu1 %v13043_v13  ;;  %v13125_v13 = vld [vmem:[%s14809_s24 + $0x64] ss:$12 sps:$4 sm:$0xff]  }
 0xf85   : > { %7286 = vmatpush1.bf16.msra.mxu0 %v13046_v20  ;;  %7201 = vmatprep.subr.bf16.mxu1 %v13051_v47  ;;  %v13126_v20 = vld [vmem:[%s14809_s24 + $0x128] ss:$12 sps:$4 sm:$0xff]   ;;  %v13123_v47 = vld [vmem:[%s14809_s24 + $0x60] ss:$12 sps:$4 sm:$0xff]  }
 0xf86   : > { %7287 = vmatprep.subr.bf16.mxu0 %v13054_v45  ;;  %v16048_v45 = vld [vmem:[%s14807_s0] sm:$0xff] }
 0xf88   : > { %7202 = vmatpush1.bf16.msra.mxu1 %v13049_v3  ;;  %v5341_v3 = vsub.s32 3, %v14931_v30 }
 0xf89   : > { %7288 = vmatpush1.bf16.msra.mxu0 %v13052_v52  ;;  %7214 = vmatprep.subr.bf16.mxu1 %v13057_v43  ;;  %v13127_v52 = vld [vmem:[%s14809_s24 + $0x68] ss:$12 sps:$4 sm:$0xff]  }
 0xf8a   : > { %7300 = vmatprep.subr.bf16.mxu0 %v13060_v29  ;;  %v13130_v43 = vld [vmem:[%s14809_s24 + $0x7c] ss:$12 sps:$4 sm:$0xff]   ;;  %v13131_v29 = vld [vmem:[%s14809_s24 + $0x140] ss:$12 sps:$4 sm:$0xff]  }
 0xf8b   : > { %7204 = vmatmul.mubr.bf16.vlgmr.msra.gmra.mrb[68].mxu1 %v15772_v36 }
 0xf8c   : > { %7290 = vmatmul.mubr.bf16.vlgmr.msra.gmra.mrb[84].mxu0 %v15772_v36  ;;  %7215 = vmatpush1.bf16.msra.mxu1 %v13055_v54  ;;  %v13067_v36 = vld [vmem:[%s14800_s12 + $0x6e0] ss:$48 sps:$4 sm:$0xff]   ;;  %v5330_v54 = vrot.slane %v16048_v45, %v14942_v34 }
 0xf8d   : > { %7301 = vmatpush1.bf16.msra.mxu0 %v13058_v55  ;;  %7216 = vmatprep.subr.bf16.mxu1 %v13063_v9  ;;  %v5338_v55 = vrot.slane %v16048_v45, %v14939_v33  ;;  %v5334_v9 = vrot.slane %v16048_v45, %v14936_v32 }
 0xf8e   : > { %7302 = vmatprep.subr.bf16.mxu0 %v13066_v41  ;;  %7246 = vmatprep.mubr.bf16.mxu1 %v14152_v17  ;;  %v5342_v41 = vrot.slane %v16048_v45, %v5341_v3 }
 0xf8f   : > { %7332 = vmatprep.mubr.bf16.mxu0 %v14152_v17  ;;  %v13081_v17 = vld [vmem:[%s14800_s12 + $0x7a4] ss:$48 sps:$4 sm:$0xff]  }
 0xf90   : > { %7217 = vmatpush1.bf16.msra.mxu1 %v13061_v57  ;;  %v13128_v57 = vld [vmem:[%s14809_s24 + $0x78] ss:$12 sps:$4 sm:$0xff]  }
 0xf91   : > { %7303 = vmatpush1.bf16.msra.mxu0 %v13064_v59  ;;  %7218 = vmatprep.subr.bf16.mxu1 %v13069_v25  ;;  %v13132_v59 = vld [vmem:[%s14809_s24 + $0x80] ss:$12 sps:$4 sm:$0xff]  }
 0xf92   : > { %7304 = vmatprep.subr.bf16.mxu0 %v13072_v2  ;;  %v13135_v25 = vld [vmem:[%s14809_s24 + $0x94] ss:$12 sps:$4 sm:$0xff]  }
 0xf94   : > { %7219 = vmatpush1.bf16.msra.mxu1 %v13067_v36 }
 0xf95   : > { %7305 = vmatpush1.bf16.msra.mxu0 %v13070_v31  ;;  %7220 = vmatprep.subr.bf16.mxu1 %v13075_v53  ;;  %v13136_v31 = vld [vmem:[%s14809_s24 + $0x158] ss:$12 sps:$4 sm:$0xff]  }
 0xf96   : > { %7306 = vmatprep.subr.bf16.mxu0 %v13078_v11 }
 0xf98   : > { %7221 = vmatpush1.bf16.msra.mxu1 %v13073_v50 }
 0xf99   : > { %7307 = vmatpush1.bf16.msra.mxu0 %v13076_v62  ;;  %7222 = vmatprep.subr.bf16.mxu1 %v13081_v17 }
 0xf9a   : > { %7308 = vmatprep.subr.bf16.mxu0 %v13084_v1 }
 0xf9c   : > { %7223 = vmatpush1.bf16.msra.mxu1 %v13079_v63 }
 0xf9d   : > { %7309 = vmatpush1.bf16.msra.mxu0 %v13082_v26  ;;  %7224 = vmatprep.subr.bf16.mxu1 %v13087_v42  ;;  %v13133_v42 = vld [vmem:[%s14809_s24 + $0x90] ss:$12 sps:$4 sm:$0xff]  }
 0xf9e   : > { %7310 = vmatprep.subr.bf16.mxu0 %v13090_v40 }
 0xfa0   : > { %7225 = vmatpush1.bf16.msra.mxu1 %v13085_v51 }
 0xfa1   : > { %7311 = vmatpush1.bf16.msra.mxu0 %v13088_v61  ;;  %7226 = vmatprep.subr.bf16.mxu1 %v13093_v0 }
 0xfa2   : > { %7312 = vmatprep.subr.bf16.mxu0 %v13096_v46  ;;  %v13137_v46 = vld [vmem:[%s14809_s24 + $0x98] ss:$12 sps:$4 sm:$0xff]  }
 0xfa4   : > { %7227 = vmatpush1.bf16.msra.mxu1 %v13091_v28  ;;  %v13140_v28 = vld [vmem:[%s14809_s24 + $0xac] ss:$12 sps:$4 sm:$0xff]  }
 0xfa5   : > { %7313 = vmatpush1.bf16.msra.mxu0 %v13094_v4  ;;  %7228 = vmatprep.subr.bf16.mxu1 %v13099_v5 }
 0xfa6   : > { %7314 = vmatprep.subr.bf16.mxu0 %v13102_v8  ;;  %v13141_v8 = vld [vmem:[%s14809_s24 + $0x170] ss:$12 sps:$4 sm:$0xff]  }
 0xfa8   : > { %7229 = vmatpush1.bf16.msra.mxu1 %v13097_v23 }
 0xfa9   : > { %7315 = vmatpush1.bf16.msra.mxu0 %v13100_v48  ;;  %9316 = vmatprep.subr.bf16.mxu1 %v13105_v56 }
 0xfaa   : > { %11604 = vmatprep.subr.bf16.mxu0 %v13106_v10 }
 0xfab   : > { %7247 = vmatmul.mubr.bf16.vlgmr.msra.gmra.mrb[68].mxu1 %v15819_v18 }
 0xfac   : > { %7333 = vmatmul.mubr.bf16.vlgmr.msra.gmra.mrb[84].mxu0 %v15819_v18  ;;  %9317 = vmatpush1.bf16.msra.mxu1 %v13103_v49  ;;  %v13117_v18 = vld [vmem:[%s14809_s24 + $0x38] ss:$12 sps:$4 sm:$0xff]  }
 0xfad   : > { %11605 = vmatpush3.bf16.msra.mxu0 %v13107_v14  ;;  %9318 = vmatprep.subr.bf16.mxu1 %v13110_v7 }
 0xfae   : > { %11606 = vmatprep.subr.bf16.mxu0 %v13111_v6 }
 0xfb0   : > { %9319 = vmatpush1.bf16.msra.mxu1 %v13108_v37  ;;  %v13138_v37 = vld [vmem:[%s14809_s24 + $0xa8] ss:$12 sps:$4 sm:$0xff]  }
 0xfb1   : > { %11607 = vmatpush3.bf16.msra.mxu0 %v13112_v24  ;;  %9320 = vmatprep.subr.bf16.mxu1 %v13115_v12 }
 0xfb2   : > { %11608 = vmatprep.subr.bf16.mxu0 %v13116_v15  ;;  %v13142_v15 = vld [vmem:[%s14809_s24 + $0xb0] ss:$12 sps:$4 sm:$0xff]  }
 0xfb4   : > { %9321 = vmatpush1.bf16.msra.mxu1 %v13113_v21 }
 0xfb5   : > { %11609 = vmatpush3.bf16.msra.mxu0 %v13117_v18  ;;  %9322 = vmatprep.subr.bf16.mxu1 %v13120_v39  ;;  %v13145_v39 = vld [vmem:[%s14809_s24 + $0xc4] ss:$12 sps:$4 sm:$0xff]  }
 0xfb6   : > { %11610 = vmatprep.subr.bf16.mxu0 %v13121_v44  ;;  %v13146_v44 = vld [vmem:[%s14809_s24 + $0x248] ss:$12 sps:$4 sm:$0xff]  }
 0xfb8   : > { %9323 = vmatpush1.bf16.msra.mxu1 %v13118_v22  ;;  %v13143_v22 = vld [vmem:[%s14809_s24 + $0xc0] ss:$12 sps:$4 sm:$0xff]  }
 0xfb9   : > { %11611 = vmatpush3.bf16.msra.mxu0 %v13122_v60  ;;  %9324 = vmatprep.subr.bf16.mxu1 %v13125_v13  ;;  %v13147_v60 = vld [vmem:[%s14809_s24 + $0x188] ss:$12 sps:$4 sm:$0xff]  }
 0xfba   : > { %11612 = vmatprep.subr.bf16.mxu0 %v13126_v20  ;;  %v13150_v13 = vld [vmem:[%s14809_s24 + $0xdc] ss:$12 sps:$4 sm:$0xff]   ;;  %v13151_v20 = vld [vmem:[%s14809_s24 + $0x260] ss:$12 sps:$4 sm:$0xff]  }
 0xfbc   : > { %9325 = vmatpush1.bf16.msra.mxu1 %v13123_v47  ;;  %v13148_v47 = vld [vmem:[%s14809_s24 + $0xd8] ss:$12 sps:$4 sm:$0xff]  }
 0xfbd   : > { %11613 = vmatpush3.bf16.msra.mxu0 %v13127_v52  ;;  %9326 = vmatprep.subr.bf16.mxu1 %v13130_v43  ;;  %v13152_v52 = vld [vmem:[%s14809_s24 + $0x1a0] ss:$12 sps:$4 sm:$0xff]  }
 0xfbe   : > { %v6904_v2 = vpop.f32.mrb[60].mxu1  ;;  %v6990_v36 = vpop.f32.mrb[76].mxu0  ;;  %11614 = vmatprep.subr.bf16.mxu0 %v13131_v29  ;;  %v13155_v43 = vld [vmem:[%s14809_s24 + $0xf4] ss:$12 sps:$4 sm:$0xff]   ;;  %v13156_v29 = vld [vmem:[%s14809_s24 + $0x278] ss:$12 sps:$4 sm:$0xff]  }
 0xfbf   : > { %v11979_v53 = vadd.f32 %v6904_v2, %v5330_v54  ;;  %v11983_v11 = vadd.f32 %v6990_v36, %v5338_v55  ;;  %v6906_v50 = vpop.f32.mrb[61].mxu1  ;;  %v6992_v62 = vpop.f32.mrb[77].mxu0  ;;  %v13166_v2 = vld [vmem:[%s14809_s24 + $0x2a8] ss:$12 sps:$4 sm:$0xff]   ;;  %v13163_v36 = vld [vmem:[%s14809_s24 + $0x120] ss:$12 sps:$4 sm:$0xff]  }
 0xfc0   : > { %v11980_v17 = vadd.f32 %v6906_v50, %v5334_v9  ;;  %v11984_v1 = vadd.f32 %v6992_v62, %v5342_v41  ;;  %v6908_v63 = vpop.f32.mrb[62].mxu1  ;;  %v6994_v26 = vpop.f32.mrb[78].mxu0  ;;  %9327 = vmatpush1.bf16.msra.mxu1 %v13128_v57  ;;  %v13158_v57 = vld [vmem:[%s14809_s24 + $0x108] ss:$12 sps:$4 sm:$0xff]   ;;  %v13168_v50 = vld [vmem:[%s14809_s24 + $0x138] ss:$12 sps:$4 sm:$0xff]  }
 0xfc1   : > { %v11981_v40 = vadd.f32 %v6908_v63, %v5330_v54  ;;  %v11985_v51 = vadd.f32 %v6994_v26, %v5338_v55  ;;  %11615 = vmatpush3.bf16.msra.mxu0 %v13132_v59  ;;  %v6910_v61 = vpop.f32.mrb[63].mxu1  ;;  %v6996_v0 = vpop.f32.mrb[79].mxu0  ;;  %9328 = vmatprep.subr.bf16.mxu1 %v13135_v25  ;;  %v7343_v23 = vmax.f32 %v11979_v53, 0.0  ;;  %v7345_v48 = vmax.f32 %v11983_v11, 0.0  ;;  %v13153_v54 = vld [vmem:[%s14809_s24 + $0xf0] ss:$12 sps:$4 sm:$0xff]  }
 0xfc2   : > { %v11982_v4 = vadd.f32 %v6910_v61, %v5334_v9  ;;  %v11986_v5 = vadd.f32 %v6996_v0, %v5342_v41  ;;  %11616 = vmatprep.subr.bf16.mxu0 %v13136_v31  ;;  %v7344_v49 = vmax.f32 %v11980_v17, 0.0  ;;  %v7346_v14 = vmax.f32 %v11984_v1, 0.0  ;;  %v13157_v55 = vld [vmem:[%s14809_s24 + $0x1b8] ss:$12 sps:$4 sm:$0xff]   ;;  %v13161_v41 = vld [vmem:[%s14809_s24 + $0x290] ss:$12 sps:$4 sm:$0xff]  }
 0xfc3   : > { %v7355_v56 = vmax.f32 %v11981_v40, 0.0  ;;  %v7357_v10 = vmax.f32 %v11985_v51, 0.0  ;;  %v13160_v9 = vld [vmem:[%s14809_s24 + $0x10c] ss:$12 sps:$4 sm:$0xff]   ;;  %v13162_v59 = vld [vmem:[%s14809_s24 + $0x1d0] ss:$12 sps:$4 sm:$0xff]  }
 0xfc4   : > { %v7356_v7 = vmax.f32 %v11982_v4, 0.0  ;;  %v7358_v6 = vmax.f32 %v11986_v5, 0.0  ;;  %9329 = vmatpush1.bf16.msra.mxu1 %v13133_v42  ;;  %v13165_v25 = vld [vmem:[%s14809_s24 + $0x124] ss:$12 sps:$4 sm:$0xff]   ;;  %v13167_v31 = vld [vmem:[%s14809_s24 + $0x1e8] ss:$12 sps:$4 sm:$0xff]  }
 0xfc5   : > { %v16072_v24 = vpack.c.bf16 %v7355_v56, %v7343_v23  ;;  %v16074_v12 = vpack.c.bf16 %v7357_v10, %v7345_v48  ;;  %11617 = vmatpush3.bf16.msra.mxu0 %v13137_v46  ;;  %9330 = vmatprep.subr.bf16.mxu1 %v13140_v28  ;;  %v13170_v53 = vld [vmem:[%s14809_s24 + $0x13c] ss:$12 sps:$4 sm:$0xff]   ;;  %v13171_v11 = vld [vmem:[%s14809_s24 + $0x2c0] ss:$12 sps:$4 sm:$0xff]   ;;  %v13176_v1 = vld [vmem:[%s14809_s24 + $0x2d8] ss:$12 sps:$4 sm:$0xff]  }
 0xfc6   : > { %v7368_v21 = vpack.c.bf16 %v7356_v7, %v7344_v49  ;;  %v16077_v18 = vpack.c.bf16 %v7358_v6, %v7346_v14  ;;  %11618 = vmatprep.subr.bf16.mxu0 %v13141_v8  ;;  %v13172_v62 = vld [vmem:[%s14809_s24 + $0x200] ss:$12 sps:$4 sm:$0xff]   ;;  %v13173_v63 = vld [vmem:[%s14809_s24 + $0x150] ss:$12 sps:$4 sm:$0xff]   ;;  %v13177_v26 = vld [vmem:[%s14809_s24 + $0x218] ss:$12 sps:$4 sm:$0xff]  }
 0xfc7   : > { %v13175_v17 = vld [vmem:[%s14809_s24 + $0x154] ss:$12 sps:$4 sm:$0xff]   ;;  %v13180_v42 = vld [vmem:[%s14809_s24 + $0x16c] ss:$12 sps:$4 sm:$0xff]   ;;  %v13181_v40 = vld [vmem:[%s14809_s24 + $0x2f0] ss:$12 sps:$4 sm:$0xff]  }
 0xfc8   : > { %9331 = vmatpush1.bf16.msra.mxu1 %v13138_v37  ;;  %9348 = vmatprep.mubr.bf16.mxu1 %v7368_v21  ;;  %v13178_v51 = vld [vmem:[%s14809_s24 + $0x168] ss:$12 sps:$4 sm:$0xff]   ;;  %v13182_v61 = vld [vmem:[%s14809_s24 + $0x230] ss:$12 sps:$4 sm:$0xff]   ;;  %v13183_v28 = vld [vmem:[%s14809_s24 + $0x180] ss:$12 sps:$4 sm:$0xff]  }
 0xfc9   : > { %11619 = vmatpush3.bf16.msra.mxu0 %v13142_v15  ;;  %9606 = vmatprep.mubr.bf16.mxu0 %v7368_v21  ;;  %v13185_v0 = vld [vmem:[%s14809_s24 + $0x184] ss:$12 sps:$4 sm:$0xff]   ;;  %v13207_v46 = vld [vmem:[%s14809_s24 + $0x3c8] ss:$12 sps:$4 sm:$0xff]   ;;  %v13212_v8 = vld [vmem:[%s14809_s24 + $0x3e0] ss:$12 sps:$4 sm:$0xff]  }
 0xfca   : > { %9332 = vmatprep.subr.bf16.mxu1 %v13145_v39  ;;  %11626 = vmatprep.subr.bf16.mxu0 %v13146_v44  ;;  %v13188_v4 = vld [vmem:[%s14809_s24 + $0x19c] ss:$12 sps:$4 sm:$0xff]   ;;  %v13186_v23 = vld [vmem:[%s14809_s24 + $0x198] ss:$12 sps:$4 sm:$0xff]   ;;  %v13191_v48 = vld [vmem:[%s14809_s24 + $0x1b4] ss:$12 sps:$4 sm:$0xff]  }
 0xfcb   : > { %v13208_v5 = vld [vmem:[%s14809_s24 + $0x308] ss:$12 sps:$4 sm:$0xff]   ;;  %v13213_v56 = vld [vmem:[%s14809_s24 + $0x320] ss:$12 sps:$4 sm:$0xff]   ;;  %v13217_v10 = vld [vmem:[%s14809_s24 + $0x3f8] ss:$12 sps:$4 sm:$0xff]  }
 0xfcc   : > { %9607 = vmatmul.mubr.bf16.vlgmr.msra.gmra.mrb[88].mxu0 %v16072_v24  ;;  %9333 = vmatpush1.bf16.msra.mxu1 %v13143_v22  ;;  %v13189_v49 = vld [vmem:[%s14809_s24 + $0x1b0] ss:$12 sps:$4 sm:$0xff]   ;;  %v13194_v14 = vld [vmem:[%s14809_s24 + $0x1cc] ss:$12 sps:$4 sm:$0xff]   ;;  %v13192_v37 = vld [vmem:[%s14809_s24 + $0x1c8] ss:$12 sps:$4 sm:$0xff]  }
 0xfcd   : > { %11627 = vmatpush3.bf16.msra.mxu0 %v13147_v60  ;;  %9647 = vmatprep.mubr.bf16.mxu0 %v16077_v18  ;;  %v13218_v7 = vld [vmem:[%s14809_s24 + $0x338] ss:$12 sps:$4 sm:$0xff]   ;;  %v13222_v6 = vld [vmem:[%s14809_s24 + $0x410] ss:$12 sps:$4 sm:$0xff]   ;;  %v13227_v21 = vld [vmem:[%s14809_s24 + $0x428] ss:$12 sps:$4 sm:$0xff]  }
 0xfce   : > { %9334 = vmatprep.subr.bf16.mxu1 %v13150_v13  ;;  %11628 = vmatprep.subr.bf16.mxu0 %v13151_v20  ;;  %v13223_v15 = vld [vmem:[%s14809_s24 + $0x350] ss:$12 sps:$4 sm:$0xff]   ;;  %v13228_v44 = vld [vmem:[%s14809_s24 + $0x368] ss:$12 sps:$4 sm:$0xff]   ;;  %v13232_v22 = vld [vmem:[%s14809_s24 + $0x440] ss:$12 sps:$4 sm:$0xff]  }
 0xfcf   : > { %v13200_v39 = vld [vmem:[%s14809_s24 + $0x1fc] ss:$12 sps:$4 sm:$0xff]   ;;  %v13198_v60 = vld [vmem:[%s14809_s24 + $0x1f8] ss:$12 sps:$4 sm:$0xff]   ;;  %v13203_v13 = vld [vmem:[%s14809_s24 + $0x214] ss:$12 sps:$4 sm:$0xff]  }
 0xfd0   : > { %9335 = vmatpush1.bf16.msra.mxu1 %v13148_v47  ;;  %v13233_v20 = vld [vmem:[%s14809_s24 + $0x380] ss:$12 sps:$4 sm:$0xff]   ;;  %v13237_v47 = vld [vmem:[%s14809_s24 + $0x458] ss:$12 sps:$4 sm:$0xff]  }
 0xfd1   : > { %11629 = vmatpush3.bf16.msra.mxu0 %v13152_v52  ;;  %9336 = vmatprep.subr.bf16.mxu1 %v13155_v43  ;;  %v13201_v52 = vld [vmem:[%s14809_s24 + $0x210] ss:$12 sps:$4 sm:$0xff]   ;;  %v13206_v43 = vld [vmem:[%s14809_s24 + $0x22c] ss:$12 sps:$4 sm:$0xff]  }
 0xfd2   : > { %11630 = vmatprep.subr.bf16.mxu0 %v13156_v29  ;;  %v13238_v29 = vld [vmem:[%s14809_s24 + $0x398] ss:$12 sps:$4 sm:$0xff]  }
 0xfd4   : > { %9337 = vmatpush1.bf16.msra.mxu1 %v13153_v54  ;;  %v13242_v54 = vld [vmem:[%s14809_s24 + $0x470] ss:$12 sps:$4 sm:$0xff]  }
 0xfd5   : > { %11631 = vmatpush3.bf16.msra.mxu0 %v13157_v55  ;;  %9338 = vmatprep.subr.bf16.mxu1 %v13160_v9  ;;  %v13204_v55 = vld [vmem:[%s14809_s24 + $0x228] ss:$12 sps:$4 sm:$0xff]   ;;  %v13211_v9 = vld [vmem:[%s14809_s24 + $0x244] ss:$12 sps:$4 sm:$0xff]  }
 0xfd6   : > { %11632 = vmatprep.subr.bf16.mxu0 %v13161_v41  ;;  %v13243_v41 = vld [vmem:[%s14809_s24 + $0x3b0] ss:$12 sps:$4 sm:$0xff]  }
 0xfd8   : > { %9339 = vmatpush1.bf16.msra.mxu1 %v13158_v57  ;;  %v13247_v57 = vld [vmem:[%s14809_s24 + $0x548] ss:$12 sps:$4 sm:$0xff]  }
 0xfd9   : > { %11633 = vmatpush3.bf16.msra.mxu0 %v13162_v59  ;;  %9340 = vmatprep.subr.bf16.mxu1 %v13165_v25  ;;  %v13209_v59 = vld [vmem:[%s14809_s24 + $0x240] ss:$12 sps:$4 sm:$0xff]   ;;  %v13216_v25 = vld [vmem:[%s14809_s24 + $0x25c] ss:$12 sps:$4 sm:$0xff]  }
 0xfda   : > { %11634 = vmatprep.subr.bf16.mxu0 %v13166_v2  ;;  %v13214_v2 = vld [vmem:[%s14809_s24 + $0x258] ss:$12 sps:$4 sm:$0xff]  }
 0xfdc   : > { %9341 = vmatpush1.bf16.msra.mxu1 %v13163_v36  ;;  %v13221_v36 = vld [vmem:[%s14809_s24 + $0x274] ss:$12 sps:$4 sm:$0xff]  }
 0xfdd   : > { %11635 = vmatpush3.bf16.msra.mxu0 %v13167_v31  ;;  %9342 = vmatprep.subr.bf16.mxu1 %v13170_v53  ;;  %v13219_v31 = vld [vmem:[%s14809_s24 + $0x270] ss:$12 sps:$4 sm:$0xff]   ;;  %v13226_v53 = vld [vmem:[%s14809_s24 + $0x28c] ss:$12 sps:$4 sm:$0xff]  }
 0xfde   : > { %11636 = vmatprep.subr.bf16.mxu0 %v13171_v11  ;;  %v13224_v11 = vld [vmem:[%s14809_s24 + $0x288] ss:$12 sps:$4 sm:$0xff]  }
 0xfe0   : > { %9343 = vmatpush1.bf16.msra.mxu1 %v13168_v50  ;;  %v13231_v50 = vld [vmem:[%s14809_s24 + $0x2a4] ss:$12 sps:$4 sm:$0xff]  }
 0xfe1   : > { %11637 = vmatpush3.bf16.msra.mxu0 %v13172_v62  ;;  %9344 = vmatprep.subr.bf16.mxu1 %v13175_v17  ;;  %v5345_v62 = vsub.s32 4, %v14931_v30  ;;  %v13229_v17 = vld [vmem:[%s14809_s24 + $0x2a0] ss:$12 sps:$4 sm:$0xff]  }
 0xfe2   : > { %11638 = vmatprep.subr.bf16.mxu0 %v13176_v1  ;;  %v5353_v1 = vsub.s32 6, %v14931_v30 }
 0xfe4   : > { %9345 = vmatpush1.bf16.msra.mxu1 %v13173_v63  ;;  %v5349_v63 = vsub.s32 5, %v14931_v30 }
 0xfe5   : > { %11639 = vmatpush3.bf16.msra.mxu0 %v13177_v26  ;;  %9346 = vmatprep.subr.bf16.mxu1 %v13180_v42  ;;  %v5357_v26 = vsub.s32 7, %v14931_v30  ;;  %v13236_v42 = vld [vmem:[%s14809_s24 + $0x2bc] ss:$12 sps:$4 sm:$0xff]   ;;  %v13350_v30 = vld [vmem:[%s14809_s24 + $0x52c] ss:$12 sps:$4 sm:$0xff]  }
 0xfe6   : > { %11640 = vmatprep.subr.bf16.mxu0 %v13181_v40  ;;  %v5346_v40 = vrot.slane %v16048_v45, %v5345_v62  ;;  %v13258_v62 = vld [vmem:[%s14809_s24 + $0x4b8] ss:$12 sps:$4 sm:$0xff]  }
 0xfe8   : > { %9347 = vmatpush1.bf16.msra.mxu1 %v13178_v51  ;;  %v5354_v51 = vrot.slane %v16048_v45, %v5353_v1  ;;  %v13259_v1 = vld [vmem:[%s14809_s24 + $0x330] ss:$12 sps:$4 sm:$0xff]  }
 0xfe9   : > { %11641 = vmatpush3.bf16.msra.mxu0 %v13182_v61  ;;  %9359 = vmatprep.subr.bf16.mxu1 %v13185_v0  ;;  %v5350_v61 = vrot.slane %v16048_v45, %v5349_v63  ;;  %v13234_v0 = vld [vmem:[%s14809_s24 + $0x2b8] ss:$12 sps:$4 sm:$0xff]   ;;  %v13263_v63 = vld [vmem:[%s14809_s24 + $0x4d0] ss:$12 sps:$4 sm:$0xff]  }
 0xfea   : > { %11648 = vmatprep.subr.bf16.mxu0 %v13207_v46  ;;  %v5358_v46 = vrot.slane %v16048_v45, %v5357_v26  ;;  %v13246_v45 = vld [vmem:[%s14809_s24 + $0x2ec] ss:$12 sps:$4 sm:$0xff]   ;;  %v13267_v26 = vld [vmem:[%s14809_s24 + $0x5a8] ss:$12 sps:$4 sm:$0xff]  }
 0xfeb   : > { %9349 = vmatmul.mubr.bf16.vlgmr.msra.gmra.mrb[72].mxu1 %v16072_v24  ;;  %v13197_v24 = vld [vmem:[%s14809_s24 + $0x1e4] ss:$12 sps:$4 sm:$0xff]  }
 0xfec   : > { %9648 = vmatmul.mubr.bf16.vlgmr.msra.gmra.mrb[92].mxu0 %v16074_v12  ;;  %9360 = vmatpush1.bf16.msra.mxu1 %v13183_v28  ;;  %v13241_v28 = vld [vmem:[%s14809_s24 + $0x2d4] ss:$12 sps:$4 sm:$0xff]  }
 0xfed   : > { %9391 = vmatprep.mubr.bf16.mxu1 %v16077_v18  ;;  %9361 = vmatprep.subr.bf16.mxu1 %v13188_v4  ;;  %v13195_v18 = vld [vmem:[%s14809_s24 + $0x1e0] ss:$12 sps:$4 sm:$0xff]  }
 0xfee   : > { %11649 = vmatpush3.bf16.msra.mxu0 %v13208_v5 }
 0xfef   : > { %11650 = vmatprep.subr.bf16.mxu0 %v13212_v8 }
 0xff0   : > { %9362 = vmatpush1.bf16.msra.mxu1 %v13186_v23 }
 0xff1   : > { %9363 = vmatprep.subr.bf16.mxu1 %v13191_v48 }
 0xff2   : > { %11651 = vmatpush3.bf16.msra.mxu0 %v13213_v56 }
 0xff3   : > { %11652 = vmatprep.subr.bf16.mxu0 %v13217_v10 }
 0xff4   : > { %9364 = vmatpush1.bf16.msra.mxu1 %v13189_v49 }
 0xff5   : > { %9365 = vmatprep.subr.bf16.mxu1 %v13194_v14  ;;  %v13239_v14 = vld [vmem:[%s14809_s24 + $0x2d0] ss:$12 sps:$4 sm:$0xff]  }
 0xff6   : > { %11653 = vmatpush3.bf16.msra.mxu0 %v13218_v7 }
 0xff7   : > { %11654 = vmatprep.subr.bf16.mxu0 %v13222_v6 }
 0xff8   : > { %9366 = vmatpush1.bf16.msra.mxu1 %v13192_v37 }
 0xff9   : > { %9367 = vmatprep.subr.bf16.mxu1 %v13197_v24 }
 0xffa   : > { %11655 = vmatpush3.bf16.msra.mxu0 %v13223_v15 }
 0xffb   : > { %11656 = vmatprep.subr.bf16.mxu0 %v13227_v21 }
 0xffc   : > { %9368 = vmatpush1.bf16.msra.mxu1 %v13195_v18 }
 0xffd   : > { %9369 = vmatprep.subr.bf16.mxu1 %v13200_v39 }
 0xffe   : > { %11657 = vmatpush3.bf16.msra.mxu0 %v13228_v44 }
 0xfff   : > { %11658 = vmatprep.subr.bf16.mxu0 %v13232_v22 }
0x1000   : > { %9370 = vmatpush1.bf16.msra.mxu1 %v13198_v60 }
0x1001   : > { %9371 = vmatprep.subr.bf16.mxu1 %v13203_v13 }
0x1002   : > { %11659 = vmatpush3.bf16.msra.mxu0 %v13233_v20 }
0x1003   : > { %11660 = vmatprep.subr.bf16.mxu0 %v13237_v47 }
0x1004   : > { %9372 = vmatpush1.bf16.msra.mxu1 %v13201_v52  ;;  %v13244_v52 = vld [vmem:[%s14809_s24 + $0x2e8] ss:$12 sps:$4 sm:$0xff]  }
0x1005   : > { %9373 = vmatprep.subr.bf16.mxu1 %v13206_v43 }
0x1006   : > { %11661 = vmatpush3.bf16.msra.mxu0 %v13238_v29 }
0x1007   : > { %11662 = vmatprep.subr.bf16.mxu0 %v13242_v54 }
0x1008   : > { %9374 = vmatpush1.bf16.msra.mxu1 %v13204_v55  ;;  %v13251_v55 = vld [vmem:[%s14809_s24 + $0x304] ss:$12 sps:$4 sm:$0xff]  }
0x1009   : > { %9375 = vmatprep.subr.bf16.mxu1 %v13211_v9 }
0x100a   : > { %11663 = vmatpush3.bf16.msra.mxu0 %v13243_v41 }
0x100b   : > { %11670 = vmatprep.subr.bf16.mxu0 %v13247_v57  ;;  %v13248_v57 = vld [vmem:[%s14809_s24 + $0x488] ss:$12 sps:$4 sm:$0xff]  }
0x100c   : > { %9376 = vmatpush1.bf16.msra.mxu1 %v13209_v59 }
0x100d   : > { %9377 = vmatprep.subr.bf16.mxu1 %v13216_v25  ;;  %v13252_v25 = vld [vmem:[%s14809_s24 + $0x560] ss:$12 sps:$4 sm:$0xff]  }
0x1010   : > { %9378 = vmatpush1.bf16.msra.mxu1 %v13214_v2  ;;  %v13249_v2 = vld [vmem:[%s14809_s24 + $0x300] ss:$12 sps:$4 sm:$0xff]  }
0x1011   : > { %9379 = vmatprep.subr.bf16.mxu1 %v13221_v36  ;;  %v13256_v36 = vld [vmem:[%s14809_s24 + $0x31c] ss:$12 sps:$4 sm:$0xff]  }
0x1014   : > { %9380 = vmatpush1.bf16.msra.mxu1 %v13219_v31  ;;  %v13253_v31 = vld [vmem:[%s14809_s24 + $0x4a0] ss:$12 sps:$4 sm:$0xff]  }
0x1015   : > { %9381 = vmatprep.subr.bf16.mxu1 %v13226_v53  ;;  %v13257_v53 = vld [vmem:[%s14809_s24 + $0x578] ss:$12 sps:$4 sm:$0xff]  }
0x1018   : > { %9382 = vmatpush1.bf16.msra.mxu1 %v13224_v11  ;;  %v13254_v11 = vld [vmem:[%s14809_s24 + $0x318] ss:$12 sps:$4 sm:$0xff]  }
0x1019   : > { %9383 = vmatprep.subr.bf16.mxu1 %v13231_v50  ;;  %v13261_v50 = vld [vmem:[%s14809_s24 + $0x334] ss:$12 sps:$4 sm:$0xff]  }
0x101c   : > { %9384 = vmatpush1.bf16.msra.mxu1 %v13229_v17  ;;  %v13262_v17 = vld [vmem:[%s14809_s24 + $0x590] ss:$12 sps:$4 sm:$0xff]  }
0x101d   : > { %9385 = vmatprep.subr.bf16.mxu1 %v13236_v42  ;;  %v13264_v42 = vld [vmem:[%s14809_s24 + $0x348] ss:$12 sps:$4 sm:$0xff]  }
0x101e   : > { %v7076_v4 = vpop.f32.mrb[64].mxu1 }
0x101f   : > { %v11987_v5 = vadd.f32 %v7076_v4, %v5346_v40  ;;  %v7162_v8 = vpop.f32.mrb[80].mxu0  ;;  %v7078_v23 = vpop.f32.mrb[65].mxu1  ;;  %v13277_v4 = vld [vmem:[%s14809_s24 + $0x5d8] ss:$12 sps:$4 sm:$0xff]  }
0x1020   : > { %v11991_v48 = vadd.f32 %v7162_v8, %v5354_v51  ;;  %v11988_v56 = vadd.f32 %v7078_v23, %v5350_v61  ;;  %v7164_v10 = vpop.f32.mrb[81].mxu0  ;;  %v7080_v49 = vpop.f32.mrb[66].mxu1  ;;  %9386 = vmatpush1.bf16.msra.mxu1 %v13234_v0  ;;  %v13269_v0 = vld [vmem:[%s14809_s24 + $0x360] ss:$12 sps:$4 sm:$0xff]   ;;  %v13278_v23 = vld [vmem:[%s14809_s24 + $0x518] ss:$12 sps:$4 sm:$0xff]  }
0x1021   : > { %v11992_v7 = vadd.f32 %v7164_v10, %v5358_v46  ;;  %v11989_v6 = vadd.f32 %v7080_v49, %v5346_v40  ;;  %v7166_v37 = vpop.f32.mrb[82].mxu0  ;;  %v7082_v24 = vpop.f32.mrb[67].mxu1  ;;  %9387 = vmatprep.subr.bf16.mxu1 %v13241_v28  ;;  %v7347_v39 = vmax.f32 %v11987_v5, 0.0  ;;  %v13271_v40 = vld [vmem:[%s14809_s24 + $0x364] ss:$12 sps:$4 sm:$0xff]  }
0x1022   : > { %v11993_v15 = vadd.f32 %v7166_v37, %v5354_v51  ;;  %v11990_v21 = vadd.f32 %v7082_v24, %v5350_v61  ;;  %v7168_v18 = vpop.f32.mrb[83].mxu0  ;;  %v7349_v60 = vmax.f32 %v11991_v48, 0.0  ;;  %v7348_v13 = vmax.f32 %v11988_v56, 0.0  ;;  %v13268_v51 = vld [vmem:[%s14809_s24 + $0x4e8] ss:$12 sps:$4 sm:$0xff]  }
0x1023   : > { %v7359_v44 = vmax.f32 %v11989_v6, 0.0  ;;  %v11994_v22 = vadd.f32 %v7168_v18, %v5358_v46  ;;  %v7350_v43 = vmax.f32 %v11992_v7, 0.0  ;;  %v13272_v61 = vld [vmem:[%s14809_s24 + $0x5c0] ss:$12 sps:$4 sm:$0xff]   ;;  %v13276_v46 = vld [vmem:[%s14809_s24 + $0x37c] ss:$12 sps:$4 sm:$0xff]  }
0x1024   : > { %v7361_v20 = vmax.f32 %v11993_v15, 0.0  ;;  %v7360_v47 = vmax.f32 %v11990_v21, 0.0  ;;  %9388 = vmatpush1.bf16.msra.mxu1 %v13239_v14  ;;  %v13273_v28 = vld [vmem:[%s14809_s24 + $0x500] ss:$12 sps:$4 sm:$0xff]   ;;  %v13274_v5 = vld [vmem:[%s14809_s24 + $0x378] ss:$12 sps:$4 sm:$0xff]  }
0x1025   : > { %v16173_v29 = vpack.c.bf16 %v7359_v44, %v7347_v39  ;;  %v7362_v54 = vmax.f32 %v11994_v22, 0.0  ;;  %9389 = vmatprep.subr.bf16.mxu1 %v13246_v45  ;;  %v13281_v8 = vld [vmem:[%s14809_s24 + $0x394] ss:$12 sps:$4 sm:$0xff]   ;;  %v13282_v48 = vld [vmem:[%s14809_s24 + $0x5f0] ss:$12 sps:$4 sm:$0xff]  }
0x1026   : > { %v16176_v9 = vpack.c.bf16 %v7361_v20, %v7349_v60  ;;  %v7372_v41 = vpack.c.bf16 %v7360_v47, %v7348_v13  ;;  %v13279_v56 = vld [vmem:[%s14809_s24 + $0x390] ss:$12 sps:$4 sm:$0xff]   ;;  %v13286_v10 = vld [vmem:[%s14809_s24 + $0x3ac] ss:$12 sps:$4 sm:$0xff]   ;;  %v13311_v14 = vld [vmem:[%s14809_s24 + $0x6c8] ss:$12 sps:$4 sm:$0xff]  }
0x1027   : > { %v16179_v59 = vpack.c.bf16 %v7362_v54, %v7350_v43  ;;  %v13283_v49 = vld [vmem:[%s14809_s24 + $0x530] ss:$12 sps:$4 sm:$0xff]   ;;  %v13284_v7 = vld [vmem:[%s14809_s24 + $0x3a8] ss:$12 sps:$4 sm:$0xff]   ;;  %v13316_v24 = vld [vmem:[%s14809_s24 + $0x6e0] ss:$12 sps:$4 sm:$0xff]  }
0x1028   : > { %9390 = vmatpush1.bf16.msra.mxu1 %v13244_v52  ;;  %9688 = vmatprep.mubr.bf16.mxu0 %v7372_v41  ;;  %v13289_v6 = vld [vmem:[%s14809_s24 + $0x3c4] ss:$12 sps:$4 sm:$0xff]   ;;  %v13312_v37 = vld [vmem:[%s14809_s24 + $0x608] ss:$12 sps:$4 sm:$0xff]   ;;  %v13287_v45 = vld [vmem:[%s14809_s24 + $0x3c0] ss:$12 sps:$4 sm:$0xff]  }
0x1029   : > { %9689 = vmatmul.mubr.bf16.vlgmr.msra.gmra.mrb[96].mxu0 %v16173_v29  ;;  %9402 = vmatprep.subr.bf16.mxu1 %v13251_v55  ;;  %v13292_v15 = vld [vmem:[%s14809_s24 + $0x3dc] ss:$12 sps:$4 sm:$0xff]   ;;  %v13317_v21 = vld [vmem:[%s14809_s24 + $0x620] ss:$12 sps:$4 sm:$0xff]   ;;  %v13321_v18 = vld [vmem:[%s14809_s24 + $0x6f8] ss:$12 sps:$4 sm:$0xff]  }
0x102a   : > { %11671 = vmatpush3.bf16.msra.mxu0 %v13248_v57  ;;  %9729 = vmatprep.mubr.bf16.mxu0 %v16179_v59  ;;  %v13290_v39 = vld [vmem:[%s14809_s24 + $0x3d8] ss:$12 sps:$4 sm:$0xff]   ;;  %v13295_v44 = vld [vmem:[%s14809_s24 + $0x3f4] ss:$12 sps:$4 sm:$0xff]   ;;  %v13326_v60 = vld [vmem:[%s14809_s24 + $0x710] ss:$12 sps:$4 sm:$0xff]  }
0x102b   : > { %9392 = vmatmul.mubr.bf16.vlgmr.msra.gmra.mrb[72].mxu1 %v16074_v12  ;;  %11672 = vmatprep.subr.bf16.mxu0 %v13252_v25  ;;  %v13266_v12 = vld [vmem:[%s14809_s24 + $0x34c] ss:$12 sps:$4 sm:$0xff]   ;;  %v13293_v13 = vld [vmem:[%s14809_s24 + $0x3f0] ss:$12 sps:$4 sm:$0xff]   ;;  %v13331_v52 = vld [vmem:[%s14809_s24 + $0x728] ss:$12 sps:$4 sm:$0xff]  }
0x102c   : > { %9403 = vmatpush1.bf16.msra.mxu1 %v13249_v2  ;;  %9434 = vmatprep.mubr.bf16.mxu1 %v7372_v41  ;;  %v13322_v22 = vld [vmem:[%s14809_s24 + $0x638] ss:$12 sps:$4 sm:$0xff]   ;;  %v13327_v47 = vld [vmem:[%s14809_s24 + $0x650] ss:$12 sps:$4 sm:$0xff]   ;;  %v13296_v43 = vld [vmem:[%s14809_s24 + $0x408] ss:$12 sps:$4 sm:$0xff]  }
0x102d   : > { %9404 = vmatprep.subr.bf16.mxu1 %v13256_v36  ;;  %v13298_v20 = vld [vmem:[%s14809_s24 + $0x40c] ss:$12 sps:$4 sm:$0xff]   ;;  %v13301_v54 = vld [vmem:[%s14809_s24 + $0x424] ss:$12 sps:$4 sm:$0xff]   ;;  %v13332_v55 = vld [vmem:[%s14809_s24 + $0x668] ss:$12 sps:$4 sm:$0xff]  }
0x102e   : > { %11673 = vmatpush3.bf16.msra.mxu0 %v13253_v31  ;;  %v13336_v41 = vld [vmem:[%s14809_s24 + $0x740] ss:$12 sps:$4 sm:$0xff]   ;;  %v13304_v25 = vld [vmem:[%s14809_s24 + $0x43c] ss:$12 sps:$4 sm:$0xff]   ;;  %v13341_v36 = vld [vmem:[%s14809_s24 + $0x758] ss:$12 sps:$4 sm:$0xff]  }
0x102f   : > { %11674 = vmatprep.subr.bf16.mxu0 %v13257_v53  ;;  %v13299_v57 = vld [vmem:[%s14809_s24 + $0x420] ss:$12 sps:$4 sm:$0xff]   ;;  %v13302_v31 = vld [vmem:[%s14809_s24 + $0x438] ss:$12 sps:$4 sm:$0xff]  }
0x1030   : > { %9405 = vmatpush1.bf16.msra.mxu1 %v13254_v11  ;;  %v13337_v2 = vld [vmem:[%s14809_s24 + $0x680] ss:$12 sps:$4 sm:$0xff]   ;;  %v13342_v11 = vld [vmem:[%s14809_s24 + $0x698] ss:$12 sps:$4 sm:$0xff]  }
0x1031   : > { %9406 = vmatprep.subr.bf16.mxu1 %v13261_v50  ;;  %v13307_v53 = vld [vmem:[%s14809_s24 + $0x454] ss:$12 sps:$4 sm:$0xff]   ;;  %v13346_v50 = vld [vmem:[%s14809_s24 + $0x770] ss:$12 sps:$4 sm:$0xff]  }
0x1032   : > { %11675 = vmatpush3.bf16.msra.mxu0 %v13258_v62  ;;  %v13305_v62 = vld [vmem:[%s14809_s24 + $0x450] ss:$12 sps:$4 sm:$0xff]  }
0x1033   : > { %11676 = vmatprep.subr.bf16.mxu0 %v13262_v17  ;;  %v13310_v17 = vld [vmem:[%s14809_s24 + $0x46c] ss:$12 sps:$4 sm:$0xff]  }
0x1034   : > { %9407 = vmatpush1.bf16.msra.mxu1 %v13259_v1  ;;  %v13347_v1 = vld [vmem:[%s14809_s24 + $0x6b0] ss:$12 sps:$4 sm:$0xff]  }
0x1035   : > { %9408 = vmatprep.subr.bf16.mxu1 %v13266_v12  ;;  %v13351_v12 = vld [vmem:[%s14809_s24 + $0x848] ss:$12 sps:$4 sm:$0xff]  }
0x1036   : > { %11677 = vmatpush3.bf16.msra.mxu0 %v13263_v63  ;;  %v13308_v63 = vld [vmem:[%s14809_s24 + $0x468] ss:$12 sps:$4 sm:$0xff]  }
0x1037   : > { %11678 = vmatprep.subr.bf16.mxu0 %v13267_v26  ;;  %v13315_v26 = vld [vmem:[%s14809_s24 + $0x484] ss:$12 sps:$4 sm:$0xff]  }
0x1038   : > { %9409 = vmatpush1.bf16.msra.mxu1 %v13264_v42  ;;  %v13313_v42 = vld [vmem:[%s14809_s24 + $0x480] ss:$12 sps:$4 sm:$0xff]  }
0x1039   : > { %9410 = vmatprep.subr.bf16.mxu1 %v13271_v40  ;;  %v13320_v40 = vld [vmem:[%s14809_s24 + $0x49c] ss:$12 sps:$4 sm:$0xff]  }
0x103a   : > { %11679 = vmatpush3.bf16.msra.mxu0 %v13268_v51  ;;  %v13318_v51 = vld [vmem:[%s14809_s24 + $0x498] ss:$12 sps:$4 sm:$0xff]  }
0x103b   : > { %11680 = vmatprep.subr.bf16.mxu0 %v13272_v61  ;;  %v13325_v61 = vld [vmem:[%s14809_s24 + $0x4b4] ss:$12 sps:$4 sm:$0xff]  }
0x103c   : > { %9411 = vmatpush1.bf16.msra.mxu1 %v13269_v0  ;;  %v13323_v0 = vld [vmem:[%s14809_s24 + $0x4b0] ss:$12 sps:$4 sm:$0xff]  }
0x103d   : > { %9412 = vmatprep.subr.bf16.mxu1 %v13276_v46  ;;  %v13330_v46 = vld [vmem:[%s14809_s24 + $0x4cc] ss:$12 sps:$4 sm:$0xff]  }
0x103e   : > { %11681 = vmatpush3.bf16.msra.mxu0 %v13273_v28  ;;  %v13328_v28 = vld [vmem:[%s14809_s24 + $0x4c8] ss:$12 sps:$4 sm:$0xff]  }
0x103f   : > { %11682 = vmatprep.subr.bf16.mxu0 %v13277_v4  ;;  %v13335_v4 = vld [vmem:[%s14809_s24 + $0x4e4] ss:$12 sps:$4 sm:$0xff]  }
0x1040   : > { %9413 = vmatpush1.bf16.msra.mxu1 %v13274_v5  ;;  %v5324_v5 = vld [vmem:[%s14807_s0 + $0x8] sm:$0xf] }
0x1041   : > { %9414 = vmatprep.subr.bf16.mxu1 %v13281_v8  ;;  %v13340_v8 = vld [vmem:[%s14809_s24 + $0x4fc] ss:$12 sps:$4 sm:$0xff]  }
0x1042   : > { %11683 = vmatpush3.bf16.msra.mxu0 %v13278_v23  ;;  %v5370_v23 = vrot.slane %v5324_v5, %v14939_v33 }
0x1043   : > { %11684 = vmatprep.subr.bf16.mxu0 %v13282_v48  ;;  %v5366_v48 = vrot.slane %v5324_v5, %v14936_v32 }
0x1044   : > { %9415 = vmatpush1.bf16.msra.mxu1 %v13279_v56  ;;  %v13338_v56 = vld [vmem:[%s14809_s24 + $0x4f8] ss:$12 sps:$4 sm:$0xff]  }
0x1045   : > { %9416 = vmatprep.subr.bf16.mxu1 %v13286_v10  ;;  %v5374_v10 = vrot.slane %v5324_v5, %v5341_v3 }
0x1046   : > { %11685 = vmatpush3.bf16.msra.mxu0 %v13283_v49  ;;  %v13345_v49 = vld [vmem:[%s14809_s24 + $0x514] ss:$12 sps:$4 sm:$0xff]  }
0x1047   : > { %11692 = vmatprep.subr.bf16.mxu0 %v13311_v14 }
0x1048   : > { %9417 = vmatpush1.bf16.msra.mxu1 %v13284_v7 }
0x1049   : > { %9730 = vmatmul.mubr.bf16.vlgmr.msra.gmra.mrb[100].mxu0 %v16176_v9  ;;  %9418 = vmatprep.subr.bf16.mxu1 %v13289_v6 }
0x104a   : > { %11693 = vmatpush3.bf16.msra.mxu0 %v13312_v37 }
0x104b   : > { %11694 = vmatprep.subr.bf16.mxu0 %v13316_v24 }
0x104c   : > { %9419 = vmatpush1.bf16.msra.mxu1 %v13287_v45 }
0x104d   : > { %9420 = vmatprep.subr.bf16.mxu1 %v13292_v15 }
0x104e   : > { %11695 = vmatpush3.bf16.msra.mxu0 %v13317_v21 }
0x104f   : > { %11696 = vmatprep.subr.bf16.mxu0 %v13321_v18  ;;  %v13343_v18 = vld [vmem:[%s14809_s24 + $0x510] ss:$12 sps:$4 sm:$0xff]  }
0x1050   : > { %9421 = vmatpush1.bf16.msra.mxu1 %v13290_v39 }
0x1051   : > { %9422 = vmatprep.subr.bf16.mxu1 %v13295_v44 }
0x1052   : > { %11697 = vmatpush3.bf16.msra.mxu0 %v13322_v22 }
0x1053   : > { %11698 = vmatprep.subr.bf16.mxu0 %v13326_v60 }
0x1054   : > { %9423 = vmatpush1.bf16.msra.mxu1 %v13293_v13 }
0x1055   : > { %9424 = vmatprep.subr.bf16.mxu1 %v13298_v20 }
0x1056   : > { %11699 = vmatpush3.bf16.msra.mxu0 %v13327_v47 }
0x1057   : > { %11700 = vmatprep.subr.bf16.mxu0 %v13331_v52 }
0x1058   : > { %9425 = vmatpush1.bf16.msra.mxu1 %v13296_v43 }
0x1059   : > { %9426 = vmatprep.subr.bf16.mxu1 %v13301_v54 }
0x105a   : > { %11701 = vmatpush3.bf16.msra.mxu0 %v13332_v55 }
0x105b   : > { %11702 = vmatprep.subr.bf16.mxu0 %v13336_v41 }
0x105c   : > { %9427 = vmatpush1.bf16.msra.mxu1 %v13299_v57 }
0x105d   : > { %9428 = vmatprep.subr.bf16.mxu1 %v13304_v25  ;;  %v13348_v25 = vld [vmem:[%s14809_s24 + $0x528] ss:$12 sps:$4 sm:$0xff]  }
0x105e   : > { %11703 = vmatpush3.bf16.msra.mxu0 %v13337_v2 }
0x105f   : > { %11704 = vmatprep.subr.bf16.mxu0 %v13341_v36 }
0x1060   : > { %9429 = vmatpush1.bf16.msra.mxu1 %v13302_v31 }
0x1061   : > { %9430 = vmatprep.subr.bf16.mxu1 %v13307_v53  ;;  %v13355_v53 = vld [vmem:[%s14809_s24 + $0x544] ss:$12 sps:$4 sm:$0xff]  }
0x1062   : > { %11705 = vmatpush3.bf16.msra.mxu0 %v13342_v11 }
0x1063   : > { %11706 = vmatprep.subr.bf16.mxu0 %v13346_v50 }
0x1064   : > { %9431 = vmatpush1.bf16.msra.mxu1 %v13305_v62  ;;  %v13352_v62 = vld [vmem:[%s14809_s24 + $0x788] ss:$12 sps:$4 sm:$0xff]  }
0x1065   : > { %9432 = vmatprep.subr.bf16.mxu1 %v13310_v17 }
0x1066   : > { %11707 = vmatpush3.bf16.msra.mxu0 %v13347_v1  ;;  %v13356_v1 = vld [vmem:[%s14809_s24 + $0x860] ss:$12 sps:$4 sm:$0xff]  }
0x1067   : > { %11714 = vmatprep.subr.bf16.mxu0 %v13351_v12  ;;  %v13353_v12 = vld [vmem:[%s14809_s24 + $0x540] ss:$12 sps:$4 sm:$0xff]  }
0x1068   : > { %9433 = vmatpush1.bf16.msra.mxu1 %v13308_v63  ;;  %v13360_v63 = vld [vmem:[%s14809_s24 + $0x55c] ss:$12 sps:$4 sm:$0xff]  }
0x1069   : > { %9445 = vmatprep.subr.bf16.mxu1 %v13315_v26  ;;  %v13357_v26 = vld [vmem:[%s14809_s24 + $0x7a0] ss:$12 sps:$4 sm:$0xff]  }
0x106b   : > { %9435 = vmatmul.mubr.bf16.vlgmr.msra.gmra.mrb[72].mxu1 %v16173_v29  ;;  %v13333_v29 = vld [vmem:[%s14809_s24 + $0x4e0] ss:$12 sps:$4 sm:$0xff]  }
0x106c   : > { %9446 = vmatpush1.bf16.msra.mxu1 %v13313_v42  ;;  %9477 = vmatprep.mubr.bf16.mxu1 %v16179_v59  ;;  %v5362_v59 = vrot.slane %v5324_v5, %v14942_v34  ;;  %v13361_v42 = vld [vmem:[%s14809_s24 + $0x878] ss:$12 sps:$4 sm:$0xff]   ;;  %v13368_v5 = vld [vmem:[%s14809_s24 + $0x588] ss:$12 sps:$4 sm:$0xff]  }
0x106d   : > { %9447 = vmatprep.subr.bf16.mxu1 %v13320_v40  ;;  %v13358_v40 = vld [vmem:[%s14809_s24 + $0x558] ss:$12 sps:$4 sm:$0xff]  }
0x1070   : > { %9448 = vmatpush1.bf16.msra.mxu1 %v13318_v51  ;;  %v13365_v51 = vld [vmem:[%s14809_s24 + $0x574] ss:$12 sps:$4 sm:$0xff]  }
0x1071   : > { %9449 = vmatprep.subr.bf16.mxu1 %v13325_v61  ;;  %v13362_v61 = vld [vmem:[%s14809_s24 + $0x7b8] ss:$12 sps:$4 sm:$0xff]  }
0x1074   : > { %9450 = vmatpush1.bf16.msra.mxu1 %v13323_v0  ;;  %v13366_v0 = vld [vmem:[%s14809_s24 + $0x890] ss:$12 sps:$4 sm:$0xff]  }
0x1075   : > { %9451 = vmatprep.subr.bf16.mxu1 %v13330_v46  ;;  %v13363_v46 = vld [vmem:[%s14809_s24 + $0x570] ss:$12 sps:$4 sm:$0xff]  }
0x1078   : > { %9452 = vmatpush1.bf16.msra.mxu1 %v13328_v28  ;;  %v13370_v28 = vld [vmem:[%s14809_s24 + $0x58c] ss:$12 sps:$4 sm:$0xff]  }
0x1079   : > { %9453 = vmatprep.subr.bf16.mxu1 %v13335_v4  ;;  %v13367_v4 = vld [vmem:[%s14809_s24 + $0x7d0] ss:$12 sps:$4 sm:$0xff]  }
0x107c   : > { %9454 = vmatpush1.bf16.msra.mxu1 %v13333_v29  ;;  %v13371_v29 = vld [vmem:[%s14809_s24 + $0x8a8] ss:$12 sps:$4 sm:$0xff]  }
0x107d   : > { %9455 = vmatprep.subr.bf16.mxu1 %v13340_v8  ;;  %v13375_v8 = vld [vmem:[%s14809_s24 + $0x5a4] ss:$12 sps:$4 sm:$0xff]  }
0x107e   : > { %v7248_v14 = vpop.f32.mrb[68].mxu1 }
0x107f   : > { %v11995_v7 = vadd.f32 %v7248_v14, %v5362_v59  ;;  %v7334_v6 = vpop.f32.mrb[84].mxu0  ;;  %v7250_v37 = vpop.f32.mrb[69].mxu1  ;;  %v13378_v14 = vld [vmem:[%s14809_s24 + $0x5b8] ss:$12 sps:$4 sm:$0xff]  }
0x1080   : > { %v11999_v24 = vadd.f32 %v7334_v6, %v5370_v23  ;;  %v11996_v45 = vadd.f32 %v7250_v37, %v5366_v48  ;;  %v7336_v15 = vpop.f32.mrb[85].mxu0  ;;  %v7252_v21 = vpop.f32.mrb[70].mxu1  ;;  %9456 = vmatpush1.bf16.msra.mxu1 %v13338_v56  ;;  %v13380_v56 = vld [vmem:[%s14809_s24 + $0x5bc] ss:$12 sps:$4 sm:$0xff]   ;;  %v13382_v6 = vld [vmem:[%s14809_s24 + $0x818] ss:$12 sps:$4 sm:$0xff]  }
0x1081   : > { %v12000_v39 = vadd.f32 %v7336_v15, %v5374_v10  ;;  %v11997_v44 = vadd.f32 %v7252_v21, %v5362_v59  ;;  %v7338_v22 = vpop.f32.mrb[86].mxu0  ;;  %v7254_v60 = vpop.f32.mrb[71].mxu1  ;;  %9457 = vmatprep.subr.bf16.mxu1 %v13345_v49  ;;  %v7351_v47 = vmax.f32 %v11995_v7, 0.0  ;;  %v13372_v59 = vld [vmem:[%s14809_s24 + $0x7e8] ss:$12 sps:$4 sm:$0xff]  }
0x1082   : > { %v12001_v3 = vadd.f32 %v7338_v22, %v5370_v23  ;;  %v11998_v13 = vadd.f32 %v7254_v60, %v5366_v48  ;;  %v7340_v20 = vpop.f32.mrb[87].mxu0  ;;  %v7353_v54 = vmax.f32 %v11999_v24, 0.0  ;;  %v7352_v55 = vmax.f32 %v11996_v45, 0.0  ;;  %v13376_v23 = vld [vmem:[%s14809_s24 + $0x8c0] ss:$12 sps:$4 sm:$0xff]  }
0x1083   : > { %v7363_v52 = vmax.f32 %v11997_v44, 0.0  ;;  %v12002_v43 = vadd.f32 %v7340_v20, %v5374_v10  ;;  %v7354_v2 = vmax.f32 %v12000_v39, 0.0  ;;  %v13373_v48 = vld [vmem:[%s14809_s24 + $0x5a0] ss:$12 sps:$4 sm:$0xff]   ;;  %v13381_v49 = vld [vmem:[%s14809_s24 + $0x8d8] ss:$12 sps:$4 sm:$0xff]  }
0x1084   : > { %v7365_v41 = vmax.f32 %v12001_v3, 0.0  ;;  %v7364_v57 = vmax.f32 %v11998_v13, 0.0  ;;  %9458 = vmatpush1.bf16.msra.mxu1 %v13343_v18  ;;  %v13377_v10 = vld [vmem:[%s14809_s24 + $0x800] ss:$12 sps:$4 sm:$0xff]   ;;  %v13386_v24 = vld [vmem:[%s14809_s24 + $0x8f0] ss:$12 sps:$4 sm:$0xff]  }
0x1085   : > { %v16271_v36 = vpack.c.bf16 %v7363_v52, %v7351_v47  ;;  %v7366_v31 = vmax.f32 %v12002_v43, 0.0  ;;  %9459 = vmatprep.subr.bf16.mxu1 %v13350_v30  ;;  %v13385_v7 = vld [vmem:[%s14809_s24 + $0x5d4] ss:$12 sps:$4 sm:$0xff]   ;;  %v13383_v15 = vld [vmem:[%s14809_s24 + $0x5d0] ss:$12 sps:$4 sm:$0xff]  }
0x1086   : > { %v16274_v11 = vpack.c.bf16 %v7365_v41, %v7353_v54  ;;  %v16276_v50 = vpack.c.bf16 %v7364_v57, %v7352_v55  ;;  %v13390_v39 = vld [vmem:[%s14809_s24 + $0x5ec] ss:$12 sps:$4 sm:$0xff]   ;;  %v13387_v22 = vld [vmem:[%s14809_s24 + $0x830] ss:$12 sps:$4 sm:$0xff]   ;;  %v13388_v30 = vld [vmem:[%s14809_s24 + $0x5e8] ss:$12 sps:$4 sm:$0xff]  }
0x1087   : > { %v16279_v17 = vpack.c.bf16 %v7366_v31, %v7354_v2  ;;  %v13393_v3 = vld [vmem:[%s14809_s24 + $0x604] ss:$12 sps:$4 sm:$0xff]   ;;  %v13391_v13 = vld [vmem:[%s14809_s24 + $0x600] ss:$12 sps:$4 sm:$0xff]   ;;  %v13396_v20 = vld [vmem:[%s14809_s24 + $0x61c] ss:$12 sps:$4 sm:$0xff]  }
0x1088   : > { %9460 = vmatpush1.bf16.msra.mxu1 %v13348_v25  ;;  %9770 = vmatprep.mubr.bf16.mxu0 %v16276_v50  ;;  %v13394_v47 = vld [vmem:[%s14809_s24 + $0x618] ss:$12 sps:$4 sm:$0xff]   ;;  %v13399_v52 = vld [vmem:[%s14809_s24 + $0x634] ss:$12 sps:$4 sm:$0xff]   ;;  %v13397_v43 = vld [vmem:[%s14809_s24 + $0x630] ss:$12 sps:$4 sm:$0xff]  }
0x1089   : > { %9771 = vmatmul.mubr.bf16.vlgmr.msra.gmra.mrb[104].mxu0 %v16271_v36  ;;  %9461 = vmatprep.subr.bf16.mxu1 %v13355_v53  ;;  %v13402_v54 = vld [vmem:[%s14809_s24 + $0x64c] ss:$12 sps:$4 sm:$0xff]   ;;  %v13400_v55 = vld [vmem:[%s14809_s24 + $0x648] ss:$12 sps:$4 sm:$0xff]   ;;  %v13405_v41 = vld [vmem:[%s14809_s24 + $0x664] ss:$12 sps:$4 sm:$0xff]  }
0x108a   : > { %11715 = vmatpush3.bf16.msra.mxu0 %v13352_v62  ;;  %9811 = vmatprep.mubr.bf16.mxu0 %v16279_v17  ;;  %v13408_v57 = vld [vmem:[%s14809_s24 + $0x67c] ss:$12 sps:$4 sm:$0xff]   ;;  %v16329_v25 = vld [vmem:[%s16610_s6] sm:$0x7] }
0x108b   : > { %11716 = vmatprep.subr.bf16.mxu0 %v13356_v1  ;;  %v13406_v2 = vld [vmem:[%s14809_s24 + $0x678] ss:$12 sps:$4 sm:$0xff]   ;;  %v7776_v31 = vrot.slane %v16329_v25, %v14939_v33  ;;  %v13411_v53 = vld [vmem:[%s14809_s24 + $0x694] ss:$12 sps:$4 sm:$0xff]   ;;  %v13409_v1 = vld [vmem:[%s14809_s24 + $0x690] ss:$12 sps:$4 sm:$0xff]  }
0x108c   : > { %9462 = vmatpush1.bf16.msra.mxu1 %v13353_v12 }
0x108d   : > { %9463 = vmatprep.subr.bf16.mxu1 %v13360_v63 }
0x108e   : > { %11717 = vmatpush3.bf16.msra.mxu0 %v13357_v26 }
0x108f   : > { %11718 = vmatprep.subr.bf16.mxu0 %v13361_v42  ;;  %v13414_v42 = vld [vmem:[%s14809_s24 + $0x6ac] ss:$12 sps:$4 sm:$0xff]  }
0x1090   : > { %9464 = vmatpush1.bf16.msra.mxu1 %v13358_v40 }
0x1091   : > { %9465 = vmatprep.subr.bf16.mxu1 %v13365_v51 }
0x1092   : > { %11719 = vmatpush3.bf16.msra.mxu0 %v13362_v61 }
0x1093   : > { %11720 = vmatprep.subr.bf16.mxu0 %v13366_v0 }
0x1094   : > { %9466 = vmatpush1.bf16.msra.mxu1 %v13363_v46  ;;  %v13412_v46 = vld [vmem:[%s14809_s24 + $0x6a8] ss:$12 sps:$4 sm:$0xff]  }
0x1095   : > { %9467 = vmatprep.subr.bf16.mxu1 %v13370_v28 }
0x1096   : > { %11721 = vmatpush3.bf16.msra.mxu0 %v13367_v4  ;;  %v13417_v4 = vld [vmem:[%s14809_s24 + $0x6c4] ss:$12 sps:$4 sm:$0xff]  }
0x1097   : > { %11722 = vmatprep.subr.bf16.mxu0 %v13371_v29  ;;  %v13415_v29 = vld [vmem:[%s14809_s24 + $0x6c0] ss:$12 sps:$4 sm:$0xff]  }
0x1098   : > { %9468 = vmatpush1.bf16.msra.mxu1 %v13368_v5  ;;  %v13420_v5 = vld [vmem:[%s14809_s24 + $0x6dc] ss:$12 sps:$4 sm:$0xff]  }
0x1099   : > { %9469 = vmatprep.subr.bf16.mxu1 %v13375_v8  ;;  %v13418_v8 = vld [vmem:[%s14809_s24 + $0x6d8] ss:$12 sps:$4 sm:$0xff]  }
0x109a   : > { %11723 = vmatpush3.bf16.msra.mxu0 %v13372_v59  ;;  %v13423_v59 = vld [vmem:[%s14809_s24 + $0x6f4] ss:$12 sps:$4 sm:$0xff]  }
0x109b   : > { %11724 = vmatprep.subr.bf16.mxu0 %v13376_v23  ;;  %v13421_v23 = vld [vmem:[%s14809_s24 + $0x6f0] ss:$12 sps:$4 sm:$0xff]  }
0x109c   : > { %9470 = vmatpush1.bf16.msra.mxu1 %v13373_v48  ;;  %v13426_v48 = vld [vmem:[%s14809_s24 + $0x70c] ss:$12 sps:$4 sm:$0xff]  }
0x109d   : > { %9471 = vmatprep.subr.bf16.mxu1 %v13380_v56  ;;  %v13424_v56 = vld [vmem:[%s14809_s24 + $0x708] ss:$12 sps:$4 sm:$0xff]  }
0x109e   : > { %11725 = vmatpush3.bf16.msra.mxu0 %v13377_v10  ;;  %v13429_v10 = vld [vmem:[%s14809_s24 + $0x724] ss:$12 sps:$4 sm:$0xff]  }
0x109f   : > { %v11620_v37 = vpop.f32.mrb[88].mxu0  ;;  %11726 = vmatprep.subr.bf16.mxu0 %v13381_v49  ;;  %v13427_v49 = vld [vmem:[%s14809_s24 + $0x720] ss:$12 sps:$4 sm:$0xff]  }
0x10a0   : > { %v11621_v45 = vpop.f32.mrb[89].mxu0  ;;  %9472 = vmatpush1.bf16.msra.mxu1 %v13378_v14  ;;  %v13432_v14 = vld [vmem:[%s14809_s24 + $0x73c] ss:$12 sps:$4 sm:$0xff]  }
0x10a1   : > { %v11622_v21 = vadd.f32 %v11621_v45, %v11620_v37  ;;  %v11623_v18 = vpop.f32.mrb[90].mxu0  ;;  %9473 = vmatprep.subr.bf16.mxu1 %v13385_v7  ;;  %v13430_v7 = vld [vmem:[%s14809_s24 + $0x738] ss:$12 sps:$4 sm:$0xff]   ;;  %v13433_v37 = vld [vmem:[%s14809_s24 + $0x750] ss:$12 sps:$4 sm:$0xff]  }
0x10a2   : > { %v11624_v44 = vpop.f32.mrb[91].mxu0  ;;  %11727 = vmatpush3.bf16.msra.mxu0 %v13382_v6  ;;  %v13435_v6 = vld [vmem:[%s14809_s24 + $0x754] ss:$12 sps:$4 sm:$0xff]  }
0x10a3   : > { %v11625_v60 = vadd.f32 %v11624_v44, %v11623_v18  ;;  %11728 = vmatprep.subr.bf16.mxu0 %v13386_v24  ;;  %v9609_v12 = vadd.f32 %v11622_v21, %v7776_v31  ;;  %v13438_v24 = vld [vmem:[%s14809_s24 + $0x76c] ss:$12 sps:$4 sm:$0xff]   ;;  %v13436_v45 = vld [vmem:[%s14809_s24 + $0x768] ss:$12 sps:$4 sm:$0xff]  }
0x10a4   : > { %9474 = vmatpush1.bf16.msra.mxu1 %v13383_v15  ;;  %v13441_v15 = vld [vmem:[%s14809_s24 + $0x784] ss:$12 sps:$4 sm:$0xff]   ;;  %v13439_v21 = vld [vmem:[%s14809_s24 + $0x780] ss:$12 sps:$4 sm:$0xff]   ;;  %v13444_v18 = vld [vmem:[%s14809_s24 + $0x79c] ss:$12 sps:$4 sm:$0xff]  }
0x10a5   : > { %9475 = vmatprep.subr.bf16.mxu1 %v13390_v39  ;;  %v9612_v51 = vadd.f32 %v11625_v60, %v7776_v31  ;;  %v13442_v39 = vld [vmem:[%s14809_s24 + $0x798] ss:$12 sps:$4 sm:$0xff]   ;;  %v13447_v44 = vld [vmem:[%s14809_s24 + $0x7b4] ss:$12 sps:$4 sm:$0xff]  }
0x10a6   : > { %11729 = vmatpush3.bf16.msra.mxu0 %v13387_v22  ;;  %v13445_v22 = vld [vmem:[%s14809_s24 + $0x7b0] ss:$12 sps:$4 sm:$0xff]   ;;  %v13450_v60 = vld [vmem:[%s14809_s24 + $0x7cc] ss:$12 sps:$4 sm:$0xff]  }
0x10a8   : > { %9476 = vmatpush1.bf16.msra.mxu1 %v13388_v30  ;;  %v13448_v30 = vld [vmem:[%s14809_s24 + $0x7c8] ss:$12 sps:$4 sm:$0xff]  }
0x10a9   : > { %9812 = vmatmul.mubr.bf16.vlgmr.msra.gmra.mrb[108].mxu0 %v16274_v11  ;;  %9488 = vmatprep.subr.bf16.mxu1 %v13393_v3  ;;  %v13453_v3 = vld [vmem:[%s14809_s24 + $0x7e4] ss:$12 sps:$4 sm:$0xff]  }
0x10ab   : > { %9478 = vmatmul.mubr.bf16.vlgmr.msra.gmra.mrb[72].mxu1 %v16176_v9  ;;  %v13403_v9 = vld [vmem:[%s14809_s24 + $0x660] ss:$12 sps:$4 sm:$0xff]  }
0x10ac   : > { %9489 = vmatpush1.bf16.msra.mxu1 %v13391_v13  ;;  %9520 = vmatprep.mubr.bf16.mxu1 %v16276_v50  ;;  %v13456_v13 = vld [vmem:[%s14809_s24 + $0x7fc] ss:$12 sps:$4 sm:$0xff]  }
0x10ad   : > { %9490 = vmatprep.subr.bf16.mxu1 %v13396_v20  ;;  %v13454_v20 = vld [vmem:[%s14809_s24 + $0x7f8] ss:$12 sps:$4 sm:$0xff]  }
0x10b0   : > { %9491 = vmatpush1.bf16.msra.mxu1 %v13394_v47 }
0x10b1   : > { %9492 = vmatprep.subr.bf16.mxu1 %v13399_v52  ;;  %v13459_v52 = vld [vmem:[%s14809_s24 + $0x814] ss:$12 sps:$4 sm:$0xff]  }
0x10b4   : > { %9493 = vmatpush1.bf16.msra.mxu1 %v13397_v43 }
0x10b5   : > { %9494 = vmatprep.subr.bf16.mxu1 %v13402_v54 }
0x10b8   : > { %9495 = vmatpush1.bf16.msra.mxu1 %v13400_v55 }
0x10b9   : > { %9496 = vmatprep.subr.bf16.mxu1 %v13405_v41 }
0x10bc   : > { %9497 = vmatpush1.bf16.msra.mxu1 %v13403_v9 }
0x10bd   : > { %9498 = vmatprep.subr.bf16.mxu1 %v13408_v57  ;;  %v13457_v57 = vld [vmem:[%s14809_s24 + $0x810] ss:$12 sps:$4 sm:$0xff]  }
0x10bf   : > { %v11642_v50 = vpop.f32.mrb[92].mxu0 }
0x10c0   : > { %v11643_v62 = vpop.f32.mrb[93].mxu0  ;;  %9499 = vmatpush1.bf16.msra.mxu1 %v13406_v2  ;;  %v13462_v2 = vld [vmem:[%s14809_s24 + $0x82c] ss:$12 sps:$4 sm:$0xff]  }
0x10c1   : > { %v11644_v63 = vadd.f32 %v11643_v62, %v11642_v50  ;;  %v11645_v26 = vpop.f32.mrb[94].mxu0  ;;  %9500 = vmatprep.subr.bf16.mxu1 %v13411_v53  ;;  %v13460_v53 = vld [vmem:[%s14809_s24 + $0x828] ss:$12 sps:$4 sm:$0xff]   ;;  %v13465_v50 = vld [vmem:[%s14809_s24 + $0x844] ss:$12 sps:$4 sm:$0xff]  }
0x10c2   : > { %v11646_v40 = vpop.f32.mrb[95].mxu0  ;;  %v13463_v62 = vld [vmem:[%s14809_s24 + $0x840] ss:$12 sps:$4 sm:$0xff]  }
0x10c3   : > { %v16337_v61 = vadd.f32 %v11644_v63, %v9609_v12  ;;  %v11647_v0 = vadd.f32 %v11646_v40, %v11645_v26  ;;  %v13466_v12 = vld [vmem:[%s14809_s24 + $0x858] ss:$12 sps:$4 sm:$0xff]   ;;  %v13471_v63 = vld [vmem:[%s14809_s24 + $0x874] ss:$12 sps:$4 sm:$0xff]   ;;  %v13469_v26 = vld [vmem:[%s14809_s24 + $0x870] ss:$12 sps:$4 sm:$0xff]  }
0x10c4   : > { %9501 = vmatpush1.bf16.msra.mxu1 %v13409_v1  ;;  %v13468_v1 = vld [vmem:[%s14809_s24 + $0x85c] ss:$12 sps:$4 sm:$0xff]  }
0x10c5   : > { %v16340_v28 = vadd.f32 %v11647_v0, %v9612_v51  ;;  %9502 = vmatprep.subr.bf16.mxu1 %v13414_v42  ;;  %v13474_v42 = vld [vmem:[%s14809_s24 + $0x88c] ss:$12 sps:$4 sm:$0xff]   ;;  %v13472_v40 = vld [vmem:[%s14809_s24 + $0x888] ss:$12 sps:$4 sm:$0xff]   ;;  %v13477_v51 = vld [vmem:[%s14809_s24 + $0x8a4] ss:$12 sps:$4 sm:$0xff]  }
0x10c6   : > { %v13480_v0 = vld [vmem:[%s14809_s24 + $0x8bc] ss:$12 sps:$4 sm:$0xff]  }
0x10c8   : > { %9503 = vmatpush1.bf16.msra.mxu1 %v13412_v46 }
0x10c9   : > { %9504 = vmatprep.subr.bf16.mxu1 %v13417_v4 }
0x10cc   : > { %9505 = vmatpush1.bf16.msra.mxu1 %v13415_v29  ;;  %v13483_v29 = vld [vmem:[%s14809_s24 + $0x8d4] ss:$12 sps:$4 sm:$0xff]  }
0x10cd   : > { %9506 = vmatprep.subr.bf16.mxu1 %v13420_v5 }
0x10d0   : > { %9507 = vmatpush1.bf16.msra.mxu1 %v13418_v8 }
0x10d1   : > { %9508 = vmatprep.subr.bf16.mxu1 %v13423_v59 }
0x10d4   : > { %9509 = vmatpush1.bf16.msra.mxu1 %v13421_v23 }
0x10d5   : > { %9510 = vmatprep.subr.bf16.mxu1 %v13426_v48 }
0x10d8   : > { %9511 = vmatpush1.bf16.msra.mxu1 %v13424_v56  ;;  %v13481_v56 = vld [vmem:[%s14809_s24 + $0x8d0] ss:$12 sps:$4 sm:$0xff]  }
0x10d9   : > { %9512 = vmatprep.subr.bf16.mxu1 %v13429_v10  ;;  %v13486_v10 = vld [vmem:[%s14809_s24 + $0x8ec] ss:$12 sps:$4 sm:$0xff]  }
0x10dc   : > { %9513 = vmatpush1.bf16.msra.mxu1 %v13427_v49 }
0x10dd   : > { %9514 = vmatprep.subr.bf16.mxu1 %v13432_v14  ;;  %v13484_v14 = vld [vmem:[%s14809_s24 + $0x8e8] ss:$12 sps:$4 sm:$0xff]  }
0x10e0   : > { %9515 = vmatpush1.bf16.msra.mxu1 %v13430_v7 }
0x10e1   : > { %9516 = vmatprep.subr.bf16.mxu1 %v13435_v6 }
0x10e4   : > { %9517 = vmatpush1.bf16.msra.mxu1 %v13433_v37 }
0x10e5   : > { %9518 = vmatprep.subr.bf16.mxu1 %v13438_v24 }
0x10e8   : > { %9519 = vmatpush1.bf16.msra.mxu1 %v13436_v45 }
0x10e9   : > { %9531 = vmatprep.subr.bf16.mxu1 %v13441_v15 }
0x10eb   : > { %9521 = vmatmul.mubr.bf16.vlgmr.msra.gmra.mrb[72].mxu1 %v16271_v36  ;;  %v13451_v36 = vld [vmem:[%s14809_s24 + $0x7e0] ss:$12 sps:$4 sm:$0xff]  }
0x10ec   : > { %9532 = vmatpush1.bf16.msra.mxu1 %v13439_v21  ;;  %9563 = vmatprep.mubr.bf16.mxu1 %v16279_v17 }
0x10ed   : > { %9533 = vmatprep.subr.bf16.mxu1 %v13444_v18 }
0x10f0   : > { %9534 = vmatpush1.bf16.msra.mxu1 %v13442_v39 }
0x10f1   : > { %9535 = vmatprep.subr.bf16.mxu1 %v13447_v44 }
0x10f4   : > { %9536 = vmatpush1.bf16.msra.mxu1 %v13445_v22 }
0x10f5   : > { %9537 = vmatprep.subr.bf16.mxu1 %v13450_v60 }
0x10f8   : > { %9538 = vmatpush1.bf16.msra.mxu1 %v13448_v30 }
0x10f9   : > { %9539 = vmatprep.subr.bf16.mxu1 %v13453_v3 }
0x10fc   : > { %9540 = vmatpush1.bf16.msra.mxu1 %v13451_v36  ;;  %v11664_v17 = vpop.f32.mrb[96].mxu0 }
0x10fd   : > { %v11665_v47 = vpop.f32.mrb[97].mxu0  ;;  %9541 = vmatprep.subr.bf16.mxu1 %v13456_v13 }
0x10fe   : > { %v11666_v43 = vadd.f32 %v11665_v47, %v11664_v17  ;;  %v11667_v54 = vpop.f32.mrb[98].mxu0  ;;  %v7772_v47 = vrot.slane %v16329_v25, %v14936_v32 }
0x10ff   : > { %v11668_v55 = vpop.f32.mrb[99].mxu0 }
0x1100   : > { %v9691_v41 = vadd.f32 %v11666_v43, %v16337_v61  ;;  %v11669_v9 = vadd.f32 %v11668_v55, %v11667_v54  ;;  %9542 = vmatpush1.bf16.msra.mxu1 %v13454_v20  ;;  %v13475_v61 = vld [vmem:[%s14809_s24 + $0x8a0] ss:$12 sps:$4 sm:$0xff]   ;;  %v7768_v20 = vrot.slane %v16329_v25, %v14942_v34 }
0x1101   : > { %9543 = vmatprep.subr.bf16.mxu1 %v13459_v52 }
0x1102   : > { %v9694_v31 = vadd.f32 %v11669_v9, %v16340_v28  ;;  %v13478_v28 = vld [vmem:[%s14809_s24 + $0x8b8] ss:$12 sps:$4 sm:$0xff]  }
0x1104   : > { %9544 = vmatpush1.bf16.msra.mxu1 %v13457_v57 }
0x1105   : > { %9545 = vmatprep.subr.bf16.mxu1 %v13462_v2 }
0x1108   : > { %9546 = vmatpush1.bf16.msra.mxu1 %v13460_v53 }
0x1109   : > { %9547 = vmatprep.subr.bf16.mxu1 %v13465_v50 }
0x110c   : > { %9548 = vmatpush1.bf16.msra.mxu1 %v13463_v62 }
0x110d   : > { %9549 = vmatprep.subr.bf16.mxu1 %v13468_v1  ;;  %v13549_v1 = vld [vmem:[#allocation24 + $0x40] sm:$0xff] (!%p11464_p8)  }
0x110e   : > { %11736 = vmatprep.subr.bf16.mxu0 (!%p11464_p8), %v13549_v1 }
0x1110   : > { %9550 = vmatpush1.bf16.msra.mxu1 %v13466_v12  ;;  %v13551_v12 = vld [vmem:[#allocation24] sm:$0xff] (!%p11464_p8)  }
0x1111   : > { %9551 = vmatprep.subr.bf16.mxu1 %v13471_v63  ;;  %v14156_v63 = vmov (!%p11464_p8), 0.0   ;;  %11737 = vmatpush3.bf16.msra.mxu0 (!%p11464_p8), %v13551_v12 }
0x1114   : > { %9552 = vmatpush1.bf16.msra.mxu1 %v13469_v26 }
0x1115   : > { %9553 = vmatprep.subr.bf16.mxu1 %v13474_v42 }
0x1118   : > { %9554 = vmatpush1.bf16.msra.mxu1 %v13472_v40 }
0x1119   : > { %9555 = vmatprep.subr.bf16.mxu1 %v13477_v51 }
0x111c   : > { %v11686_v46 = vpop.f32.mrb[100].mxu0  ;;  %9556 = vmatpush1.bf16.msra.mxu1 %v13475_v61 }
0x111d   : > { %v11687_v4 = vpop.f32.mrb[101].mxu0  ;;  %9557 = vmatprep.subr.bf16.mxu1 %v13480_v0 }
0x111e   : > { %v11688_v5 = vadd.f32 %v11687_v4, %v11686_v46  ;;  %v11689_v8 = vpop.f32.mrb[102].mxu0 }
0x111f   : > { %v11690_v59 = vpop.f32.mrb[103].mxu0 }
0x1120   : > { %v9732_v23 = vadd.f32 %v11688_v5, %v9691_v41  ;;  %v11691_v48 = vadd.f32 %v11690_v59, %v11689_v8  ;;  %9558 = vmatpush1.bf16.msra.mxu1 %v13478_v28 }
0x1121   : > { %9559 = vmatprep.subr.bf16.mxu1 %v13483_v29 }
0x1122   : > { %v9735_v49 = vadd.f32 %v11691_v48, %v9694_v31 }
0x1124   : > { %9560 = vmatpush1.bf16.msra.mxu1 %v13481_v56 }
0x1125   : > { %9561 = vmatprep.subr.bf16.mxu1 %v13486_v10 }
0x1128   : > { %9562 = vmatpush1.bf16.msra.mxu1 %v13484_v14  ;;  %v13552_v14 = vld [vmem:[#allocation24 + $0x48] sm:$0xff] (!%p11464_p8)  }
0x1129   : > { %11951 = vmatprep.subr.bf16.mxu1 (!%p11464_p8), %v14156_v63  ;;  %11738 = vmatprep.subr.bf16.mxu0 (!%p11464_p8), %v13552_v14 }
0x112b   : > { %9564 = vmatmul.mubr.bf16.vlgmr.msra.gmra.mrb[72].mxu1 %v16274_v11 }
0x112c   : > { %11967 = vmatprep.mubr.msk.bf16.mxu1 (!%p11464_p8), %vm14157_vm5, %v14156_v63 }
0x115c   : > { %v11708_v7 = vpop.f32.mrb[104].mxu0 }
0x115d   : > { %v11709_v6 = vpop.f32.mrb[105].mxu0 }
0x115e   : > { %v11710_v37 = vadd.f32 %v11709_v6, %v11708_v7  ;;  %v11711_v24 = vpop.f32.mrb[106].mxu0  ;;  %v13553_v7 = vld [vmem:[#allocation24 + $0x88] sm:$0xff] (!%p11464_p8)  }
0x115f   : > { %v11712_v45 = vpop.f32.mrb[107].mxu0  ;;  %v13554_v6 = vld [vmem:[#allocation24 + $0x8] sm:$0xff] (!%p11464_p8)  }
0x1160   : > { %v9773_v15 = vadd.f32 %v11710_v37, %v9732_v23  ;;  %v11713_v21 = vadd.f32 %v11712_v45, %v11711_v24  ;;  %11739 = vmatpush3.bf16.msra.mxu0 (!%p11464_p8), %v13554_v6  ;;  %v13555_v37 = vld [vmem:[#allocation24 + $0x50] sm:$0xff] (!%p11464_p8)  }
0x1161   : > { %v13556_v24 = vld [vmem:[#allocation24 + $0x90] sm:$0xff] (!%p11464_p8)   ;;  %11740 = vmatprep.subr.bf16.mxu0 (!%p11464_p8), %v13555_v37 }
0x1162   : > { %v9776_v18 = vadd.f32 %v11713_v21, %v9735_v49  ;;  %v13557_v45 = vld [vmem:[#allocation24 + $0x10] sm:$0xff] (!%p11464_p8)   ;;  %v13559_v21 = vld [vmem:[#allocation24 + $0x98] sm:$0xff] (!%p11464_p8)  }
0x1164   : > { %11741 = vmatpush3.bf16.msra.mxu0 (!%p11464_p8), %v13557_v45 }
0x117c   : > { %v11730_v39 = vpop.f32.mrb[108].mxu0 }
0x117d   : > { %v11731_v44 = vpop.f32.mrb[109].mxu0 }
0x117e   : > { %v11732_v22 = vadd.f32 %v11731_v44, %v11730_v39  ;;  %v11733_v60 = vpop.f32.mrb[110].mxu0  ;;  %v13561_v39 = vld [vmem:[#allocation24 + $0x60] sm:$0xff] (!%p11464_p8)  }
0x117f   : > { %v11734_v30 = vpop.f32.mrb[111].mxu0  ;;  %v13562_v44 = vld [vmem:[#allocation24 + $0xa0] sm:$0xff] (!%p11464_p8)  }
0x1180   : > { %v9814_v3 = vadd.f32 %v11732_v22, %v9773_v15  ;;  %v11735_v36 = vadd.f32 %v11734_v30, %v11733_v60  ;;  %v13558_v15 = vld [vmem:[#allocation24 + $0x58] sm:$0xff] (!%p11464_p8)   ;;  %v13563_v22 = vld [vmem:[#allocation24 + $0x20] sm:$0xff] (!%p11464_p8)   ;;  %v13564_v60 = vld [vmem:[#allocation24 + $0x68] sm:$0xff] (!%p11464_p8)  }
0x1181   : > { %11742 = vmatprep.subr.bf16.mxu0 (!%p11464_p8), %v13558_v15  ;;  %v13565_v30 = vld [vmem:[#allocation24 + $0xa8] sm:$0xff] (!%p11464_p8)  }
0x1182   : > { %v9822_v13 = vadd.f32 %v9814_v3, %v15632_v16  ;;  %v9817_v17 = vadd.f32 %v11735_v36, %v9776_v18  ;;  %v13560_v18 = vld [vmem:[#allocation24 + $0x18] sm:$0xff] (!%p11464_p8)   ;;  %v13566_v3 = vld [vmem:[#allocation24 + $0x28] sm:$0xff] (!%p11464_p8)   ;;  %v13567_v36 = vld [vmem:[#allocation24 + $0x70] sm:$0xff] (!%p11464_p8)  }
0x1183   : > { %11743 = vmatpush3.bf16.msra.mxu0 (!%p11464_p8), %v13560_v18 }
0x1184   : > { %9828 = vst [vmem:[#allocation2 + $0x10] sm:$0xff] %v9822_v13  ;;  %v9825_v11 = vadd.f32 %v9817_v17, %v15638_v38  ;;  %11744 = vmatprep.subr.bf16.mxu0 (!%p11464_p8), %v13561_v39  ;;  %v13569_v17 = vld [vmem:[#allocation24 + $0x30] sm:$0xff] (!%p11464_p8)  }
0x1186   : > { %9831 = vst [vmem:[#allocation2 + $0x28] sm:$0xff] %v9825_v11 }
0x1187   : > { %11745 = vmatpush3.bf16.msra.mxu0 (!%p11464_p8), %v13563_v22 }
0x1188   : > { %11746 = vmatprep.subr.bf16.mxu0 (!%p11464_p8), %v13564_v60 }
0x118b   : > { %11747 = vmatpush3.bf16.msra.mxu0 (!%p11464_p8), %v13566_v3 }
0x118c   : > { %11748 = vmatprep.subr.bf16.mxu0 (!%p11464_p8), %v13567_v36 }
0x118f   : > { %11749 = vmatpush3.bf16.msra.mxu0 (!%p11464_p8), %v13569_v17 }
0x11fe   : > { %v9565_v52 = vpop.f32.mrb[72].mxu1 }
0x11ff   : > { %v12003_v43 = vadd.f32 %v9565_v52, %v7768_v20  ;;  %v9567_v54 = vpop.f32.mrb[73].mxu1 }
0x1200   : > { %v12004_v55 = vadd.f32 %v9567_v54, %v7772_v47  ;;  %v9569_v41 = vpop.f32.mrb[74].mxu1  ;;  %9835 = sbr.rel (%p11464_p8) target bundleno = 5160 (0x1428), region = 152 }
0x1201   : > { %v9820_v9 = vadd.f32 %v12003_v43, %v15626_v27  ;;  %v12005_v57 = vadd.f32 %v9569_v41, %v7768_v20  ;;  %v9571_v16 = vpop.f32.mrb[75].mxu1  ;;  %v13571_v20 = vld [vmem:[#allocation24 + $0xb8] sm:$0xff] (!%p11464_p8)  }
0x1202   : > { %v9821_v2 = vadd.f32 %v12004_v55, %v15628_v58  ;;  %v12006_v31 = vadd.f32 %v9571_v16, %v7772_v47  ;;  %v13550_v58 = vld [vmem:[#allocation24 + $0x80] sm:$0xff] (!%p11464_p8)   ;;  %v13572_v47 = vld [vmem:[#allocation24 + $0x38] sm:$0xff] (!%p11464_p8)  }
0x1203   : > { %9826 = vst [vmem:[#allocation2] sm:$0xff] %v9820_v9  ;;  %v9823_v38 = vadd.f32 %v12005_v57, %v15630_v19  ;;  %11952 = vmatpush3.bf16.msra.mxu1 (!%p11464_p8), %v13550_v58  ;;  %v9836_v57 = vld [vmem:[#allocation21] sm:$0x7] (!%p11464_p8) }
0x1204   : > { %9827 = vst [vmem:[#allocation2 + $0x8] sm:$0xff] %v9821_v2  ;;  %v9824_v53 = vadd.f32 %v12006_v31, %v15634_v35  ;;  %v9838_v25 = vadd.f32 (!%p11464_p8), %v9821_v2, %v9820_v9  ;;  %11953 = vmatprep.subr.bf16.mxu1 (!%p11464_p8), %v14156_v63 }
0x1205   : > { %9829 = vst [vmem:[#allocation2 + $0x18] sm:$0xff] %v9823_v38 }
0x1206   : > { %9830 = vst [vmem:[#allocation2 + $0x20] sm:$0xff] %v9824_v53  ;;  %v9842_v50 = vadd.f32 (!%p11464_p8), %v9824_v53, %v9823_v38  ;;  %v9839_v62 = vadd.f32 (!%p11464_p8), %v9838_v25, %v9822_v13  ;;  %v9892_v25 = vrot.slane (!%p11464_p8), %v9836_v57, %v14939_v33 }
0x1207   : > { %11954 = vmatpush3.bf16.msra.mxu1 %v13553_v7 }
0x1208   : > { %9840 = vadd.xlane.f32.xlu0 %v9839_v62  ;;  %v9843_v27 = vadd.f32 %v9842_v50, %v9825_v11  ;;  %11955 = vmatprep.subr.bf16.mxu1 %v14156_v63  ;;  %v9884_v62 = vrot.slane %v9836_v57, %v14942_v34 }
0x120b   : > { %11956 = vmatpush3.bf16.msra.mxu1 %v13556_v24 }
0x120c   : > { %9844 = vadd.xlane.f32.xlu0 %v9843_v27  ;;  %11957 = vmatprep.subr.bf16.mxu1 %v14156_v63 }
0x120f   : > { %11958 = vmatpush3.bf16.msra.mxu1 %v13559_v21 }
0x1210   : > { %11959 = vmatprep.subr.bf16.mxu1 %v14156_v63 }
0x1213   : > { %11960 = vmatpush3.bf16.msra.mxu1 %v13562_v44 }
0x1214   : > { %11961 = vmatprep.subr.bf16.mxu1 %v14156_v63 }
0x1217   : > { %11962 = vmatpush3.bf16.msra.mxu1 %v13565_v30 }
0x1218   : > { %11963 = vmatprep.subr.bf16.mxu1 %v14156_v63 }
0x1295   : > { %v9841_v19 = vpop.xlane.xlu0 %9840 }
0x1296   : > { %v9846_v35 = vmul.f32 0.0026041667, %v9841_v19 }
0x1298   : > { %v16408_v26 = vsub.f32 %v9820_v9, %v9846_v35  ;;  %v16410_v42 = vsub.f32 %v9821_v2, %v9846_v35  ;;  %v16412_v40 = vsub.f32 %v9822_v13, %v9846_v35  ;;  %v13568_v13 = vld [vmem:[#allocation24 + $0xb0] sm:$0xff]   ;;  %v9837_v2 = vld [vmem:[#allocation23] sm:$0x7] }
0x1299   : > { %v9845_v51 = vpop.xlane.xlu0 %9844  ;;  %11964 = vmatpush3.bf16.msra.mxu1 %v13568_v13  ;;  %v9910_v1 = vrot.slane %v9837_v2, %v14936_v32  ;;  %v9914_v58 = vrot.slane %v9837_v2, %v14939_v33 }
0x129a   : > { %v9847_v61 = vmul.f32 0.0026041667, %v9845_v51  ;;  %v9854_v0 = vmul.f32 %v16408_v26, %v16408_v26  ;;  %v9855_v46 = vmul.f32 %v16410_v42, %v16410_v42  ;;  %v9856_v28 = vmul.f32 %v16412_v40, %v16412_v40  ;;  %11965 = vmatprep.subr.bf16.mxu1 %v14156_v63 }
0x129b   : > { %v9906_v51 = vrot.slane %v9837_v2, %v14942_v34 }
0x129c   : > { %v16420_v4 = vsub.f32 %v9823_v38, %v9847_v61  ;;  %v16422_v29 = vsub.f32 %v9824_v53, %v9847_v61  ;;  %v16424_v5 = vsub.f32 %v9825_v11, %v9847_v61  ;;  %v9860_v8 = vadd.f32 %v9855_v46, %v9854_v0  ;;  %v13570_v11 = vld [vmem:[#allocation24 + $0x78] sm:$0xff]  }
0x129d   : > { %11750 = vmatprep.subr.bf16.mxu0 %v13570_v11  ;;  %11966 = vmatpush3.bf16.msra.mxu1 %v13571_v20  ;;  %v9888_v38 = vrot.slane %v9836_v57, %v14936_v32 }
0x129e   : > { %v9861_v59 = vadd.f32 %v9860_v8, %v9856_v28  ;;  %v9857_v23 = vmul.f32 %v16420_v4, %v16420_v4  ;;  %v9858_v48 = vmul.f32 %v16422_v29, %v16422_v29  ;;  %v9859_v56 = vmul.f32 %v16424_v5, %v16424_v5  ;;  %11751 = vmatpush3.bf16.msra.mxu0 %v13572_v47 }
0x12a0   : > { %9862 = vadd.xlane.f32.xlu1 %v9861_v59  ;;  %v9864_v10 = vadd.f32 %v9858_v48, %v9857_v23 }
0x12a2   : > { %v9865_v49 = vadd.f32 %v9864_v10, %v9859_v56  ;;  %v11465_v10 = vld [vmem:[#allocation26] ss:$0 sm:$0xff] }
0x12a4   : > { %9866 = vadd.xlane.f32.xlu1 %v9865_v49 }
0x132d   : > { %v9863_v52 = vpop.xlane.xlu1 %9862 }
0x132e   : > { %v9868_v43 = vmul.f32 0.0026041667, %v9863_v52 }
0x1330   : > { %v9870_v54 = vadd.f32 1e-05, %v9868_v43 }
0x1331   : > { %v9867_v55 = vpop.xlane.xlu1 %9866 }
0x1332   : > { %13573 = vrsqrt.f32 %v9870_v54  ;;  %v9869_v41 = vmul.f32 0.0026041667, %v9867_v55 }
0x1334   : > { %v9871_v9 = vadd.f32 1e-05, %v9869_v41 }
0x1336   : > { %13575 = vrsqrt.f32 %v9871_v9 }
0x133c   : > { %v13574_v16 = vpop.eup %13573 }
0x133d   : > { %v9875_v31 = vmul.f32 %v13574_v16, %v16410_v42  ;;  %v9876_v53 = vmul.f32 %v13574_v16, %v16412_v40  ;;  %v9874_v50 = vmul.f32 %v13574_v16, %v16408_v26 }
0x133f   : > { %v9897_v63 = vmul.f32 %v9888_v38, %v9875_v31  ;;  %v9898_v35 = vmul.f32 %v9892_v25, %v9876_v53  ;;  %v9896_v40 = vmul.f32 %v9884_v62, %v9874_v50 }
0x1340   : > { %v13576_v27 = vpop.eup %13575 }
0x1341   : > { %v9878_v12 = vmul.f32 %v13576_v27, %v16422_v29  ;;  %v9879_v19 = vmul.f32 %v13576_v27, %v16424_v5  ;;  %v9877_v42 = vmul.f32 %v13576_v27, %v16420_v4  ;;  %v9919_v46 = vadd.f32 %v9910_v1, %v9897_v63 }
0x1342   : > { %v9920_v8 = vadd.f32 %v9914_v58, %v9898_v35  ;;  %v9918_v59 = vadd.f32 %v9906_v51, %v9896_v40 }
0x1343   : > { %v9900_v61 = vmul.f32 %v9888_v38, %v9878_v12  ;;  %v9901_v26 = vmul.f32 %v9892_v25, %v9879_v19  ;;  %v9899_v0 = vmul.f32 %v9884_v62, %v9877_v42 }
0x1345   : > { %v9922_v28 = vadd.f32 %v9910_v1, %v9900_v61  ;;  %v9923_v32 = vadd.f32 %v9914_v58, %v9901_v26  ;;  %v9921_v33 = vadd.f32 %v9906_v51, %v9899_v0 }
0x1347   : > { %v9925_v23 = vpack.c.bf16 %v9922_v28, %v9919_v46  ;;  %v9926_v29 = vpack.c.bf16 %v9923_v32, %v9920_v8  ;;  %v9924_v48 = vpack.c.bf16 %v9921_v33, %v9918_v59 }
0x1349   : > { %10158 = vmatprep.mubr.bf16.mxu0 %v9925_v23  ;;  %11968 = vmatmul.mubr.bf16.vlgmr.msra.gmra.mrb[0].mxu1 %v9926_v29 }
0x134a   : > { %10159 = vmatmul.mubr.bf16.vlgmr.msra.gmra.mrb[0].mxu0 %v9924_v48 }
0x141c   : > { %v10201_v5 = vpop.f32.mrb[0].mxu1 }
0x141d   : > { %v11752_v4 = vpop.f32.mrb[0].mxu0  ;;  %v11969_v56 = vpop.f32.mrb[1].mxu1 }
0x141e   : > { %v11753_v34 = vpop.f32.mrb[1].mxu0  ;;  %v10204_v49 = vpop.f32.mrb[2].mxu1 }
0x141f   : > { %v11754_v14 = vadd.f32 %v11753_v34, %v11752_v4  ;;  %v11755_v7 = vpop.f32.mrb[2].mxu0  ;;  %v11970_v6 = vpop.f32.mrb[3].mxu1 }
0x1420   : > { %v11756_v37 = vpop.f32.mrb[3].mxu0 }
0x1421   : > { %v10161_v24 = vadd.f32 %v11754_v14, %v11465_v10  ;;  %v11757_v45 = vadd.f32 %v11756_v37, %v11755_v7 }
0x1423   : > { %v10202_v15 = vadd.f32 %v10201_v5, %v10161_v24  ;;  %v10164_v21 = vadd.f32 %v11757_v45, %v11465_v10 }
0x1425   : > { %10208 = vst [vmem:[#allocation27] sm:$0xff] %v10202_v15  ;;  %v10205_v18 = vadd.f32 %v10204_v49, %v10164_v21 }
0x1427   : > { %10209 = vst [vmem:[#allocation27 + $0x8] sm:$0xff] %v10205_v18 }
0x1428 PF: > { %s16612_s21 = sld [smem:[#allocation41_spill]]  ;;  %s14158_s18 = smov [#allocation27]  }
0x1429   : > { %s10219_s19 = sshll.u32 %s14158_s18, 4  ;;  %s10220_s19 = int_to_ptr.vmem [resolvable:$true] %s10219_s19 }
0x142a   : > { %s14019_s9 = scalar_lea.vmem %s10220_s19, 256  ;;  %p14026_p3 = scmp.lt.s32.totalorder %s10220_s19, %s10220_s19 }
0x142b   : > { %p14020_p4 = scmp.ne.s32.totalorder %s10220_s19, %s14019_s9  ;;  %p14027_p10 = scmp.lt.s32.totalorder %s14019_s9, %s14019_s9 }
0x142d   : > { %p14028_p13 = por %p14027_p10, %p14026_p3 }
0x142e   : > { %p12192_p7 = scmp.eq.s32.totalorder %s16612_s21, 5 }
0x1430   : > { %p14021_p12 = pnand %p14020_p4, %p12192_p7 }
0x1432   : > { %p14022_p1 = pneg %p14021_p12 }
0x1434   : > { %p14029_p9 = pnand %p14028_p13, %p14022_p1 }
0x1436   : > { %14032 = shalt.err (!%p14029_p9)
}
0x1437   : > { %s16613_s24 = sld [smem:[#allocation55_spill]] }
0x143d   : > { %s16614_s16 = smov %s16613_s24  ;;  %s14033_s26 = scalar_lea.hbm %s16613_s24, 256 }
0x143e   : > { %p14034_p11 = scmp.ne.s32.totalorder %s16614_s16, %s14033_s26  ;;  %p14039_p2 = scmp.lt.u32.totalorder %s14033_s26, %s16614_s16 }
0x1440   : > { %p14035_p0 = pnand %p14034_p11, %p12192_p7 }
0x1442   : > { %p14036_p6 = pneg %p14035_p0 }
0x1444   : > { %p14041_p5 = pnand %p14039_p2, %p14036_p6 }
0x1446   : > { %14044 = shalt.err (!%p14041_p5)
}
0x1447   : > { %s14159_s11 = smov 128   ;;  %s14160_s20 = smov 8  }
0x1448   : > { %12133 = dma.vmem_to_hbm [thread:$0]  (%p12192_p7), %s10220_s19, 256, %s16614_s16, [#allocation5], %s14159_s11, %s14159_s11, %s14160_s20  }
0x1449   : > { %14102 = dma.done.wait (%p12192_p7), [#allocation5], 256  }
0x144a   : > { %14104 = vsyncadd (%p12192_p7), [#allocation5], 4294967040 }
0x144b PF: > { %s16615_s28 = sld [smem:[#allocation40_spill]]  ;;  %s16616_s21 = sld [smem:[#allocation37_spill]] }
0x144c   : > { %s16617_s22 = sld [smem:[#allocation38_spill]]  ;;  %s16618_s23 = sld [smem:[#allocation44_spill]] }
0x144d   : > { %s16619_s6 = sld [smem:[#allocation42_spill]]  ;;  %s16620_s24 = smov %s14123_s25 }
0x1451   : > { %s47_s26 = sadd.s32 1, %s16615_s28  }
0x1452   : > { %p44_p8 = scmp.ge.s32.totalorder %s47_s26, 8  }
0x1453   : > { %s16621_s25 = smov %s16619_s6 }
0x1454   :  { %46 = sbr.rel (!%p44_p8) target bundleno = 28 (0x1c), region = 269 }
0x145b   :  { %10235 = vsyncpa [#allocation4], 1 }
0x145c   :  { %10237 = vsyncpa [#allocation4 + $0x1], 1 }
0x145d   :  { %10238 = vsyncpa [#allocation7], 1 }
0x145e   :  { %10240 = vsyncpa [#allocation7 + $0x1], 1 }
0x145f   :  { %10241 = vsyncpa [#allocation10], 1 }
0x1460   :  { %10243 = vsyncpa [#allocation10 + $0x1], 1 }
0x1461   :  { %10244 = vsyncpa [#allocation13], 1 }
0x1462   :  { %10246 = vsyncpa [#allocation13 + $0x1], 1 }
0x1463   :  { %10247 = vsyncpa [#allocation16], 1 }
0x1464   :  { %10249 = vsyncpa [#allocation16 + $0x1], 1 }
0x1465   :  { %10250 = vsyncpa [#allocation19], 1 }
0x1466   :  { %10252 = vsyncpa [#allocation19 + $0x1], 1 }
0x1467   :  { %10253 = vsyncpa [#allocation22], 1 }
0x1468   :  { %10254 = vsyncpa [#allocation25], 1 }
0x1469   :  { %10255 = vsyncpa [#allocation5], 1 }
0x146a   :  { %10257 = vsyncpa [#allocation5 + $0x1], 1 }

</bundles_post_ra>
